<compile_context>
chip_gen: v7x
topology: tpu7x:2x2x1
jax: 0.10.0
libtpu: 0.0.40
codegen_flags: <defaults>
</compile_context>

<pallas_src>
import functools

import jax
import jax.numpy as jnp
from jax import lax
from jax.experimental import pallas as pl
from jax.experimental.pallas import tpu as pltpu

LANES = 128


def _round_up(v, m):
    return -(-v // m) * m


# ---------------------------------------------------------------------------
# Fused 3x3 conv (pad=1, stride=1) + bias + ReLU + 2x2 max-pool kernel.
# ---------------------------------------------------------------------------
def conv3x3_relu_pool_kernel(x_ref, w_ref, b_ref, o_ref, *, rb, cpad, half):
    """One grid step = one image x one block of `rb` packed pooled-row slabs.

    x_ref : (1, rb, 4*cpad, 2*half) bf16 K-stacked tap slab.  Along K the four
            cpad-sized chunks are [e0 | o0 | e1 | o1]; lanes [0:half) hold conv
            rows of parity 0, [half:2*half) parity 1; inside each half, `rp`
            pooled rows are packed side by side (rp * Wout = half).
    w_ref : (Cout, 3*cpad) bf16 merged weights [wa|wb|wc] (dx = 0,1,2), each
            dx-chunk zero-padded from 3*Cin to cpad.
    b_ref : (Cout, 1) f32
    o_ref : (1, rb, Cout, half) bf16
    """
    # Hoist loop-invariant weight / bias loads out of the row loop.
    w = w_ref[...]
    bias = b_ref[...]

    def body(i, carry):
        row = x_ref[0, i]                     # (4*cpad, 2*half), loaded once
        # even output columns contract K-chunks (e0, o0, e1);
        # odd  output columns contract K-chunks (o0, e1, o1).
        # cpad is a multiple of 16, so both slices are bf16-tile aligned.
        acc_e = jnp.dot(w, row[:3 * cpad], preferred_element_type=jnp.float32)
        acc_o = jnp.dot(w, row[cpad:], preferred_element_type=jnp.float32)
        m = jnp.maximum(acc_e, acc_o)               # horizontal half of pool
        m = jnp.maximum(m[:, :half], m[:, half:])   # vertical half (row parity)
        # pool(relu(conv + b)) == relu(pool(conv) + b): bias is uniform over
        # the pooled window and ReLU is monotone.
        o_ref[0, i] = jnp.maximum(m + bias, 0.0).astype(o_ref.dtype)
        return carry

    lax.fori_loop(0, rb, body, 0)


def conv3x3_relu_pool(x_nhcw, wm, bk):
    """x_nhcw: (N, H, Cin, W) float; wm: (Cout, 3*cpad) bf16 merged weights
    from prepare_params; bk: (Cout, 1) f32.  Returns (N, H//2, Cout, W//2) bf16.
    """
    n, h, cin, w = x_nhcw.shape
    cout = wm.shape[0]
    cpad = wm.shape[1] // 3
    k3 = 3 * cin
    assert cpad == _round_up(k3, 16)
    wh = w // 2                    # pooled output width
    hout = h // 2                  # pooled output height
    rp = max(1, LANES // wh)       # pooled rows packed along lanes
    half = rp * wh
    assert hout % rp == 0
    hb = hout // rp                # packed pooled-row slabs per image

    # ---- plain-JAX glue (all in bf16): build the single K-stacked slab.
    x = x_nhcw.astype(jnp.bfloat16)
    xp = jnp.pad(x, ((0, 0), (1, 1), (0, 0), (1, 1)))
    xe = xp[..., 0::2]             # even padded columns
    xo = xp[..., 1::2]             # odd padded columns
    variants = (xe[..., :wh], xo[..., :wh],
                xe[..., 1:wh + 1], xo[..., 1:wh + 1])     # e0, o0, e1, o1

    def pack(s):
        halves = []
        for p in (0, 1):           # conv-row parity
            t = jnp.stack(
                [s[:, p + dy: p + dy + 2 * hout: 2] for dy in range(3)],
                axis=2)                                    # (N, hout, 3, Cin, wh)
            t = t.reshape(n, hb, rp, k3, wh)
            t = jnp.transpose(t, (0, 1, 3, 2, 4)).reshape(n, hb, k3, half)
            halves.append(t)
        v = jnp.concatenate(halves, axis=-1)               # (N, hb, k3, 2*half)
        if cpad > k3:
            v = jnp.pad(v, ((0, 0), (0, 0), (0, cpad - k3), (0, 0)))
        return v

    slab = jnp.concatenate([pack(s) for s in variants], axis=2)
    # slab: (N, hb, 4*cpad, 2*half) bf16

    # rows per grid step: big blocks (<= ~8 MiB double-buffered is cheap in
    # VMEM now that slabs are bf16), but keep >= 4 grid steps total so both
    # v7x TensorCores and the DMA pipeline stay busy.
    row_bytes = 4 * cpad * 2 * half * 2
    rb = 1
    while (rb * 2 <= hb and hb % (rb * 2) == 0
           and (rb * 2) * row_bytes * 2 <= (8 << 20)
           and n * (hb // (rb * 2)) >= 4):
        rb *= 2
    assert hb % rb == 0

    kernel = functools.partial(conv3x3_relu_pool_kernel,
                               rb=rb, cpad=cpad, half=half)
    out = pl.pallas_call(
        kernel,
        out_shape=jax.ShapeDtypeStruct((n, hb, cout, half), jnp.bfloat16),
        grid_spec=pltpu.PrefetchScalarGridSpec(
            num_scalar_prefetch=0,
            grid=(n, hb // rb),
            in_specs=[
                pl.BlockSpec((1, rb, 4 * cpad, 2 * half),
                             lambda i, j: (i, j, 0, 0)),
                pl.BlockSpec((cout, 3 * cpad), lambda i, j: (0, 0)),
                pl.BlockSpec((cout, 1), lambda i, j: (0, 0)),
            ],
            out_specs=pl.BlockSpec((1, rb, cout, half),
                                   lambda i, j: (i, j, 0, 0)),
        ),
        compiler_params=pltpu.CompilerParams(
            dimension_semantics=("parallel", "parallel"),
            vmem_limit_bytes=32 * 1024 * 1024),
    )(slab, wm, bk)

    # unpack lane-packed rows back to plain NHCW (N, hout, Cout, wh).
    out = out.reshape(n, hb, cout, rp, wh)
    out = jnp.transpose(out, (0, 1, 3, 2, 4)).reshape(n, hout, cout, wh)
    return out


# ---------------------------------------------------------------------------
# fc1: relu(x @ W + b), bf16 weight streaming, fp32 accumulation in o_ref.
# Weights arrive pre-transposed / pre-cast (no per-call HBM transpose).
# ---------------------------------------------------------------------------
def fc1_kernel(x_ref, w_ref, b_ref, o_ref):
    k = pl.program_id(1)

    @pl.when(k == 0)
    def _():
        o_ref[...] = jnp.zeros_like(o_ref)

    o_ref[...] += jnp.dot(x_ref[...], w_ref[...],
                          preferred_element_type=jnp.float32)

    @pl.when(k == pl.num_programs(1) - 1)
    def _():
        o_ref[...] = jnp.maximum(o_ref[...] + b_ref[...], 0.0)


def fc1_linear_relu(x_bf16, wk, bk, *, tn=256, tk=16384):
    """x_bf16: (M, K) bf16; wk: (K, Nout) bf16; bk: (1, Nout) f32."""
    m, k = x_bf16.shape
    nout = wk.shape[1]
    tn = min(tn, nout)
    tk = min(tk, k)
    assert k % tk == 0 and nout % tn == 0

    return pl.pallas_call(
        fc1_kernel,
        out_shape=jax.ShapeDtypeStruct((m, nout), jnp.float32),
        grid_spec=pltpu.PrefetchScalarGridSpec(
            num_scalar_prefetch=0,
            grid=(nout // tn, k // tk),        # (Nout parallel, K reduction)
            in_specs=[
                pl.BlockSpec((m, tk), lambda j, kk: (0, kk)),
                pl.BlockSpec((tk, tn), lambda j, kk: (kk, j)),
                pl.BlockSpec((1, tn), lambda j, kk: (0, j)),
            ],
            out_specs=pl.BlockSpec((m, tn), lambda j, kk: (0, j)),
        ),
        compiler_params=pltpu.CompilerParams(
            dimension_semantics=("parallel", "arbitrary"),
            vmem_limit_bytes=32 * 1024 * 1024),
    )(x_bf16, wk, bk)


# ---------------------------------------------------------------------------
# fc2 + fc3 fused head: (relu(x @ W2 + b2)) @ W3 + b3  (both tiny).
# ---------------------------------------------------------------------------
def head_kernel(x_ref, w2_ref, b2_ref, w3_ref, b3_ref, o_ref):
    h = jnp.dot(x_ref[...], w2_ref[...], preferred_element_type=jnp.float32)
    h = jnp.maximum(h + b2_ref[...], 0.0)
    o_ref[...] = (jnp.dot(h, w3_ref[...], preferred_element_type=jnp.float32)
                  + b3_ref[...]).astype(o_ref.dtype)


def fc2_fc3_head(x, w2k, b2k, w3k, b3k):
    m, k2 = x.shape
    n2 = w2k.shape[1]
    n3 = w3k.shape[1]
    return pl.pallas_call(
        head_kernel,
        out_shape=jax.ShapeDtypeStruct((m, n3), jnp.float32),
        grid_spec=pltpu.PrefetchScalarGridSpec(
            num_scalar_prefetch=0,
            grid=(1,),
            in_specs=[
                pl.BlockSpec((m, k2), lambda i: (0, 0)),
                pl.BlockSpec((k2, n2), lambda i: (0, 0)),
                pl.BlockSpec((1, n2), lambda i: (0, 0)),
                pl.BlockSpec((n2, n3), lambda i: (0, 0)),
                pl.BlockSpec((1, n3), lambda i: (0, 0)),
            ],
            out_specs=pl.BlockSpec((m, n3), lambda i: (0, 0)),
        ),
    )(x, w2k, b2k, w3k, b3k)


# ---------------------------------------------------------------------------
# Parameters: torch-layout init + one-time kernel-layout preparation.
# ---------------------------------------------------------------------------
def init_params(key):
    ks = jax.random.split(key, 12)

    def conv_w(k, cout, cin):
        s = 1.0 / jnp.sqrt(cin * 9.0)
        return jax.random.normal(k, (cout, cin, 3, 3), jnp.float32) * s

    def lin_w(k, nout, nin):
        s = 1.0 / jnp.sqrt(float(nin))
        return jax.random.normal(k, (nout, nin), jnp.float32) * s

    return {
        "conv1_w": conv_w(ks[0], 16, 3),
        "conv1_b": jax.random.normal(ks[1], (16,), jnp.float32) * 0.01,
        "conv2_w": conv_w(ks[2], 32, 16),
        "conv2_b": jax.random.normal(ks[3], (32,), jnp.float32) * 0.01,
        "conv3_w": conv_w(ks[4], 64, 32),
        "conv3_b": jax.random.normal(ks[5], (64,), jnp.float32) * 0.01,
        "fc1_w": lin_w(ks[6], 512, 64 * 32 * 32),
        "fc1_b": jax.random.normal(ks[7], (512,), jnp.float32) * 0.01,
        "fc2_w": lin_w(ks[8], 128, 512),
        "fc2_b": jax.random.normal(ks[9], (128,), jnp.float32) * 0.01,
        "fc3_w": lin_w(ks[10], 1, 128),
        "fc3_b": jax.random.normal(ks[11], (1,), jnp.float32) * 0.01,
    }


def _prep_conv(w_torch, b_torch):
    """torch (Cout, Cin, 3, 3) -> merged (Cout, 3*cpad) bf16 with each dx-chunk
    (K-order dy*Cin + ci) zero-padded from 3*Cin to a multiple of 16."""
    cout, cin = w_torch.shape[0], w_torch.shape[1]
    k3 = 3 * cin
    cpad = _round_up(k3, 16)
    wm = jnp.transpose(w_torch, (3, 0, 2, 1)).reshape(3, cout, k3)
    wm = jnp.pad(wm, ((0, 0), (0, 0), (0, cpad - k3)))
    wm = jnp.transpose(wm, (1, 0, 2)).reshape(cout, 3 * cpad)
    return wm.astype(jnp.bfloat16), b_torch.reshape(cout, 1).astype(jnp.float32)


def prepare_params(p):
    """One-time conversion to kernel-ready layouts (outside the jitted
    forward, so the 128 MB fc1 transpose/cast never hits the hot path)."""
    kp = {}
    kp["conv1_w"], kp["conv1_b"] = _prep_conv(p["conv1_w"], p["conv1_b"])
    kp["conv2_w"], kp["conv2_b"] = _prep_conv(p["conv2_w"], p["conv2_b"])
    kp["conv3_w"], kp["conv3_b"] = _prep_conv(p["conv3_w"], p["conv3_b"])
    kp["fc1_w"] = jnp.transpose(p["fc1_w"], (1, 0)).astype(jnp.bfloat16)
    kp["fc1_b"] = p["fc1_b"].reshape(1, -1).astype(jnp.float32)
    kp["fc2_w"] = jnp.transpose(p["fc2_w"], (1, 0)).astype(jnp.float32)
    kp["fc2_b"] = p["fc2_b"].reshape(1, -1).astype(jnp.float32)
    kp["fc3_w"] = jnp.transpose(p["fc3_w"], (1, 0)).astype(jnp.float32)
    kp["fc3_b"] = p["fc3_b"].reshape(1, -1).astype(jnp.float32)
    return kp


# ---------------------------------------------------------------------------
# Forward pass.
# ---------------------------------------------------------------------------
def net_forward(kp, x_nchw):
    """x_nchw: (N, 3, 256, 256) float32 -> (N, 1) float32."""
    x = jnp.transpose(x_nchw, (0, 2, 1, 3))                  # NCHW -> NHCW
    # dropout(pool(relu(conv(x))))  (dropout = identity in eval)
    x = conv3x3_relu_pool(x, kp["conv1_w"], kp["conv1_b"])   # (N,128,16,128) bf16
    x = conv3x3_relu_pool(x, kp["conv2_w"], kp["conv2_b"])   # (N, 64,32, 64) bf16
    x = conv3x3_relu_pool(x, kp["conv3_w"], kp["conv3_b"])   # (N, 32,64, 32) bf16
    n = x.shape[0]
    # x.view(-1, 65536): flatten in torch's (C, H, W) order (already bf16).
    x = jnp.transpose(x, (0, 2, 1, 3)).reshape(n, 64 * 32 * 32)
    x = fc1_linear_relu(x, kp["fc1_w"], kp["fc1_b"])
    x = fc2_fc3_head(x, kp["fc2_w"], kp["fc2_b"], kp["fc3_w"], kp["fc3_b"])
    return x


if __name__ == "__main__":
    key = jax.random.PRNGKey(0)
    k_x, k_p = jax.random.split(key)
    # Batch 2; spatial 256x256x3 is dictated by fc1's 64*32*32 = 65536 input
    # features after three 2x2 pools.
    x = jax.random.normal(k_x, (2, 3, 256, 256), jnp.float32)
    params = init_params(k_p)
    kparams = jax.block_until_ready(prepare_params(params))  # one-time prep

    fwd = jax.jit(net_forward)
    out = fwd(kparams, x)
    out = jax.block_until_ready(out)
    assert out.shape == (2, 1), out.shape
    print("KERNEL_OK")
</pallas_src>

<mosaic_0001>
module attributes {stable_mosaic.version = 11 : i64} {
  func.func @conv3x3_relu_pool_kernel(%arg0: i32, %arg1: i32, %arg2: memref<1x64x64x256xbf16, #tpu.memory_space<vmem>>, %arg3: memref<16x48xbf16, #tpu.memory_space<vmem>>, %arg4: memref<16x1xf32, #tpu.memory_space<vmem>>, %arg5: memref<1x64x16x128xbf16, #tpu.memory_space<vmem>>) attributes {dimension_semantics = [#tpu.dimension_semantics<parallel>, #tpu.dimension_semantics<parallel>], iteration_bounds = array<i64: 2, 2>, scalar_prefetch = 0 : i64, scratch_operands = 0 : i64, tpu.core_type = #tpu.core_type<tc>, window_params = [{transform_indices = @transform_0, window_bounds = array<i64: 1, 64, 64, 256>}, {pipeline_mode = #tpu.pipeline_mode<synchronous>, transform_indices = @transform_1, window_bounds = array<i64: 16, 48>}, {pipeline_mode = #tpu.pipeline_mode<synchronous>, transform_indices = @transform_2, window_bounds = array<i64: 16, 1>}, {transform_indices = @transform_3, window_bounds = array<i64: 1, 64, 16, 128>}]} {
    %c0 = arith.constant 0 : index
    %c0_0 = arith.constant 0 : index
    %0 = vector.load %arg3[%c0, %c0_0] : memref<16x48xbf16, #tpu.memory_space<vmem>>, vector<16x48xbf16>
    %c0_1 = arith.constant 0 : index
    %c0_2 = arith.constant 0 : index
    %1 = vector.load %arg4[%c0_1, %c0_2] : memref<16x1xf32, #tpu.memory_space<vmem>>, vector<16x1xf32>
    %c0_i32 = arith.constant 0 : i32
    %c64_i32 = arith.constant 64 : i32
    %2 = arith.addi %c0_i32, %c64_i32 : i32
    %c1_i32 = arith.constant 1 : i32
    scf.for %arg6 = %c0_i32 to %2 step %c1_i32  : i32 {
      %c0_4 = arith.constant 0 : index
      %3 = arith.index_cast %arg6 : i32 to index
      %c0_5 = arith.constant 0 : index
      %c0_6 = arith.constant 0 : index
      %4 = vector.load %arg2[%c0_4, %3, %c0_5, %c0_6] : memref<1x64x64x256xbf16, #tpu.memory_space<vmem>>, vector<1x1x64x256xbf16>
      %5 = vector.shape_cast %4 : vector<1x1x64x256xbf16> to vector<64x256xbf16>
      %6 = vector.extract_strided_slice %5 {offsets = [0, 0], sizes = [48, 256], strides = [1, 1]} : vector<64x256xbf16> to vector<48x256xbf16>
      %cst = arith.constant dense<0.000000e+00> : vector<16x256xf32>
      %7 = tpu.matmul %0, %6, %cst {dimension_numbers = #tpu.dot_dimension_numbers<[1], [0], [0], [1], [0, 0, 1, 1], [], []>} : vector<16x48xbf16>, vector<48x256xbf16>, vector<16x256xf32> -> vector<16x256xf32>
      %8 = vector.extract_strided_slice %5 {offsets = [16, 0], sizes = [48, 256], strides = [1, 1]} : vector<64x256xbf16> to vector<48x256xbf16>
      %cst_7 = arith.constant dense<0.000000e+00> : vector<16x256xf32>
      %9 = tpu.matmul %0, %8, %cst_7 {dimension_numbers = #tpu.dot_dimension_numbers<[1], [0], [0], [1], [0, 0, 1, 1], [], []>} : vector<16x48xbf16>, vector<48x256xbf16>, vector<16x256xf32> -> vector<16x256xf32>
      %10 = arith.maximumf %7, %9 : vector<16x256xf32>
      %11 = vector.extract_strided_slice %10 {offsets = [0, 0], sizes = [16, 128], strides = [1, 1]} : vector<16x256xf32> to vector<16x128xf32>
      %12 = vector.extract_strided_slice %10 {offsets = [0, 128], sizes = [16, 128], strides = [1, 1]} : vector<16x256xf32> to vector<16x128xf32>
      %13 = arith.maximumf %11, %12 : vector<16x128xf32>
      %14 = vector.broadcast %1 : vector<16x1xf32> to vector<16x128xf32>
      %15 = arith.addf %13, %14 : vector<16x128xf32>
      %cst_8 = arith.constant 0.000000e+00 : f32
      %16 = vector.broadcast %cst_8 : f32 to vector<16x128xf32>
      %17 = arith.maximumf %15, %16 : vector<16x128xf32>
      %18 = arith.truncf %17 : vector<16x128xf32> to vector<16x128xbf16>
      %c0_9 = arith.constant 0 : index
      %19 = arith.index_cast %arg6 : i32 to index
      %c0_10 = arith.constant 0 : index
      %c0_11 = arith.constant 0 : index
      %20 = vector.load %arg5[%c0_9, %19, %c0_10, %c0_11] : memref<1x64x16x128xbf16, #tpu.memory_space<vmem>>, vector<1x1x16x128xbf16>
      %21 = vector.shape_cast %20 : vector<1x1x16x128xbf16> to vector<16x128xbf16>
      %22 = vector.shape_cast %18 : vector<16x128xbf16> to vector<1x1x16x128xbf16>
      tpu.vector_store %arg5[%c0_9, %19, %c0_10, %c0_11], %22 {strides = array<i32>} : memref<1x64x16x128xbf16, #tpu.memory_space<vmem>>, vector<1x1x16x128xbf16>,
    }
    %c64_i32_3 = arith.constant 64 : i32
    return
  }
  func.func @transform_0(%arg0: i32, %arg1: i32) -> (i32, i32, i32, i32) {
    %c0_i32 = arith.constant 0 : i32
    %c0_i32_0 = arith.constant 0 : i32
    %c0_i32_1 = arith.constant 0 : i32
    return %arg0, %arg1, %c0_i32, %c0_i32_0 : i32, i32, i32, i32
  }
  func.func @transform_1(%arg0: i32, %arg1: i32) -> (i32, i32) {
    %c0_i32 = arith.constant 0 : i32
    %c0_i32_0 = arith.constant 0 : i32
    %c0_i32_1 = arith.constant 0 : i32
    return %c0_i32, %c0_i32_0 : i32, i32
  }
  func.func @transform_2(%arg0: i32, %arg1: i32) -> (i32, i32) {
    %c0_i32 = arith.constant 0 : i32
    %c0_i32_0 = arith.constant 0 : i32
    %c0_i32_1 = arith.constant 0 : i32
    return %c0_i32, %c0_i32_0 : i32, i32
  }
  func.func @transform_3(%arg0: i32, %arg1: i32) -> (i32, i32, i32, i32) {
    %c0_i32 = arith.constant 0 : i32
    %c0_i32_0 = arith.constant 0 : i32
    %c0_i32_1 = arith.constant 0 : i32
    return %arg0, %arg1, %c0_i32, %c0_i32_0 : i32, i32, i32, i32
  }
}

module attributes {stable_mosaic.version = 11 : i64} {
  func.func @conv3x3_relu_pool_kernel(%arg0: i32, %arg1: i32, %arg2: memref<1x16x192x256xbf16, #tpu.memory_space<vmem>>, %arg3: memref<32x144xbf16, #tpu.memory_space<vmem>>, %arg4: memref<32x1xf32, #tpu.memory_space<vmem>>, %arg5: memref<1x16x32x128xbf16, #tpu.memory_space<vmem>>) attributes {dimension_semantics = [#tpu.dimension_semantics<parallel>, #tpu.dimension_semantics<parallel>], iteration_bounds = array<i64: 2, 2>, scalar_prefetch = 0 : i64, scratch_operands = 0 : i64, tpu.core_type = #tpu.core_type<tc>, window_params = [{transform_indices = @transform_0, window_bounds = array<i64: 1, 16, 192, 256>}, {pipeline_mode = #tpu.pipeline_mode<synchronous>, transform_indices = @transform_1, window_bounds = array<i64: 32, 144>}, {pipeline_mode = #tpu.pipeline_mode<synchronous>, transform_indices = @transform_2, window_bounds = array<i64: 32, 1>}, {transform_indices = @transform_3, window_bounds = array<i64: 1, 16, 32, 128>}]} {
    %c0 = arith.constant 0 : index
    %c0_0 = arith.constant 0 : index
    %0 = vector.load %arg3[%c0, %c0_0] : memref<32x144xbf16, #tpu.memory_space<vmem>>, vector<32x144xbf16>
    %c0_1 = arith.constant 0 : index
    %c0_2 = arith.constant 0 : index
    %1 = vector.load %arg4[%c0_1, %c0_2] : memref<32x1xf32, #tpu.memory_space<vmem>>, vector<32x1xf32>
    %c0_i32 = arith.constant 0 : i32
    %c16_i32 = arith.constant 16 : i32
    %2 = arith.addi %c0_i32, %c16_i32 : i32
    %c1_i32 = arith.constant 1 : i32
    scf.for %arg6 = %c0_i32 to %2 step %c1_i32  : i32 {
      %c0_4 = arith.constant 0 : index
      %3 = arith.index_cast %arg6 : i32 to index
      %c0_5 = arith.constant 0 : index
      %c0_6 = arith.constant 0 : index
      %4 = vector.load %arg2[%c0_4, %3, %c0_5, %c0_6] : memref<1x16x192x256xbf16, #tpu.memory_space<vmem>>, vector<1x1x192x256xbf16>
      %5 = vector.shape_cast %4 : vector<1x1x192x256xbf16> to vector<192x256xbf16>
      %6 = vector.extract_strided_slice %5 {offsets = [0, 0], sizes = [144, 256], strides = [1, 1]} : vector<192x256xbf16> to vector<144x256xbf16>
      %cst = arith.constant dense<0.000000e+00> : vector<32x256xf32>
      %7 = tpu.matmul %0, %6, %cst {dimension_numbers = #tpu.dot_dimension_numbers<[1], [0], [0], [1], [0, 0, 1, 1], [], []>} : vector<32x144xbf16>, vector<144x256xbf16>, vector<32x256xf32> -> vector<32x256xf32>
      %8 = vector.extract_strided_slice %5 {offsets = [48, 0], sizes = [144, 256], strides = [1, 1]} : vector<192x256xbf16> to vector<144x256xbf16>
      %cst_7 = arith.constant dense<0.000000e+00> : vector<32x256xf32>
      %9 = tpu.matmul %0, %8, %cst_7 {dimension_numbers = #tpu.dot_dimension_numbers<[1], [0], [0], [1], [0, 0, 1, 1], [], []>} : vector<32x144xbf16>, vector<144x256xbf16>, vector<32x256xf32> -> vector<32x256xf32>
      %10 = arith.maximumf %7, %9 : vector<32x256xf32>
      %11 = vector.extract_strided_slice %10 {offsets = [0, 0], sizes = [32, 128], strides = [1, 1]} : vector<32x256xf32> to vector<32x128xf32>
      %12 = vector.extract_strided_slice %10 {offsets = [0, 128], sizes = [32, 128], strides = [1, 1]} : vector<32x256xf32> to vector<32x128xf32>
      %13 = arith.maximumf %11, %12 : vector<32x128xf32>
      %14 = vector.broadcast %1 : vector<32x1xf32> to vector<32x128xf32>
      %15 = arith.addf %13, %14 : vector<32x128xf32>
      %cst_8 = arith.constant 0.000000e+00 : f32
      %16 = vector.broadcast %cst_8 : f32 to vector<32x128xf32>
      %17 = arith.maximumf %15, %16 : vector<32x128xf32>
      %18 = arith.truncf %17 : vector<32x128xf32> to vector<32x128xbf16>
      %c0_9 = arith.constant 0 : index
      %19 = arith.index_cast %arg6 : i32 to index
      %c0_10 = arith.constant 0 : index
      %c0_11 = arith.constant 0 : index
      %20 = vector.load %arg5[%c0_9, %19, %c0_10, %c0_11] : memref<1x16x32x128xbf16, #tpu.memory_space<vmem>>, vector<1x1x32x128xbf16>
      %21 = vector.shape_cast %20 : vector<1x1x32x128xbf16> to vector<32x128xbf16>
      %22 = vector.shape_cast %18 : vector<32x128xbf16> to vector<1x1x32x128xbf16>
      tpu.vector_store %arg5[%c0_9, %19, %c0_10, %c0_11], %22 {strides = array<i32>} : memref<1x16x32x128xbf16, #tpu.memory_space<vmem>>, vector<1x1x32x128xbf16>,
    }
    %c16_i32_3 = arith.constant 16 : i32
    return
  }
  func.func @transform_0(%arg0: i32, %arg1: i32) -> (i32, i32, i32, i32) {
    %c0_i32 = arith.constant 0 : i32
    %c0_i32_0 = arith.constant 0 : i32
    %c0_i32_1 = arith.constant 0 : i32
    return %arg0, %arg1, %c0_i32, %c0_i32_0 : i32, i32, i32, i32
  }
  func.func @transform_1(%arg0: i32, %arg1: i32) -> (i32, i32) {
    %c0_i32 = arith.constant 0 : i32
    %c0_i32_0 = arith.constant 0 : i32
    %c0_i32_1 = arith.constant 0 : i32
    return %c0_i32, %c0_i32_0 : i32, i32
  }
  func.func @transform_2(%arg0: i32, %arg1: i32) -> (i32, i32) {
    %c0_i32 = arith.constant 0 : i32
    %c0_i32_0 = arith.constant 0 : i32
    %c0_i32_1 = arith.constant 0 : i32
    return %c0_i32, %c0_i32_0 : i32, i32
  }
  func.func @transform_3(%arg0: i32, %arg1: i32) -> (i32, i32, i32, i32) {
    %c0_i32 = arith.constant 0 : i32
    %c0_i32_0 = arith.constant 0 : i32
    %c0_i32_1 = arith.constant 0 : i32
    return %arg0, %arg1, %c0_i32, %c0_i32_0 : i32, i32, i32, i32
  }
}

module attributes {stable_mosaic.version = 11 : i64} {
  func.func @conv3x3_relu_pool_kernel(%arg0: i32, %arg1: i32, %arg2: memref<1x4x384x256xbf16, #tpu.memory_space<vmem>>, %arg3: memref<64x288xbf16, #tpu.memory_space<vmem>>, %arg4: memref<64x1xf32, #tpu.memory_space<vmem>>, %arg5: memref<1x4x64x128xbf16, #tpu.memory_space<vmem>>) attributes {dimension_semantics = [#tpu.dimension_semantics<parallel>, #tpu.dimension_semantics<parallel>], iteration_bounds = array<i64: 2, 2>, scalar_prefetch = 0 : i64, scratch_operands = 0 : i64, tpu.core_type = #tpu.core_type<tc>, window_params = [{transform_indices = @transform_0, window_bounds = array<i64: 1, 4, 384, 256>}, {pipeline_mode = #tpu.pipeline_mode<synchronous>, transform_indices = @transform_1, window_bounds = array<i64: 64, 288>}, {pipeline_mode = #tpu.pipeline_mode<synchronous>, transform_indices = @transform_2, window_bounds = array<i64: 64, 1>}, {transform_indices = @transform_3, window_bounds = array<i64: 1, 4, 64, 128>}]} {
    %c0 = arith.constant 0 : index
    %c0_0 = arith.constant 0 : index
    %0 = vector.load %arg3[%c0, %c0_0] : memref<64x288xbf16, #tpu.memory_space<vmem>>, vector<64x288xbf16>
    %c0_1 = arith.constant 0 : index
    %c0_2 = arith.constant 0 : index
    %1 = vector.load %arg4[%c0_1, %c0_2] : memref<64x1xf32, #tpu.memory_space<vmem>>, vector<64x1xf32>
    %c0_i32 = arith.constant 0 : i32
    %c4_i32 = arith.constant 4 : i32
    %2 = arith.addi %c0_i32, %c4_i32 : i32
    %c1_i32 = arith.constant 1 : i32
    scf.for %arg6 = %c0_i32 to %2 step %c1_i32  : i32 {
      %c0_4 = arith.constant 0 : index
      %3 = arith.index_cast %arg6 : i32 to index
      %c0_5 = arith.constant 0 : index
      %c0_6 = arith.constant 0 : index
      %4 = vector.load %arg2[%c0_4, %3, %c0_5, %c0_6] : memref<1x4x384x256xbf16, #tpu.memory_space<vmem>>, vector<1x1x384x256xbf16>
      %5 = vector.shape_cast %4 : vector<1x1x384x256xbf16> to vector<384x256xbf16>
      %6 = vector.extract_strided_slice %5 {offsets = [0, 0], sizes = [288, 256], strides = [1, 1]} : vector<384x256xbf16> to vector<288x256xbf16>
      %cst = arith.constant dense<0.000000e+00> : vector<64x256xf32>
      %7 = tpu.matmul %0, %6, %cst {dimension_numbers = #tpu.dot_dimension_numbers<[1], [0], [0], [1], [0, 0, 1, 1], [], []>} : vector<64x288xbf16>, vector<288x256xbf16>, vector<64x256xf32> -> vector<64x256xf32>
      %8 = vector.extract_strided_slice %5 {offsets = [96, 0], sizes = [288, 256], strides = [1, 1]} : vector<384x256xbf16> to vector<288x256xbf16>
      %cst_7 = arith.constant dense<0.000000e+00> : vector<64x256xf32>
      %9 = tpu.matmul %0, %8, %cst_7 {dimension_numbers = #tpu.dot_dimension_numbers<[1], [0], [0], [1], [0, 0, 1, 1], [], []>} : vector<64x288xbf16>, vector<288x256xbf16>, vector<64x256xf32> -> vector<64x256xf32>
      %10 = arith.maximumf %7, %9 : vector<64x256xf32>
      %11 = vector.extract_strided_slice %10 {offsets = [0, 0], sizes = [64, 128], strides = [1, 1]} : vector<64x256xf32> to vector<64x128xf32>
      %12 = vector.extract_strided_slice %10 {offsets = [0, 128], sizes = [64, 128], strides = [1, 1]} : vector<64x256xf32> to vector<64x128xf32>
      %13 = arith.maximumf %11, %12 : vector<64x128xf32>
      %14 = vector.broadcast %1 : vector<64x1xf32> to vector<64x128xf32>
      %15 = arith.addf %13, %14 : vector<64x128xf32>
      %cst_8 = arith.constant 0.000000e+00 : f32
      %16 = vector.broadcast %cst_8 : f32 to vector<64x128xf32>
      %17 = arith.maximumf %15, %16 : vector<64x128xf32>
      %18 = arith.truncf %17 : vector<64x128xf32> to vector<64x128xbf16>
      %c0_9 = arith.constant 0 : index
      %19 = arith.index_cast %arg6 : i32 to index
      %c0_10 = arith.constant 0 : index
      %c0_11 = arith.constant 0 : index
      %20 = vector.load %arg5[%c0_9, %19, %c0_10, %c0_11] : memref<1x4x64x128xbf16, #tpu.memory_space<vmem>>, vector<1x1x64x128xbf16>
      %21 = vector.shape_cast %20 : vector<1x1x64x128xbf16> to vector<64x128xbf16>
      %22 = vector.shape_cast %18 : vector<64x128xbf16> to vector<1x1x64x128xbf16>
      tpu.vector_store %arg5[%c0_9, %19, %c0_10, %c0_11], %22 {strides = array<i32>} : memref<1x4x64x128xbf16, #tpu.memory_space<vmem>>, vector<1x1x64x128xbf16>,
    }
    %c4_i32_3 = arith.constant 4 : i32
    return
  }
  func.func @transform_0(%arg0: i32, %arg1: i32) -> (i32, i32, i32, i32) {
    %c0_i32 = arith.constant 0 : i32
    %c0_i32_0 = arith.constant 0 : i32
    %c0_i32_1 = arith.constant 0 : i32
    return %arg0, %arg1, %c0_i32, %c0_i32_0 : i32, i32, i32, i32
  }
  func.func @transform_1(%arg0: i32, %arg1: i32) -> (i32, i32) {
    %c0_i32 = arith.constant 0 : i32
    %c0_i32_0 = arith.constant 0 : i32
    %c0_i32_1 = arith.constant 0 : i32
    return %c0_i32, %c0_i32_0 : i32, i32
  }
  func.func @transform_2(%arg0: i32, %arg1: i32) -> (i32, i32) {
    %c0_i32 = arith.constant 0 : i32
    %c0_i32_0 = arith.constant 0 : i32
    %c0_i32_1 = arith.constant 0 : i32
    return %c0_i32, %c0_i32_0 : i32, i32
  }
  func.func @transform_3(%arg0: i32, %arg1: i32) -> (i32, i32, i32, i32) {
    %c0_i32 = arith.constant 0 : i32
    %c0_i32_0 = arith.constant 0 : i32
    %c0_i32_1 = arith.constant 0 : i32
    return %arg0, %arg1, %c0_i32, %c0_i32_0 : i32, i32, i32, i32
  }
}

module attributes {stable_mosaic.version = 11 : i64} {
  func.func @fc1_kernel(%arg0: i32, %arg1: i32, %arg2: memref<2x16384xbf16, #tpu.memory_space<vmem>>, %arg3: memref<16384x256xbf16, #tpu.memory_space<vmem>>, %arg4: memref<1x256xf32, #tpu.memory_space<vmem>>, %arg5: memref<2x256xf32, #tpu.memory_space<vmem>>) attributes {dimension_semantics = [#tpu.dimension_semantics<parallel>, #tpu.dimension_semantics<arbitrary>], iteration_bounds = array<i64: 2, 4>, scalar_prefetch = 0 : i64, scratch_operands = 0 : i64, tpu.core_type = #tpu.core_type<tc>, window_params = [{transform_indices = @transform_0, window_bounds = array<i64: 2, 16384>}, {transform_indices = @transform_1, window_bounds = array<i64: 16384, 256>}, {transform_indices = @transform_2, window_bounds = array<i64: 1, 256>}, {transform_indices = @transform_3, window_bounds = array<i64: 2, 256>}]} {
    %c0_i32 = arith.constant 0 : i32
    %0 = arith.cmpi eq, %arg1, %c0_i32 : i32
    %1 = arith.extui %0 : i1 to i32
    %c0_i32_0 = arith.constant 0 : i32
    %2 = arith.cmpi ne, %1, %c0_i32_0 : i32
    scf.if %2 {
      %cst_9 = arith.constant 0.000000e+00 : f32
      %12 = vector.broadcast %cst_9 : f32 to vector<2x256xf32>
      %c0_10 = arith.constant 0 : index
      %c0_11 = arith.constant 0 : index
      %13 = vector.load %arg5[%c0_10, %c0_11] : memref<2x256xf32, #tpu.memory_space<vmem>>, vector<2x256xf32>
      tpu.vector_store %arg5[%c0_10, %c0_11], %12 {strides = array<i32>} : memref<2x256xf32, #tpu.memory_space<vmem>>, vector<2x256xf32>,
    } else {
    }
    %c0 = arith.constant 0 : index
    %c0_1 = arith.constant 0 : index
    %3 = vector.load %arg5[%c0, %c0_1] : memref<2x256xf32, #tpu.memory_space<vmem>>, vector<2x256xf32>
    %c0_2 = arith.constant 0 : index
    %c0_3 = arith.constant 0 : index
    %4 = vector.load %arg2[%c0_2, %c0_3] : memref<2x16384xbf16, #tpu.memory_space<vmem>>, vector<2x16384xbf16>
    %c0_4 = arith.constant 0 : index
    %c0_5 = arith.constant 0 : index
    %5 = vector.load %arg3[%c0_4, %c0_5] : memref<16384x256xbf16, #tpu.memory_space<vmem>>, vector<16384x256xbf16>
    %cst = arith.constant dense<0.000000e+00> : vector<2x256xf32>
    %6 = tpu.matmul %4, %5, %cst {dimension_numbers = #tpu.dot_dimension_numbers<[1], [0], [0], [1], [0, 0, 1, 1], [], []>} : vector<2x16384xbf16>, vector<16384x256xbf16>, vector<2x256xf32> -> vector<2x256xf32>
    %7 = arith.addf %3, %6 : vector<2x256xf32>
    %c0_6 = arith.constant 0 : index
    %c0_7 = arith.constant 0 : index
    %8 = vector.load %arg5[%c0_6, %c0_7] : memref<2x256xf32, #tpu.memory_space<vmem>>, vector<2x256xf32>
    tpu.vector_store %arg5[%c0_6, %c0_7], %7 {strides = array<i32>} : memref<2x256xf32, #tpu.memory_space<vmem>>, vector<2x256xf32>,
    %c3_i32 = arith.constant 3 : i32
    %9 = arith.cmpi eq, %arg1, %c3_i32 : i32
    %10 = arith.extui %9 : i1 to i32
    %c0_i32_8 = arith.constant 0 : i32
    %11 = arith.cmpi ne, %10, %c0_i32_8 : i32
    scf.if %11 {
      %c0_9 = arith.constant 0 : index
      %c0_10 = arith.constant 0 : index
      %12 = vector.load %arg5[%c0_9, %c0_10] : memref<2x256xf32, #tpu.memory_space<vmem>>, vector<2x256xf32>
      %c0_11 = arith.constant 0 : index
      %c0_12 = arith.constant 0 : index
      %13 = vector.load %arg4[%c0_11, %c0_12] : memref<1x256xf32, #tpu.memory_space<vmem>>, vector<1x256xf32>
      %14 = vector.broadcast %13 : vector<1x256xf32> to vector<2x256xf32>
      %15 = arith.addf %12, %14 : vector<2x256xf32>
      %cst_13 = arith.constant 0.000000e+00 : f32
      %16 = vector.broadcast %cst_13 : f32 to vector<2x256xf32>
      %17 = arith.maximumf %15, %16 : vector<2x256xf32>
      %c0_14 = arith.constant 0 : index
      %c0_15 = arith.constant 0 : index
      %18 = vector.load %arg5[%c0_14, %c0_15] : memref<2x256xf32, #tpu.memory_space<vmem>>, vector<2x256xf32>
      tpu.vector_store %arg5[%c0_14, %c0_15], %17 {strides = array<i32>} : memref<2x256xf32, #tpu.memory_space<vmem>>, vector<2x256xf32>,
    } else {
    }
    return
  }
  func.func @transform_0(%arg0: i32, %arg1: i32) -> (i32, i32) {
    %c0_i32 = arith.constant 0 : i32
    %c0_i32_0 = arith.constant 0 : i32
    return %c0_i32, %arg1 : i32, i32
  }
  func.func @transform_1(%arg0: i32, %arg1: i32) -> (i32, i32) {
    %c0_i32 = arith.constant 0 : i32
    return %arg1, %arg0 : i32, i32
  }
  func.func @transform_2(%arg0: i32, %arg1: i32) -> (i32, i32) {
    %c0_i32 = arith.constant 0 : i32
    %c0_i32_0 = arith.constant 0 : i32
    return %c0_i32, %arg0 : i32, i32
  }
  func.func @transform_3(%arg0: i32, %arg1: i32) -> (i32, i32) {
    %c0_i32 = arith.constant 0 : i32
    %c0_i32_0 = arith.constant 0 : i32
    return %c0_i32, %arg0 : i32, i32
  }
}

module attributes {stable_mosaic.version = 11 : i64} {
  func.func @head_kernel(%arg0: i32, %arg1: memref<2x512xf32, #tpu.memory_space<vmem>>, %arg2: memref<512x128xf32, #tpu.memory_space<vmem>>, %arg3: memref<1x128xf32, #tpu.memory_space<vmem>>, %arg4: memref<128x1xf32, #tpu.memory_space<vmem>>, %arg5: memref<1x1xf32, #tpu.memory_space<vmem>>, %arg6: memref<2x1xf32, #tpu.memory_space<vmem>>) attributes {dimension_semantics = [#tpu.dimension_semantics<arbitrary>], iteration_bounds = array<i64: 1>, scalar_prefetch = 0 : i64, scratch_operands = 0 : i64, tpu.core_type = #tpu.core_type<tc>, window_params = [{pipeline_mode = #tpu.pipeline_mode<synchronous>, transform_indices = @transform_0, window_bounds = array<i64: 2, 512>}, {pipeline_mode = #tpu.pipeline_mode<synchronous>, transform_indices = @transform_1, window_bounds = array<i64: 512, 128>}, {pipeline_mode = #tpu.pipeline_mode<synchronous>, transform_indices = @transform_2, window_bounds = array<i64: 1, 128>}, {pipeline_mode = #tpu.pipeline_mode<synchronous>, transform_indices = @transform_3, window_bounds = array<i64: 128, 1>}, {pipeline_mode = #tpu.pipeline_mode<synchronous>, transform_indices = @transform_4, window_bounds = array<i64: 1, 1>}, {pipeline_mode = #tpu.pipeline_mode<synchronous>, transform_indices = @transform_5, window_bounds = array<i64: 2, 1>}]} {
    %c0 = arith.constant 0 : index
    %c0_0 = arith.constant 0 : index
    %0 = vector.load %arg1[%c0, %c0_0] : memref<2x512xf32, #tpu.memory_space<vmem>>, vector<2x512xf32>
    %c0_1 = arith.constant 0 : index
    %c0_2 = arith.constant 0 : index
    %1 = vector.load %arg2[%c0_1, %c0_2] : memref<512x128xf32, #tpu.memory_space<vmem>>, vector<512x128xf32>
    %cst = arith.constant dense<0.000000e+00> : vector<2x128xf32>
    %2 = tpu.matmul %0, %1, %cst {dimension_numbers = #tpu.dot_dimension_numbers<[1], [0], [0], [1], [0, 0, 1, 1], [], []>} : vector<2x512xf32>, vector<512x128xf32>, vector<2x128xf32> -> vector<2x128xf32>
    %c0_3 = arith.constant 0 : index
    %c0_4 = arith.constant 0 : index
    %3 = vector.load %arg3[%c0_3, %c0_4] : memref<1x128xf32, #tpu.memory_space<vmem>>, vector<1x128xf32>
    %4 = vector.broadcast %3 : vector<1x128xf32> to vector<2x128xf32>
    %5 = arith.addf %2, %4 : vector<2x128xf32>
    %cst_5 = arith.constant 0.000000e+00 : f32
    %6 = vector.broadcast %cst_5 : f32 to vector<2x128xf32>
    %7 = arith.maximumf %5, %6 : vector<2x128xf32>
    %c0_6 = arith.constant 0 : index
    %c0_7 = arith.constant 0 : index
    %8 = vector.load %arg4[%c0_6, %c0_7] : memref<128x1xf32, #tpu.memory_space<vmem>>, vector<128x1xf32>
    %cst_8 = arith.constant dense<0.000000e+00> : vector<2x1xf32>
    %9 = tpu.matmul %7, %8, %cst_8 {dimension_numbers = #tpu.dot_dimension_numbers<[1], [0], [0], [1], [0, 0, 1, 1], [], []>} : vector<2x128xf32>, vector<128x1xf32>, vector<2x1xf32> -> vector<2x1xf32>
    %c0_9 = arith.constant 0 : index
    %c0_10 = arith.constant 0 : index
    %10 = vector.load %arg5[%c0_9, %c0_10] : memref<1x1xf32, #tpu.memory_space<vmem>>, vector<1x1xf32>
    %11 = vector.broadcast %10 : vector<1x1xf32> to vector<2x1xf32>
    %12 = arith.addf %9, %11 : vector<2x1xf32>
    %c0_11 = arith.constant 0 : index
    %c0_12 = arith.constant 0 : index
    %13 = vector.load %arg6[%c0_11, %c0_12] : memref<2x1xf32, #tpu.memory_space<vmem>>, vector<2x1xf32>
    tpu.vector_store %arg6[%c0_11, %c0_12], %12 {strides = array<i32>} : memref<2x1xf32, #tpu.memory_space<vmem>>, vector<2x1xf32>,
    return
  }
  func.func @transform_0(%arg0: i32) -> (i32, i32) {
    %c0_i32 = arith.constant 0 : i32
    %c0_i32_0 = arith.constant 0 : i32
    %c0_i32_1 = arith.constant 0 : i32
    return %c0_i32, %c0_i32_0 : i32, i32
  }
  func.func @transform_1(%arg0: i32) -> (i32, i32) {
    %c0_i32 = arith.constant 0 : i32
    %c0_i32_0 = arith.constant 0 : i32
    %c0_i32_1 = arith.constant 0 : i32
    return %c0_i32, %c0_i32_0 : i32, i32
  }
  func.func @transform_2(%arg0: i32) -> (i32, i32) {
    %c0_i32 = arith.constant 0 : i32
    %c0_i32_0 = arith.constant 0 : i32
    %c0_i32_1 = arith.constant 0 : i32
    return %c0_i32, %c0_i32_0 : i32, i32
  }
  func.func @transform_3(%arg0: i32) -> (i32, i32) {
    %c0_i32 = arith.constant 0 : i32
    %c0_i32_0 = arith.constant 0 : i32
    %c0_i32_1 = arith.constant 0 : i32
    return %c0_i32, %c0_i32_0 : i32, i32
  }
  func.func @transform_4(%arg0: i32) -> (i32, i32) {
    %c0_i32 = arith.constant 0 : i32
    %c0_i32_0 = arith.constant 0 : i32
    %c0_i32_1 = arith.constant 0 : i32
    return %c0_i32, %c0_i32_0 : i32, i32
  }
  func.func @transform_5(%arg0: i32) -> (i32, i32) {
    %c0_i32 = arith.constant 0 : i32
    %c0_i32_0 = arith.constant 0 : i32
    %c0_i32_1 = arith.constant 0 : i32
    return %c0_i32, %c0_i32_0 : i32, i32
  }
}

</mosaic_0001>

<bundles_post_ra>
// kernel: net_forward.5
= control target key start
LH: loop header
LB: loop body
LE: loop exit
PB: predicated region body
PF: predicated region fallthrough
CT: control target
= control target key end

     0   :  { %s685_s12 = smov 0   ;;  %s687_s13 = smov 0   ;;  %s776_s0 = inlined_call_operand.vmem [shape: bf16[2,128,64,256], index: 0, kind: input, shape index: {}]   ;;  %s777_s1 = inlined_call_operand.vmem [shape: bf16[16,48], index: 1, kind: input, shape index: {}]   ;;  %s778_s2 = inlined_call_operand.vmem [shape: f32[16,1], index: 2, kind: input, shape index: {}]   ;;  %s779_s3 = inlined_call_operand.vmem [shape: bf16[2,128,16,128], index: 3, kind: output, shape index: {}]  }
   0x1   :  { %s689_s14 = smov 0   ;;  %s691_s15 = smov 0  }
   0x2   :  { %s693_s16 = smov 0  }
   0x3 LB: > { %s22_s17 = sadd.s32 1, %s650_s14  ;;  %s25_s18 = sadd.s32 1, %s654_s15  ;;  %s658_s16 = sphi %s693_s16, %s13_s16   ;;  %s654_s15 = sphi %s691_s15, %s783_s15   ;;  %s650_s14 = sphi %s689_s14, %s782_s14   ;;  %s646_s13 = sphi %s687_s13, %s781_s13   ;;  %s642_s12 = sphi %s685_s12, %s780_s12  }
   0x4   : > { %p23_p0 = scmp.ge.s32.totalorder %s22_s17, 2  ;;  %p517_p1 = scmp.ge.s32.totalorder %s658_s16, 1 }
   0x5   : > { %p159_p2 = scmp.lt.s32.totalorder %s658_s16, 5 }
   0x6   : > { %s785_s17 = smov (%p23_p0, %s22_s17), 0  ;;  %s787_s18 = smov (!%p23_p0, %s25_s18), %s654_s15 }
   0x7   : > { %p160_p3 = pnand %p517_p1, %p159_p2  ;;  %p27_p4 = scmp.ge.s32.totalorder %s787_s18, 2 }
   0x8   : > { %s518_s19 = sshll.u32 (!%p160_p3), %s642_s12, 6  ;;  %p194_p5 = scmp.lt.s32.totalorder (!%p160_p3), %s646_s13, 1  ;;  %v718_v0 = vld [vmem:[%s777_s1] sm:$0xf] (!%p160_p3)  ;;  %v723_v1 = vld [vmem:[%s777_s1 + $0x4] sm:$0xf] (!%p160_p3) }
   0x9   : > { %s789_s18 = smov (%p27_p4, %s787_s18), 0  ;;  %163 = sbr.rel (%p160_p3) target bundleno = 264 (0x108), region = 32 }
   0xa   : > { %p196_p6 = scmp.lt.s32.totalorder (!%p160_p3), %s518_s19, 127  ;;  %v728_v2 = vld [vmem:[%s778_s2] sm:$0xff] (!%p160_p3)  ;;  %v733_v3 = vld [vmem:[%s778_s2 + $0x8] sm:$0xff] (!%p160_p3)  ;;  %s745_s22 = smov (!%p160_p3), 0  }
  0x10   : > { %s791_s13 = smov (!%p194_p5, %s646_s13), 1  ;;  %s793_s19 = smov (!%p196_p6, %s518_s19), 127 }
  0x11   : > { %s520_s28 = sshll.u32 %s791_s13, 11  ;;  %s524_s29 = sshll.u32 %s791_s13, 8 }
  0x12   : > { %s519_s30 = sshll.u32 %s793_s19, 4  ;;  %s523_s4 = sshll.u32 %s793_s19, 1 }
  0x13   : > { %s200_s5 = sadd.s32 %s520_s28, %s519_s30  ;;  %s211_s6 = sadd.s32 %s524_s29, %s523_s4 }
  0x14   : > { %s521_s7 = sshll.u32 %s200_s5, 2  ;;  %s525_s8 = sshll.u32 %s211_s6, 2 }
  0x15   : > { %s738_s11 = scalar_lea.vmem %s776_s0, %s521_s7  ;;  %s743_s21 = scalar_lea.vmem %s779_s3, %s525_s8 }
  0x16 LB: >> { %v664_v4 = vmov 0   ;;  %s545_s13 = sshll.u32 %s662_s22, 6  ;;  %v528_v13 = vcombine.low %v718_v0, %v723_v1  ;;  %vm272_vm0 = vcmask 392192   ;;  %s548_s23 = sshll.u32 %s662_s22, 3  ;;  %s662_s22 = sphi %s745_s22, %s225_s22  }
  0x17   : >> { %308 = vmatprep.mubr.bf16.mxu0 %v664_v4  ;;  %361 = vmatprep.mubr.bf16.mxu1 %v664_v4  ;;  %s228_s19 = scalar_lea.vmem %s738_s11, %s545_s13  ;;  %s402_s24 = scalar_lea.vmem %s743_s21, %s548_s23 }
  0x18   : >> { %603 = vset.pattern.permute.xlu0 %v664_v4  ;;  %v604_v5 = vld [vmem:[%s228_s19 + $0x4] ss:$8 sps:$4 sm:$0xff]   ;;  %v606_v6 = vld [vmem:[%s228_s19 + $0x14] ss:$8 sps:$4 sm:$0xff]   ;;  %v608_v7 = vld [vmem:[%s228_s19] ss:$8 sps:$4 sm:$0xff]  }
  0x19   : >> { %380 = vperm.xlu0 %603, %v728_v2   ;;  %276 = vmatprep.subr.bf16.mxu0 %v604_v5  ;;  %v609_v8 = vld [vmem:[%s228_s19 + $0x10] ss:$8 sps:$4 sm:$0xff]   ;;  %v610_v9 = vld [vmem:[%s228_s19 + $0x24] ss:$8 sps:$4 sm:$0xff]   ;;  %v612_v10 = vld [vmem:[%s228_s19 + $0x20] ss:$8 sps:$4 sm:$0xff]  }
  0x1a   : >> { %329 = vmatprep.subr.bf16.mxu1 %v606_v6  ;;  %277 = vmatpush1.bf16.msra.mxu0 %v608_v7  ;;  %v613_v11 = vld [vmem:[%s228_s19 + $0x34] ss:$8 sps:$4 sm:$0xff]   ;;  %v615_v12 = vld [vmem:[%s228_s19 + $0x30] ss:$8 sps:$4 sm:$0xff]   ;;  %s225_s22 = sadd.s32 1, %s662_s22  }
  0x1b   : >> { %330 = vmatpush1.bf16.msra.mxu1 %v609_v8  ;;  %278 = vmatprep.subr.bf16.mxu0 %v606_v6  ;;  %p222_p7 = scmp.ge.s32.totalorder %s225_s22, 64  }
  0x1c   : >> { %331 = vmatprep.subr.bf16.mxu1 %v610_v9 }
  0x1d   : >> { %385 = vperm.xlu0 %603, %v733_v3  }
  0x1e   : >> { %279 = vmatpush1.bf16.msra.mxu0 %v609_v8 }
  0x1f   : >> { %332 = vmatpush1.bf16.msra.mxu1 %v612_v10  ;;  %280 = vmatprep.subr.bf16.mxu0 %v610_v9 }
  0x20   : >> { %333 = vmatprep.subr.bf16.mxu1 %v613_v11 }
  0x22   : >> { %281 = vmatpush1.bf16.msra.mxu0 %v612_v10 }
  0x23   : >> { %334 = vmatpush1.bf16.msra.mxu1 %v615_v12 }
  0x25   : >> { %535 = vmatmul.mubr.msk.bf16.vlgmr.msra.gmra.mrb[0].mxu0 %vm272_vm0, %v528_v13 }
  0x26   : >> { %538 = vmatmul.mubr.msk.bf16.vlgmr.msra.gmra.mrb[0].mxu1 %vm272_vm0, %v528_v13 }
  0x98   : >> { %v381_v14 = vpop.permute.xlu0 %380 }
  0x9c   : >> { %v386_v30 = vpop.permute.xlu0 %385 }
  0xf8   : >> { %v310_v15 = vpop.f32.mrb[0].mxu0 }
  0xf9   : >> { %v363_v16 = vpop.f32.mrb[0].mxu1  ;;  %v312_v18 = vpop.f32.mrb[1].mxu0 }
  0xfa   : >> { %v372_v17 = vmax.f32 %v310_v15, %v363_v16  ;;  %v365_v19 = vpop.f32.mrb[1].mxu1  ;;  %v314_v21 = vpop.f32.mrb[2].mxu0 }
  0xfb   : >> { %v373_v20 = vmax.f32 %v312_v18, %v365_v19  ;;  %v367_v22 = vpop.f32.mrb[2].mxu1  ;;  %v316_v24 = vpop.f32.mrb[3].mxu0 }
  0xfc   : >> { %v374_v23 = vmax.f32 %v314_v21, %v367_v22  ;;  %v369_v25 = vpop.f32.mrb[3].mxu1 }
  0xfd   : >> { %v376_v26 = vmax.f32 %v372_v17, %v373_v20  ;;  %v375_v27 = vmax.f32 %v316_v24, %v369_v25 }
  0xff   : >> { %v388_v28 = vadd.f32 %v381_v14, %v376_v26  ;;  %v377_v29 = vmax.f32 %v374_v23, %v375_v27 }
 0x101   : >> { %v389_v31 = vadd.f32 %v386_v30, %v377_v29  ;;  %v390_v32 = vmax.f32 %v388_v28, 0.0  ;;  %224 = sbr.rel (!%p222_p7) target bundleno = 22 (0x16), region = 71 }
 0x103   : >> { %v391_v33 = vmax.f32 %v389_v31, 0.0 }
 0x105   : >> { %v552_v34 = vpack.c.bf16 %v391_v33, %v390_v32 }
 0x107   : >> { %553 = vst [vmem:[%s402_s24] sm:$0xff] %v552_v34  }
 0x108 PF: > { %s13_s16 = sadd.s32 1, %s658_s16   ;;  %s780_s12 = smov %s650_s14 }
 0x109   : > { %p10_p8 = scmp.ge.s32.totalorder %s13_s16, 6   ;;  %s781_s13 = smov %s654_s15 }
 0x10a   : > { %s782_s14 = smov %s785_s17  ;;  %s783_s15 = smov %s789_s18 }
 0x10b   :  { %12 = sbr.rel (!%p10_p8) target bundleno = 3 (0x3), region = 82 }

// kernel: net_forward.6
= control target key start
LH: loop header
LB: loop body
LE: loop exit
PB: predicated region body
PF: predicated region fallthrough
CT: control target
= control target key end

     0   :  { %s906_s12 = smov 0   ;;  %s908_s13 = smov 0   ;;  %s1055_s0 = inlined_call_operand.vmem [shape: bf16[2,32,192,256], index: 0, kind: input, shape index: {}]   ;;  %s1056_s1 = inlined_call_operand.vmem [shape: bf16[32,144], index: 1, kind: input, shape index: {}]   ;;  %s1057_s2 = inlined_call_operand.vmem [shape: f32[32,1], index: 2, kind: input, shape index: {}]   ;;  %s1058_s3 = inlined_call_operand.vmem [shape: bf16[2,32,32,128], index: 3, kind: output, shape index: {}]  }
   0x1   :  { %s910_s14 = smov 0   ;;  %s912_s15 = smov 0  }
   0x2   :  { %s914_s16 = smov 0  }
   0x3 LB: > { %s22_s17 = sadd.s32 1, %s871_s14  ;;  %s25_s18 = sadd.s32 1, %s875_s15  ;;  %s879_s16 = sphi %s914_s16, %s13_s16   ;;  %s875_s15 = sphi %s912_s15, %s1062_s15   ;;  %s871_s14 = sphi %s910_s14, %s1061_s14   ;;  %s867_s13 = sphi %s908_s13, %s1060_s13   ;;  %s863_s12 = sphi %s906_s12, %s1059_s12  }
   0x4   : > { %p23_p0 = scmp.ge.s32.totalorder %s22_s17, 2  ;;  %p683_p1 = scmp.ge.s32.totalorder %s879_s16, 1 }
   0x5   : > { %p159_p2 = scmp.lt.s32.totalorder %s879_s16, 5 }
   0x6   : > { %s1064_s17 = smov (%p23_p0, %s22_s17), 0  ;;  %s1066_s18 = smov (!%p23_p0, %s25_s18), %s875_s15 }
   0x7   : > { %p160_p3 = pnand %p683_p1, %p159_p2  ;;  %p27_p4 = scmp.ge.s32.totalorder %s1066_s18, 2 }
   0x8   : > { %s684_s19 = sshll.u32 (!%p160_p3), %s863_s12, 4  ;;  %p194_p5 = scmp.lt.s32.totalorder (!%p160_p3), %s867_s13, 1  ;;  %v939_v0 = vld [vmem:[%s1056_s1] sm:$0xff] (!%p160_p3)  ;;  %v944_v1 = vld [vmem:[%s1056_s1 + $0x8] sm:$0xff] (!%p160_p3)  ;;  %v949_v2 = vld [vmem:[%s1056_s1 + $0x10] sm:$0xff] (!%p160_p3) }
   0x9   : > { %s1068_s18 = smov (%p27_p4, %s1066_s18), 0  ;;  %163 = sbr.rel (%p160_p3) target bundleno = 297 (0x129), region = 32 }
   0xa   : > { %p196_p6 = scmp.lt.s32.totalorder (!%p160_p3), %s684_s19, 31  ;;  %v954_v3 = vld [vmem:[%s1056_s1 + $0x18] sm:$0xff] (!%p160_p3)  ;;  %v959_v4 = vld [vmem:[%s1057_s2] sm:$0xff] (!%p160_p3)  ;;  %v964_v5 = vld [vmem:[%s1057_s2 + $0x8] sm:$0xff] (!%p160_p3)  ;;  %s986_s30 = smov (!%p160_p3), 0  }
   0xb   : > { %v969_v6 = vld [vmem:[%s1057_s2 + $0x10] sm:$0xff] (!%p160_p3)  ;;  %v974_v7 = vld [vmem:[%s1057_s2 + $0x18] sm:$0xff] (!%p160_p3) }
  0x10   : > { %s1070_s13 = smov (!%p194_p5, %s867_s13), 1  ;;  %s1072_s19 = smov (!%p196_p6, %s684_s19), 31 }
  0x11   : > { %s749_s9 = smul.u32 1536, %s1070_s13  ;;  %s688_s10 = sshll.u32 %s1070_s13, 7 }
  0x12   : > { %s748_s11 = smul.u32 48, %s1072_s19  ;;  %s687_s12 = sshll.u32 %s1072_s19, 2 }
  0x13   : > { %s211_s20 = sadd.s32 %s688_s10, %s687_s12 }
  0x14   : > { %s200_s21 = sadd.s32 %s749_s9, %s748_s11  ;;  %s689_s22 = sshll.u32 %s211_s20, 2 }
  0x15   : > { %s685_s23 = sshll.u32 %s200_s21, 2  ;;  %s979_s26 = scalar_lea.vmem %s1058_s3, %s689_s22 }
  0x16   : > { %s984_s29 = scalar_lea.vmem %s1055_s0, %s685_s23 }
  0x17 LB: >> { %v692_v8 = vcombine.high %v939_v0, %v944_v1  ;;  %vm365_vm0 = vcmask 130048   ;;  %s731_s13 = smul.u32 192, %s883_s30  ;;  %v885_v9 = vmov 0   ;;  %v691_v34 = vcombine.low %v939_v0, %v944_v1  ;;  %s736_s4 = sshll.u32 %s883_s30, 4  ;;  %s883_s30 = sphi %s986_s30, %s229_s30  }
  0x18   : >> { %799 = vset.pattern.permute.xlu0 %v885_v9  ;;  %800 = vset.pattern.permute.xlu1 %v885_v9  ;;  %v694_v35 = vcombine.high %v949_v2, %v954_v3  ;;  %v693_v36 = vcombine.low %v949_v2, %v954_v3  ;;  %s566_s5 = scalar_lea.vmem %s979_s26, %s736_s4  ;;  %s229_s30 = sadd.s32 1, %s883_s30  }
  0x19   : >> { %713 = vmatprep.mubr.msk.bf16.mxu0 %vm365_vm0, %v692_v8  ;;  %721 = vmatprep.mubr.msk.bf16.mxu1 %vm365_vm0, %v692_v8  ;;  %s997_s19 = scalar_lea.vmem %s984_s29, %s731_s13  ;;  %p226_p7 = scmp.ge.s32.totalorder %s229_s30, 16  }
  0x1a   : >> { %522 = vperm.xlu0 %799, %v959_v4   ;;  %532 = vperm.xlu1 %800, %v969_v6   ;;  %v801_v10 = vld [vmem:[%s997_s19 + $0x4] ss:$8 sps:$4 sm:$0xff]   ;;  %v803_v11 = vld [vmem:[%s997_s19 + $0x34] ss:$8 sps:$4 sm:$0xff]   ;;  %v805_v12 = vld [vmem:[%s997_s19] ss:$8 sps:$4 sm:$0xff]  }
  0x1b   : >> { %372 = vmatprep.subr.bf16.mxu0 %v801_v10  ;;  %v806_v13 = vld [vmem:[%s997_s19 + $0x30] ss:$8 sps:$4 sm:$0xff]   ;;  %455 = vmatprep.subr.bf16.mxu1 %v803_v11  ;;  %v807_v14 = vld [vmem:[%s997_s19 + $0x14] ss:$8 sps:$4 sm:$0xff]   ;;  %v809_v15 = vld [vmem:[%s997_s19 + $0x44] ss:$8 sps:$4 sm:$0xff]  }
  0x1c   : >> { %373 = vmatpush1.bf16.msra.mxu0 %v805_v12  ;;  %456 = vmatpush1.bf16.msra.mxu1 %v806_v13  ;;  %v811_v16 = vld [vmem:[%s997_s19 + $0x10] ss:$8 sps:$4 sm:$0xff]   ;;  %v812_v17 = vld [vmem:[%s997_s19 + $0x40] ss:$8 sps:$4 sm:$0xff]   ;;  %v813_v18 = vld [vmem:[%s997_s19 + $0x24] ss:$8 sps:$4 sm:$0xff]  }
  0x1d   : >> { %374 = vmatprep.subr.bf16.mxu0 %v807_v14  ;;  %457 = vmatprep.subr.bf16.mxu1 %v809_v15  ;;  %v815_v19 = vld [vmem:[%s997_s19 + $0x54] ss:$8 sps:$4 sm:$0xff]   ;;  %v817_v20 = vld [vmem:[%s997_s19 + $0x20] ss:$8 sps:$4 sm:$0xff]   ;;  %v818_v21 = vld [vmem:[%s997_s19 + $0x50] ss:$8 sps:$4 sm:$0xff]  }
  0x1e   : >> { %527 = vperm.xlu0 %799, %v964_v5   ;;  %537 = vperm.xlu1 %800, %v974_v7   ;;  %v819_v22 = vld [vmem:[%s997_s19 + $0x64] ss:$8 sps:$4 sm:$0xff]   ;;  %v821_v23 = vld [vmem:[%s997_s19 + $0x60] ss:$8 sps:$4 sm:$0xff]   ;;  %v822_v24 = vld [vmem:[%s997_s19 + $0x74] ss:$8 sps:$4 sm:$0xff]  }
  0x1f   : >> { %v824_v25 = vld [vmem:[%s997_s19 + $0x70] ss:$8 sps:$4 sm:$0xff]   ;;  %v825_v26 = vld [vmem:[%s997_s19 + $0x84] ss:$8 sps:$4 sm:$0xff]   ;;  %v827_v27 = vld [vmem:[%s997_s19 + $0x80] ss:$8 sps:$4 sm:$0xff]  }
  0x20   : >> { %375 = vmatpush1.bf16.msra.mxu0 %v811_v16  ;;  %458 = vmatpush1.bf16.msra.mxu1 %v812_v17  ;;  %v828_v28 = vld [vmem:[%s997_s19 + $0x94] ss:$8 sps:$4 sm:$0xff]   ;;  %v830_v29 = vld [vmem:[%s997_s19 + $0x90] ss:$8 sps:$4 sm:$0xff]   ;;  %v831_v30 = vld [vmem:[%s997_s19 + $0xa4] ss:$8 sps:$4 sm:$0xff]  }
  0x21   : >> { %376 = vmatprep.subr.bf16.mxu0 %v813_v18  ;;  %459 = vmatprep.subr.bf16.mxu1 %v815_v19  ;;  %v833_v31 = vld [vmem:[%s997_s19 + $0xa0] ss:$8 sps:$4 sm:$0xff]   ;;  %v834_v32 = vld [vmem:[%s997_s19 + $0xb4] ss:$8 sps:$4 sm:$0xff]   ;;  %v836_v33 = vld [vmem:[%s997_s19 + $0xb0] ss:$8 sps:$4 sm:$0xff]  }
  0x24   : >> { %377 = vmatpush1.bf16.msra.mxu0 %v817_v20  ;;  %460 = vmatpush1.bf16.msra.mxu1 %v818_v21 }
  0x25   : >> { %378 = vmatprep.subr.bf16.mxu0 %v803_v11  ;;  %461 = vmatprep.subr.bf16.mxu1 %v819_v22 }
  0x28   : >> { %379 = vmatpush1.bf16.msra.mxu0 %v806_v13  ;;  %462 = vmatpush1.bf16.msra.mxu1 %v821_v23 }
  0x29   : >> { %380 = vmatprep.subr.bf16.mxu0 %v809_v15  ;;  %463 = vmatprep.subr.bf16.mxu1 %v822_v24 }
  0x2c   : >> { %381 = vmatpush1.bf16.msra.mxu0 %v812_v17  ;;  %464 = vmatpush1.bf16.msra.mxu1 %v824_v25 }
  0x2d   : >> { %382 = vmatprep.subr.bf16.mxu0 %v815_v19  ;;  %465 = vmatprep.subr.bf16.mxu1 %v825_v26 }
  0x30   : >> { %383 = vmatpush1.bf16.msra.mxu0 %v818_v21  ;;  %466 = vmatpush1.bf16.msra.mxu1 %v827_v27 }
  0x31   : >> { %384 = vmatprep.subr.bf16.mxu0 %v819_v22  ;;  %467 = vmatprep.subr.bf16.mxu1 %v828_v28 }
  0x34   : >> { %385 = vmatpush1.bf16.msra.mxu0 %v821_v23  ;;  %468 = vmatpush1.bf16.msra.mxu1 %v830_v29 }
  0x35   : >> { %386 = vmatprep.subr.bf16.mxu0 %v822_v24  ;;  %469 = vmatprep.subr.bf16.mxu1 %v831_v30 }
  0x38   : >> { %387 = vmatpush1.bf16.msra.mxu0 %v824_v25  ;;  %470 = vmatpush1.bf16.msra.mxu1 %v833_v31 }
  0x39   : >> { %388 = vmatprep.subr.bf16.mxu0 %v825_v26  ;;  %471 = vmatprep.subr.bf16.mxu1 %v834_v32 }
  0x3c   : >> { %389 = vmatpush1.bf16.msra.mxu0 %v827_v27  ;;  %472 = vmatpush1.bf16.msra.mxu1 %v836_v33 }
  0x3f   : >> { %405 = vmatmul.mubr.bf16.vlgmr.msra.gmra.mrb[0].mxu0 %v691_v34  ;;  %488 = vmatmul.mubr.bf16.vlgmr.msra.gmra.mrb[0].mxu1 %v691_v34 }
  0x40   : >> { %714 = vmatprep.mubr.msk.bf16.mxu0 %vm365_vm0, %v694_v35  ;;  %722 = vmatprep.mubr.msk.bf16.mxu1 %vm365_vm0, %v694_v35 }
  0x47   : >> { %415 = vmatmul.mubr.bf16.gmra.mrb[4].mxu0 %v693_v36  ;;  %498 = vmatmul.mubr.bf16.gmra.mrb[4].mxu1 %v693_v36 }
  0x99   : >> { %v523_v37 = vpop.permute.xlu0 %522  ;;  %v533_v54 = vpop.permute.xlu1 %532 }
  0x9d   : >> { %v528_v51 = vpop.permute.xlu0 %527  ;;  %v538_v18 = vpop.permute.xlu1 %537 }
 0x112   : >> { %v406_v38 = vpop.f32.mrb[0].mxu0  ;;  %v489_v39 = vpop.f32.mrb[0].mxu1 }
 0x113   : >> { %v508_v40 = vmax.f32 %v406_v38, %v489_v39  ;;  %v408_v41 = vpop.f32.mrb[1].mxu0  ;;  %v491_v42 = vpop.f32.mrb[1].mxu1 }
 0x114   : >> { %v509_v43 = vmax.f32 %v408_v41, %v491_v42  ;;  %v410_v44 = vpop.f32.mrb[2].mxu0  ;;  %v493_v45 = vpop.f32.mrb[2].mxu1 }
 0x115   : >> { %v510_v46 = vmax.f32 %v410_v44, %v493_v45  ;;  %v412_v47 = vpop.f32.mrb[3].mxu0  ;;  %v495_v48 = vpop.f32.mrb[3].mxu1 }
 0x116   : >> { %v516_v49 = vmax.f32 %v508_v40, %v509_v43  ;;  %v511_v50 = vmax.f32 %v412_v47, %v495_v48 }
 0x118   : >> { %v540_v52 = vadd.f32 %v523_v37, %v516_v49  ;;  %v517_v53 = vmax.f32 %v510_v46, %v511_v50 }
 0x11a   : >> { %v541_v55 = vadd.f32 %v528_v51, %v517_v53  ;;  %v416_v56 = vpop.f32.mrb[4].mxu0  ;;  %v499_v57 = vpop.f32.mrb[4].mxu1  ;;  %v544_v61 = vmax.f32 %v540_v52, 0.0 }
 0x11b   : >> { %v512_v58 = vmax.f32 %v416_v56, %v499_v57  ;;  %v418_v59 = vpop.f32.mrb[5].mxu0  ;;  %v501_v60 = vpop.f32.mrb[5].mxu1 }
 0x11c   : >> { %v545_v62 = vmax.f32 %v541_v55, 0.0  ;;  %v513_v63 = vmax.f32 %v418_v59, %v501_v60  ;;  %v420_v8 = vpop.f32.mrb[6].mxu0  ;;  %v503_v9 = vpop.f32.mrb[6].mxu1 }
 0x11d   : >> { %v514_v10 = vmax.f32 %v420_v8, %v503_v9  ;;  %v422_v11 = vpop.f32.mrb[7].mxu0  ;;  %v505_v12 = vpop.f32.mrb[7].mxu1 }
 0x11e   : >> { %v740_v13 = vpack.c.bf16 %v545_v62, %v544_v61  ;;  %v518_v14 = vmax.f32 %v512_v58, %v513_v63  ;;  %v515_v15 = vmax.f32 %v422_v11, %v505_v12 }
 0x120   : >> { %741 = vst [vmem:[%s566_s5] sm:$0xff] %v740_v13   ;;  %v542_v16 = vadd.f32 %v533_v54, %v518_v14  ;;  %v519_v17 = vmax.f32 %v514_v10, %v515_v15 }
 0x122   : >> { %v543_v19 = vadd.f32 %v538_v18, %v519_v17  ;;  %v546_v20 = vmax.f32 %v542_v16, 0.0  ;;  %228 = sbr.rel (!%p226_p7) target bundleno = 23 (0x17), region = 71 }
 0x124   : >> { %v547_v21 = vmax.f32 %v543_v19, 0.0 }
 0x126   : >> { %v745_v22 = vpack.c.bf16 %v547_v21, %v546_v20 }
 0x128   : >> { %747 = vst [vmem:[%s566_s5 + $0x8] sm:$0xff] %v745_v22  }
 0x129 PF: > { %s13_s16 = sadd.s32 1, %s879_s16   ;;  %s1059_s12 = smov %s871_s14 }
 0x12a   : > { %p10_p8 = scmp.ge.s32.totalorder %s13_s16, 6   ;;  %s1060_s13 = smov %s875_s15 }
 0x12b   : > { %s1061_s14 = smov %s1064_s17  ;;  %s1062_s15 = smov %s1068_s18 }
 0x12c   :  { %12 = sbr.rel (!%p10_p8) target bundleno = 3 (0x3), region = 82 }

// kernel: net_forward.7
= control target key start
LH: loop header
LB: loop body
LE: loop exit
PB: predicated region body
PF: predicated region fallthrough
CT: control target
= control target key end

     0   :  { %s1484_s12 = smov 0   ;;  %s1486_s13 = smov 0   ;;  %s1780_s0 = inlined_call_operand.vmem [shape: bf16[2,8,384,256], index: 0, kind: input, shape index: {}]   ;;  %s1781_s1 = inlined_call_operand.vmem [shape: bf16[64,288], index: 1, kind: input, shape index: {}]   ;;  %s1782_s2 = inlined_call_operand.vmem [shape: f32[64,1], index: 2, kind: input, shape index: {}]   ;;  %s1783_s3 = inlined_call_operand.vmem [shape: bf16[2,8,64,128], index: 3, kind: output, shape index: {}]  }
   0x1   :  { %s1488_s14 = smov 0   ;;  %s1490_s15 = smov 0  }
   0x2   :  { %s1492_s16 = smov 0  }
   0x3 LB: > { %s22_s17 = sadd.s32 1, %s1449_s14  ;;  %s25_s18 = sadd.s32 1, %s1453_s15  ;;  %s1457_s16 = sphi %s1492_s16, %s13_s16   ;;  %s1453_s15 = sphi %s1490_s15, %s1787_s15   ;;  %s1449_s14 = sphi %s1488_s14, %s1786_s14   ;;  %s1445_s13 = sphi %s1486_s13, %s1785_s13   ;;  %s1441_s12 = sphi %s1484_s12, %s1784_s12  }
   0x4   : > { %p23_p0 = scmp.ge.s32.totalorder %s22_s17, 2  ;;  %p1137_p1 = scmp.ge.s32.totalorder %s1457_s16, 1 }
   0x5   : > { %p159_p2 = scmp.lt.s32.totalorder %s1457_s16, 5 }
   0x6   : > { %s1789_s17 = smov (%p23_p0, %s22_s17), 0  ;;  %s1791_s18 = smov (!%p23_p0, %s25_s18), %s1453_s15 }
   0x7   : > { %p160_p3 = pnand %p1137_p1, %p159_p2  ;;  %p27_p4 = scmp.ge.s32.totalorder %s1791_s18, 2 }
   0x8   : > { %s1138_s19 = sshll.u32 (!%p160_p3), %s1441_s12, 2  ;;  %p194_p5 = scmp.lt.s32.totalorder (!%p160_p3), %s1445_s13, 1  ;;  %v1520_v0 = vld [vmem:[%s1781_s1] sm:$0xff] (!%p160_p3)  ;;  %v1525_v1 = vld [vmem:[%s1781_s1 + $0x8] sm:$0xf] (!%p160_p3)  ;;  %v1530_v2 = vld [vmem:[%s1781_s1 + $0xc] sm:$0xff] (!%p160_p3) }
   0x9   : > { %s1793_s18 = smov (%p27_p4, %s1791_s18), 0  ;;  %163 = sbr.rel (%p160_p3) target bundleno = 374 (0x176), region = 32 }
   0xa   : > { %p196_p6 = scmp.lt.s32.totalorder (!%p160_p3), %s1138_s19, 7  ;;  %v1535_v3 = vld [vmem:[%s1781_s1 + $0x14] sm:$0xf] (!%p160_p3)  ;;  %v1540_v4 = vld [vmem:[%s1781_s1 + $0x18] sm:$0xff] (!%p160_p3)  ;;  %v1545_v5 = vld [vmem:[%s1781_s1 + $0x20] sm:$0xf] (!%p160_p3) }
   0xb   : > { %v1550_v6 = vld [vmem:[%s1781_s1 + $0x24] sm:$0xff] (!%p160_p3)  ;;  %v1555_v7 = vld [vmem:[%s1781_s1 + $0x2c] sm:$0xf] (!%p160_p3)  ;;  %v1560_v8 = vld [vmem:[%s1781_s1 + $0x30] sm:$0xff] (!%p160_p3) }
   0xc   : > { %v1565_v9 = vld [vmem:[%s1781_s1 + $0x38] sm:$0xf] (!%p160_p3)  ;;  %v1570_v10 = vld [vmem:[%s1781_s1 + $0x3c] sm:$0xff] (!%p160_p3)  ;;  %v1575_v11 = vld [vmem:[%s1781_s1 + $0x44] sm:$0xf] (!%p160_p3) }
   0xd   : > { %v1580_v12 = vld [vmem:[%s1781_s1 + $0x48] sm:$0xff] (!%p160_p3)  ;;  %v1585_v13 = vld [vmem:[%s1781_s1 + $0x50] sm:$0xf] (!%p160_p3)  ;;  %v1590_v14 = vld [vmem:[%s1781_s1 + $0x54] sm:$0xff] (!%p160_p3) }
   0xe   : > { %v1595_v15 = vld [vmem:[%s1781_s1 + $0x5c] sm:$0xf] (!%p160_p3)  ;;  %v1600_v16 = vld [vmem:[%s1782_s2] sm:$0xff] (!%p160_p3)  ;;  %v1605_v17 = vld [vmem:[%s1782_s2 + $0x8] sm:$0xff] (!%p160_p3) }
   0xf   : > { %v1610_v18 = vld [vmem:[%s1782_s2 + $0x10] sm:$0xff] (!%p160_p3)  ;;  %v1615_v19 = vld [vmem:[%s1782_s2 + $0x18] sm:$0xff] (!%p160_p3)  ;;  %v1620_v20 = vld [vmem:[%s1782_s2 + $0x20] sm:$0xff] (!%p160_p3) }
  0x10   : > { %s1795_s13 = smov (!%p194_p5, %s1445_s13), 1  ;;  %s1797_s19 = smov (!%p196_p6, %s1138_s19), 7  ;;  %v1625_v21 = vld [vmem:[%s1782_s2 + $0x28] sm:$0xff]  ;;  %v1630_v22 = vld [vmem:[%s1782_s2 + $0x30] sm:$0xff]  ;;  %v1635_v23 = vld [vmem:[%s1782_s2 + $0x38] sm:$0xff] }
  0x11   : > { %s1291_s24 = smul.u32 768, %s1795_s13  ;;  %s1142_s25 = sshll.u32 %s1795_s13, 6 }
  0x12   : > { %s1290_s5 = smul.u32 96, %s1797_s19  ;;  %s1141_s6 = sshll.u32 %s1797_s19, 3 }
  0x13   : > { %s211_s12 = sadd.s32 %s1142_s25, %s1141_s6 }
  0x14   : > { %s200_s27 = sadd.s32 %s1291_s24, %s1290_s5  ;;  %s1143_s28 = sshll.u32 %s211_s12, 2 }
  0x15   : > { %s1139_s8 = sshll.u32 %s200_s27, 2  ;;  %s1640_s24 = scalar_lea.vmem %s1783_s3, %s1143_s28 }
  0x16   : > { %s1645_s11 = scalar_lea.vmem %s1780_s0, %s1139_s8  ;;  %s1647_s12 = smov 0  }
  0x17 LB: >> { %v1146_v24 = vcombine.high %v1520_v0, %v1530_v2  ;;  %s1225_s20 = smul.u32 384, %s1461_s12  ;;  %v1463_v25 = vmov 0   ;;  %vm537_vm0 = vcmask 261120   ;;  %s1234_s19 = sshll.u32 %s1461_s12, 5  ;;  %s1461_s12 = sphi %s1647_s12, %s245_s12  }
  0x18   : >> { %1341 = vset.pattern.permute.xlu0 %v1463_v25  ;;  %1342 = vset.pattern.permute.xlu1 %v1463_v25  ;;  %s1756_s22 = scalar_lea.vmem %s1640_s24, %s1234_s19  ;;  %s245_s12 = sadd.s32 1, %s1461_s12  }
  0x19   : >> { %582 = vmatprep.mubr.bf16.mxu0 %v1146_v24  ;;  %788 = vmatprep.mubr.bf16.mxu1 %v1146_v24  ;;  %s1658_s21 = scalar_lea.vmem %s1645_s11, %s1225_s20  ;;  %p242_p7 = scmp.ge.s32.totalorder %s245_s12, 4  }
  0x1a   : >> { %928 = vperm.xlu0 %1341, %v1600_v16   ;;  %938 = vperm.xlu1 %1342, %v1610_v18   ;;  %v1343_v26 = vld [vmem:[%s1658_s21 + $0x4] ss:$8 sps:$4 sm:$0xff]   ;;  %v1347_v28 = vld [vmem:[%s1658_s21] ss:$8 sps:$4 sm:$0xff]   ;;  %v1349_v30 = vld [vmem:[%s1658_s21 + $0x14] ss:$8 sps:$4 sm:$0xff]  }
  0x1b   : >> { %v1345_v27 = vld [vmem:[%s1658_s21 + $0x64] ss:$8 sps:$4 sm:$0xff]   ;;  %550 = vmatprep.subr.bf16.mxu0 %v1343_v26  ;;  %v1348_v29 = vld [vmem:[%s1658_s21 + $0x60] ss:$8 sps:$4 sm:$0xff]   ;;  %v1351_v31 = vld [vmem:[%s1658_s21 + $0x74] ss:$8 sps:$4 sm:$0xff]  }
  0x1c   : >> { %756 = vmatprep.subr.bf16.mxu1 %v1345_v27  ;;  %551 = vmatpush1.bf16.msra.mxu0 %v1347_v28  ;;  %v1353_v32 = vld [vmem:[%s1658_s21 + $0x10] ss:$8 sps:$4 sm:$0xff]   ;;  %v1355_v34 = vld [vmem:[%s1658_s21 + $0x24] ss:$8 sps:$4 sm:$0xff]   ;;  %v1359_v36 = vld [vmem:[%s1658_s21 + $0x20] ss:$8 sps:$4 sm:$0xff]  }
  0x1d   : >> { %757 = vmatpush1.bf16.msra.mxu1 %v1348_v29  ;;  %552 = vmatprep.subr.bf16.mxu0 %v1349_v30  ;;  %v1354_v33 = vld [vmem:[%s1658_s21 + $0x70] ss:$8 sps:$4 sm:$0xff]   ;;  %v1357_v35 = vld [vmem:[%s1658_s21 + $0x84] ss:$8 sps:$4 sm:$0xff]   ;;  %v1360_v37 = vld [vmem:[%s1658_s21 + $0x80] ss:$8 sps:$4 sm:$0xff]  }
  0x1e   : >> { %933 = vperm.xlu0 %1341, %v1605_v17   ;;  %943 = vperm.xlu1 %1342, %v1615_v19   ;;  %v1361_v38 = vld [vmem:[%s1658_s21 + $0x34] ss:$8 sps:$4 sm:$0xff]   ;;  %v1365_v40 = vld [vmem:[%s1658_s21 + $0x30] ss:$8 sps:$4 sm:$0xff]   ;;  %v1367_v42 = vld [vmem:[%s1658_s21 + $0x44] ss:$8 sps:$4 sm:$0xff]  }
  0x1f   : >> { %758 = vmatprep.subr.bf16.mxu1 %v1351_v31  ;;  %v1363_v39 = vld [vmem:[%s1658_s21 + $0x94] ss:$8 sps:$4 sm:$0xff]   ;;  %v1366_v41 = vld [vmem:[%s1658_s21 + $0x90] ss:$8 sps:$4 sm:$0xff]   ;;  %v1369_v43 = vld [vmem:[%s1658_s21 + $0xa4] ss:$8 sps:$4 sm:$0xff]  }
  0x20   : >> { %553 = vmatpush1.bf16.msra.mxu0 %v1353_v32  ;;  %v1371_v44 = vld [vmem:[%s1658_s21 + $0x40] ss:$8 sps:$4 sm:$0xff]   ;;  %v1373_v46 = vld [vmem:[%s1658_s21 + $0x54] ss:$8 sps:$4 sm:$0xff]   ;;  %v1377_v48 = vld [vmem:[%s1658_s21 + $0x50] ss:$8 sps:$4 sm:$0xff]   ;;  %v1145_v32 = vcombine.low %v1520_v0, %v1530_v2 }
  0x21   : >> { %759 = vmatpush1.bf16.msra.mxu1 %v1354_v33  ;;  %554 = vmatprep.subr.bf16.mxu0 %v1355_v34  ;;  %v1372_v45 = vld [vmem:[%s1658_s21 + $0xa0] ss:$8 sps:$4 sm:$0xff]   ;;  %v1375_v47 = vld [vmem:[%s1658_s21 + $0xb4] ss:$8 sps:$4 sm:$0xff]   ;;  %v1378_v49 = vld [vmem:[%s1658_s21 + $0xb0] ss:$8 sps:$4 sm:$0xff]   ;;  %v1149_v34 = vcombine.high %v1540_v4, %v1550_v6 }
  0x22   : >> { %948 = vperm.xlu0 %1341, %v1620_v20   ;;  %760 = vmatprep.subr.bf16.mxu1 %v1357_v35  ;;  %v1379_v50 = vld [vmem:[%s1658_s21 + $0xc4] ss:$8 sps:$4 sm:$0xff]   ;;  %v1381_v51 = vld [vmem:[%s1658_s21 + $0xc0] ss:$8 sps:$4 sm:$0xff]   ;;  %v1382_v52 = vld [vmem:[%s1658_s21 + $0xd4] ss:$8 sps:$4 sm:$0xff]  }
  0x23   : >> { %953 = vperm.xlu1 %1342, %v1625_v21   ;;  %v1384_v53 = vld [vmem:[%s1658_s21 + $0xd0] ss:$8 sps:$4 sm:$0xff]   ;;  %v1385_v54 = vld [vmem:[%s1658_s21 + $0xe4] ss:$8 sps:$4 sm:$0xff]   ;;  %v1387_v55 = vld [vmem:[%s1658_s21 + $0xe0] ss:$8 sps:$4 sm:$0xff]  }
  0x24   : >> { %555 = vmatpush1.bf16.msra.mxu0 %v1359_v36  ;;  %v1388_v56 = vld [vmem:[%s1658_s21 + $0xf4] ss:$8 sps:$4 sm:$0xff]   ;;  %v1390_v57 = vld [vmem:[%s1658_s21 + $0xf0] ss:$8 sps:$4 sm:$0xff]   ;;  %v1391_v58 = vld [vmem:[%s1658_s21 + $0x104] ss:$8 sps:$4 sm:$0xff]  }
  0x25   : >> { %761 = vmatpush1.bf16.msra.mxu1 %v1360_v37  ;;  %556 = vmatprep.subr.bf16.mxu0 %v1361_v38  ;;  %v1393_v59 = vld [vmem:[%s1658_s21 + $0x100] ss:$8 sps:$4 sm:$0xff]   ;;  %v1394_v60 = vld [vmem:[%s1658_s21 + $0x114] ss:$8 sps:$4 sm:$0xff]   ;;  %v1396_v61 = vld [vmem:[%s1658_s21 + $0x110] ss:$8 sps:$4 sm:$0xff]   ;;  %v1152_v38 = vcombine.high %v1560_v8, %v1570_v10 }
  0x26   : >> { %958 = vperm.xlu0 %1341, %v1630_v22   ;;  %762 = vmatprep.subr.bf16.mxu1 %v1363_v39  ;;  %v1397_v62 = vld [vmem:[%s1658_s21 + $0x124] ss:$8 sps:$4 sm:$0xff]   ;;  %v1399_v63 = vld [vmem:[%s1658_s21 + $0x120] ss:$8 sps:$4 sm:$0xff]   ;;  %v1400_v24 = vld [vmem:[%s1658_s21 + $0x134] ss:$8 sps:$4 sm:$0xff]  }
  0x27   : >> { %963 = vperm.xlu1 %1342, %v1635_v23   ;;  %v1402_v26 = vld [vmem:[%s1658_s21 + $0x130] ss:$8 sps:$4 sm:$0xff]   ;;  %v1405_v28 = vld [vmem:[%s1658_s21 + $0x140] ss:$8 sps:$4 sm:$0xff]  }
  0x28   : >> { %557 = vmatpush1.bf16.msra.mxu0 %v1365_v40  ;;  %v1408_v30 = vld [vmem:[%s1658_s21 + $0x150] ss:$8 sps:$4 sm:$0xff]   ;;  %v1155_v40 = vcombine.high %v1580_v12, %v1590_v14 }
  0x29   : >> { %763 = vmatpush1.bf16.msra.mxu1 %v1366_v41  ;;  %558 = vmatprep.subr.bf16.mxu0 %v1367_v42  ;;  %v1412_v36 = vld [vmem:[%s1658_s21 + $0x170] ss:$8 sps:$4 sm:$0xff]   ;;  %v1147_v42 = vcombine.low %v1525_v1, %v1535_v3 }
  0x2a   : >> { %764 = vmatprep.subr.bf16.mxu1 %v1369_v43 }
  0x2c   : >> { %559 = vmatpush1.bf16.msra.mxu0 %v1371_v44  ;;  %v1153_v44 = vcombine.low %v1565_v9, %v1575_v11 }
  0x2d   : >> { %765 = vmatpush1.bf16.msra.mxu1 %v1372_v45  ;;  %560 = vmatprep.subr.bf16.mxu0 %v1373_v46 }
  0x2e   : >> { %766 = vmatprep.subr.bf16.mxu1 %v1375_v47 }
  0x30   : >> { %561 = vmatpush1.bf16.msra.mxu0 %v1377_v48 }
  0x31   : >> { %767 = vmatpush1.bf16.msra.mxu1 %v1378_v49  ;;  %562 = vmatprep.subr.bf16.mxu0 %v1345_v27  ;;  %v1403_v27 = vld [vmem:[%s1658_s21 + $0x144] ss:$8 sps:$4 sm:$0xff]  }
  0x32   : >> { %768 = vmatprep.subr.bf16.mxu1 %v1379_v50 }
  0x34   : >> { %563 = vmatpush1.bf16.msra.mxu0 %v1348_v29  ;;  %v1406_v29 = vld [vmem:[%s1658_s21 + $0x154] ss:$8 sps:$4 sm:$0xff]  }
  0x35   : >> { %769 = vmatpush1.bf16.msra.mxu1 %v1381_v51  ;;  %564 = vmatprep.subr.bf16.mxu0 %v1351_v31  ;;  %v1411_v31 = vld [vmem:[%s1658_s21 + $0x164] ss:$8 sps:$4 sm:$0xff]  }
  0x36   : >> { %770 = vmatprep.subr.bf16.mxu1 %v1382_v52 }
  0x38   : >> { %565 = vmatpush1.bf16.msra.mxu0 %v1354_v33  ;;  %v1409_v33 = vld [vmem:[%s1658_s21 + $0x160] ss:$8 sps:$4 sm:$0xff]  }
  0x39   : >> { %771 = vmatpush1.bf16.msra.mxu1 %v1384_v53  ;;  %566 = vmatprep.subr.bf16.mxu0 %v1357_v35  ;;  %v1414_v35 = vld [vmem:[%s1658_s21 + $0x174] ss:$8 sps:$4 sm:$0xff]  }
  0x3a   : >> { %772 = vmatprep.subr.bf16.mxu1 %v1385_v54 }
  0x3c   : >> { %567 = vmatpush1.bf16.msra.mxu0 %v1360_v37  ;;  %v1148_v37 = vcombine.low %v1540_v4, %v1550_v6 }
  0x3d   : >> { %773 = vmatpush1.bf16.msra.mxu1 %v1387_v55  ;;  %568 = vmatprep.subr.bf16.mxu0 %v1363_v39  ;;  %v1151_v39 = vcombine.low %v1560_v8, %v1570_v10 }
  0x3e   : >> { %774 = vmatprep.subr.bf16.mxu1 %v1388_v56 }
  0x40   : >> { %569 = vmatpush1.bf16.msra.mxu0 %v1366_v41  ;;  %v1154_v41 = vcombine.low %v1580_v12, %v1590_v14 }
  0x41   : >> { %775 = vmatpush1.bf16.msra.mxu1 %v1390_v57  ;;  %570 = vmatprep.subr.bf16.mxu0 %v1369_v43  ;;  %v1150_v43 = vcombine.low %v1545_v5, %v1555_v7 }
  0x42   : >> { %776 = vmatprep.subr.bf16.mxu1 %v1391_v58 }
  0x44   : >> { %571 = vmatpush1.bf16.msra.mxu0 %v1372_v45  ;;  %v1156_v45 = vcombine.low %v1585_v13, %v1595_v15 }
  0x45   : >> { %777 = vmatpush1.bf16.msra.mxu1 %v1393_v59  ;;  %572 = vmatprep.subr.bf16.mxu0 %v1375_v47 }
  0x46   : >> { %778 = vmatprep.subr.bf16.mxu1 %v1394_v60 }
  0x48   : >> { %573 = vmatpush1.bf16.msra.mxu0 %v1378_v49 }
  0x49   : >> { %779 = vmatpush1.bf16.msra.mxu1 %v1396_v61  ;;  %574 = vmatprep.subr.bf16.mxu0 %v1379_v50 }
  0x4a   : >> { %780 = vmatprep.subr.bf16.mxu1 %v1397_v62 }
  0x4c   : >> { %575 = vmatpush1.bf16.msra.mxu0 %v1381_v51 }
  0x4d   : >> { %781 = vmatpush1.bf16.msra.mxu1 %v1399_v63  ;;  %576 = vmatprep.subr.bf16.mxu0 %v1382_v52 }
  0x4e   : >> { %782 = vmatprep.subr.bf16.mxu1 %v1400_v24 }
  0x50   : >> { %577 = vmatpush1.bf16.msra.mxu0 %v1384_v53 }
  0x51   : >> { %783 = vmatpush1.bf16.msra.mxu1 %v1402_v26  ;;  %578 = vmatprep.subr.bf16.mxu0 %v1385_v54 }
  0x52   : >> { %784 = vmatprep.subr.bf16.mxu1 %v1403_v27 }
  0x54   : >> { %579 = vmatpush1.bf16.msra.mxu0 %v1387_v55 }
  0x55   : >> { %785 = vmatpush1.bf16.msra.mxu1 %v1405_v28  ;;  %580 = vmatprep.subr.bf16.mxu0 %v1388_v56 }
  0x56   : >> { %786 = vmatprep.subr.bf16.mxu1 %v1406_v29 }
  0x58   : >> { %581 = vmatpush1.bf16.msra.mxu0 %v1390_v57 }
  0x59   : >> { %787 = vmatpush1.bf16.msra.mxu1 %v1408_v30  ;;  %623 = vmatprep.subr.bf16.mxu0 %v1391_v58 }
  0x5a   : >> { %829 = vmatprep.subr.bf16.mxu1 %v1411_v31 }
  0x5b   : >> { %583 = vmatmul.mubr.bf16.vlgmr.msra.gmra.mrb[0].mxu0 %v1145_v32 }
  0x5c   : >> { %789 = vmatmul.mubr.bf16.vlgmr.msra.gmra.mrb[0].mxu1 %v1145_v32  ;;  %624 = vmatpush1.bf16.msra.mxu0 %v1393_v59 }
  0x5d   : >> { %830 = vmatpush1.bf16.msra.mxu1 %v1409_v33  ;;  %592 = vmatprep.mubr.bf16.mxu0 %v1149_v34 }
  0x5e   : >> { %798 = vmatprep.mubr.bf16.mxu1 %v1149_v34  ;;  %625 = vmatprep.subr.bf16.mxu0 %v1394_v60 }
  0x5f   : >> { %831 = vmatprep.subr.bf16.mxu1 %v1414_v35 }
  0x60   : >> { %626 = vmatpush1.bf16.msra.mxu0 %v1396_v61 }
  0x61   : >> { %832 = vmatpush1.bf16.msra.mxu1 %v1412_v36 }
  0x63   : >> { %593 = vmatmul.mubr.bf16.gmra.mrb[4].mxu0 %v1148_v37 }
  0x64   : >> { %799 = vmatmul.mubr.bf16.gmra.mrb[4].mxu1 %v1148_v37  ;;  %602 = vmatprep.mubr.bf16.mxu0 %v1152_v38 }
  0x65   : >> { %808 = vmatprep.mubr.bf16.mxu1 %v1152_v38 }
  0x6b   : >> { %603 = vmatmul.mubr.bf16.gmra.mrb[8].mxu0 %v1151_v39 }
  0x6c   : >> { %809 = vmatmul.mubr.bf16.gmra.mrb[8].mxu1 %v1151_v39  ;;  %612 = vmatprep.mubr.bf16.mxu0 %v1155_v40 }
  0x6d   : >> { %818 = vmatprep.mubr.bf16.mxu1 %v1155_v40 }
  0x73   : >> { %613 = vmatmul.mubr.bf16.gmra.mrb[12].mxu0 %v1154_v41 }
  0x74   : >> { %819 = vmatmul.mubr.bf16.gmra.mrb[12].mxu1 %v1154_v41  ;;  %655 = vmatprep.mubr.bf16.mxu0 %v1463_v25 }
  0x75   : >> { %861 = vmatprep.mubr.bf16.mxu1 %v1463_v25 }
  0x7b   : >> { %1193 = vmatmul.mubr.msk.bf16.vlgmr.msra.gmra.mrb[0].mxu0 %vm537_vm0, %v1147_v42 }
  0x7c   : >> { %1209 = vmatmul.mubr.msk.bf16.vlgmr.msra.gmra.mrb[0].mxu1 %vm537_vm0, %v1147_v42  ;;  %665 = vmatprep.mubr.bf16.mxu0 %v1463_v25 }
  0x7d   : >> { %871 = vmatprep.mubr.bf16.mxu1 %v1463_v25 }
  0x83   : >> { %1194 = vmatmul.mubr.msk.bf16.gmra.mrb[4].mxu0 %vm537_vm0, %v1150_v43 }
  0x84   : >> { %1210 = vmatmul.mubr.msk.bf16.gmra.mrb[4].mxu1 %vm537_vm0, %v1150_v43  ;;  %675 = vmatprep.mubr.bf16.mxu0 %v1463_v25 }
  0x85   : >> { %881 = vmatprep.mubr.bf16.mxu1 %v1463_v25 }
  0x8b   : >> { %1195 = vmatmul.mubr.msk.bf16.gmra.mrb[8].mxu0 %vm537_vm0, %v1153_v44 }
  0x8c   : >> { %1211 = vmatmul.mubr.msk.bf16.gmra.mrb[8].mxu1 %vm537_vm0, %v1153_v44  ;;  %685 = vmatprep.mubr.bf16.mxu0 %v1463_v25 }
  0x8d   : >> { %891 = vmatprep.mubr.bf16.mxu1 %v1463_v25 }
  0x93   : >> { %1196 = vmatmul.mubr.msk.bf16.gmra.mrb[12].mxu0 %vm537_vm0, %v1156_v45 }
  0x94   : >> { %1212 = vmatmul.mubr.msk.bf16.gmra.mrb[12].mxu1 %vm537_vm0, %v1156_v45 }
  0x99   : >> { %v929_v46 = vpop.permute.xlu0 %928  ;;  %v939_v62 = vpop.permute.xlu1 %938 }
  0x9d   : >> { %v934_v59 = vpop.permute.xlu0 %933  ;;  %v944_v43 = vpop.permute.xlu1 %943 }
 0x14e   : >> { %v657_v47 = vpop.f32.mrb[0].mxu0 }
 0x14f   : >> { %v863_v48 = vpop.f32.mrb[0].mxu1  ;;  %v659_v50 = vpop.f32.mrb[1].mxu0 }
 0x150   : >> { %v902_v49 = vmax.f32 %v657_v47, %v863_v48  ;;  %v865_v51 = vpop.f32.mrb[1].mxu1  ;;  %v661_v53 = vpop.f32.mrb[2].mxu0 }
 0x151   : >> { %v903_v52 = vmax.f32 %v659_v50, %v865_v51  ;;  %v867_v54 = vpop.f32.mrb[2].mxu1  ;;  %v663_v56 = vpop.f32.mrb[3].mxu0 }
 0x152   : >> { %v904_v55 = vmax.f32 %v661_v53, %v867_v54  ;;  %v869_v25 = vpop.f32.mrb[3].mxu1 }
 0x153   : >> { %v918_v57 = vmax.f32 %v902_v49, %v903_v52  ;;  %v905_v58 = vmax.f32 %v663_v56, %v869_v25 }
 0x155   : >> { %v966_v60 = vadd.f32 %v929_v46, %v918_v57  ;;  %v919_v61 = vmax.f32 %v904_v55, %v905_v58 }
 0x156   : >> { %v667_v24 = vpop.f32.mrb[4].mxu0 }
 0x157   : >> { %v967_v63 = vadd.f32 %v934_v59, %v919_v61  ;;  %v873_v26 = vpop.f32.mrb[4].mxu1  ;;  %v669_v28 = vpop.f32.mrb[5].mxu0  ;;  %v974_v30 = vmax.f32 %v966_v60, 0.0 }
 0x158   : >> { %v906_v27 = vmax.f32 %v667_v24, %v873_v26  ;;  %v875_v29 = vpop.f32.mrb[5].mxu1  ;;  %v671_v33 = vpop.f32.mrb[6].mxu0 }
 0x159   : >> { %v975_v31 = vmax.f32 %v967_v63, 0.0  ;;  %v907_v32 = vmax.f32 %v669_v28, %v875_v29  ;;  %v877_v34 = vpop.f32.mrb[6].mxu1  ;;  %v673_v36 = vpop.f32.mrb[7].mxu0 }
 0x15a   : >> { %v908_v35 = vmax.f32 %v671_v33, %v877_v34  ;;  %v879_v37 = vpop.f32.mrb[7].mxu1  ;;  %v949_v60 = vpop.permute.xlu0 %948 }
 0x15b   : >> { %v1238_v38 = vpack.c.bf16 %v975_v31, %v974_v30  ;;  %v920_v39 = vmax.f32 %v906_v27, %v907_v32  ;;  %v909_v40 = vmax.f32 %v673_v36, %v879_v37  ;;  %v954_v63 = vpop.permute.xlu1 %953 }
 0x15d   : >> { %1239 = vst [vmem:[%s1756_s22] sm:$0xff] %v1238_v38   ;;  %v968_v41 = vadd.f32 %v939_v62, %v920_v39  ;;  %v921_v42 = vmax.f32 %v908_v35, %v909_v40 }
 0x15e   : >> { %v677_v45 = vpop.f32.mrb[8].mxu0 }
 0x15f   : >> { %v969_v44 = vadd.f32 %v944_v43, %v921_v42  ;;  %v883_v46 = vpop.f32.mrb[8].mxu1  ;;  %v679_v48 = vpop.f32.mrb[9].mxu0  ;;  %v976_v50 = vmax.f32 %v968_v41, 0.0 }
 0x160   : >> { %v910_v47 = vmax.f32 %v677_v45, %v883_v46  ;;  %v885_v49 = vpop.f32.mrb[9].mxu1  ;;  %v681_v53 = vpop.f32.mrb[10].mxu0 }
 0x161   : >> { %v977_v51 = vmax.f32 %v969_v44, 0.0  ;;  %v911_v52 = vmax.f32 %v679_v48, %v885_v49  ;;  %v887_v54 = vpop.f32.mrb[10].mxu1  ;;  %v683_v56 = vpop.f32.mrb[11].mxu0 }
 0x162   : >> { %v912_v55 = vmax.f32 %v681_v53, %v887_v54  ;;  %v889_v25 = vpop.f32.mrb[11].mxu1  ;;  %v959_v42 = vpop.permute.xlu0 %958 }
 0x163   : >> { %v1243_v57 = vpack.c.bf16 %v977_v51, %v976_v50  ;;  %v922_v58 = vmax.f32 %v910_v47, %v911_v52  ;;  %v913_v59 = vmax.f32 %v683_v56, %v889_v25  ;;  %v964_v45 = vpop.permute.xlu1 %963 }
 0x165   : >> { %1255 = vst [vmem:[%s1756_s22 + $0x8] sm:$0xff] %v1243_v57   ;;  %v970_v61 = vadd.f32 %v949_v60, %v922_v58  ;;  %v923_v62 = vmax.f32 %v912_v55, %v913_v59 }
 0x166   : >> { %v687_v26 = vpop.f32.mrb[12].mxu0 }
 0x167   : >> { %v971_v24 = vadd.f32 %v954_v63, %v923_v62  ;;  %v893_v27 = vpop.f32.mrb[12].mxu1  ;;  %v689_v29 = vpop.f32.mrb[13].mxu0  ;;  %v978_v31 = vmax.f32 %v970_v61, 0.0 }
 0x168   : >> { %v914_v28 = vmax.f32 %v687_v26, %v893_v27  ;;  %v895_v30 = vpop.f32.mrb[13].mxu1  ;;  %v691_v34 = vpop.f32.mrb[14].mxu0 }
 0x169   : >> { %v979_v32 = vmax.f32 %v971_v24, 0.0  ;;  %v915_v33 = vmax.f32 %v689_v29, %v895_v30  ;;  %v897_v35 = vpop.f32.mrb[14].mxu1  ;;  %v693_v37 = vpop.f32.mrb[15].mxu0 }
 0x16a   : >> { %v916_v36 = vmax.f32 %v691_v34, %v897_v35  ;;  %v899_v38 = vpop.f32.mrb[15].mxu1 }
 0x16b   : >> { %v1248_v39 = vpack.c.bf16 %v979_v32, %v978_v31  ;;  %v924_v40 = vmax.f32 %v914_v28, %v915_v33  ;;  %v917_v41 = vmax.f32 %v693_v37, %v899_v38 }
 0x16d   : >> { %1256 = vst [vmem:[%s1756_s22 + $0x10] sm:$0xff] %v1248_v39   ;;  %v972_v43 = vadd.f32 %v959_v42, %v924_v40  ;;  %v925_v44 = vmax.f32 %v916_v36, %v917_v41 }
 0x16f   : >> { %v973_v46 = vadd.f32 %v964_v45, %v925_v44  ;;  %v980_v47 = vmax.f32 %v972_v43, 0.0  ;;  %244 = sbr.rel (!%p242_p7) target bundleno = 23 (0x17), region = 71 }
 0x171   : >> { %v981_v48 = vmax.f32 %v973_v46, 0.0 }
 0x173   : >> { %v1253_v49 = vpack.c.bf16 %v981_v48, %v980_v47 }
 0x175   : >> { %1257 = vst [vmem:[%s1756_s22 + $0x18] sm:$0xff] %v1253_v49  }
 0x176 PF: > { %s13_s16 = sadd.s32 1, %s1457_s16   ;;  %s1784_s12 = smov %s1449_s14 }
 0x177   : > { %p10_p8 = scmp.ge.s32.totalorder %s13_s16, 6   ;;  %s1785_s13 = smov %s1453_s15 }
 0x178   : > { %s1786_s14 = smov %s1789_s17  ;;  %s1787_s15 = smov %s1793_s18 }
 0x179   :  { %12 = sbr.rel (!%p10_p8) target bundleno = 3 (0x3), region = 82 }

// kernel: net_forward.8
= control target key start
LH: loop header
LB: loop body
LE: loop exit
PB: predicated region body
PF: predicated region fallthrough
CT: control target
= control target key end

     0   :  { %8 = vsyncpa [#allocation3], 0  ;;  %s24726_s0 = inlined_call_operand.vmem [shape: bf16[2,65536], index: 0, kind: input, shape index: {}]   ;;  %s24727_s1 = inlined_call_operand.hbm [shape: bf16[65536,512], index: 1, kind: input, shape index: {}]   ;;  %s24728_s2 = inlined_call_operand.vmem [shape: f32[1,512], index: 2, kind: input, shape index: {}]   ;;  %s24729_s3 = inlined_call_operand.vmem [shape: f32[2,512], index: 3, kind: output, shape index: {}]  }
   0x1   :  { %10 = vsyncpa [#allocation3 + $0x1], 0  ;;  %s21871_s12 = smov 0   ;;  %s21873_s13 = smov 0  }
   0x2   :  { %s21875_s14 = smov 0   ;;  %s21877_s15 = smov 0  }
   0x3   :  { %s21879_s16 = smov 0   ;;  %s21881_s17 = smov 0  }
   0x4   :  { %s21883_s18 = smov 0   ;;  %s21885_s19 = smov 0  }
   0x5 LB: > { %s16251_s20 = sadd.s32 4294967295, %s21842_s19   ;;  %s25_s21 = sadd.s32 1, %s21834_s17  ;;  %s21842_s19 = sphi %s21885_s19, %s16_s19   ;;  %s21838_s18 = sphi %s21883_s18, %s24739_s18   ;;  %s21834_s17 = sphi %s21881_s17, %s24738_s17   ;;  %s21830_s16 = sphi %s21879_s16, %s24737_s16   ;;  %s21826_s15 = sphi %s21877_s15, %s24736_s15   ;;  %s21822_s14 = sphi %s21875_s14, %s24735_s14   ;;  %s21818_s13 = sphi %s21873_s13, %s24734_s13   ;;  %s21814_s12 = sphi %s21871_s12, %s24733_s12  }
   0x6   : > { %p26_p0 = scmp.ge.s32.totalorder %s25_s21, 4  ;;  %s28_s22 = sadd.s32 1, %s21838_s18 }
   0x7   : > { %s63_s23 = sadd.s32 1, %s21822_s14  ;;  %p70_p1 = scmp.ne.s32.totalorder %s21822_s14, %s21818_s13 }
   0x8   : > { %s24741_s21 = smov (%p26_p0, %s25_s21), 0  ;;  %s24743_s22 = smov (!%p26_p0, %s28_s22), %s21838_s18 }
   0x9   : > { %s58_s24 = ssub.s32 %s21834_s17, %s24741_s21  ;;  %p71_p2 = scmp.eq.s32.totalorder %s21842_s19, 0 }
   0xa   : > { %p30_p3 = scmp.ge.s32.totalorder %s24743_s22, 2  ;;  %p76_p4 = scmp.ne.s32.totalorder %s21818_s13, %s21814_s12 }
   0xb   : > { %p21922_p5 = por %p71_p2, %p70_p1  ;;  %p77_p6 = scmp.eq.s32.totalorder %s16251_s20, 0 }
   0xc   : > { %s24745_s22 = smov (%p30_p3, %s24743_s22), 0  ;;  %p18575_p8 = scmp.lt.s32.totalorder %s21842_s19, 8 }
   0xd   : > { %p21928_p7 = por %p77_p6, %p76_p4  ;;  %s59_s27 = ssub.s32 %s21838_s18, %s24745_s22 }
   0xe   : > { %s60_s28 = sor.u32 %s59_s27, %s58_s24  ;;  %s160_s29 = sand.u32 1, %s21822_s14  }
   0xf   : > { %p61_p9 = scmp.eq.s32.totalorder %s60_s28, 0  ;;  %s16255_s30 = sshll.u32 %s160_s29, 14 }
  0x10   : > { %s16257_s4 = sshll.u32 %s21838_s18, 1  ;;  %s18318_s6 = sshll.u32 %s21834_s17, 13 }
  0x11   : > { %s21938_s5 = scalar_select %p61_p9, %s21822_s14, %s63_s23  }
  0x12   : > { %s171_s7 = sadd.s32 %s18318_s6, %s16257_s4  ;;  %s164_s8 = scalar_lea.vmem [#allocation2], %s16255_s30 }
  0x13   : > { %s174_s9 = sshll.u32 %s164_s8, 4  ;;  %s16259_s10 = sshll.u32 %s171_s7, 6  ;;  %s21941_s9 = int_to_ptr.vmem [resolvable:$true] %s174_s9 }
  0x14   : > { %s21946_s20 = scalar_lea.hbm %s24727_s1, %s16259_s10  ;;  %p21952_p10 = pnand %p18575_p8, %p21922_p5 }
  0x15   : > { %s21956_s24 = scalar_lea.sflag [#allocation3], %s160_s29  ;;  %s21746_s27 = scalar_lea.hbm %s21946_s20, 262144 }
  0x16   : > { %p21747_p11 = scmp.ne.s32.totalorder %s21946_s20, %s21746_s27  ;;  %p21748_p12 = pneg %p21952_p10 }
  0x17   : > { %s21751_s30 = scalar_lea.hbm %s24727_s1, 2097152  ;;  %p21752_p1 = scmp.lt.u32.totalorder %s21946_s20, %s24727_s1 }
  0x18   : > { %p21749_p13 = pnand %p21748_p12, %p21747_p11  ;;  %p21753_p2 = scmp.lt.u32.totalorder %s21751_s30, %s21746_s27 }
  0x19   : > { %p21755_p4 = scmp.lt.u32.totalorder %s21746_s27, %s21946_s20 }
  0x1a   : > { %p21750_p0 = pneg %p21749_p13  ;;  %p21754_p3 = por %p21753_p2, %p21752_p1 }
  0x1c   : > { %p21756_p5 = por %p21755_p4, %p21754_p3 }
  0x1e   : > { %p21757_p6 = pnand %p21756_p5, %p21750_p0 }
  0x20   : > { %21760 = shalt.err (!%p21757_p6)
}
  0x21   : > { %s21761_s29 = scalar_lea.vmem %s21941_s9, 262144  ;;  %s21844_s7 = smov [#allocation2]  }
  0x22   : > { %p21762_p8 = scmp.ne.s32.totalorder %s21941_s9, %s21761_s29  ;;  %s21766_s8 = sshll.u32 %s21844_s7, 4  ;;  %s21767_s8 = int_to_ptr.vmem [resolvable:$false] %s21766_s8 }
  0x23   : > { %s21768_s10 = scalar_lea.vmem %s21767_s8, 524288  ;;  %p21769_p13 = scmp.lt.s32.totalorder %s21941_s9, %s21767_s8 }
  0x24   : > { %p21764_p9 = pnand %p21762_p8, %p21748_p12  ;;  %p21770_p1 = scmp.lt.s32.totalorder %s21768_s10, %s21761_s29 }
  0x26   : > { %p21765_p11 = pneg %p21764_p9  ;;  %p21771_p2 = por %p21770_p1, %p21769_p13 }
  0x28   : > { %p21772_p3 = pnand %p21771_p2, %p21765_p11 }
  0x2a   : > { %21775 = shalt.err (!%p21772_p3)
}
  0x2b   : > { %s21845_s11 = smov 256   ;;  %s21846_s12 = smov 128  }
  0x2c   : > { %s21847_s27 = smov 8   ;;  %p16260_p12 = scmp.ge.s32.totalorder %s21842_s19, 1 }
  0x2d   : > { %18574 = dma.hbm_to_vmem [thread:$0]  (!%p21952_p10), %s21946_s20, 262144, %s21941_s9, %s21956_s24, %s21845_s11, %s21846_s12, %s21847_s27  }
  0x2e   : > { %p190_p0 = scmp.lt.s32.totalorder %s21842_s19, 9 }
  0x30   : > { %p191_p4 = pnand %p16260_p12, %p190_p0 }
  0x31   : > { %s196_s25 = sand.u32 (!%p191_p4), 1, %s21818_s13  }
  0x32   : > { %194 = sbr.rel (%p191_p4) target bundleno = 2354 (0x932), region = 32  ;;  %s16261_s28 = sshll.u32 (!%p191_p4), %s196_s25, 14 }
  0x33   : > { %s197_s30 = scalar_lea.sflag (!%p191_p4), [#allocation3], %s196_s25  ;;  %s21987_s4 = scalar_lea.vmem (!%p191_p4), [#allocation2], %s16261_s28 }
  0x39   : > { %21809 = dma.done.wait (%p21928_p7), %s197_s30, 262144  }
  0x3a   : > { %21811 = vsyncadd (%p21928_p7), %s197_s30, 4294705152  ;;  %s16262_s23 = sshll.u32 %s21826_s15, 7  ;;  %s16263_s9 = sshll.u32 %s21830_s16, 1 }
  0x3b   : > { %p232_p10 = scmp.lt.s32.totalorder %s16262_s23, 511  ;;  %p239_p5 = scmp.lt.s32.totalorder %s16263_s9, 3 }
  0x3c   : > { %p16266_p7 = scmp.ne.s32.totalorder %s21826_s15, 0 }
  0x3d   : > { %s24747_s23 = smov (!%p232_p10, %s16262_s23), 511  ;;  %s24749_s9 = smov (!%p239_p5, %s16263_s9), 3 }
  0x3e   : > { %s22000_s6 = scalar_lea.vmem %s24726_s0, %s24747_s23  ;;  %s241_s26 = scalar_lea.vmem %s24728_s2, %s24749_s9  ;;  %v21848_v0 = vmov (!%p16266_p7), 0.0  }
  0x3f   : > { %s16265_s8 = sshll.u32 %s24749_s9, 1  ;;  %252 = sbr.rel (%p16266_p7) target bundleno = 70 (0x46), region = 40 }
  0x40   : > { %s22010_s16 = scalar_lea.vmem %s24729_s3, %s16265_s8 }
  0x41   : > { %253 = vst [vmem:[%s22010_s16] sm:$0xf] (!%p16266_p7), %v21848_v0 }
  0x46 PF: > { %v18646_v1 = vld [vmem:[%s21987_s4 + $0x4] ss:$8 sps:$4 sm:$0xff]   ;;  %v18650_v3 = vld [vmem:[%s21987_s4] ss:$8 sps:$4 sm:$0xff]   ;;  %v18652_v5 = vld [vmem:[%s21987_s4 + $0x14] ss:$8 sps:$4 sm:$0xff]   ;;  %v2339_v39 = vlaneseq }
  0x47   : > { %v18648_v2 = vld [vmem:[%s21987_s4 + $0x2004] ss:$8 sps:$4 sm:$0xff]   ;;  %13487 = vmatprep.subr.bf16.mxu1 %v18646_v1  ;;  %v18651_v4 = vld [vmem:[%s21987_s4 + $0x2000] ss:$8 sps:$4 sm:$0xff]   ;;  %v18654_v6 = vld [vmem:[%s21987_s4 + $0x2014] ss:$8 sps:$4 sm:$0xff]  }
  0x48   : > { %14799 = vmatprep.subr.bf16.mxu0 %v18648_v2  ;;  %13488 = vmatpush1.bf16.msra.mxu1 %v18650_v3  ;;  %v18656_v7 = vld [vmem:[%s21987_s4 + $0x10] ss:$8 sps:$4 sm:$0xff]   ;;  %v18658_v9 = vld [vmem:[%s21987_s4 + $0x24] ss:$8 sps:$4 sm:$0xff]   ;;  %v18662_v11 = vld [vmem:[%s21987_s4 + $0x20] ss:$8 sps:$4 sm:$0xff]  }
  0x49   : > { %14800 = vmatpush1.bf16.msra.mxu0 %v18651_v4  ;;  %13489 = vmatprep.subr.bf16.mxu1 %v18652_v5  ;;  %v18657_v8 = vld [vmem:[%s21987_s4 + $0x2010] ss:$8 sps:$4 sm:$0xff]   ;;  %v18660_v10 = vld [vmem:[%s21987_s4 + $0x2024] ss:$8 sps:$4 sm:$0xff]   ;;  %v18663_v12 = vld [vmem:[%s21987_s4 + $0x2020] ss:$8 sps:$4 sm:$0xff]  }
  0x4a   : > { %14801 = vmatprep.subr.bf16.mxu0 %v18654_v6  ;;  %v18664_v13 = vld [vmem:[%s21987_s4 + $0x34] ss:$8 sps:$4 sm:$0xff]   ;;  %v18668_v15 = vld [vmem:[%s21987_s4 + $0x30] ss:$8 sps:$4 sm:$0xff]   ;;  %v18670_v17 = vld [vmem:[%s21987_s4 + $0x44] ss:$8 sps:$4 sm:$0xff]  }
  0x4b   : > { %v18666_v14 = vld [vmem:[%s21987_s4 + $0x2034] ss:$8 sps:$4 sm:$0xff]   ;;  %v18669_v16 = vld [vmem:[%s21987_s4 + $0x2030] ss:$8 sps:$4 sm:$0xff]   ;;  %v18672_v18 = vld [vmem:[%s21987_s4 + $0x2044] ss:$8 sps:$4 sm:$0xff]  }
  0x4c   : > { %13490 = vmatpush1.bf16.msra.mxu1 %v18656_v7  ;;  %v18674_v19 = vld [vmem:[%s21987_s4 + $0x40] ss:$8 sps:$4 sm:$0xff]   ;;  %v18676_v21 = vld [vmem:[%s21987_s4 + $0x54] ss:$8 sps:$4 sm:$0xff]   ;;  %v18680_v23 = vld [vmem:[%s21987_s4 + $0x50] ss:$8 sps:$4 sm:$0xff]  }
  0x4d   : > { %14802 = vmatpush1.bf16.msra.mxu0 %v18657_v8  ;;  %13491 = vmatprep.subr.bf16.mxu1 %v18658_v9  ;;  %v18675_v20 = vld [vmem:[%s21987_s4 + $0x2040] ss:$8 sps:$4 sm:$0xff]   ;;  %v18678_v22 = vld [vmem:[%s21987_s4 + $0x2054] ss:$8 sps:$4 sm:$0xff]   ;;  %v18681_v24 = vld [vmem:[%s21987_s4 + $0x2050] ss:$8 sps:$4 sm:$0xff]  }
  0x4e   : > { %14803 = vmatprep.subr.bf16.mxu0 %v18660_v10  ;;  %v18682_v25 = vld [vmem:[%s21987_s4 + $0x64] ss:$8 sps:$4 sm:$0xff]   ;;  %v18686_v27 = vld [vmem:[%s21987_s4 + $0x60] ss:$8 sps:$4 sm:$0xff]   ;;  %v18688_v29 = vld [vmem:[%s21987_s4 + $0x74] ss:$8 sps:$4 sm:$0xff]  }
  0x4f   : > { %v18684_v26 = vld [vmem:[%s21987_s4 + $0x2064] ss:$8 sps:$4 sm:$0xff]   ;;  %v18687_v28 = vld [vmem:[%s21987_s4 + $0x2060] ss:$8 sps:$4 sm:$0xff]   ;;  %v18690_v30 = vld [vmem:[%s21987_s4 + $0x2074] ss:$8 sps:$4 sm:$0xff]  }
  0x50   : > { %13492 = vmatpush1.bf16.msra.mxu1 %v18662_v11  ;;  %v18692_v31 = vld [vmem:[%s21987_s4 + $0x70] ss:$8 sps:$4 sm:$0xff]   ;;  %v18694_v33 = vld [vmem:[%s21987_s4 + $0x84] ss:$8 sps:$4 sm:$0xff]   ;;  %v18698_v35 = vld [vmem:[%s21987_s4 + $0x80] ss:$8 sps:$4 sm:$0xff]  }
  0x51   : > { %14804 = vmatpush1.bf16.msra.mxu0 %v18663_v12  ;;  %13493 = vmatprep.subr.bf16.mxu1 %v18664_v13  ;;  %v18693_v32 = vld [vmem:[%s21987_s4 + $0x2070] ss:$8 sps:$4 sm:$0xff]   ;;  %v18696_v34 = vld [vmem:[%s21987_s4 + $0x2084] ss:$8 sps:$4 sm:$0xff]   ;;  %v18699_v36 = vld [vmem:[%s21987_s4 + $0x2080] ss:$8 sps:$4 sm:$0xff]  }
  0x52   : > { %14805 = vmatprep.subr.bf16.mxu0 %v18666_v14  ;;  %v21849_v37 = vmov 1966171168   ;;  %v18700_v40 = vld [vmem:[%s21987_s4 + $0x94] ss:$8 sps:$4 sm:$0xff]   ;;  %v18704_v42 = vld [vmem:[%s21987_s4 + $0x90] ss:$8 sps:$4 sm:$0xff]  }
  0x53   : > { %v2337_v38 = vunpack.c.l.s4 %v21849_v37  ;;  %v18702_v41 = vld [vmem:[%s21987_s4 + $0x2094] ss:$8 sps:$4 sm:$0xff]   ;;  %v22053_v44 = vshrl.u32 %v2339_v39, 7  ;;  %v18705_v45 = vld [vmem:[%s21987_s4 + $0x2090] ss:$8 sps:$4 sm:$0xff]   ;;  %v22066_v53 = vld [vmem:[%s22000_s6] sm:$0xff] }
  0x54   : > { %13494 = vmatpush1.bf16.msra.mxu1 %v18668_v15  ;;  %v18706_v46 = vld [vmem:[%s21987_s4 + $0xa4] ss:$8 sps:$4 sm:$0xff]   ;;  %v18710_v48 = vld [vmem:[%s21987_s4 + $0xa0] ss:$8 sps:$4 sm:$0xff]   ;;  %v18712_v51 = vld [vmem:[%s21987_s4 + $0xb4] ss:$8 sps:$4 sm:$0xff]  }
  0x55   : > { %14806 = vmatpush1.bf16.msra.mxu0 %v18669_v16  ;;  %13495 = vmatprep.subr.bf16.mxu1 %v18670_v17  ;;  %v2338_v43 = vunpack.c.0.s8 %v2337_v38  ;;  %v18708_v47 = vld [vmem:[%s21987_s4 + $0x20a4] ss:$8 sps:$4 sm:$0xff]   ;;  %v18711_v49 = vld [vmem:[%s21987_s4 + $0x20a0] ss:$8 sps:$4 sm:$0xff]   ;;  %v18714_v52 = vld [vmem:[%s21987_s4 + $0x20b4] ss:$8 sps:$4 sm:$0xff]  }
  0x56   : > { %14807 = vmatprep.subr.bf16.mxu0 %v18672_v18  ;;  %v18716_v54 = vld [vmem:[%s21987_s4 + $0xb0] ss:$8 sps:$4 sm:$0xff]   ;;  %v22073_v57 = vld [vmem:[%s22000_s6 + $0x40] sm:$0xff]  ;;  %v18724_v2 = vld [vmem:[%s21987_s4 + $0xd4] ss:$8 sps:$4 sm:$0xff]   ;;  %p18315_p6 = scmp.ne.s32.totalorder %s21826_s15, 3 }
  0x57   : > { %v22061_v50 = vsub.s32 %v2338_v43, %v22053_v44  ;;  %v18717_v56 = vld [vmem:[%s21987_s4 + $0x20b0] ss:$8 sps:$4 sm:$0xff]   ;;  %v18718_v58 = vld [vmem:[%s21987_s4 + $0xc4] ss:$8 sps:$4 sm:$0xff]   ;;  %v18722_v0 = vld [vmem:[%s21987_s4 + $0xc0] ss:$8 sps:$4 sm:$0xff]  }
  0x58   : > { %13496 = vmatpush1.bf16.msra.mxu1 %v18674_v19  ;;  %v18720_v59 = vld [vmem:[%s21987_s4 + $0x20c4] ss:$8 sps:$4 sm:$0xff]   ;;  %v18723_v1 = vld [vmem:[%s21987_s4 + $0x20c0] ss:$8 sps:$4 sm:$0xff]   ;;  %v18726_v3 = vld [vmem:[%s21987_s4 + $0x20d4] ss:$8 sps:$4 sm:$0xff]  }
  0x59   : > { %14808 = vmatpush1.bf16.msra.mxu0 %v18675_v20  ;;  %13497 = vmatprep.subr.bf16.mxu1 %v18676_v21  ;;  %v2342_v55 = vrot.slane %v22066_v53, %v22061_v50  ;;  %v2734_v61 = vrot.slane %v22073_v57, %v22061_v50  ;;  %v18728_v5 = vld [vmem:[%s21987_s4 + $0xd0] ss:$8 sps:$4 sm:$0xff]   ;;  %v18730_v7 = vld [vmem:[%s21987_s4 + $0xe4] ss:$8 sps:$4 sm:$0xff]   ;;  %v18734_v9 = vld [vmem:[%s21987_s4 + $0xe0] ss:$8 sps:$4 sm:$0xff]  }
  0x5a   : > { %14809 = vmatprep.subr.bf16.mxu0 %v18678_v22  ;;  %v18729_v6 = vld [vmem:[%s21987_s4 + $0x20d0] ss:$8 sps:$4 sm:$0xff]   ;;  %v18732_v8 = vld [vmem:[%s21987_s4 + $0x20e4] ss:$8 sps:$4 sm:$0xff]   ;;  %v18735_v10 = vld [vmem:[%s21987_s4 + $0x20e0] ss:$8 sps:$4 sm:$0xff]  }
  0x5b   : > { %v2350_v60 = vcombine.high %v2342_v55, %v2342_v55  ;;  %v2742_v63 = vcombine.high %v2734_v61, %v2734_v61  ;;  %v18736_v11 = vld [vmem:[%s21987_s4 + $0xf4] ss:$8 sps:$4 sm:$0xff]   ;;  %v18740_v13 = vld [vmem:[%s21987_s4 + $0xf0] ss:$8 sps:$4 sm:$0xff]   ;;  %v18745_v15 = vld [vmem:[%s21987_s4 + $0x104] ss:$8 sps:$4 sm:$0xff]   ;;  %v22098_v17 = vrot.slane %v2342_v55, %v22061_v50  ;;  %v22101_v18 = vrot.slane %v2734_v61, %v22061_v50 }
  0x5c   : > { %13498 = vmatpush1.bf16.msra.mxu1 %v18680_v23  ;;  %v18738_v12 = vld [vmem:[%s21987_s4 + $0x20f4] ss:$8 sps:$4 sm:$0xff]   ;;  %v18741_v14 = vld [vmem:[%s21987_s4 + $0x20f0] ss:$8 sps:$4 sm:$0xff]   ;;  %v18749_v16 = vld [vmem:[%s21987_s4 + $0x2104] ss:$8 sps:$4 sm:$0xff]  }
  0x5d   : > { %14810 = vmatpush1.bf16.msra.mxu0 %v18681_v24  ;;  %13499 = vmatprep.subr.bf16.mxu1 %v18682_v25  ;;  %v2372_v62 = vrot.slane %v2350_v60, %v22061_v50  ;;  %v2764_v4 = vrot.slane %v2742_v63, %v22061_v50  ;;  %v18743_v19 = vld [vmem:[%s21987_s4 + $0x100] ss:$8 sps:$4 sm:$0xff]   ;;  %v18752_v21 = vld [vmem:[%s21987_s4 + $0x114] ss:$8 sps:$4 sm:$0xff]   ;;  %v18750_v25 = vld [vmem:[%s21987_s4 + $0x110] ss:$8 sps:$4 sm:$0xff]  }
  0x5e   : > { %14811 = vmatprep.subr.bf16.mxu0 %v18684_v26  ;;  %v18747_v20 = vld [vmem:[%s21987_s4 + $0x2100] ss:$8 sps:$4 sm:$0xff]   ;;  %v18755_v22 = vld [vmem:[%s21987_s4 + $0x2114] ss:$8 sps:$4 sm:$0xff]   ;;  %v18753_v26 = vld [vmem:[%s21987_s4 + $0x2110] ss:$8 sps:$4 sm:$0xff]  }
  0x5f   : > { %13519 = vmatprep.mubr.bf16.mxu1 %v2372_v62  ;;  %14831 = vmatprep.mubr.bf16.mxu0 %v2764_v4  ;;  %v2382_v23 = vcombine.high %v2372_v62, %v2372_v62  ;;  %v2774_v24 = vcombine.high %v2764_v4, %v2764_v4  ;;  %v18768_v37 = vld [vmem:[%s21987_s4 + $0x140] ss:$8 sps:$4 sm:$0xff]   ;;  %v18776_v39 = vld [vmem:[%s21987_s4 + $0x154] ss:$8 sps:$4 sm:$0xff]   ;;  %v18782_v43 = vld [vmem:[%s21987_s4 + $0x164] ss:$8 sps:$4 sm:$0xff]  }
  0x60   : > { %13500 = vmatpush1.bf16.msra.mxu1 %v18686_v27  ;;  %v18758_v27 = vld [vmem:[%s21987_s4 + $0x124] ss:$8 sps:$4 sm:$0xff]   ;;  %v18771_v38 = vld [vmem:[%s21987_s4 + $0x2140] ss:$8 sps:$4 sm:$0xff]   ;;  %v18803_v60 = vld [vmem:[%s21987_s4 + $0x2194] ss:$8 sps:$4 sm:$0xff]  }
  0x61   : > { %14812 = vmatpush1.bf16.msra.mxu0 %v18687_v28  ;;  %13501 = vmatprep.subr.bf16.mxu1 %v18688_v29  ;;  %v18761_v28 = vld [vmem:[%s21987_s4 + $0x2124] ss:$8 sps:$4 sm:$0xff]   ;;  %v18756_v29 = vld [vmem:[%s21987_s4 + $0x120] ss:$8 sps:$4 sm:$0xff]   ;;  %v18798_v61 = vld [vmem:[%s21987_s4 + $0x190] ss:$8 sps:$4 sm:$0xff]  }
  0x62   : > { %14813 = vmatprep.subr.bf16.mxu0 %v18690_v30  ;;  %v18759_v30 = vld [vmem:[%s21987_s4 + $0x2120] ss:$8 sps:$4 sm:$0xff]   ;;  %v18797_v55 = vld [vmem:[%s21987_s4 + $0x2184] ss:$8 sps:$4 sm:$0xff]   ;;  %v18801_v62 = vld [vmem:[%s21987_s4 + $0x2190] ss:$8 sps:$4 sm:$0xff]  }
  0x63   : > { %v18806_v63 = vld [vmem:[%s21987_s4 + $0x1a4] ss:$8 sps:$4 sm:$0xff]   ;;  %v18815_v4 = vld [vmem:[%s21987_s4 + $0x21b4] ss:$8 sps:$4 sm:$0xff]  }
  0x64   : > { %13502 = vmatpush1.bf16.msra.mxu1 %v18692_v31  ;;  %v18764_v31 = vld [vmem:[%s21987_s4 + $0x134] ss:$8 sps:$4 sm:$0xff]  }
  0x65   : > { %14814 = vmatpush1.bf16.msra.mxu0 %v18693_v32  ;;  %13503 = vmatprep.subr.bf16.mxu1 %v18694_v33  ;;  %v18767_v32 = vld [vmem:[%s21987_s4 + $0x2134] ss:$8 sps:$4 sm:$0xff]   ;;  %v18762_v33 = vld [vmem:[%s21987_s4 + $0x130] ss:$8 sps:$4 sm:$0xff]  }
  0x66   : > { %14815 = vmatprep.subr.bf16.mxu0 %v18696_v34  ;;  %v18765_v34 = vld [vmem:[%s21987_s4 + $0x2130] ss:$8 sps:$4 sm:$0xff]  }
  0x68   : > { %13504 = vmatpush1.bf16.msra.mxu1 %v18698_v35  ;;  %v18770_v35 = vld [vmem:[%s21987_s4 + $0x144] ss:$8 sps:$4 sm:$0xff]  }
  0x69   : > { %14816 = vmatpush1.bf16.msra.mxu0 %v18699_v36  ;;  %13505 = vmatprep.subr.bf16.mxu1 %v18700_v40  ;;  %v18773_v36 = vld [vmem:[%s21987_s4 + $0x2144] ss:$8 sps:$4 sm:$0xff]   ;;  %v18779_v40 = vld [vmem:[%s21987_s4 + $0x2154] ss:$8 sps:$4 sm:$0xff]  }
  0x6a   : > { %14817 = vmatprep.subr.bf16.mxu0 %v18702_v41  ;;  %v18774_v41 = vld [vmem:[%s21987_s4 + $0x150] ss:$8 sps:$4 sm:$0xff]  }
  0x6c   : > { %13506 = vmatpush1.bf16.msra.mxu1 %v18704_v42  ;;  %v18777_v42 = vld [vmem:[%s21987_s4 + $0x2150] ss:$8 sps:$4 sm:$0xff]  }
  0x6d   : > { %14818 = vmatpush1.bf16.msra.mxu0 %v18705_v45  ;;  %13507 = vmatprep.subr.bf16.mxu1 %v18706_v46  ;;  %v18785_v45 = vld [vmem:[%s21987_s4 + $0x2164] ss:$8 sps:$4 sm:$0xff]   ;;  %v18780_v46 = vld [vmem:[%s21987_s4 + $0x160] ss:$8 sps:$4 sm:$0xff]  }
  0x6e   : > { %14819 = vmatprep.subr.bf16.mxu0 %v18708_v47  ;;  %v18783_v47 = vld [vmem:[%s21987_s4 + $0x2160] ss:$8 sps:$4 sm:$0xff]  }
  0x70   : > { %13508 = vmatpush1.bf16.msra.mxu1 %v18710_v48  ;;  %v18788_v48 = vld [vmem:[%s21987_s4 + $0x174] ss:$8 sps:$4 sm:$0xff]  }
  0x71   : > { %14820 = vmatpush1.bf16.msra.mxu0 %v18711_v49  ;;  %13509 = vmatprep.subr.bf16.mxu1 %v18712_v51  ;;  %v18791_v49 = vld [vmem:[%s21987_s4 + $0x2174] ss:$8 sps:$4 sm:$0xff]   ;;  %v18786_v51 = vld [vmem:[%s21987_s4 + $0x170] ss:$8 sps:$4 sm:$0xff]  }
  0x72   : > { %14821 = vmatprep.subr.bf16.mxu0 %v18714_v52  ;;  %v18789_v52 = vld [vmem:[%s21987_s4 + $0x2170] ss:$8 sps:$4 sm:$0xff]  }
  0x74   : > { %13510 = vmatpush1.bf16.msra.mxu1 %v18716_v54  ;;  %v18794_v54 = vld [vmem:[%s21987_s4 + $0x184] ss:$8 sps:$4 sm:$0xff]  }
  0x75   : > { %14822 = vmatpush1.bf16.msra.mxu0 %v18717_v56  ;;  %13511 = vmatprep.subr.bf16.mxu1 %v18718_v58  ;;  %v18792_v56 = vld [vmem:[%s21987_s4 + $0x180] ss:$8 sps:$4 sm:$0xff]  }
  0x76   : > { %14823 = vmatprep.subr.bf16.mxu0 %v18720_v59  ;;  %v18795_v58 = vld [vmem:[%s21987_s4 + $0x2180] ss:$8 sps:$4 sm:$0xff]   ;;  %v18800_v59 = vld [vmem:[%s21987_s4 + $0x194] ss:$8 sps:$4 sm:$0xff]  }
  0x78   : > { %13512 = vmatpush1.bf16.msra.mxu1 %v18722_v0  ;;  %v18809_v0 = vld [vmem:[%s21987_s4 + $0x21a4] ss:$8 sps:$4 sm:$0xff]  }
  0x79   : > { %14824 = vmatpush1.bf16.msra.mxu0 %v18723_v1  ;;  %13513 = vmatprep.subr.bf16.mxu1 %v18724_v2  ;;  %v18804_v1 = vld [vmem:[%s21987_s4 + $0x1a0] ss:$8 sps:$4 sm:$0xff]  }
  0x7a   : > { %14825 = vmatprep.subr.bf16.mxu0 %v18726_v3  ;;  %v18807_v2 = vld [vmem:[%s21987_s4 + $0x21a0] ss:$8 sps:$4 sm:$0xff]   ;;  %v18812_v3 = vld [vmem:[%s21987_s4 + $0x1b4] ss:$8 sps:$4 sm:$0xff]  }
  0x7c   : > { %13514 = vmatpush1.bf16.msra.mxu1 %v18728_v5  ;;  %v18810_v5 = vld [vmem:[%s21987_s4 + $0x1b0] ss:$8 sps:$4 sm:$0xff]  }
  0x7d   : > { %14826 = vmatpush1.bf16.msra.mxu0 %v18729_v6  ;;  %13515 = vmatprep.subr.bf16.mxu1 %v18730_v7  ;;  %v18813_v6 = vld [vmem:[%s21987_s4 + $0x21b0] ss:$8 sps:$4 sm:$0xff]   ;;  %v18818_v7 = vld [vmem:[%s21987_s4 + $0x1c4] ss:$8 sps:$4 sm:$0xff]  }
  0x7e   : > { %14827 = vmatprep.subr.bf16.mxu0 %v18732_v8  ;;  %v18821_v8 = vld [vmem:[%s21987_s4 + $0x21c4] ss:$8 sps:$4 sm:$0xff]  }
  0x80   : > { %13516 = vmatpush1.bf16.msra.mxu1 %v18734_v9  ;;  %v18816_v9 = vld [vmem:[%s21987_s4 + $0x1c0] ss:$8 sps:$4 sm:$0xff]  }
  0x81   : > { %14828 = vmatpush1.bf16.msra.mxu0 %v18735_v10  ;;  %13517 = vmatprep.subr.bf16.mxu1 %v18736_v11  ;;  %v18819_v10 = vld [vmem:[%s21987_s4 + $0x21c0] ss:$8 sps:$4 sm:$0xff]   ;;  %v18824_v11 = vld [vmem:[%s21987_s4 + $0x1d4] ss:$8 sps:$4 sm:$0xff]  }
  0x82   : > { %14829 = vmatprep.subr.bf16.mxu0 %v18738_v12  ;;  %v18827_v12 = vld [vmem:[%s21987_s4 + $0x21d4] ss:$8 sps:$4 sm:$0xff]  }
  0x84   : > { %13518 = vmatpush1.bf16.msra.mxu1 %v18740_v13  ;;  %v18822_v13 = vld [vmem:[%s21987_s4 + $0x1d0] ss:$8 sps:$4 sm:$0xff]  }
  0x85   : > { %14830 = vmatpush1.bf16.msra.mxu0 %v18741_v14  ;;  %13528 = vmatprep.subr.bf16.mxu1 %v18745_v15  ;;  %v18825_v14 = vld [vmem:[%s21987_s4 + $0x21d0] ss:$8 sps:$4 sm:$0xff]   ;;  %v18830_v15 = vld [vmem:[%s21987_s4 + $0x1e4] ss:$8 sps:$4 sm:$0xff]  }
  0x86   : > { %14840 = vmatprep.subr.bf16.mxu0 %v18749_v16  ;;  %v18833_v16 = vld [vmem:[%s21987_s4 + $0x21e4] ss:$8 sps:$4 sm:$0xff]  }
  0x87   : > { %13520 = vmatmul.mubr.bf16.vlgmr.msra.gmra.mrb[0].mxu1 %v22098_v17 }
  0x88   : > { %14832 = vmatmul.mubr.bf16.vlgmr.msra.gmra.mrb[0].mxu0 %v22101_v18  ;;  %13529 = vmatpush1.bf16.msra.mxu1 %v18743_v19  ;;  %v2335_v19 = vcombine.high %v22066_v53, %v22066_v53  ;;  %v18834_v53 = vld [vmem:[%s21987_s4 + $0x1f0] ss:$8 sps:$4 sm:$0xff]  }
  0x89   : > { %14841 = vmatpush1.bf16.msra.mxu0 %v18747_v20  ;;  %13530 = vmatprep.subr.bf16.mxu1 %v18752_v21  ;;  %v2727_v20 = vcombine.high %v22073_v57, %v22073_v57  ;;  %v18828_v21 = vld [vmem:[%s21987_s4 + $0x1e0] ss:$8 sps:$4 sm:$0xff]   ;;  %v18837_v57 = vld [vmem:[%s21987_s4 + $0x21f0] ss:$8 sps:$4 sm:$0xff]  }
  0x8a   : > { %14842 = vmatprep.subr.bf16.mxu0 %v18755_v22  ;;  %13560 = vmatprep.mubr.bf16.mxu1 %v2382_v23  ;;  %v18831_v22 = vld [vmem:[%s21987_s4 + $0x21e0] ss:$8 sps:$4 sm:$0xff]   ;;  %v18836_v23 = vld [vmem:[%s21987_s4 + $0x1f4] ss:$8 sps:$4 sm:$0xff]  }
  0x8b   : > { %14872 = vmatprep.mubr.bf16.mxu0 %v2774_v24  ;;  %v18839_v24 = vld [vmem:[%s21987_s4 + $0x21f4] ss:$8 sps:$4 sm:$0xff]  }
  0x8c   : > { %13531 = vmatpush1.bf16.msra.mxu1 %v18750_v25  ;;  %v22170_v25 = vrot.slane %v2335_v19, %v22061_v50  ;;  %v18906_v19 = vld [vmem:[%s21987_s4 + $0x2b0] ss:$8 sps:$4 sm:$0xff]  }
  0x8d   : > { %14843 = vmatpush1.bf16.msra.mxu0 %v18753_v26  ;;  %13532 = vmatprep.subr.bf16.mxu1 %v18758_v27  ;;  %v22173_v26 = vrot.slane %v2727_v20, %v22061_v50  ;;  %v18842_v27 = vld [vmem:[%s21987_s4 + $0x204] ss:$8 sps:$4 sm:$0xff]   ;;  %v18909_v20 = vld [vmem:[%s21987_s4 + $0x22b0] ss:$8 sps:$4 sm:$0xff]  }
  0x8e   : > { %14844 = vmatprep.subr.bf16.mxu0 %v18761_v28  ;;  %v18845_v28 = vld [vmem:[%s21987_s4 + $0x2204] ss:$8 sps:$4 sm:$0xff]  }
  0x90   : > { %13533 = vmatpush1.bf16.msra.mxu1 %v18756_v29  ;;  %v2351_v29 = vcombine.high %v22170_v25, %v22170_v25 }
  0x91   : > { %14845 = vmatpush1.bf16.msra.mxu0 %v18759_v30  ;;  %13534 = vmatprep.subr.bf16.mxu1 %v18764_v31  ;;  %v2743_v30 = vcombine.high %v22173_v26, %v22173_v26  ;;  %v2380_v31 = vcombine.high %v22098_v17, %v22098_v17 }
  0x92   : > { %14846 = vmatprep.subr.bf16.mxu0 %v18767_v32  ;;  %v2772_v32 = vcombine.high %v22101_v18, %v22101_v18  ;;  %v18846_v18 = vld [vmem:[%s21987_s4 + $0x210] ss:$8 sps:$4 sm:$0xff]  }
  0x93   : > { %v22195_v17 = vrot.slane %v2743_v30, %v22061_v50  ;;  %v18929_v30 = vld [vmem:[%s21987_s4 + $0x22e4] ss:$8 sps:$4 sm:$0xff]  }
  0x94   : > { %13535 = vmatpush1.bf16.msra.mxu1 %v18762_v33  ;;  %v18840_v33 = vld [vmem:[%s21987_s4 + $0x200] ss:$8 sps:$4 sm:$0xff]  }
  0x95   : > { %14847 = vmatpush1.bf16.msra.mxu0 %v18765_v34  ;;  %13536 = vmatprep.subr.bf16.mxu1 %v18770_v35  ;;  %v18843_v34 = vld [vmem:[%s21987_s4 + $0x2200] ss:$8 sps:$4 sm:$0xff]   ;;  %v18848_v35 = vld [vmem:[%s21987_s4 + $0x214] ss:$8 sps:$4 sm:$0xff]  }
  0x96   : > { %14848 = vmatprep.subr.bf16.mxu0 %v18773_v36  ;;  %v18851_v36 = vld [vmem:[%s21987_s4 + $0x2214] ss:$8 sps:$4 sm:$0xff]  }
  0x98   : > { %13537 = vmatpush1.bf16.msra.mxu1 %v18768_v37  ;;  %v22192_v37 = vrot.slane %v2351_v29, %v22061_v50  ;;  %v18926_v29 = vld [vmem:[%s21987_s4 + $0x2e4] ss:$8 sps:$4 sm:$0xff]  }
  0x99   : > { %14849 = vmatpush1.bf16.msra.mxu0 %v18771_v38  ;;  %13538 = vmatprep.subr.bf16.mxu1 %v18776_v39  ;;  %v18849_v38 = vld [vmem:[%s21987_s4 + $0x2210] ss:$8 sps:$4 sm:$0xff]   ;;  %v18854_v39 = vld [vmem:[%s21987_s4 + $0x224] ss:$8 sps:$4 sm:$0xff]  }
  0x9a   : > { %14850 = vmatprep.subr.bf16.mxu0 %v18779_v40  ;;  %v18857_v40 = vld [vmem:[%s21987_s4 + $0x2224] ss:$8 sps:$4 sm:$0xff]  }
  0x9c   : > { %13539 = vmatpush1.bf16.msra.mxu1 %v18774_v41  ;;  %v18852_v41 = vld [vmem:[%s21987_s4 + $0x220] ss:$8 sps:$4 sm:$0xff]  }
  0x9d   : > { %14851 = vmatpush1.bf16.msra.mxu0 %v18777_v42  ;;  %13540 = vmatprep.subr.bf16.mxu1 %v18782_v43  ;;  %v18855_v42 = vld [vmem:[%s21987_s4 + $0x2220] ss:$8 sps:$4 sm:$0xff]   ;;  %v18860_v43 = vld [vmem:[%s21987_s4 + $0x234] ss:$8 sps:$4 sm:$0xff]  }
  0x9e   : > { %14852 = vmatprep.subr.bf16.mxu0 %v18785_v45  ;;  %v18863_v45 = vld [vmem:[%s21987_s4 + $0x2234] ss:$8 sps:$4 sm:$0xff]  }
  0xa0   : > { %13541 = vmatpush1.bf16.msra.mxu1 %v18780_v46  ;;  %v18858_v46 = vld [vmem:[%s21987_s4 + $0x230] ss:$8 sps:$4 sm:$0xff]  }
  0xa1   : > { %14853 = vmatpush1.bf16.msra.mxu0 %v18783_v47  ;;  %13542 = vmatprep.subr.bf16.mxu1 %v18788_v48  ;;  %v18861_v47 = vld [vmem:[%s21987_s4 + $0x2230] ss:$8 sps:$4 sm:$0xff]   ;;  %v18866_v48 = vld [vmem:[%s21987_s4 + $0x244] ss:$8 sps:$4 sm:$0xff]  }
  0xa2   : > { %14854 = vmatprep.subr.bf16.mxu0 %v18791_v49  ;;  %v18869_v49 = vld [vmem:[%s21987_s4 + $0x2244] ss:$8 sps:$4 sm:$0xff]  }
  0xa4   : > { %13543 = vmatpush1.bf16.msra.mxu1 %v18786_v51  ;;  %v18864_v51 = vld [vmem:[%s21987_s4 + $0x240] ss:$8 sps:$4 sm:$0xff]  }
  0xa5   : > { %14855 = vmatpush1.bf16.msra.mxu0 %v18789_v52  ;;  %13544 = vmatprep.subr.bf16.mxu1 %v18794_v54  ;;  %v18867_v52 = vld [vmem:[%s21987_s4 + $0x2240] ss:$8 sps:$4 sm:$0xff]   ;;  %v18872_v54 = vld [vmem:[%s21987_s4 + $0x254] ss:$8 sps:$4 sm:$0xff]  }
  0xa6   : > { %14856 = vmatprep.subr.bf16.mxu0 %v18797_v55  ;;  %v18875_v55 = vld [vmem:[%s21987_s4 + $0x2254] ss:$8 sps:$4 sm:$0xff]  }
  0xa8   : > { %13545 = vmatpush1.bf16.msra.mxu1 %v18792_v56  ;;  %v18870_v56 = vld [vmem:[%s21987_s4 + $0x250] ss:$8 sps:$4 sm:$0xff]  }
  0xa9   : > { %14857 = vmatpush1.bf16.msra.mxu0 %v18795_v58  ;;  %13546 = vmatprep.subr.bf16.mxu1 %v18800_v59  ;;  %v18873_v58 = vld [vmem:[%s21987_s4 + $0x2250] ss:$8 sps:$4 sm:$0xff]   ;;  %v18878_v59 = vld [vmem:[%s21987_s4 + $0x264] ss:$8 sps:$4 sm:$0xff]  }
  0xaa   : > { %14858 = vmatprep.subr.bf16.mxu0 %v18803_v60  ;;  %v18881_v60 = vld [vmem:[%s21987_s4 + $0x2264] ss:$8 sps:$4 sm:$0xff]  }
  0xac   : > { %13547 = vmatpush1.bf16.msra.mxu1 %v18798_v61  ;;  %v18876_v61 = vld [vmem:[%s21987_s4 + $0x260] ss:$8 sps:$4 sm:$0xff]  }
  0xad   : > { %14859 = vmatpush1.bf16.msra.mxu0 %v18801_v62  ;;  %13548 = vmatprep.subr.bf16.mxu1 %v18806_v63  ;;  %v18879_v62 = vld [vmem:[%s21987_s4 + $0x2260] ss:$8 sps:$4 sm:$0xff]   ;;  %v18884_v63 = vld [vmem:[%s21987_s4 + $0x274] ss:$8 sps:$4 sm:$0xff]  }
  0xae   : > { %14860 = vmatprep.subr.bf16.mxu0 %v18809_v0  ;;  %v18887_v0 = vld [vmem:[%s21987_s4 + $0x2274] ss:$8 sps:$4 sm:$0xff]  }
  0xb0   : > { %13549 = vmatpush1.bf16.msra.mxu1 %v18804_v1  ;;  %v18882_v1 = vld [vmem:[%s21987_s4 + $0x270] ss:$8 sps:$4 sm:$0xff]  }
  0xb1   : > { %14861 = vmatpush1.bf16.msra.mxu0 %v18807_v2  ;;  %13550 = vmatprep.subr.bf16.mxu1 %v18812_v3  ;;  %v18885_v2 = vld [vmem:[%s21987_s4 + $0x2270] ss:$8 sps:$4 sm:$0xff]   ;;  %v18890_v3 = vld [vmem:[%s21987_s4 + $0x284] ss:$8 sps:$4 sm:$0xff]  }
  0xb2   : > { %14862 = vmatprep.subr.bf16.mxu0 %v18815_v4  ;;  %v18893_v4 = vld [vmem:[%s21987_s4 + $0x2284] ss:$8 sps:$4 sm:$0xff]  }
  0xb4   : > { %13551 = vmatpush1.bf16.msra.mxu1 %v18810_v5  ;;  %v18888_v5 = vld [vmem:[%s21987_s4 + $0x280] ss:$8 sps:$4 sm:$0xff]  }
  0xb5   : > { %14863 = vmatpush1.bf16.msra.mxu0 %v18813_v6  ;;  %13552 = vmatprep.subr.bf16.mxu1 %v18818_v7  ;;  %v18891_v6 = vld [vmem:[%s21987_s4 + $0x2280] ss:$8 sps:$4 sm:$0xff]   ;;  %v18896_v7 = vld [vmem:[%s21987_s4 + $0x294] ss:$8 sps:$4 sm:$0xff]  }
  0xb6   : > { %14864 = vmatprep.subr.bf16.mxu0 %v18821_v8  ;;  %v18899_v8 = vld [vmem:[%s21987_s4 + $0x2294] ss:$8 sps:$4 sm:$0xff]  }
  0xb8   : > { %13553 = vmatpush1.bf16.msra.mxu1 %v18816_v9  ;;  %v18894_v9 = vld [vmem:[%s21987_s4 + $0x290] ss:$8 sps:$4 sm:$0xff]  }
  0xb9   : > { %14865 = vmatpush1.bf16.msra.mxu0 %v18819_v10  ;;  %13554 = vmatprep.subr.bf16.mxu1 %v18824_v11  ;;  %v18897_v10 = vld [vmem:[%s21987_s4 + $0x2290] ss:$8 sps:$4 sm:$0xff]   ;;  %v18902_v11 = vld [vmem:[%s21987_s4 + $0x2a4] ss:$8 sps:$4 sm:$0xff]  }
  0xba   : > { %14866 = vmatprep.subr.bf16.mxu0 %v18827_v12  ;;  %v18905_v12 = vld [vmem:[%s21987_s4 + $0x22a4] ss:$8 sps:$4 sm:$0xff]  }
  0xbc   : > { %13555 = vmatpush1.bf16.msra.mxu1 %v18822_v13  ;;  %v18900_v13 = vld [vmem:[%s21987_s4 + $0x2a0] ss:$8 sps:$4 sm:$0xff]  }
  0xbd   : > { %14867 = vmatpush1.bf16.msra.mxu0 %v18825_v14  ;;  %13556 = vmatprep.subr.bf16.mxu1 %v18830_v15  ;;  %v18903_v14 = vld [vmem:[%s21987_s4 + $0x22a0] ss:$8 sps:$4 sm:$0xff]   ;;  %v18908_v15 = vld [vmem:[%s21987_s4 + $0x2b4] ss:$8 sps:$4 sm:$0xff]  }
  0xbe   : > { %14868 = vmatprep.subr.bf16.mxu0 %v18833_v16  ;;  %v18911_v16 = vld [vmem:[%s21987_s4 + $0x22b4] ss:$8 sps:$4 sm:$0xff]  }
  0xc0   : > { %13557 = vmatpush1.bf16.msra.mxu1 %v18828_v21  ;;  %v18914_v21 = vld [vmem:[%s21987_s4 + $0x2c4] ss:$8 sps:$4 sm:$0xff]  }
  0xc1   : > { %14869 = vmatpush1.bf16.msra.mxu0 %v18831_v22  ;;  %13558 = vmatprep.subr.bf16.mxu1 %v18836_v23  ;;  %v18917_v22 = vld [vmem:[%s21987_s4 + $0x22c4] ss:$8 sps:$4 sm:$0xff]   ;;  %v18912_v23 = vld [vmem:[%s21987_s4 + $0x2c0] ss:$8 sps:$4 sm:$0xff]  }
  0xc2   : > { %14870 = vmatprep.subr.bf16.mxu0 %v18839_v24  ;;  %v18915_v24 = vld [vmem:[%s21987_s4 + $0x22c0] ss:$8 sps:$4 sm:$0xff]  }
  0xc4   : > { %13559 = vmatpush1.bf16.msra.mxu1 %v18834_v53  ;;  %v18920_v53 = vld [vmem:[%s21987_s4 + $0x2d4] ss:$8 sps:$4 sm:$0xff]  }
  0xc5   : > { %14871 = vmatpush1.bf16.msra.mxu0 %v18837_v57  ;;  %13569 = vmatprep.subr.bf16.mxu1 %v18842_v27  ;;  %v18923_v57 = vld [vmem:[%s21987_s4 + $0x22d4] ss:$8 sps:$4 sm:$0xff]   ;;  %v18918_v27 = vld [vmem:[%s21987_s4 + $0x2d0] ss:$8 sps:$4 sm:$0xff]  }
  0xc6   : > { %14881 = vmatprep.subr.bf16.mxu0 %v18845_v28  ;;  %v18921_v28 = vld [vmem:[%s21987_s4 + $0x22d0] ss:$8 sps:$4 sm:$0xff]  }
  0xc7   : > { %13561 = vmatmul.mubr.bf16.vlgmr.msra.gmra.mrb[0].mxu1 %v2380_v31  ;;  %v18924_v31 = vld [vmem:[%s21987_s4 + $0x2e0] ss:$8 sps:$4 sm:$0xff]  }
  0xc8   : > { %14873 = vmatmul.mubr.bf16.vlgmr.msra.gmra.mrb[0].mxu0 %v2772_v32  ;;  %13570 = vmatpush1.bf16.msra.mxu1 %v18840_v33  ;;  %v18927_v32 = vld [vmem:[%s21987_s4 + $0x22e0] ss:$8 sps:$4 sm:$0xff]   ;;  %v18932_v33 = vld [vmem:[%s21987_s4 + $0x2f4] ss:$8 sps:$4 sm:$0xff]  }
  0xc9   : > { %14882 = vmatpush1.bf16.msra.mxu0 %v18843_v34  ;;  %13571 = vmatprep.subr.bf16.mxu1 %v18848_v35  ;;  %v18935_v34 = vld [vmem:[%s21987_s4 + $0x22f4] ss:$8 sps:$4 sm:$0xff]   ;;  %v18930_v35 = vld [vmem:[%s21987_s4 + $0x2f0] ss:$8 sps:$4 sm:$0xff]  }
  0xca   : > { %14883 = vmatprep.subr.bf16.mxu0 %v18851_v36  ;;  %13601 = vmatprep.mubr.bf16.mxu1 %v22192_v37  ;;  %v18933_v36 = vld [vmem:[%s21987_s4 + $0x22f0] ss:$8 sps:$4 sm:$0xff]  }
  0xcb   : > { %14913 = vmatprep.mubr.bf16.mxu0 %v22195_v17 }
  0xcc   : > { %13572 = vmatpush1.bf16.msra.mxu1 %v18846_v18  ;;  %v18938_v18 = vld [vmem:[%s21987_s4 + $0x304] ss:$8 sps:$4 sm:$0xff]  }
  0xcd   : > { %14884 = vmatpush1.bf16.msra.mxu0 %v18849_v38  ;;  %13573 = vmatprep.subr.bf16.mxu1 %v18854_v39  ;;  %v18941_v38 = vld [vmem:[%s21987_s4 + $0x2304] ss:$8 sps:$4 sm:$0xff]   ;;  %v22261_v39 = vrot.slane %v22170_v25, %v22061_v50  ;;  %v2383_v25 = vcombine.high %v22192_v37, %v22192_v37 }
  0xce   : > { %14885 = vmatprep.subr.bf16.mxu0 %v18857_v40  ;;  %v22265_v40 = vrot.slane %v22173_v26, %v22061_v50  ;;  %v18942_v26 = vld [vmem:[%s21987_s4 + $0x310] ss:$8 sps:$4 sm:$0xff]   ;;  %v18950_v37 = vld [vmem:[%s21987_s4 + $0x324] ss:$8 sps:$4 sm:$0xff]  }
  0xd0   : > { %13574 = vmatpush1.bf16.msra.mxu1 %v18852_v41  ;;  %v18936_v41 = vld [vmem:[%s21987_s4 + $0x300] ss:$8 sps:$4 sm:$0xff]  }
  0xd1   : > { %14886 = vmatpush1.bf16.msra.mxu0 %v18855_v42  ;;  %13575 = vmatprep.subr.bf16.mxu1 %v18860_v43  ;;  %v18939_v42 = vld [vmem:[%s21987_s4 + $0x2300] ss:$8 sps:$4 sm:$0xff]   ;;  %v18944_v43 = vld [vmem:[%s21987_s4 + $0x314] ss:$8 sps:$4 sm:$0xff]  }
  0xd2   : > { %14887 = vmatprep.subr.bf16.mxu0 %v18863_v45  ;;  %v18947_v45 = vld [vmem:[%s21987_s4 + $0x2314] ss:$8 sps:$4 sm:$0xff]  }
  0xd4   : > { %13576 = vmatpush1.bf16.msra.mxu1 %v18858_v46  ;;  %v2775_v46 = vcombine.high %v22195_v17, %v22195_v17  ;;  %v18948_v17 = vld [vmem:[%s21987_s4 + $0x320] ss:$8 sps:$4 sm:$0xff]  }
  0xd5   : > { %14888 = vmatpush1.bf16.msra.mxu0 %v18861_v47  ;;  %13577 = vmatprep.subr.bf16.mxu1 %v18866_v48  ;;  %v18945_v47 = vld [vmem:[%s21987_s4 + $0x2310] ss:$8 sps:$4 sm:$0xff]   ;;  %v18953_v48 = vld [vmem:[%s21987_s4 + $0x2324] ss:$8 sps:$4 sm:$0xff]  }
  0xd6   : > { %14889 = vmatprep.subr.bf16.mxu0 %v18869_v49  ;;  %v18951_v49 = vld [vmem:[%s21987_s4 + $0x2320] ss:$8 sps:$4 sm:$0xff]  }
  0xd8   : > { %13578 = vmatpush1.bf16.msra.mxu1 %v18864_v51  ;;  %v18956_v51 = vld [vmem:[%s21987_s4 + $0x334] ss:$8 sps:$4 sm:$0xff]  }
  0xd9   : > { %14890 = vmatpush1.bf16.msra.mxu0 %v18867_v52  ;;  %13579 = vmatprep.subr.bf16.mxu1 %v18872_v54  ;;  %v18959_v52 = vld [vmem:[%s21987_s4 + $0x2334] ss:$8 sps:$4 sm:$0xff]   ;;  %v18954_v54 = vld [vmem:[%s21987_s4 + $0x330] ss:$8 sps:$4 sm:$0xff]  }
  0xda   : > { %14891 = vmatprep.subr.bf16.mxu0 %v18875_v55  ;;  %v18957_v55 = vld [vmem:[%s21987_s4 + $0x2330] ss:$8 sps:$4 sm:$0xff]  }
  0xdc   : > { %13580 = vmatpush1.bf16.msra.mxu1 %v18870_v56  ;;  %v18962_v56 = vld [vmem:[%s21987_s4 + $0x344] ss:$8 sps:$4 sm:$0xff]  }
  0xdd   : > { %14892 = vmatpush1.bf16.msra.mxu0 %v18873_v58  ;;  %13581 = vmatprep.subr.bf16.mxu1 %v18878_v59  ;;  %v18965_v58 = vld [vmem:[%s21987_s4 + $0x2344] ss:$8 sps:$4 sm:$0xff]   ;;  %v18960_v59 = vld [vmem:[%s21987_s4 + $0x340] ss:$8 sps:$4 sm:$0xff]  }
  0xde   : > { %14893 = vmatprep.subr.bf16.mxu0 %v18881_v60  ;;  %v18963_v60 = vld [vmem:[%s21987_s4 + $0x2340] ss:$8 sps:$4 sm:$0xff]  }
  0xe0   : > { %13582 = vmatpush1.bf16.msra.mxu1 %v18876_v61  ;;  %v18968_v61 = vld [vmem:[%s21987_s4 + $0x354] ss:$8 sps:$4 sm:$0xff]  }
  0xe1   : > { %14894 = vmatpush1.bf16.msra.mxu0 %v18879_v62  ;;  %13583 = vmatprep.subr.bf16.mxu1 %v18884_v63  ;;  %v18971_v62 = vld [vmem:[%s21987_s4 + $0x2354] ss:$8 sps:$4 sm:$0xff]   ;;  %v18966_v63 = vld [vmem:[%s21987_s4 + $0x350] ss:$8 sps:$4 sm:$0xff]  }
  0xe2   : > { %14895 = vmatprep.subr.bf16.mxu0 %v18887_v0  ;;  %v18969_v0 = vld [vmem:[%s21987_s4 + $0x2350] ss:$8 sps:$4 sm:$0xff]  }
  0xe4   : > { %13584 = vmatpush1.bf16.msra.mxu1 %v18882_v1  ;;  %v18974_v1 = vld [vmem:[%s21987_s4 + $0x364] ss:$8 sps:$4 sm:$0xff]  }
  0xe5   : > { %14896 = vmatpush1.bf16.msra.mxu0 %v18885_v2  ;;  %13585 = vmatprep.subr.bf16.mxu1 %v18890_v3  ;;  %v18977_v2 = vld [vmem:[%s21987_s4 + $0x2364] ss:$8 sps:$4 sm:$0xff]   ;;  %v18972_v3 = vld [vmem:[%s21987_s4 + $0x360] ss:$8 sps:$4 sm:$0xff]  }
  0xe6   : > { %14897 = vmatprep.subr.bf16.mxu0 %v18893_v4  ;;  %v18975_v4 = vld [vmem:[%s21987_s4 + $0x2360] ss:$8 sps:$4 sm:$0xff]  }
  0xe8   : > { %13586 = vmatpush1.bf16.msra.mxu1 %v18888_v5  ;;  %v18980_v5 = vld [vmem:[%s21987_s4 + $0x374] ss:$8 sps:$4 sm:$0xff]  }
  0xe9   : > { %14898 = vmatpush1.bf16.msra.mxu0 %v18891_v6  ;;  %13587 = vmatprep.subr.bf16.mxu1 %v18896_v7  ;;  %v18983_v6 = vld [vmem:[%s21987_s4 + $0x2374] ss:$8 sps:$4 sm:$0xff]   ;;  %v18978_v7 = vld [vmem:[%s21987_s4 + $0x370] ss:$8 sps:$4 sm:$0xff]  }
  0xea   : > { %14899 = vmatprep.subr.bf16.mxu0 %v18899_v8  ;;  %v18981_v8 = vld [vmem:[%s21987_s4 + $0x2370] ss:$8 sps:$4 sm:$0xff]  }
  0xec   : > { %13588 = vmatpush1.bf16.msra.mxu1 %v18894_v9  ;;  %v18986_v9 = vld [vmem:[%s21987_s4 + $0x384] ss:$8 sps:$4 sm:$0xff]  }
  0xed   : > { %14900 = vmatpush1.bf16.msra.mxu0 %v18897_v10  ;;  %13589 = vmatprep.subr.bf16.mxu1 %v18902_v11  ;;  %v18989_v10 = vld [vmem:[%s21987_s4 + $0x2384] ss:$8 sps:$4 sm:$0xff]   ;;  %v18984_v11 = vld [vmem:[%s21987_s4 + $0x380] ss:$8 sps:$4 sm:$0xff]  }
  0xee   : > { %14901 = vmatprep.subr.bf16.mxu0 %v18905_v12  ;;  %v18987_v12 = vld [vmem:[%s21987_s4 + $0x2380] ss:$8 sps:$4 sm:$0xff]  }
  0xf0   : > { %13590 = vmatpush1.bf16.msra.mxu1 %v18900_v13  ;;  %v18992_v13 = vld [vmem:[%s21987_s4 + $0x394] ss:$8 sps:$4 sm:$0xff]  }
  0xf1   : > { %14902 = vmatpush1.bf16.msra.mxu0 %v18903_v14  ;;  %13591 = vmatprep.subr.bf16.mxu1 %v18908_v15  ;;  %v18995_v14 = vld [vmem:[%s21987_s4 + $0x2394] ss:$8 sps:$4 sm:$0xff]   ;;  %v18990_v15 = vld [vmem:[%s21987_s4 + $0x390] ss:$8 sps:$4 sm:$0xff]  }
  0xf2   : > { %14903 = vmatprep.subr.bf16.mxu0 %v18911_v16  ;;  %v18993_v16 = vld [vmem:[%s21987_s4 + $0x2390] ss:$8 sps:$4 sm:$0xff]  }
  0xf4   : > { %13592 = vmatpush1.bf16.msra.mxu1 %v18906_v19  ;;  %v18998_v19 = vld [vmem:[%s21987_s4 + $0x3a4] ss:$8 sps:$4 sm:$0xff]  }
  0xf5   : > { %14904 = vmatpush1.bf16.msra.mxu0 %v18909_v20  ;;  %13593 = vmatprep.subr.bf16.mxu1 %v18914_v21  ;;  %v19001_v20 = vld [vmem:[%s21987_s4 + $0x23a4] ss:$8 sps:$4 sm:$0xff]   ;;  %v18996_v21 = vld [vmem:[%s21987_s4 + $0x3a0] ss:$8 sps:$4 sm:$0xff]  }
  0xf6   : > { %14905 = vmatprep.subr.bf16.mxu0 %v18917_v22  ;;  %v18999_v22 = vld [vmem:[%s21987_s4 + $0x23a0] ss:$8 sps:$4 sm:$0xff]  }
  0xf8   : > { %13594 = vmatpush1.bf16.msra.mxu1 %v18912_v23  ;;  %v19004_v23 = vld [vmem:[%s21987_s4 + $0x3b4] ss:$8 sps:$4 sm:$0xff]  }
  0xf9   : > { %14906 = vmatpush1.bf16.msra.mxu0 %v18915_v24  ;;  %13595 = vmatprep.subr.bf16.mxu1 %v18920_v53  ;;  %v19007_v24 = vld [vmem:[%s21987_s4 + $0x23b4] ss:$8 sps:$4 sm:$0xff]   ;;  %v19002_v53 = vld [vmem:[%s21987_s4 + $0x3b0] ss:$8 sps:$4 sm:$0xff]  }
  0xfa   : > { %14907 = vmatprep.subr.bf16.mxu0 %v18923_v57  ;;  %v19005_v57 = vld [vmem:[%s21987_s4 + $0x23b0] ss:$8 sps:$4 sm:$0xff]  }
  0xfc   : > { %13596 = vmatpush1.bf16.msra.mxu1 %v18918_v27  ;;  %v19010_v27 = vld [vmem:[%s21987_s4 + $0x3c4] ss:$8 sps:$4 sm:$0xff]  }
  0xfd   : > { %14908 = vmatpush1.bf16.msra.mxu0 %v18921_v28  ;;  %13597 = vmatprep.subr.bf16.mxu1 %v18926_v29  ;;  %v19013_v28 = vld [vmem:[%s21987_s4 + $0x23c4] ss:$8 sps:$4 sm:$0xff]   ;;  %v19008_v29 = vld [vmem:[%s21987_s4 + $0x3c0] ss:$8 sps:$4 sm:$0xff]  }
  0xfe   : > { %14909 = vmatprep.subr.bf16.mxu0 %v18929_v30  ;;  %v19011_v30 = vld [vmem:[%s21987_s4 + $0x23c0] ss:$8 sps:$4 sm:$0xff]  }
 0x100   : > { %13598 = vmatpush1.bf16.msra.mxu1 %v18924_v31  ;;  %v19016_v31 = vld [vmem:[%s21987_s4 + $0x3d4] ss:$8 sps:$4 sm:$0xff]  }
 0x101   : > { %14910 = vmatpush1.bf16.msra.mxu0 %v18927_v32  ;;  %13599 = vmatprep.subr.bf16.mxu1 %v18932_v33  ;;  %v19019_v32 = vld [vmem:[%s21987_s4 + $0x23d4] ss:$8 sps:$4 sm:$0xff]   ;;  %v19014_v33 = vld [vmem:[%s21987_s4 + $0x3d0] ss:$8 sps:$4 sm:$0xff]  }
 0x102   : > { %14911 = vmatprep.subr.bf16.mxu0 %v18935_v34  ;;  %v19017_v34 = vld [vmem:[%s21987_s4 + $0x23d0] ss:$8 sps:$4 sm:$0xff]  }
 0x104   : > { %13600 = vmatpush1.bf16.msra.mxu1 %v18930_v35  ;;  %v19022_v35 = vld [vmem:[%s21987_s4 + $0x3e4] ss:$8 sps:$4 sm:$0xff]  }
 0x105   : > { %14912 = vmatpush1.bf16.msra.mxu0 %v18933_v36  ;;  %13610 = vmatprep.subr.bf16.mxu1 %v18938_v18  ;;  %v19025_v36 = vld [vmem:[%s21987_s4 + $0x23e4] ss:$8 sps:$4 sm:$0xff]   ;;  %v19020_v18 = vld [vmem:[%s21987_s4 + $0x3e0] ss:$8 sps:$4 sm:$0xff]  }
 0x106   : > { %14922 = vmatprep.subr.bf16.mxu0 %v18941_v38  ;;  %v19023_v38 = vld [vmem:[%s21987_s4 + $0x23e0] ss:$8 sps:$4 sm:$0xff]  }
 0x107   : > { %13602 = vmatmul.mubr.bf16.vlgmr.msra.gmra.mrb[0].mxu1 %v22261_v39 }
 0x108   : > { %14914 = vmatmul.mubr.bf16.vlgmr.msra.gmra.mrb[0].mxu0 %v22265_v40  ;;  %13611 = vmatpush1.bf16.msra.mxu1 %v18936_v41  ;;  %v22332_v41 = vld.sshfl [vmem:[%s22000_s6 + $0x8] sm:$0xff pattern:$0x75316420] }
 0x109   : > { %14923 = vmatpush1.bf16.msra.mxu0 %v18939_v42  ;;  %13612 = vmatprep.subr.bf16.mxu1 %v18944_v43  ;;  %v22335_v42 = vld.sshfl [vmem:[%s22000_s6 + $0x48] sm:$0xff pattern:$0x75316420]  ;;  %v19028_v43 = vld [vmem:[%s21987_s4 + $0x3f4] ss:$8 sps:$4 sm:$0xff]  }
 0x10a   : > { %14924 = vmatprep.subr.bf16.mxu0 %v18947_v45  ;;  %13642 = vmatprep.mubr.bf16.mxu1 %v2383_v25  ;;  %v19031_v45 = vld [vmem:[%s21987_s4 + $0x23f4] ss:$8 sps:$4 sm:$0xff]   ;;  %v19026_v25 = vld [vmem:[%s21987_s4 + $0x3f0] ss:$8 sps:$4 sm:$0xff]  }
 0x10b   : > { %14954 = vmatprep.mubr.bf16.mxu0 %v2775_v46  ;;  %v19029_v46 = vld [vmem:[%s21987_s4 + $0x23f0] ss:$8 sps:$4 sm:$0xff]  }
 0x10c   : > { %13613 = vmatpush1.bf16.msra.mxu1 %v18942_v26  ;;  %v19034_v26 = vld [vmem:[%s21987_s4 + $0x404] ss:$8 sps:$4 sm:$0xff]  }
 0x10d   : > { %14925 = vmatpush1.bf16.msra.mxu0 %v18945_v47  ;;  %13614 = vmatprep.subr.bf16.mxu1 %v18950_v37  ;;  %v19037_v47 = vld [vmem:[%s21987_s4 + $0x2404] ss:$8 sps:$4 sm:$0xff]   ;;  %v2399_v37 = vcombine.high %v22332_v41, %v22332_v41 }
 0x10e   : > { %14926 = vmatprep.subr.bf16.mxu0 %v18953_v48  ;;  %v2791_v48 = vcombine.high %v22335_v42, %v22335_v42 }
 0x110   : > { %13615 = vmatpush1.bf16.msra.mxu1 %v18948_v17  ;;  %v19032_v17 = vld [vmem:[%s21987_s4 + $0x400] ss:$8 sps:$4 sm:$0xff]  }
 0x111   : > { %14927 = vmatpush1.bf16.msra.mxu0 %v18951_v49  ;;  %13616 = vmatprep.subr.bf16.mxu1 %v18956_v51  ;;  %v19035_v49 = vld [vmem:[%s21987_s4 + $0x2400] ss:$8 sps:$4 sm:$0xff]   ;;  %v2381_v51 = vcombine.high %v22261_v39, %v22261_v39  ;;  %v19038_v39 = vld [vmem:[%s21987_s4 + $0x410] ss:$8 sps:$4 sm:$0xff]  }
 0x112   : > { %14928 = vmatprep.subr.bf16.mxu0 %v18959_v52  ;;  %v2773_v52 = vcombine.high %v22265_v40, %v22265_v40  ;;  %v19041_v40 = vld [vmem:[%s21987_s4 + $0x2410] ss:$8 sps:$4 sm:$0xff]  }
 0x114   : > { %13617 = vmatpush1.bf16.msra.mxu1 %v18954_v54  ;;  %v19040_v54 = vld [vmem:[%s21987_s4 + $0x414] ss:$8 sps:$4 sm:$0xff]  }
 0x115   : > { %14929 = vmatpush1.bf16.msra.mxu0 %v18957_v55  ;;  %13618 = vmatprep.subr.bf16.mxu1 %v18962_v56  ;;  %v19043_v55 = vld [vmem:[%s21987_s4 + $0x2414] ss:$8 sps:$4 sm:$0xff]   ;;  %v22356_v56 = vrot.slane %v2399_v37, %v22061_v50  ;;  %v19118_v37 = vld [vmem:[%s21987_s4 + $0x4e4] ss:$8 sps:$4 sm:$0xff]  }
 0x116   : > { %14930 = vmatprep.subr.bf16.mxu0 %v18965_v58  ;;  %v22359_v58 = vrot.slane %v2791_v48, %v22061_v50  ;;  %v19121_v48 = vld [vmem:[%s21987_s4 + $0x24e4] ss:$8 sps:$4 sm:$0xff]  }
 0x118   : > { %13619 = vmatpush1.bf16.msra.mxu1 %v18960_v59  ;;  %v19046_v59 = vld [vmem:[%s21987_s4 + $0x424] ss:$8 sps:$4 sm:$0xff]  }
 0x119   : > { %14931 = vmatpush1.bf16.msra.mxu0 %v18963_v60  ;;  %13620 = vmatprep.subr.bf16.mxu1 %v18968_v61  ;;  %v19049_v60 = vld [vmem:[%s21987_s4 + $0x2424] ss:$8 sps:$4 sm:$0xff]   ;;  %v19044_v61 = vld [vmem:[%s21987_s4 + $0x420] ss:$8 sps:$4 sm:$0xff]  }
 0x11a   : > { %14932 = vmatprep.subr.bf16.mxu0 %v18971_v62  ;;  %v19047_v62 = vld [vmem:[%s21987_s4 + $0x2420] ss:$8 sps:$4 sm:$0xff]  }
 0x11c   : > { %13621 = vmatpush1.bf16.msra.mxu1 %v18966_v63  ;;  %v19052_v63 = vld [vmem:[%s21987_s4 + $0x434] ss:$8 sps:$4 sm:$0xff]  }
 0x11d   : > { %14933 = vmatpush1.bf16.msra.mxu0 %v18969_v0  ;;  %13622 = vmatprep.subr.bf16.mxu1 %v18974_v1  ;;  %v19055_v0 = vld [vmem:[%s21987_s4 + $0x2434] ss:$8 sps:$4 sm:$0xff]   ;;  %v19050_v1 = vld [vmem:[%s21987_s4 + $0x430] ss:$8 sps:$4 sm:$0xff]  }
 0x11e   : > { %14934 = vmatprep.subr.bf16.mxu0 %v18977_v2  ;;  %v19053_v2 = vld [vmem:[%s21987_s4 + $0x2430] ss:$8 sps:$4 sm:$0xff]  }
 0x120   : > { %13623 = vmatpush1.bf16.msra.mxu1 %v18972_v3  ;;  %v19058_v3 = vld [vmem:[%s21987_s4 + $0x444] ss:$8 sps:$4 sm:$0xff]  }
 0x121   : > { %14935 = vmatpush1.bf16.msra.mxu0 %v18975_v4  ;;  %13624 = vmatprep.subr.bf16.mxu1 %v18980_v5  ;;  %v19061_v4 = vld [vmem:[%s21987_s4 + $0x2444] ss:$8 sps:$4 sm:$0xff]   ;;  %v19056_v5 = vld [vmem:[%s21987_s4 + $0x440] ss:$8 sps:$4 sm:$0xff]  }
 0x122   : > { %14936 = vmatprep.subr.bf16.mxu0 %v18983_v6  ;;  %v19059_v6 = vld [vmem:[%s21987_s4 + $0x2440] ss:$8 sps:$4 sm:$0xff]  }
 0x124   : > { %13625 = vmatpush1.bf16.msra.mxu1 %v18978_v7  ;;  %v19064_v7 = vld [vmem:[%s21987_s4 + $0x454] ss:$8 sps:$4 sm:$0xff]  }
 0x125   : > { %14937 = vmatpush1.bf16.msra.mxu0 %v18981_v8  ;;  %13626 = vmatprep.subr.bf16.mxu1 %v18986_v9  ;;  %v19067_v8 = vld [vmem:[%s21987_s4 + $0x2454] ss:$8 sps:$4 sm:$0xff]   ;;  %v19062_v9 = vld [vmem:[%s21987_s4 + $0x450] ss:$8 sps:$4 sm:$0xff]  }
 0x126   : > { %14938 = vmatprep.subr.bf16.mxu0 %v18989_v10  ;;  %v19065_v10 = vld [vmem:[%s21987_s4 + $0x2450] ss:$8 sps:$4 sm:$0xff]  }
 0x128   : > { %13627 = vmatpush1.bf16.msra.mxu1 %v18984_v11  ;;  %v19070_v11 = vld [vmem:[%s21987_s4 + $0x464] ss:$8 sps:$4 sm:$0xff]  }
 0x129   : > { %14939 = vmatpush1.bf16.msra.mxu0 %v18987_v12  ;;  %13628 = vmatprep.subr.bf16.mxu1 %v18992_v13  ;;  %v19073_v12 = vld [vmem:[%s21987_s4 + $0x2464] ss:$8 sps:$4 sm:$0xff]   ;;  %v19068_v13 = vld [vmem:[%s21987_s4 + $0x460] ss:$8 sps:$4 sm:$0xff]  }
 0x12a   : > { %14940 = vmatprep.subr.bf16.mxu0 %v18995_v14  ;;  %v19071_v14 = vld [vmem:[%s21987_s4 + $0x2460] ss:$8 sps:$4 sm:$0xff]  }
 0x12c   : > { %13629 = vmatpush1.bf16.msra.mxu1 %v18990_v15  ;;  %v19076_v15 = vld [vmem:[%s21987_s4 + $0x474] ss:$8 sps:$4 sm:$0xff]  }
 0x12d   : > { %14941 = vmatpush1.bf16.msra.mxu0 %v18993_v16  ;;  %13630 = vmatprep.subr.bf16.mxu1 %v18998_v19  ;;  %v19079_v16 = vld [vmem:[%s21987_s4 + $0x2474] ss:$8 sps:$4 sm:$0xff]   ;;  %v19074_v19 = vld [vmem:[%s21987_s4 + $0x470] ss:$8 sps:$4 sm:$0xff]  }
 0x12e   : > { %14942 = vmatprep.subr.bf16.mxu0 %v19001_v20  ;;  %v19077_v20 = vld [vmem:[%s21987_s4 + $0x2470] ss:$8 sps:$4 sm:$0xff]  }
 0x130   : > { %13631 = vmatpush1.bf16.msra.mxu1 %v18996_v21  ;;  %v19082_v21 = vld [vmem:[%s21987_s4 + $0x484] ss:$8 sps:$4 sm:$0xff]  }
 0x131   : > { %14943 = vmatpush1.bf16.msra.mxu0 %v18999_v22  ;;  %13632 = vmatprep.subr.bf16.mxu1 %v19004_v23  ;;  %v19085_v22 = vld [vmem:[%s21987_s4 + $0x2484] ss:$8 sps:$4 sm:$0xff]   ;;  %v19080_v23 = vld [vmem:[%s21987_s4 + $0x480] ss:$8 sps:$4 sm:$0xff]  }
 0x132   : > { %14944 = vmatprep.subr.bf16.mxu0 %v19007_v24  ;;  %v19083_v24 = vld [vmem:[%s21987_s4 + $0x2480] ss:$8 sps:$4 sm:$0xff]  }
 0x134   : > { %13633 = vmatpush1.bf16.msra.mxu1 %v19002_v53  ;;  %v19088_v53 = vld [vmem:[%s21987_s4 + $0x494] ss:$8 sps:$4 sm:$0xff]  }
 0x135   : > { %14945 = vmatpush1.bf16.msra.mxu0 %v19005_v57  ;;  %13634 = vmatprep.subr.bf16.mxu1 %v19010_v27  ;;  %v19091_v57 = vld [vmem:[%s21987_s4 + $0x2494] ss:$8 sps:$4 sm:$0xff]   ;;  %v19086_v27 = vld [vmem:[%s21987_s4 + $0x490] ss:$8 sps:$4 sm:$0xff]  }
 0x136   : > { %14946 = vmatprep.subr.bf16.mxu0 %v19013_v28  ;;  %v19089_v28 = vld [vmem:[%s21987_s4 + $0x2490] ss:$8 sps:$4 sm:$0xff]  }
 0x138   : > { %13635 = vmatpush1.bf16.msra.mxu1 %v19008_v29  ;;  %v19094_v29 = vld [vmem:[%s21987_s4 + $0x4a4] ss:$8 sps:$4 sm:$0xff]  }
 0x139   : > { %14947 = vmatpush1.bf16.msra.mxu0 %v19011_v30  ;;  %13636 = vmatprep.subr.bf16.mxu1 %v19016_v31  ;;  %v19097_v30 = vld [vmem:[%s21987_s4 + $0x24a4] ss:$8 sps:$4 sm:$0xff]   ;;  %v19092_v31 = vld [vmem:[%s21987_s4 + $0x4a0] ss:$8 sps:$4 sm:$0xff]  }
 0x13a   : > { %14948 = vmatprep.subr.bf16.mxu0 %v19019_v32  ;;  %v19095_v32 = vld [vmem:[%s21987_s4 + $0x24a0] ss:$8 sps:$4 sm:$0xff]  }
 0x13c   : > { %13637 = vmatpush1.bf16.msra.mxu1 %v19014_v33  ;;  %v19100_v33 = vld [vmem:[%s21987_s4 + $0x4b4] ss:$8 sps:$4 sm:$0xff]  }
 0x13d   : > { %14949 = vmatpush1.bf16.msra.mxu0 %v19017_v34  ;;  %13638 = vmatprep.subr.bf16.mxu1 %v19022_v35  ;;  %v19103_v34 = vld [vmem:[%s21987_s4 + $0x24b4] ss:$8 sps:$4 sm:$0xff]   ;;  %v19098_v35 = vld [vmem:[%s21987_s4 + $0x4b0] ss:$8 sps:$4 sm:$0xff]  }
 0x13e   : > { %14950 = vmatprep.subr.bf16.mxu0 %v19025_v36  ;;  %v19101_v36 = vld [vmem:[%s21987_s4 + $0x24b0] ss:$8 sps:$4 sm:$0xff]  }
 0x140   : > { %13639 = vmatpush1.bf16.msra.mxu1 %v19020_v18  ;;  %v19106_v18 = vld [vmem:[%s21987_s4 + $0x4c4] ss:$8 sps:$4 sm:$0xff]  }
 0x141   : > { %14951 = vmatpush1.bf16.msra.mxu0 %v19023_v38  ;;  %13640 = vmatprep.subr.bf16.mxu1 %v19028_v43  ;;  %v19109_v38 = vld [vmem:[%s21987_s4 + $0x24c4] ss:$8 sps:$4 sm:$0xff]   ;;  %v19104_v43 = vld [vmem:[%s21987_s4 + $0x4c0] ss:$8 sps:$4 sm:$0xff]  }
 0x142   : > { %14952 = vmatprep.subr.bf16.mxu0 %v19031_v45  ;;  %v19107_v45 = vld [vmem:[%s21987_s4 + $0x24c0] ss:$8 sps:$4 sm:$0xff]  }
 0x144   : > { %13641 = vmatpush1.bf16.msra.mxu1 %v19026_v25  ;;  %v19112_v25 = vld [vmem:[%s21987_s4 + $0x4d4] ss:$8 sps:$4 sm:$0xff]  }
 0x145   : > { %14953 = vmatpush1.bf16.msra.mxu0 %v19029_v46  ;;  %13651 = vmatprep.subr.bf16.mxu1 %v19034_v26  ;;  %v19115_v46 = vld [vmem:[%s21987_s4 + $0x24d4] ss:$8 sps:$4 sm:$0xff]   ;;  %v19110_v26 = vld [vmem:[%s21987_s4 + $0x4d0] ss:$8 sps:$4 sm:$0xff]  }
 0x146   : > { %14963 = vmatprep.subr.bf16.mxu0 %v19037_v47  ;;  %v19113_v47 = vld [vmem:[%s21987_s4 + $0x24d0] ss:$8 sps:$4 sm:$0xff]  }
 0x147   : > { %13643 = vmatmul.mubr.bf16.vlgmr.msra.gmra.mrb[0].mxu1 %v2381_v51  ;;  %v19124_v51 = vld [vmem:[%s21987_s4 + $0x4f4] ss:$8 sps:$4 sm:$0xff]  }
 0x148   : > { %14955 = vmatmul.mubr.bf16.vlgmr.msra.gmra.mrb[0].mxu0 %v2773_v52  ;;  %13652 = vmatpush1.bf16.msra.mxu1 %v19032_v17  ;;  %v19116_v17 = vld [vmem:[%s21987_s4 + $0x4e0] ss:$8 sps:$4 sm:$0xff]   ;;  %v19127_v52 = vld [vmem:[%s21987_s4 + $0x24f4] ss:$8 sps:$4 sm:$0xff]  }
 0x149   : > { %14964 = vmatpush1.bf16.msra.mxu0 %v19035_v49  ;;  %13653 = vmatprep.subr.bf16.mxu1 %v19040_v54  ;;  %v19119_v49 = vld [vmem:[%s21987_s4 + $0x24e0] ss:$8 sps:$4 sm:$0xff]   ;;  %v19122_v54 = vld [vmem:[%s21987_s4 + $0x4f0] ss:$8 sps:$4 sm:$0xff]  }
 0x14a   : > { %14965 = vmatprep.subr.bf16.mxu0 %v19043_v55  ;;  %13683 = vmatprep.mubr.bf16.mxu1 %v22356_v56  ;;  %v19125_v55 = vld [vmem:[%s21987_s4 + $0x24f0] ss:$8 sps:$4 sm:$0xff]  }
 0x14b   : > { %14995 = vmatprep.mubr.bf16.mxu0 %v22359_v58 }
 0x14c   : > { %13654 = vmatpush1.bf16.msra.mxu1 %v19038_v39  ;;  %v19130_v39 = vld [vmem:[%s21987_s4 + $0x504] ss:$8 sps:$4 sm:$0xff]  }
 0x14d   : > { %14966 = vmatpush1.bf16.msra.mxu0 %v19041_v40  ;;  %13655 = vmatprep.subr.bf16.mxu1 %v19046_v59  ;;  %v19133_v40 = vld [vmem:[%s21987_s4 + $0x2504] ss:$8 sps:$4 sm:$0xff]   ;;  %v22425_v59 = vrot.slane %v22332_v41, %v22061_v50  ;;  %v2431_v41 = vcombine.high %v22356_v56, %v22356_v56 }
 0x14e   : > { %14967 = vmatprep.subr.bf16.mxu0 %v19049_v60  ;;  %v22429_v60 = vrot.slane %v22335_v42, %v22061_v50  ;;  %v19134_v42 = vld [vmem:[%s21987_s4 + $0x510] ss:$8 sps:$4 sm:$0xff]   ;;  %v19142_v56 = vld [vmem:[%s21987_s4 + $0x524] ss:$8 sps:$4 sm:$0xff]  }
 0x150   : > { %13656 = vmatpush1.bf16.msra.mxu1 %v19044_v61  ;;  %v19128_v61 = vld [vmem:[%s21987_s4 + $0x500] ss:$8 sps:$4 sm:$0xff]  }
 0x151   : > { %14968 = vmatpush1.bf16.msra.mxu0 %v19047_v62  ;;  %13657 = vmatprep.subr.bf16.mxu1 %v19052_v63  ;;  %v19131_v62 = vld [vmem:[%s21987_s4 + $0x2500] ss:$8 sps:$4 sm:$0xff]   ;;  %v19136_v63 = vld [vmem:[%s21987_s4 + $0x514] ss:$8 sps:$4 sm:$0xff]  }
 0x152   : > { %14969 = vmatprep.subr.bf16.mxu0 %v19055_v0  ;;  %v19139_v0 = vld [vmem:[%s21987_s4 + $0x2514] ss:$8 sps:$4 sm:$0xff]  }
 0x154   : > { %13658 = vmatpush1.bf16.msra.mxu1 %v19050_v1  ;;  %v2823_v1 = vcombine.high %v22359_v58, %v22359_v58  ;;  %v19140_v58 = vld [vmem:[%s21987_s4 + $0x520] ss:$8 sps:$4 sm:$0xff]  }
 0x155   : > { %14970 = vmatpush1.bf16.msra.mxu0 %v19053_v2  ;;  %13659 = vmatprep.subr.bf16.mxu1 %v19058_v3  ;;  %v19137_v2 = vld [vmem:[%s21987_s4 + $0x2510] ss:$8 sps:$4 sm:$0xff]   ;;  %v19145_v3 = vld [vmem:[%s21987_s4 + $0x2524] ss:$8 sps:$4 sm:$0xff]  }
 0x156   : > { %14971 = vmatprep.subr.bf16.mxu0 %v19061_v4  ;;  %v19143_v4 = vld [vmem:[%s21987_s4 + $0x2520] ss:$8 sps:$4 sm:$0xff]  }
 0x158   : > { %13660 = vmatpush1.bf16.msra.mxu1 %v19056_v5  ;;  %v19148_v5 = vld [vmem:[%s21987_s4 + $0x534] ss:$8 sps:$4 sm:$0xff]  }
 0x159   : > { %14972 = vmatpush1.bf16.msra.mxu0 %v19059_v6  ;;  %13661 = vmatprep.subr.bf16.mxu1 %v19064_v7  ;;  %v19151_v6 = vld [vmem:[%s21987_s4 + $0x2534] ss:$8 sps:$4 sm:$0xff]   ;;  %v19146_v7 = vld [vmem:[%s21987_s4 + $0x530] ss:$8 sps:$4 sm:$0xff]  }
 0x15a   : > { %14973 = vmatprep.subr.bf16.mxu0 %v19067_v8  ;;  %v19149_v8 = vld [vmem:[%s21987_s4 + $0x2530] ss:$8 sps:$4 sm:$0xff]  }
 0x15c   : > { %13662 = vmatpush1.bf16.msra.mxu1 %v19062_v9  ;;  %v19154_v9 = vld [vmem:[%s21987_s4 + $0x544] ss:$8 sps:$4 sm:$0xff]  }
 0x15d   : > { %14974 = vmatpush1.bf16.msra.mxu0 %v19065_v10  ;;  %13663 = vmatprep.subr.bf16.mxu1 %v19070_v11  ;;  %v19157_v10 = vld [vmem:[%s21987_s4 + $0x2544] ss:$8 sps:$4 sm:$0xff]   ;;  %v19152_v11 = vld [vmem:[%s21987_s4 + $0x540] ss:$8 sps:$4 sm:$0xff]  }
 0x15e   : > { %14975 = vmatprep.subr.bf16.mxu0 %v19073_v12  ;;  %v19155_v12 = vld [vmem:[%s21987_s4 + $0x2540] ss:$8 sps:$4 sm:$0xff]  }
 0x160   : > { %13664 = vmatpush1.bf16.msra.mxu1 %v19068_v13  ;;  %v19160_v13 = vld [vmem:[%s21987_s4 + $0x554] ss:$8 sps:$4 sm:$0xff]  }
 0x161   : > { %14976 = vmatpush1.bf16.msra.mxu0 %v19071_v14  ;;  %13665 = vmatprep.subr.bf16.mxu1 %v19076_v15  ;;  %v19163_v14 = vld [vmem:[%s21987_s4 + $0x2554] ss:$8 sps:$4 sm:$0xff]   ;;  %v19158_v15 = vld [vmem:[%s21987_s4 + $0x550] ss:$8 sps:$4 sm:$0xff]  }
 0x162   : > { %14977 = vmatprep.subr.bf16.mxu0 %v19079_v16  ;;  %v19161_v16 = vld [vmem:[%s21987_s4 + $0x2550] ss:$8 sps:$4 sm:$0xff]  }
 0x164   : > { %13666 = vmatpush1.bf16.msra.mxu1 %v19074_v19  ;;  %v19166_v19 = vld [vmem:[%s21987_s4 + $0x564] ss:$8 sps:$4 sm:$0xff]  }
 0x165   : > { %14978 = vmatpush1.bf16.msra.mxu0 %v19077_v20  ;;  %13667 = vmatprep.subr.bf16.mxu1 %v19082_v21  ;;  %v19169_v20 = vld [vmem:[%s21987_s4 + $0x2564] ss:$8 sps:$4 sm:$0xff]   ;;  %v19164_v21 = vld [vmem:[%s21987_s4 + $0x560] ss:$8 sps:$4 sm:$0xff]  }
 0x166   : > { %14979 = vmatprep.subr.bf16.mxu0 %v19085_v22  ;;  %v19167_v22 = vld [vmem:[%s21987_s4 + $0x2560] ss:$8 sps:$4 sm:$0xff]  }
 0x168   : > { %13668 = vmatpush1.bf16.msra.mxu1 %v19080_v23  ;;  %v19172_v23 = vld [vmem:[%s21987_s4 + $0x574] ss:$8 sps:$4 sm:$0xff]  }
 0x169   : > { %14980 = vmatpush1.bf16.msra.mxu0 %v19083_v24  ;;  %13669 = vmatprep.subr.bf16.mxu1 %v19088_v53  ;;  %v19175_v24 = vld [vmem:[%s21987_s4 + $0x2574] ss:$8 sps:$4 sm:$0xff]   ;;  %v19170_v53 = vld [vmem:[%s21987_s4 + $0x570] ss:$8 sps:$4 sm:$0xff]  }
 0x16a   : > { %14981 = vmatprep.subr.bf16.mxu0 %v19091_v57  ;;  %v19173_v57 = vld [vmem:[%s21987_s4 + $0x2570] ss:$8 sps:$4 sm:$0xff]  }
 0x16c   : > { %13670 = vmatpush1.bf16.msra.mxu1 %v19086_v27  ;;  %v19178_v27 = vld [vmem:[%s21987_s4 + $0x584] ss:$8 sps:$4 sm:$0xff]  }
 0x16d   : > { %14982 = vmatpush1.bf16.msra.mxu0 %v19089_v28  ;;  %13671 = vmatprep.subr.bf16.mxu1 %v19094_v29  ;;  %v19181_v28 = vld [vmem:[%s21987_s4 + $0x2584] ss:$8 sps:$4 sm:$0xff]   ;;  %v19176_v29 = vld [vmem:[%s21987_s4 + $0x580] ss:$8 sps:$4 sm:$0xff]  }
 0x16e   : > { %14983 = vmatprep.subr.bf16.mxu0 %v19097_v30  ;;  %v19179_v30 = vld [vmem:[%s21987_s4 + $0x2580] ss:$8 sps:$4 sm:$0xff]  }
 0x170   : > { %13672 = vmatpush1.bf16.msra.mxu1 %v19092_v31  ;;  %v19184_v31 = vld [vmem:[%s21987_s4 + $0x594] ss:$8 sps:$4 sm:$0xff]  }
 0x171   : > { %14984 = vmatpush1.bf16.msra.mxu0 %v19095_v32  ;;  %13673 = vmatprep.subr.bf16.mxu1 %v19100_v33  ;;  %v19187_v32 = vld [vmem:[%s21987_s4 + $0x2594] ss:$8 sps:$4 sm:$0xff]   ;;  %v19182_v33 = vld [vmem:[%s21987_s4 + $0x590] ss:$8 sps:$4 sm:$0xff]  }
 0x172   : > { %14985 = vmatprep.subr.bf16.mxu0 %v19103_v34  ;;  %v19185_v34 = vld [vmem:[%s21987_s4 + $0x2590] ss:$8 sps:$4 sm:$0xff]  }
 0x174   : > { %13674 = vmatpush1.bf16.msra.mxu1 %v19098_v35  ;;  %v19190_v35 = vld [vmem:[%s21987_s4 + $0x5a4] ss:$8 sps:$4 sm:$0xff]  }
 0x175   : > { %14986 = vmatpush1.bf16.msra.mxu0 %v19101_v36  ;;  %13675 = vmatprep.subr.bf16.mxu1 %v19106_v18  ;;  %v19193_v36 = vld [vmem:[%s21987_s4 + $0x25a4] ss:$8 sps:$4 sm:$0xff]   ;;  %v19188_v18 = vld [vmem:[%s21987_s4 + $0x5a0] ss:$8 sps:$4 sm:$0xff]  }
 0x176   : > { %14987 = vmatprep.subr.bf16.mxu0 %v19109_v38  ;;  %v19191_v38 = vld [vmem:[%s21987_s4 + $0x25a0] ss:$8 sps:$4 sm:$0xff]  }
 0x178   : > { %13676 = vmatpush1.bf16.msra.mxu1 %v19104_v43  ;;  %v19196_v43 = vld [vmem:[%s21987_s4 + $0x5b4] ss:$8 sps:$4 sm:$0xff]  }
 0x179   : > { %14988 = vmatpush1.bf16.msra.mxu0 %v19107_v45  ;;  %13677 = vmatprep.subr.bf16.mxu1 %v19112_v25  ;;  %v19199_v45 = vld [vmem:[%s21987_s4 + $0x25b4] ss:$8 sps:$4 sm:$0xff]   ;;  %v19194_v25 = vld [vmem:[%s21987_s4 + $0x5b0] ss:$8 sps:$4 sm:$0xff]  }
 0x17a   : > { %14989 = vmatprep.subr.bf16.mxu0 %v19115_v46  ;;  %v19197_v46 = vld [vmem:[%s21987_s4 + $0x25b0] ss:$8 sps:$4 sm:$0xff]  }
 0x17c   : > { %13678 = vmatpush1.bf16.msra.mxu1 %v19110_v26  ;;  %v19202_v26 = vld [vmem:[%s21987_s4 + $0x5c4] ss:$8 sps:$4 sm:$0xff]  }
 0x17d   : > { %14990 = vmatpush1.bf16.msra.mxu0 %v19113_v47  ;;  %13679 = vmatprep.subr.bf16.mxu1 %v19118_v37  ;;  %v19205_v47 = vld [vmem:[%s21987_s4 + $0x25c4] ss:$8 sps:$4 sm:$0xff]   ;;  %v19200_v37 = vld [vmem:[%s21987_s4 + $0x5c0] ss:$8 sps:$4 sm:$0xff]  }
 0x17e   : > { %14991 = vmatprep.subr.bf16.mxu0 %v19121_v48  ;;  %v19203_v48 = vld [vmem:[%s21987_s4 + $0x25c0] ss:$8 sps:$4 sm:$0xff]  }
 0x180   : > { %13680 = vmatpush1.bf16.msra.mxu1 %v19116_v17  ;;  %v19208_v17 = vld [vmem:[%s21987_s4 + $0x5d4] ss:$8 sps:$4 sm:$0xff]  }
 0x181   : > { %14992 = vmatpush1.bf16.msra.mxu0 %v19119_v49  ;;  %13681 = vmatprep.subr.bf16.mxu1 %v19124_v51  ;;  %v19211_v49 = vld [vmem:[%s21987_s4 + $0x25d4] ss:$8 sps:$4 sm:$0xff]   ;;  %v19206_v51 = vld [vmem:[%s21987_s4 + $0x5d0] ss:$8 sps:$4 sm:$0xff]  }
 0x182   : > { %14993 = vmatprep.subr.bf16.mxu0 %v19127_v52  ;;  %v19209_v52 = vld [vmem:[%s21987_s4 + $0x25d0] ss:$8 sps:$4 sm:$0xff]  }
 0x184   : > { %13682 = vmatpush1.bf16.msra.mxu1 %v19122_v54  ;;  %v19214_v54 = vld [vmem:[%s21987_s4 + $0x5e4] ss:$8 sps:$4 sm:$0xff]  }
 0x185   : > { %14994 = vmatpush1.bf16.msra.mxu0 %v19125_v55  ;;  %13692 = vmatprep.subr.bf16.mxu1 %v19130_v39  ;;  %v19217_v55 = vld [vmem:[%s21987_s4 + $0x25e4] ss:$8 sps:$4 sm:$0xff]  }
 0x186   : > { %15004 = vmatprep.subr.bf16.mxu0 %v19133_v40  ;;  %v21734_v39 = vld [vmem:[%s22000_s6 + $0x8] sm:$0xff] }
 0x187   : > { %13684 = vmatmul.mubr.bf16.vlgmr.msra.gmra.mrb[0].mxu1 %v22425_v59  ;;  %v2384_v40 = vcombine.high %v21734_v39, %v21734_v39  ;;  %v19292_v39 = vld [vmem:[%s21987_s4 + $0x6b4] ss:$8 sps:$4 sm:$0xff]  }
 0x188   : > { %14996 = vmatmul.mubr.bf16.vlgmr.msra.gmra.mrb[0].mxu0 %v22429_v60  ;;  %13693 = vmatpush1.bf16.msra.mxu1 %v19128_v61  ;;  %v21735_v61 = vld [vmem:[%s22000_s6 + $0x48] sm:$0xff] }
 0x189   : > { %15005 = vmatpush1.bf16.msra.mxu0 %v19131_v62  ;;  %13694 = vmatprep.subr.bf16.mxu1 %v19136_v63  ;;  %v2776_v62 = vcombine.high %v21735_v61, %v21735_v61  ;;  %v19212_v63 = vld [vmem:[%s21987_s4 + $0x5e0] ss:$8 sps:$4 sm:$0xff]   ;;  %v19290_v61 = vld [vmem:[%s21987_s4 + $0x6b0] ss:$8 sps:$4 sm:$0xff]  }
 0x18a   : > { %15006 = vmatprep.subr.bf16.mxu0 %v19139_v0  ;;  %13724 = vmatprep.mubr.bf16.mxu1 %v2431_v41  ;;  %v19215_v0 = vld [vmem:[%s21987_s4 + $0x25e0] ss:$8 sps:$4 sm:$0xff]   ;;  %v19220_v41 = vld [vmem:[%s21987_s4 + $0x5f4] ss:$8 sps:$4 sm:$0xff]  }
 0x18b   : > { %15036 = vmatprep.mubr.bf16.mxu0 %v2823_v1  ;;  %v19223_v1 = vld [vmem:[%s21987_s4 + $0x25f4] ss:$8 sps:$4 sm:$0xff]  }
 0x18c   : > { %13695 = vmatpush1.bf16.msra.mxu1 %v19134_v42  ;;  %v22500_v42 = vrot.slane %v2384_v40, %v22061_v50  ;;  %v19295_v40 = vld [vmem:[%s21987_s4 + $0x26b4] ss:$8 sps:$4 sm:$0xff]  }
 0x18d   : > { %15007 = vmatpush1.bf16.msra.mxu0 %v19137_v2  ;;  %13696 = vmatprep.subr.bf16.mxu1 %v19142_v56  ;;  %v22503_v2 = vrot.slane %v2776_v62, %v22061_v50  ;;  %v19218_v56 = vld [vmem:[%s21987_s4 + $0x5f0] ss:$8 sps:$4 sm:$0xff]  }
 0x18e   : > { %15008 = vmatprep.subr.bf16.mxu0 %v19145_v3  ;;  %v19221_v3 = vld [vmem:[%s21987_s4 + $0x25f0] ss:$8 sps:$4 sm:$0xff]  }
 0x18f   : > { %v19293_v62 = vld [vmem:[%s21987_s4 + $0x26b0] ss:$8 sps:$4 sm:$0xff]  }
 0x190   : > { %13697 = vmatpush1.bf16.msra.mxu1 %v19140_v58  ;;  %v19226_v58 = vld [vmem:[%s21987_s4 + $0x604] ss:$8 sps:$4 sm:$0xff]  }
 0x191   : > { %15009 = vmatpush1.bf16.msra.mxu0 %v19143_v4  ;;  %13698 = vmatprep.subr.bf16.mxu1 %v19148_v5  ;;  %v19229_v4 = vld [vmem:[%s21987_s4 + $0x2604] ss:$8 sps:$4 sm:$0xff]   ;;  %v2400_v5 = vcombine.high %v22500_v42, %v22500_v42 }
 0x192   : > { %15010 = vmatprep.subr.bf16.mxu0 %v19151_v6  ;;  %v2792_v6 = vcombine.high %v22503_v2, %v22503_v2 }
 0x194   : > { %13699 = vmatpush1.bf16.msra.mxu1 %v19146_v7  ;;  %v2429_v7 = vcombine.high %v22425_v59, %v22425_v59  ;;  %v22525_v59 = vrot.slane %v2792_v6, %v22061_v50  ;;  %v19313_v6 = vld [vmem:[%s21987_s4 + $0x26e4] ss:$8 sps:$4 sm:$0xff]  }
 0x195   : > { %15011 = vmatpush1.bf16.msra.mxu0 %v19149_v8  ;;  %13700 = vmatprep.subr.bf16.mxu1 %v19154_v9  ;;  %v2821_v8 = vcombine.high %v22429_v60, %v22429_v60  ;;  %v19224_v9 = vld [vmem:[%s21987_s4 + $0x600] ss:$8 sps:$4 sm:$0xff]   ;;  %v19230_v60 = vld [vmem:[%s21987_s4 + $0x610] ss:$8 sps:$4 sm:$0xff]  }
 0x196   : > { %15012 = vmatprep.subr.bf16.mxu0 %v19157_v10  ;;  %v19227_v10 = vld [vmem:[%s21987_s4 + $0x2600] ss:$8 sps:$4 sm:$0xff]  }
 0x198   : > { %13701 = vmatpush1.bf16.msra.mxu1 %v19152_v11  ;;  %v19232_v11 = vld [vmem:[%s21987_s4 + $0x614] ss:$8 sps:$4 sm:$0xff]  }
 0x199   : > { %15013 = vmatpush1.bf16.msra.mxu0 %v19155_v12  ;;  %13702 = vmatprep.subr.bf16.mxu1 %v19160_v13  ;;  %v19235_v12 = vld [vmem:[%s21987_s4 + $0x2614] ss:$8 sps:$4 sm:$0xff]   ;;  %v22522_v13 = vrot.slane %v2400_v5, %v22061_v50  ;;  %v19310_v5 = vld [vmem:[%s21987_s4 + $0x6e4] ss:$8 sps:$4 sm:$0xff]  }
 0x19a   : > { %15014 = vmatprep.subr.bf16.mxu0 %v19163_v14  ;;  %v19233_v14 = vld [vmem:[%s21987_s4 + $0x2610] ss:$8 sps:$4 sm:$0xff]  }
 0x19c   : > { %13703 = vmatpush1.bf16.msra.mxu1 %v19158_v15  ;;  %v19238_v15 = vld [vmem:[%s21987_s4 + $0x624] ss:$8 sps:$4 sm:$0xff]  }
 0x19d   : > { %15015 = vmatpush1.bf16.msra.mxu0 %v19161_v16  ;;  %13704 = vmatprep.subr.bf16.mxu1 %v19166_v19  ;;  %v19241_v16 = vld [vmem:[%s21987_s4 + $0x2624] ss:$8 sps:$4 sm:$0xff]   ;;  %v19236_v19 = vld [vmem:[%s21987_s4 + $0x620] ss:$8 sps:$4 sm:$0xff]  }
 0x19e   : > { %15016 = vmatprep.subr.bf16.mxu0 %v19169_v20  ;;  %v19239_v20 = vld [vmem:[%s21987_s4 + $0x2620] ss:$8 sps:$4 sm:$0xff]  }
 0x1a0   : > { %13705 = vmatpush1.bf16.msra.mxu1 %v19164_v21  ;;  %v19244_v21 = vld [vmem:[%s21987_s4 + $0x634] ss:$8 sps:$4 sm:$0xff]  }
 0x1a1   : > { %15017 = vmatpush1.bf16.msra.mxu0 %v19167_v22  ;;  %13706 = vmatprep.subr.bf16.mxu1 %v19172_v23  ;;  %v19247_v22 = vld [vmem:[%s21987_s4 + $0x2634] ss:$8 sps:$4 sm:$0xff]   ;;  %v19242_v23 = vld [vmem:[%s21987_s4 + $0x630] ss:$8 sps:$4 sm:$0xff]  }
 0x1a2   : > { %15018 = vmatprep.subr.bf16.mxu0 %v19175_v24  ;;  %v19245_v24 = vld [vmem:[%s21987_s4 + $0x2630] ss:$8 sps:$4 sm:$0xff]  }
 0x1a4   : > { %13707 = vmatpush1.bf16.msra.mxu1 %v19170_v53  ;;  %v19250_v53 = vld [vmem:[%s21987_s4 + $0x644] ss:$8 sps:$4 sm:$0xff]  }
 0x1a5   : > { %15019 = vmatpush1.bf16.msra.mxu0 %v19173_v57  ;;  %13708 = vmatprep.subr.bf16.mxu1 %v19178_v27  ;;  %v19253_v57 = vld [vmem:[%s21987_s4 + $0x2644] ss:$8 sps:$4 sm:$0xff]   ;;  %v19248_v27 = vld [vmem:[%s21987_s4 + $0x640] ss:$8 sps:$4 sm:$0xff]  }
 0x1a6   : > { %15020 = vmatprep.subr.bf16.mxu0 %v19181_v28  ;;  %v19251_v28 = vld [vmem:[%s21987_s4 + $0x2640] ss:$8 sps:$4 sm:$0xff]  }
 0x1a8   : > { %13709 = vmatpush1.bf16.msra.mxu1 %v19176_v29  ;;  %v19256_v29 = vld [vmem:[%s21987_s4 + $0x654] ss:$8 sps:$4 sm:$0xff]  }
 0x1a9   : > { %15021 = vmatpush1.bf16.msra.mxu0 %v19179_v30  ;;  %13710 = vmatprep.subr.bf16.mxu1 %v19184_v31  ;;  %v19259_v30 = vld [vmem:[%s21987_s4 + $0x2654] ss:$8 sps:$4 sm:$0xff]   ;;  %v19254_v31 = vld [vmem:[%s21987_s4 + $0x650] ss:$8 sps:$4 sm:$0xff]  }
 0x1aa   : > { %15022 = vmatprep.subr.bf16.mxu0 %v19187_v32  ;;  %v19257_v32 = vld [vmem:[%s21987_s4 + $0x2650] ss:$8 sps:$4 sm:$0xff]  }
 0x1ac   : > { %13711 = vmatpush1.bf16.msra.mxu1 %v19182_v33  ;;  %v19262_v33 = vld [vmem:[%s21987_s4 + $0x664] ss:$8 sps:$4 sm:$0xff]  }
 0x1ad   : > { %15023 = vmatpush1.bf16.msra.mxu0 %v19185_v34  ;;  %13712 = vmatprep.subr.bf16.mxu1 %v19190_v35  ;;  %v19265_v34 = vld [vmem:[%s21987_s4 + $0x2664] ss:$8 sps:$4 sm:$0xff]   ;;  %v19260_v35 = vld [vmem:[%s21987_s4 + $0x660] ss:$8 sps:$4 sm:$0xff]  }
 0x1ae   : > { %15024 = vmatprep.subr.bf16.mxu0 %v19193_v36  ;;  %v19263_v36 = vld [vmem:[%s21987_s4 + $0x2660] ss:$8 sps:$4 sm:$0xff]  }
 0x1b0   : > { %13713 = vmatpush1.bf16.msra.mxu1 %v19188_v18  ;;  %v19268_v18 = vld [vmem:[%s21987_s4 + $0x674] ss:$8 sps:$4 sm:$0xff]  }
 0x1b1   : > { %15025 = vmatpush1.bf16.msra.mxu0 %v19191_v38  ;;  %13714 = vmatprep.subr.bf16.mxu1 %v19196_v43  ;;  %v19271_v38 = vld [vmem:[%s21987_s4 + $0x2674] ss:$8 sps:$4 sm:$0xff]   ;;  %v19266_v43 = vld [vmem:[%s21987_s4 + $0x670] ss:$8 sps:$4 sm:$0xff]  }
 0x1b2   : > { %15026 = vmatprep.subr.bf16.mxu0 %v19199_v45  ;;  %v19269_v45 = vld [vmem:[%s21987_s4 + $0x2670] ss:$8 sps:$4 sm:$0xff]  }
 0x1b4   : > { %13715 = vmatpush1.bf16.msra.mxu1 %v19194_v25  ;;  %v19274_v25 = vld [vmem:[%s21987_s4 + $0x684] ss:$8 sps:$4 sm:$0xff]  }
 0x1b5   : > { %15027 = vmatpush1.bf16.msra.mxu0 %v19197_v46  ;;  %13716 = vmatprep.subr.bf16.mxu1 %v19202_v26  ;;  %v19277_v46 = vld [vmem:[%s21987_s4 + $0x2684] ss:$8 sps:$4 sm:$0xff]   ;;  %v19272_v26 = vld [vmem:[%s21987_s4 + $0x680] ss:$8 sps:$4 sm:$0xff]  }
 0x1b6   : > { %15028 = vmatprep.subr.bf16.mxu0 %v19205_v47  ;;  %v19275_v47 = vld [vmem:[%s21987_s4 + $0x2680] ss:$8 sps:$4 sm:$0xff]  }
 0x1b8   : > { %13717 = vmatpush1.bf16.msra.mxu1 %v19200_v37  ;;  %v19280_v37 = vld [vmem:[%s21987_s4 + $0x694] ss:$8 sps:$4 sm:$0xff]  }
 0x1b9   : > { %15029 = vmatpush1.bf16.msra.mxu0 %v19203_v48  ;;  %13718 = vmatprep.subr.bf16.mxu1 %v19208_v17  ;;  %v19283_v48 = vld [vmem:[%s21987_s4 + $0x2694] ss:$8 sps:$4 sm:$0xff]   ;;  %v19278_v17 = vld [vmem:[%s21987_s4 + $0x690] ss:$8 sps:$4 sm:$0xff]  }
 0x1ba   : > { %15030 = vmatprep.subr.bf16.mxu0 %v19211_v49  ;;  %v19281_v49 = vld [vmem:[%s21987_s4 + $0x2690] ss:$8 sps:$4 sm:$0xff]  }
 0x1bc   : > { %13719 = vmatpush1.bf16.msra.mxu1 %v19206_v51  ;;  %v19286_v51 = vld [vmem:[%s21987_s4 + $0x6a4] ss:$8 sps:$4 sm:$0xff]  }
 0x1bd   : > { %15031 = vmatpush1.bf16.msra.mxu0 %v19209_v52  ;;  %13720 = vmatprep.subr.bf16.mxu1 %v19214_v54  ;;  %v19289_v52 = vld [vmem:[%s21987_s4 + $0x26a4] ss:$8 sps:$4 sm:$0xff]   ;;  %v19284_v54 = vld [vmem:[%s21987_s4 + $0x6a0] ss:$8 sps:$4 sm:$0xff]  }
 0x1be   : > { %15032 = vmatprep.subr.bf16.mxu0 %v19217_v55  ;;  %v19287_v55 = vld [vmem:[%s21987_s4 + $0x26a0] ss:$8 sps:$4 sm:$0xff]  }
 0x1c0   : > { %13721 = vmatpush1.bf16.msra.mxu1 %v19212_v63  ;;  %v19298_v63 = vld [vmem:[%s21987_s4 + $0x6c4] ss:$8 sps:$4 sm:$0xff]  }
 0x1c1   : > { %15033 = vmatpush1.bf16.msra.mxu0 %v19215_v0  ;;  %13722 = vmatprep.subr.bf16.mxu1 %v19220_v41  ;;  %v19301_v0 = vld [vmem:[%s21987_s4 + $0x26c4] ss:$8 sps:$4 sm:$0xff]   ;;  %v19296_v41 = vld [vmem:[%s21987_s4 + $0x6c0] ss:$8 sps:$4 sm:$0xff]  }
 0x1c2   : > { %15034 = vmatprep.subr.bf16.mxu0 %v19223_v1  ;;  %v19299_v1 = vld [vmem:[%s21987_s4 + $0x26c0] ss:$8 sps:$4 sm:$0xff]  }
 0x1c4   : > { %13723 = vmatpush1.bf16.msra.mxu1 %v19218_v56  ;;  %v19304_v56 = vld [vmem:[%s21987_s4 + $0x6d4] ss:$8 sps:$4 sm:$0xff]  }
 0x1c5   : > { %15035 = vmatpush1.bf16.msra.mxu0 %v19221_v3  ;;  %13733 = vmatprep.subr.bf16.mxu1 %v19226_v58  ;;  %v19307_v3 = vld [vmem:[%s21987_s4 + $0x26d4] ss:$8 sps:$4 sm:$0xff]   ;;  %v19302_v58 = vld [vmem:[%s21987_s4 + $0x6d0] ss:$8 sps:$4 sm:$0xff]  }
 0x1c6   : > { %15045 = vmatprep.subr.bf16.mxu0 %v19229_v4  ;;  %v19305_v4 = vld [vmem:[%s21987_s4 + $0x26d0] ss:$8 sps:$4 sm:$0xff]  }
 0x1c7   : > { %13725 = vmatmul.mubr.bf16.vlgmr.msra.gmra.mrb[0].mxu1 %v2429_v7  ;;  %v19308_v7 = vld [vmem:[%s21987_s4 + $0x6e0] ss:$8 sps:$4 sm:$0xff]  }
 0x1c8   : > { %15037 = vmatmul.mubr.bf16.vlgmr.msra.gmra.mrb[0].mxu0 %v2821_v8  ;;  %13734 = vmatpush1.bf16.msra.mxu1 %v19224_v9  ;;  %v19311_v8 = vld [vmem:[%s21987_s4 + $0x26e0] ss:$8 sps:$4 sm:$0xff]   ;;  %v19316_v9 = vld [vmem:[%s21987_s4 + $0x6f4] ss:$8 sps:$4 sm:$0xff]  }
 0x1c9   : > { %15046 = vmatpush1.bf16.msra.mxu0 %v19227_v10  ;;  %13735 = vmatprep.subr.bf16.mxu1 %v19232_v11  ;;  %v19319_v10 = vld [vmem:[%s21987_s4 + $0x26f4] ss:$8 sps:$4 sm:$0xff]   ;;  %v19314_v11 = vld [vmem:[%s21987_s4 + $0x6f0] ss:$8 sps:$4 sm:$0xff]  }
 0x1ca   : > { %15047 = vmatprep.subr.bf16.mxu0 %v19235_v12  ;;  %13765 = vmatprep.mubr.bf16.mxu1 %v22522_v13  ;;  %v19317_v12 = vld [vmem:[%s21987_s4 + $0x26f0] ss:$8 sps:$4 sm:$0xff]  }
 0x1cb   : > { %15077 = vmatprep.mubr.bf16.mxu0 %v22525_v59 }
 0x1cc   : > { %13736 = vmatpush1.bf16.msra.mxu1 %v19230_v60  ;;  %v19323_v60 = vld [vmem:[%s21987_s4 + $0x704] ss:$8 sps:$4 sm:$0xff]  }
 0x1cd   : > { %15048 = vmatpush1.bf16.msra.mxu0 %v19233_v14  ;;  %13737 = vmatprep.subr.bf16.mxu1 %v19238_v15  ;;  %v19327_v14 = vld [vmem:[%s21987_s4 + $0x2704] ss:$8 sps:$4 sm:$0xff]   ;;  %v22591_v15 = vrot.slane %v22500_v42, %v22061_v50  ;;  %v2432_v42 = vcombine.high %v22522_v13, %v22522_v13 }
 0x1ce   : > { %15049 = vmatprep.subr.bf16.mxu0 %v19241_v16  ;;  %v22595_v16 = vrot.slane %v22503_v2, %v22061_v50  ;;  %v19328_v2 = vld [vmem:[%s21987_s4 + $0x710] ss:$8 sps:$4 sm:$0xff]   ;;  %v19336_v13 = vld [vmem:[%s21987_s4 + $0x724] ss:$8 sps:$4 sm:$0xff]  }
 0x1d0   : > { %13738 = vmatpush1.bf16.msra.mxu1 %v19236_v19  ;;  %v19321_v19 = vld [vmem:[%s21987_s4 + $0x700] ss:$8 sps:$4 sm:$0xff]  }
 0x1d1   : > { %15050 = vmatpush1.bf16.msra.mxu0 %v19239_v20  ;;  %13739 = vmatprep.subr.bf16.mxu1 %v19244_v21  ;;  %v19325_v20 = vld [vmem:[%s21987_s4 + $0x2700] ss:$8 sps:$4 sm:$0xff]   ;;  %v19330_v21 = vld [vmem:[%s21987_s4 + $0x714] ss:$8 sps:$4 sm:$0xff]  }
 0x1d2   : > { %15051 = vmatprep.subr.bf16.mxu0 %v19247_v22  ;;  %v19333_v22 = vld [vmem:[%s21987_s4 + $0x2714] ss:$8 sps:$4 sm:$0xff]  }
 0x1d4   : > { %13740 = vmatpush1.bf16.msra.mxu1 %v19242_v23  ;;  %v2824_v23 = vcombine.high %v22525_v59, %v22525_v59  ;;  %v19334_v59 = vld [vmem:[%s21987_s4 + $0x720] ss:$8 sps:$4 sm:$0xff]  }
 0x1d5   : > { %15052 = vmatpush1.bf16.msra.mxu0 %v19245_v24  ;;  %13741 = vmatprep.subr.bf16.mxu1 %v19250_v53  ;;  %v19331_v24 = vld [vmem:[%s21987_s4 + $0x2710] ss:$8 sps:$4 sm:$0xff]   ;;  %v19339_v53 = vld [vmem:[%s21987_s4 + $0x2724] ss:$8 sps:$4 sm:$0xff]  }
 0x1d6   : > { %15053 = vmatprep.subr.bf16.mxu0 %v19253_v57  ;;  %v19337_v57 = vld [vmem:[%s21987_s4 + $0x2720] ss:$8 sps:$4 sm:$0xff]  }
 0x1d8   : > { %13742 = vmatpush1.bf16.msra.mxu1 %v19248_v27  ;;  %v19342_v27 = vld [vmem:[%s21987_s4 + $0x734] ss:$8 sps:$4 sm:$0xff]  }
 0x1d9   : > { %15054 = vmatpush1.bf16.msra.mxu0 %v19251_v28  ;;  %13743 = vmatprep.subr.bf16.mxu1 %v19256_v29  ;;  %v19345_v28 = vld [vmem:[%s21987_s4 + $0x2734] ss:$8 sps:$4 sm:$0xff]   ;;  %v19340_v29 = vld [vmem:[%s21987_s4 + $0x730] ss:$8 sps:$4 sm:$0xff]  }
 0x1da   : > { %15055 = vmatprep.subr.bf16.mxu0 %v19259_v30  ;;  %v19343_v30 = vld [vmem:[%s21987_s4 + $0x2730] ss:$8 sps:$4 sm:$0xff]  }
 0x1dc   : > { %13744 = vmatpush1.bf16.msra.mxu1 %v19254_v31  ;;  %v19348_v31 = vld [vmem:[%s21987_s4 + $0x744] ss:$8 sps:$4 sm:$0xff]  }
 0x1dd   : > { %15056 = vmatpush1.bf16.msra.mxu0 %v19257_v32  ;;  %13745 = vmatprep.subr.bf16.mxu1 %v19262_v33  ;;  %v19351_v32 = vld [vmem:[%s21987_s4 + $0x2744] ss:$8 sps:$4 sm:$0xff]   ;;  %v19346_v33 = vld [vmem:[%s21987_s4 + $0x740] ss:$8 sps:$4 sm:$0xff]  }
 0x1de   : > { %15057 = vmatprep.subr.bf16.mxu0 %v19265_v34  ;;  %v19349_v34 = vld [vmem:[%s21987_s4 + $0x2740] ss:$8 sps:$4 sm:$0xff]  }
 0x1e0   : > { %13746 = vmatpush1.bf16.msra.mxu1 %v19260_v35  ;;  %v19354_v35 = vld [vmem:[%s21987_s4 + $0x754] ss:$8 sps:$4 sm:$0xff]  }
 0x1e1   : > { %15058 = vmatpush1.bf16.msra.mxu0 %v19263_v36  ;;  %13747 = vmatprep.subr.bf16.mxu1 %v19268_v18  ;;  %v19357_v36 = vld [vmem:[%s21987_s4 + $0x2754] ss:$8 sps:$4 sm:$0xff]   ;;  %v19352_v18 = vld [vmem:[%s21987_s4 + $0x750] ss:$8 sps:$4 sm:$0xff]  }
 0x1e2   : > { %15059 = vmatprep.subr.bf16.mxu0 %v19271_v38  ;;  %v19355_v38 = vld [vmem:[%s21987_s4 + $0x2750] ss:$8 sps:$4 sm:$0xff]  }
 0x1e4   : > { %13748 = vmatpush1.bf16.msra.mxu1 %v19266_v43  ;;  %v19360_v43 = vld [vmem:[%s21987_s4 + $0x764] ss:$8 sps:$4 sm:$0xff]  }
 0x1e5   : > { %15060 = vmatpush1.bf16.msra.mxu0 %v19269_v45  ;;  %13749 = vmatprep.subr.bf16.mxu1 %v19274_v25  ;;  %v19363_v45 = vld [vmem:[%s21987_s4 + $0x2764] ss:$8 sps:$4 sm:$0xff]   ;;  %v19358_v25 = vld [vmem:[%s21987_s4 + $0x760] ss:$8 sps:$4 sm:$0xff]  }
 0x1e6   : > { %15061 = vmatprep.subr.bf16.mxu0 %v19277_v46  ;;  %v19361_v46 = vld [vmem:[%s21987_s4 + $0x2760] ss:$8 sps:$4 sm:$0xff]  }
 0x1e8   : > { %13750 = vmatpush1.bf16.msra.mxu1 %v19272_v26  ;;  %v19366_v26 = vld [vmem:[%s21987_s4 + $0x774] ss:$8 sps:$4 sm:$0xff]  }
 0x1e9   : > { %15062 = vmatpush1.bf16.msra.mxu0 %v19275_v47  ;;  %13751 = vmatprep.subr.bf16.mxu1 %v19280_v37  ;;  %v19369_v47 = vld [vmem:[%s21987_s4 + $0x2774] ss:$8 sps:$4 sm:$0xff]   ;;  %v19364_v37 = vld [vmem:[%s21987_s4 + $0x770] ss:$8 sps:$4 sm:$0xff]  }
 0x1ea   : > { %15063 = vmatprep.subr.bf16.mxu0 %v19283_v48  ;;  %v19367_v48 = vld [vmem:[%s21987_s4 + $0x2770] ss:$8 sps:$4 sm:$0xff]  }
 0x1ec   : > { %13752 = vmatpush1.bf16.msra.mxu1 %v19278_v17  ;;  %v19372_v17 = vld [vmem:[%s21987_s4 + $0x784] ss:$8 sps:$4 sm:$0xff]  }
 0x1ed   : > { %15064 = vmatpush1.bf16.msra.mxu0 %v19281_v49  ;;  %13753 = vmatprep.subr.bf16.mxu1 %v19286_v51  ;;  %v19375_v49 = vld [vmem:[%s21987_s4 + $0x2784] ss:$8 sps:$4 sm:$0xff]   ;;  %v19370_v51 = vld [vmem:[%s21987_s4 + $0x780] ss:$8 sps:$4 sm:$0xff]  }
 0x1ee   : > { %15065 = vmatprep.subr.bf16.mxu0 %v19289_v52  ;;  %v19373_v52 = vld [vmem:[%s21987_s4 + $0x2780] ss:$8 sps:$4 sm:$0xff]  }
 0x1f0   : > { %13754 = vmatpush1.bf16.msra.mxu1 %v19284_v54  ;;  %v19378_v54 = vld [vmem:[%s21987_s4 + $0x794] ss:$8 sps:$4 sm:$0xff]  }
 0x1f1   : > { %15066 = vmatpush1.bf16.msra.mxu0 %v19287_v55  ;;  %13755 = vmatprep.subr.bf16.mxu1 %v19292_v39  ;;  %v19381_v55 = vld [vmem:[%s21987_s4 + $0x2794] ss:$8 sps:$4 sm:$0xff]   ;;  %v19376_v39 = vld [vmem:[%s21987_s4 + $0x790] ss:$8 sps:$4 sm:$0xff]  }
 0x1f2   : > { %15067 = vmatprep.subr.bf16.mxu0 %v19295_v40  ;;  %v19379_v40 = vld [vmem:[%s21987_s4 + $0x2790] ss:$8 sps:$4 sm:$0xff]  }
 0x1f4   : > { %13756 = vmatpush1.bf16.msra.mxu1 %v19290_v61  ;;  %v19384_v61 = vld [vmem:[%s21987_s4 + $0x7a4] ss:$8 sps:$4 sm:$0xff]  }
 0x1f5   : > { %15068 = vmatpush1.bf16.msra.mxu0 %v19293_v62  ;;  %13757 = vmatprep.subr.bf16.mxu1 %v19298_v63  ;;  %v19387_v62 = vld [vmem:[%s21987_s4 + $0x27a4] ss:$8 sps:$4 sm:$0xff]   ;;  %v19382_v63 = vld [vmem:[%s21987_s4 + $0x7a0] ss:$8 sps:$4 sm:$0xff]  }
 0x1f6   : > { %15069 = vmatprep.subr.bf16.mxu0 %v19301_v0  ;;  %v19385_v0 = vld [vmem:[%s21987_s4 + $0x27a0] ss:$8 sps:$4 sm:$0xff]  }
 0x1f8   : > { %13758 = vmatpush1.bf16.msra.mxu1 %v19296_v41  ;;  %v19390_v41 = vld [vmem:[%s21987_s4 + $0x7b4] ss:$8 sps:$4 sm:$0xff]  }
 0x1f9   : > { %15070 = vmatpush1.bf16.msra.mxu0 %v19299_v1  ;;  %13759 = vmatprep.subr.bf16.mxu1 %v19304_v56  ;;  %v19393_v1 = vld [vmem:[%s21987_s4 + $0x27b4] ss:$8 sps:$4 sm:$0xff]   ;;  %v19388_v56 = vld [vmem:[%s21987_s4 + $0x7b0] ss:$8 sps:$4 sm:$0xff]  }
 0x1fa   : > { %15071 = vmatprep.subr.bf16.mxu0 %v19307_v3  ;;  %v19391_v3 = vld [vmem:[%s21987_s4 + $0x27b0] ss:$8 sps:$4 sm:$0xff]  }
 0x1fc   : > { %13760 = vmatpush1.bf16.msra.mxu1 %v19302_v58  ;;  %v19396_v58 = vld [vmem:[%s21987_s4 + $0x7c4] ss:$8 sps:$4 sm:$0xff]  }
 0x1fd   : > { %15072 = vmatpush1.bf16.msra.mxu0 %v19305_v4  ;;  %13761 = vmatprep.subr.bf16.mxu1 %v19310_v5  ;;  %v19399_v4 = vld [vmem:[%s21987_s4 + $0x27c4] ss:$8 sps:$4 sm:$0xff]   ;;  %v19394_v5 = vld [vmem:[%s21987_s4 + $0x7c0] ss:$8 sps:$4 sm:$0xff]  }
 0x1fe   : > { %15073 = vmatprep.subr.bf16.mxu0 %v19313_v6  ;;  %v19397_v6 = vld [vmem:[%s21987_s4 + $0x27c0] ss:$8 sps:$4 sm:$0xff]  }
 0x200   : > { %13762 = vmatpush1.bf16.msra.mxu1 %v19308_v7  ;;  %v19402_v7 = vld [vmem:[%s21987_s4 + $0x7d4] ss:$8 sps:$4 sm:$0xff]  }
 0x201   : > { %15074 = vmatpush1.bf16.msra.mxu0 %v19311_v8  ;;  %13763 = vmatprep.subr.bf16.mxu1 %v19316_v9  ;;  %v19405_v8 = vld [vmem:[%s21987_s4 + $0x27d4] ss:$8 sps:$4 sm:$0xff]   ;;  %v19400_v9 = vld [vmem:[%s21987_s4 + $0x7d0] ss:$8 sps:$4 sm:$0xff]  }
 0x202   : > { %15075 = vmatprep.subr.bf16.mxu0 %v19319_v10  ;;  %v19403_v10 = vld [vmem:[%s21987_s4 + $0x27d0] ss:$8 sps:$4 sm:$0xff]  }
 0x204   : > { %13764 = vmatpush1.bf16.msra.mxu1 %v19314_v11  ;;  %v19408_v11 = vld [vmem:[%s21987_s4 + $0x7e4] ss:$8 sps:$4 sm:$0xff]  }
 0x205   : > { %15076 = vmatpush1.bf16.msra.mxu0 %v19317_v12  ;;  %13774 = vmatprep.subr.bf16.mxu1 %v19323_v60  ;;  %v19411_v12 = vld [vmem:[%s21987_s4 + $0x27e4] ss:$8 sps:$4 sm:$0xff]   ;;  %v22660_v60 = vld.sshfl [vmem:[%s22000_s6 + $0x10] sm:$0xff pattern:$0x75316420] }
 0x206   : > { %15086 = vmatprep.subr.bf16.mxu0 %v19327_v14  ;;  %v22663_v14 = vld.sshfl [vmem:[%s22000_s6 + $0x50] sm:$0xff pattern:$0x75316420] }
 0x207   : > { %13766 = vmatmul.mubr.bf16.vlgmr.msra.gmra.mrb[0].mxu1 %v22591_v15 }
 0x208   : > { %15078 = vmatmul.mubr.bf16.vlgmr.msra.gmra.mrb[0].mxu0 %v22595_v16  ;;  %13775 = vmatpush1.bf16.msra.mxu1 %v19321_v19  ;;  %v19406_v19 = vld [vmem:[%s21987_s4 + $0x7e0] ss:$8 sps:$4 sm:$0xff]  }
 0x209   : > { %15087 = vmatpush1.bf16.msra.mxu0 %v19325_v20  ;;  %13776 = vmatprep.subr.bf16.mxu1 %v19330_v21  ;;  %v19409_v20 = vld [vmem:[%s21987_s4 + $0x27e0] ss:$8 sps:$4 sm:$0xff]   ;;  %v19414_v21 = vld [vmem:[%s21987_s4 + $0x7f4] ss:$8 sps:$4 sm:$0xff]  }
 0x20a   : > { %15088 = vmatprep.subr.bf16.mxu0 %v19333_v22  ;;  %13806 = vmatprep.mubr.bf16.mxu1 %v2432_v42  ;;  %v19417_v22 = vld [vmem:[%s21987_s4 + $0x27f4] ss:$8 sps:$4 sm:$0xff]   ;;  %v19412_v42 = vld [vmem:[%s21987_s4 + $0x7f0] ss:$8 sps:$4 sm:$0xff]  }
 0x20b   : > { %15118 = vmatprep.mubr.bf16.mxu0 %v2824_v23  ;;  %v19415_v23 = vld [vmem:[%s21987_s4 + $0x27f0] ss:$8 sps:$4 sm:$0xff]  }
 0x20c   : > { %13777 = vmatpush1.bf16.msra.mxu1 %v19328_v2  ;;  %v19420_v2 = vld [vmem:[%s21987_s4 + $0x804] ss:$8 sps:$4 sm:$0xff]  }
 0x20d   : > { %15089 = vmatpush1.bf16.msra.mxu0 %v19331_v24  ;;  %13778 = vmatprep.subr.bf16.mxu1 %v19336_v13  ;;  %v19423_v24 = vld [vmem:[%s21987_s4 + $0x2804] ss:$8 sps:$4 sm:$0xff]   ;;  %v2448_v13 = vcombine.high %v22660_v60, %v22660_v60 }
 0x20e   : > { %15090 = vmatprep.subr.bf16.mxu0 %v19339_v53  ;;  %v2840_v53 = vcombine.high %v22663_v14, %v22663_v14 }
 0x210   : > { %13779 = vmatpush1.bf16.msra.mxu1 %v19334_v59  ;;  %v2430_v59 = vcombine.high %v22591_v15, %v22591_v15  ;;  %v22689_v15 = vrot.slane %v2840_v53, %v22061_v50  ;;  %v19507_v53 = vld [vmem:[%s21987_s4 + $0x28e4] ss:$8 sps:$4 sm:$0xff]  }
 0x211   : > { %15091 = vmatpush1.bf16.msra.mxu0 %v19337_v57  ;;  %13780 = vmatprep.subr.bf16.mxu1 %v19342_v27  ;;  %v2822_v57 = vcombine.high %v22595_v16, %v22595_v16  ;;  %v19418_v27 = vld [vmem:[%s21987_s4 + $0x800] ss:$8 sps:$4 sm:$0xff]   ;;  %v19424_v16 = vld [vmem:[%s21987_s4 + $0x810] ss:$8 sps:$4 sm:$0xff]  }
 0x212   : > { %15092 = vmatprep.subr.bf16.mxu0 %v19345_v28  ;;  %v19421_v28 = vld [vmem:[%s21987_s4 + $0x2800] ss:$8 sps:$4 sm:$0xff]  }
 0x214   : > { %13781 = vmatpush1.bf16.msra.mxu1 %v19340_v29  ;;  %v19426_v29 = vld [vmem:[%s21987_s4 + $0x814] ss:$8 sps:$4 sm:$0xff]  }
 0x215   : > { %15093 = vmatpush1.bf16.msra.mxu0 %v19343_v30  ;;  %13782 = vmatprep.subr.bf16.mxu1 %v19348_v31  ;;  %v19429_v30 = vld [vmem:[%s21987_s4 + $0x2814] ss:$8 sps:$4 sm:$0xff]   ;;  %v22686_v31 = vrot.slane %v2448_v13, %v22061_v50  ;;  %v19504_v13 = vld [vmem:[%s21987_s4 + $0x8e4] ss:$8 sps:$4 sm:$0xff]  }
 0x216   : > { %15094 = vmatprep.subr.bf16.mxu0 %v19351_v32  ;;  %v19427_v32 = vld [vmem:[%s21987_s4 + $0x2810] ss:$8 sps:$4 sm:$0xff]  }
 0x218   : > { %13783 = vmatpush1.bf16.msra.mxu1 %v19346_v33  ;;  %v19432_v33 = vld [vmem:[%s21987_s4 + $0x824] ss:$8 sps:$4 sm:$0xff]  }
 0x219   : > { %15095 = vmatpush1.bf16.msra.mxu0 %v19349_v34  ;;  %13784 = vmatprep.subr.bf16.mxu1 %v19354_v35  ;;  %v19435_v34 = vld [vmem:[%s21987_s4 + $0x2824] ss:$8 sps:$4 sm:$0xff]   ;;  %v19430_v35 = vld [vmem:[%s21987_s4 + $0x820] ss:$8 sps:$4 sm:$0xff]  }
 0x21a   : > { %15096 = vmatprep.subr.bf16.mxu0 %v19357_v36  ;;  %v19433_v36 = vld [vmem:[%s21987_s4 + $0x2820] ss:$8 sps:$4 sm:$0xff]  }
 0x21c   : > { %13785 = vmatpush1.bf16.msra.mxu1 %v19352_v18  ;;  %v19438_v18 = vld [vmem:[%s21987_s4 + $0x834] ss:$8 sps:$4 sm:$0xff]  }
 0x21d   : > { %15097 = vmatpush1.bf16.msra.mxu0 %v19355_v38  ;;  %13786 = vmatprep.subr.bf16.mxu1 %v19360_v43  ;;  %v19441_v38 = vld [vmem:[%s21987_s4 + $0x2834] ss:$8 sps:$4 sm:$0xff]   ;;  %v19436_v43 = vld [vmem:[%s21987_s4 + $0x830] ss:$8 sps:$4 sm:$0xff]  }
 0x21e   : > { %15098 = vmatprep.subr.bf16.mxu0 %v19363_v45  ;;  %v19439_v45 = vld [vmem:[%s21987_s4 + $0x2830] ss:$8 sps:$4 sm:$0xff]  }
 0x220   : > { %13787 = vmatpush1.bf16.msra.mxu1 %v19358_v25  ;;  %v19444_v25 = vld [vmem:[%s21987_s4 + $0x844] ss:$8 sps:$4 sm:$0xff]  }
 0x221   : > { %15099 = vmatpush1.bf16.msra.mxu0 %v19361_v46  ;;  %13788 = vmatprep.subr.bf16.mxu1 %v19366_v26  ;;  %v19447_v46 = vld [vmem:[%s21987_s4 + $0x2844] ss:$8 sps:$4 sm:$0xff]   ;;  %v19442_v26 = vld [vmem:[%s21987_s4 + $0x840] ss:$8 sps:$4 sm:$0xff]  }
 0x222   : > { %15100 = vmatprep.subr.bf16.mxu0 %v19369_v47  ;;  %v19445_v47 = vld [vmem:[%s21987_s4 + $0x2840] ss:$8 sps:$4 sm:$0xff]  }
 0x224   : > { %13789 = vmatpush1.bf16.msra.mxu1 %v19364_v37  ;;  %v19450_v37 = vld [vmem:[%s21987_s4 + $0x854] ss:$8 sps:$4 sm:$0xff]  }
 0x225   : > { %15101 = vmatpush1.bf16.msra.mxu0 %v19367_v48  ;;  %13790 = vmatprep.subr.bf16.mxu1 %v19372_v17  ;;  %v19453_v48 = vld [vmem:[%s21987_s4 + $0x2854] ss:$8 sps:$4 sm:$0xff]   ;;  %v19448_v17 = vld [vmem:[%s21987_s4 + $0x850] ss:$8 sps:$4 sm:$0xff]  }
 0x226   : > { %15102 = vmatprep.subr.bf16.mxu0 %v19375_v49  ;;  %v19451_v49 = vld [vmem:[%s21987_s4 + $0x2850] ss:$8 sps:$4 sm:$0xff]  }
 0x228   : > { %13791 = vmatpush1.bf16.msra.mxu1 %v19370_v51  ;;  %v19456_v51 = vld [vmem:[%s21987_s4 + $0x864] ss:$8 sps:$4 sm:$0xff]  }
 0x229   : > { %15103 = vmatpush1.bf16.msra.mxu0 %v19373_v52  ;;  %13792 = vmatprep.subr.bf16.mxu1 %v19378_v54  ;;  %v19459_v52 = vld [vmem:[%s21987_s4 + $0x2864] ss:$8 sps:$4 sm:$0xff]   ;;  %v19454_v54 = vld [vmem:[%s21987_s4 + $0x860] ss:$8 sps:$4 sm:$0xff]  }
 0x22a   : > { %15104 = vmatprep.subr.bf16.mxu0 %v19381_v55  ;;  %v19457_v55 = vld [vmem:[%s21987_s4 + $0x2860] ss:$8 sps:$4 sm:$0xff]  }
 0x22c   : > { %13793 = vmatpush1.bf16.msra.mxu1 %v19376_v39  ;;  %v19462_v39 = vld [vmem:[%s21987_s4 + $0x874] ss:$8 sps:$4 sm:$0xff]  }
 0x22d   : > { %15105 = vmatpush1.bf16.msra.mxu0 %v19379_v40  ;;  %13794 = vmatprep.subr.bf16.mxu1 %v19384_v61  ;;  %v19465_v40 = vld [vmem:[%s21987_s4 + $0x2874] ss:$8 sps:$4 sm:$0xff]   ;;  %v19460_v61 = vld [vmem:[%s21987_s4 + $0x870] ss:$8 sps:$4 sm:$0xff]  }
 0x22e   : > { %15106 = vmatprep.subr.bf16.mxu0 %v19387_v62  ;;  %v19463_v62 = vld [vmem:[%s21987_s4 + $0x2870] ss:$8 sps:$4 sm:$0xff]  }
 0x230   : > { %13795 = vmatpush1.bf16.msra.mxu1 %v19382_v63  ;;  %v19468_v63 = vld [vmem:[%s21987_s4 + $0x884] ss:$8 sps:$4 sm:$0xff]  }
 0x231   : > { %15107 = vmatpush1.bf16.msra.mxu0 %v19385_v0  ;;  %13796 = vmatprep.subr.bf16.mxu1 %v19390_v41  ;;  %v19471_v0 = vld [vmem:[%s21987_s4 + $0x2884] ss:$8 sps:$4 sm:$0xff]   ;;  %v19466_v41 = vld [vmem:[%s21987_s4 + $0x880] ss:$8 sps:$4 sm:$0xff]  }
 0x232   : > { %15108 = vmatprep.subr.bf16.mxu0 %v19393_v1  ;;  %v19469_v1 = vld [vmem:[%s21987_s4 + $0x2880] ss:$8 sps:$4 sm:$0xff]  }
 0x234   : > { %13797 = vmatpush1.bf16.msra.mxu1 %v19388_v56  ;;  %v19474_v56 = vld [vmem:[%s21987_s4 + $0x894] ss:$8 sps:$4 sm:$0xff]  }
 0x235   : > { %15109 = vmatpush1.bf16.msra.mxu0 %v19391_v3  ;;  %13798 = vmatprep.subr.bf16.mxu1 %v19396_v58  ;;  %v19477_v3 = vld [vmem:[%s21987_s4 + $0x2894] ss:$8 sps:$4 sm:$0xff]   ;;  %v19472_v58 = vld [vmem:[%s21987_s4 + $0x890] ss:$8 sps:$4 sm:$0xff]  }
 0x236   : > { %15110 = vmatprep.subr.bf16.mxu0 %v19399_v4  ;;  %v19475_v4 = vld [vmem:[%s21987_s4 + $0x2890] ss:$8 sps:$4 sm:$0xff]  }
 0x238   : > { %13799 = vmatpush1.bf16.msra.mxu1 %v19394_v5  ;;  %v19480_v5 = vld [vmem:[%s21987_s4 + $0x8a4] ss:$8 sps:$4 sm:$0xff]  }
 0x239   : > { %15111 = vmatpush1.bf16.msra.mxu0 %v19397_v6  ;;  %13800 = vmatprep.subr.bf16.mxu1 %v19402_v7  ;;  %v19483_v6 = vld [vmem:[%s21987_s4 + $0x28a4] ss:$8 sps:$4 sm:$0xff]   ;;  %v19478_v7 = vld [vmem:[%s21987_s4 + $0x8a0] ss:$8 sps:$4 sm:$0xff]  }
 0x23a   : > { %15112 = vmatprep.subr.bf16.mxu0 %v19405_v8  ;;  %v19481_v8 = vld [vmem:[%s21987_s4 + $0x28a0] ss:$8 sps:$4 sm:$0xff]  }
 0x23c   : > { %13801 = vmatpush1.bf16.msra.mxu1 %v19400_v9  ;;  %v19486_v9 = vld [vmem:[%s21987_s4 + $0x8b4] ss:$8 sps:$4 sm:$0xff]  }
 0x23d   : > { %15113 = vmatpush1.bf16.msra.mxu0 %v19403_v10  ;;  %13802 = vmatprep.subr.bf16.mxu1 %v19408_v11  ;;  %v19489_v10 = vld [vmem:[%s21987_s4 + $0x28b4] ss:$8 sps:$4 sm:$0xff]   ;;  %v19484_v11 = vld [vmem:[%s21987_s4 + $0x8b0] ss:$8 sps:$4 sm:$0xff]  }
 0x23e   : > { %15114 = vmatprep.subr.bf16.mxu0 %v19411_v12  ;;  %v19487_v12 = vld [vmem:[%s21987_s4 + $0x28b0] ss:$8 sps:$4 sm:$0xff]  }
 0x240   : > { %13803 = vmatpush1.bf16.msra.mxu1 %v19406_v19  ;;  %v19492_v19 = vld [vmem:[%s21987_s4 + $0x8c4] ss:$8 sps:$4 sm:$0xff]  }
 0x241   : > { %15115 = vmatpush1.bf16.msra.mxu0 %v19409_v20  ;;  %13804 = vmatprep.subr.bf16.mxu1 %v19414_v21  ;;  %v19495_v20 = vld [vmem:[%s21987_s4 + $0x28c4] ss:$8 sps:$4 sm:$0xff]   ;;  %v19490_v21 = vld [vmem:[%s21987_s4 + $0x8c0] ss:$8 sps:$4 sm:$0xff]  }
 0x242   : > { %15116 = vmatprep.subr.bf16.mxu0 %v19417_v22  ;;  %v19493_v22 = vld [vmem:[%s21987_s4 + $0x28c0] ss:$8 sps:$4 sm:$0xff]  }
 0x244   : > { %13805 = vmatpush1.bf16.msra.mxu1 %v19412_v42  ;;  %v19498_v42 = vld [vmem:[%s21987_s4 + $0x8d4] ss:$8 sps:$4 sm:$0xff]  }
 0x245   : > { %15117 = vmatpush1.bf16.msra.mxu0 %v19415_v23  ;;  %13815 = vmatprep.subr.bf16.mxu1 %v19420_v2  ;;  %v19501_v23 = vld [vmem:[%s21987_s4 + $0x28d4] ss:$8 sps:$4 sm:$0xff]   ;;  %v19496_v2 = vld [vmem:[%s21987_s4 + $0x8d0] ss:$8 sps:$4 sm:$0xff]  }
 0x246   : > { %15127 = vmatprep.subr.bf16.mxu0 %v19423_v24  ;;  %v19499_v24 = vld [vmem:[%s21987_s4 + $0x28d0] ss:$8 sps:$4 sm:$0xff]  }
 0x247   : > { %13807 = vmatmul.mubr.bf16.vlgmr.msra.gmra.mrb[0].mxu1 %v2430_v59  ;;  %v19502_v59 = vld [vmem:[%s21987_s4 + $0x8e0] ss:$8 sps:$4 sm:$0xff]  }
 0x248   : > { %15119 = vmatmul.mubr.bf16.vlgmr.msra.gmra.mrb[0].mxu0 %v2822_v57  ;;  %13816 = vmatpush1.bf16.msra.mxu1 %v19418_v27  ;;  %v19505_v57 = vld [vmem:[%s21987_s4 + $0x28e0] ss:$8 sps:$4 sm:$0xff]   ;;  %v19510_v27 = vld [vmem:[%s21987_s4 + $0x8f4] ss:$8 sps:$4 sm:$0xff]  }
 0x249   : > { %15128 = vmatpush1.bf16.msra.mxu0 %v19421_v28  ;;  %13817 = vmatprep.subr.bf16.mxu1 %v19426_v29  ;;  %v19513_v28 = vld [vmem:[%s21987_s4 + $0x28f4] ss:$8 sps:$4 sm:$0xff]   ;;  %v19508_v29 = vld [vmem:[%s21987_s4 + $0x8f0] ss:$8 sps:$4 sm:$0xff]  }
 0x24a   : > { %15129 = vmatprep.subr.bf16.mxu0 %v19429_v30  ;;  %13847 = vmatprep.mubr.bf16.mxu1 %v22686_v31  ;;  %v19511_v30 = vld [vmem:[%s21987_s4 + $0x28f0] ss:$8 sps:$4 sm:$0xff]  }
 0x24b   : > { %15159 = vmatprep.mubr.bf16.mxu0 %v22689_v15 }
 0x24c   : > { %13818 = vmatpush1.bf16.msra.mxu1 %v19424_v16  ;;  %v19516_v16 = vld [vmem:[%s21987_s4 + $0x904] ss:$8 sps:$4 sm:$0xff]  }
 0x24d   : > { %15130 = vmatpush1.bf16.msra.mxu0 %v19427_v32  ;;  %13819 = vmatprep.subr.bf16.mxu1 %v19432_v33  ;;  %v19519_v32 = vld [vmem:[%s21987_s4 + $0x2904] ss:$8 sps:$4 sm:$0xff]   ;;  %v22755_v33 = vrot.slane %v22660_v60, %v22061_v50  ;;  %v2480_v60 = vcombine.high %v22686_v31, %v22686_v31 }
 0x24e   : > { %15131 = vmatprep.subr.bf16.mxu0 %v19435_v34  ;;  %v22759_v34 = vrot.slane %v22663_v14, %v22061_v50  ;;  %v19520_v14 = vld [vmem:[%s21987_s4 + $0x910] ss:$8 sps:$4 sm:$0xff]   ;;  %v19528_v31 = vld [vmem:[%s21987_s4 + $0x924] ss:$8 sps:$4 sm:$0xff]  }
 0x250   : > { %13820 = vmatpush1.bf16.msra.mxu1 %v19430_v35  ;;  %v19514_v35 = vld [vmem:[%s21987_s4 + $0x900] ss:$8 sps:$4 sm:$0xff]  }
 0x251   : > { %15132 = vmatpush1.bf16.msra.mxu0 %v19433_v36  ;;  %13821 = vmatprep.subr.bf16.mxu1 %v19438_v18  ;;  %v19517_v36 = vld [vmem:[%s21987_s4 + $0x2900] ss:$8 sps:$4 sm:$0xff]   ;;  %v19522_v18 = vld [vmem:[%s21987_s4 + $0x914] ss:$8 sps:$4 sm:$0xff]  }
 0x252   : > { %15133 = vmatprep.subr.bf16.mxu0 %v19441_v38  ;;  %v19525_v38 = vld [vmem:[%s21987_s4 + $0x2914] ss:$8 sps:$4 sm:$0xff]  }
 0x254   : > { %13822 = vmatpush1.bf16.msra.mxu1 %v19436_v43  ;;  %v2872_v43 = vcombine.high %v22689_v15, %v22689_v15  ;;  %v19526_v15 = vld [vmem:[%s21987_s4 + $0x920] ss:$8 sps:$4 sm:$0xff]  }
 0x255   : > { %15134 = vmatpush1.bf16.msra.mxu0 %v19439_v45  ;;  %13823 = vmatprep.subr.bf16.mxu1 %v19444_v25  ;;  %v19523_v45 = vld [vmem:[%s21987_s4 + $0x2910] ss:$8 sps:$4 sm:$0xff]   ;;  %v19531_v25 = vld [vmem:[%s21987_s4 + $0x2924] ss:$8 sps:$4 sm:$0xff]  }
 0x256   : > { %15135 = vmatprep.subr.bf16.mxu0 %v19447_v46  ;;  %v19529_v46 = vld [vmem:[%s21987_s4 + $0x2920] ss:$8 sps:$4 sm:$0xff]  }
 0x258   : > { %13824 = vmatpush1.bf16.msra.mxu1 %v19442_v26  ;;  %v19534_v26 = vld [vmem:[%s21987_s4 + $0x934] ss:$8 sps:$4 sm:$0xff]  }
 0x259   : > { %15136 = vmatpush1.bf16.msra.mxu0 %v19445_v47  ;;  %13825 = vmatprep.subr.bf16.mxu1 %v19450_v37  ;;  %v19537_v47 = vld [vmem:[%s21987_s4 + $0x2934] ss:$8 sps:$4 sm:$0xff]   ;;  %v19532_v37 = vld [vmem:[%s21987_s4 + $0x930] ss:$8 sps:$4 sm:$0xff]  }
 0x25a   : > { %15137 = vmatprep.subr.bf16.mxu0 %v19453_v48  ;;  %v19535_v48 = vld [vmem:[%s21987_s4 + $0x2930] ss:$8 sps:$4 sm:$0xff]  }
 0x25c   : > { %13826 = vmatpush1.bf16.msra.mxu1 %v19448_v17  ;;  %v19540_v17 = vld [vmem:[%s21987_s4 + $0x944] ss:$8 sps:$4 sm:$0xff]  }
 0x25d   : > { %15138 = vmatpush1.bf16.msra.mxu0 %v19451_v49  ;;  %13827 = vmatprep.subr.bf16.mxu1 %v19456_v51  ;;  %v19543_v49 = vld [vmem:[%s21987_s4 + $0x2944] ss:$8 sps:$4 sm:$0xff]   ;;  %v19538_v51 = vld [vmem:[%s21987_s4 + $0x940] ss:$8 sps:$4 sm:$0xff]  }
 0x25e   : > { %15139 = vmatprep.subr.bf16.mxu0 %v19459_v52  ;;  %v19541_v52 = vld [vmem:[%s21987_s4 + $0x2940] ss:$8 sps:$4 sm:$0xff]  }
 0x260   : > { %13828 = vmatpush1.bf16.msra.mxu1 %v19454_v54  ;;  %v19546_v54 = vld [vmem:[%s21987_s4 + $0x954] ss:$8 sps:$4 sm:$0xff]  }
 0x261   : > { %15140 = vmatpush1.bf16.msra.mxu0 %v19457_v55  ;;  %13829 = vmatprep.subr.bf16.mxu1 %v19462_v39  ;;  %v19549_v55 = vld [vmem:[%s21987_s4 + $0x2954] ss:$8 sps:$4 sm:$0xff]   ;;  %v19544_v39 = vld [vmem:[%s21987_s4 + $0x950] ss:$8 sps:$4 sm:$0xff]  }
 0x262   : > { %15141 = vmatprep.subr.bf16.mxu0 %v19465_v40  ;;  %v19547_v40 = vld [vmem:[%s21987_s4 + $0x2950] ss:$8 sps:$4 sm:$0xff]  }
 0x264   : > { %13830 = vmatpush1.bf16.msra.mxu1 %v19460_v61  ;;  %v19552_v61 = vld [vmem:[%s21987_s4 + $0x964] ss:$8 sps:$4 sm:$0xff]  }
 0x265   : > { %15142 = vmatpush1.bf16.msra.mxu0 %v19463_v62  ;;  %13831 = vmatprep.subr.bf16.mxu1 %v19468_v63  ;;  %v19555_v62 = vld [vmem:[%s21987_s4 + $0x2964] ss:$8 sps:$4 sm:$0xff]   ;;  %v19550_v63 = vld [vmem:[%s21987_s4 + $0x960] ss:$8 sps:$4 sm:$0xff]  }
 0x266   : > { %15143 = vmatprep.subr.bf16.mxu0 %v19471_v0  ;;  %v19553_v0 = vld [vmem:[%s21987_s4 + $0x2960] ss:$8 sps:$4 sm:$0xff]  }
 0x268   : > { %13832 = vmatpush1.bf16.msra.mxu1 %v19466_v41  ;;  %v19558_v41 = vld [vmem:[%s21987_s4 + $0x974] ss:$8 sps:$4 sm:$0xff]  }
 0x269   : > { %15144 = vmatpush1.bf16.msra.mxu0 %v19469_v1  ;;  %13833 = vmatprep.subr.bf16.mxu1 %v19474_v56  ;;  %v19561_v1 = vld [vmem:[%s21987_s4 + $0x2974] ss:$8 sps:$4 sm:$0xff]   ;;  %v19556_v56 = vld [vmem:[%s21987_s4 + $0x970] ss:$8 sps:$4 sm:$0xff]  }
 0x26a   : > { %15145 = vmatprep.subr.bf16.mxu0 %v19477_v3  ;;  %v19559_v3 = vld [vmem:[%s21987_s4 + $0x2970] ss:$8 sps:$4 sm:$0xff]  }
 0x26c   : > { %13834 = vmatpush1.bf16.msra.mxu1 %v19472_v58  ;;  %v19564_v58 = vld [vmem:[%s21987_s4 + $0x984] ss:$8 sps:$4 sm:$0xff]  }
 0x26d   : > { %15146 = vmatpush1.bf16.msra.mxu0 %v19475_v4  ;;  %13835 = vmatprep.subr.bf16.mxu1 %v19480_v5  ;;  %v19567_v4 = vld [vmem:[%s21987_s4 + $0x2984] ss:$8 sps:$4 sm:$0xff]   ;;  %v19562_v5 = vld [vmem:[%s21987_s4 + $0x980] ss:$8 sps:$4 sm:$0xff]  }
 0x26e   : > { %15147 = vmatprep.subr.bf16.mxu0 %v19483_v6  ;;  %v19565_v6 = vld [vmem:[%s21987_s4 + $0x2980] ss:$8 sps:$4 sm:$0xff]  }
 0x270   : > { %13836 = vmatpush1.bf16.msra.mxu1 %v19478_v7  ;;  %v19570_v7 = vld [vmem:[%s21987_s4 + $0x994] ss:$8 sps:$4 sm:$0xff]  }
 0x271   : > { %15148 = vmatpush1.bf16.msra.mxu0 %v19481_v8  ;;  %13837 = vmatprep.subr.bf16.mxu1 %v19486_v9  ;;  %v19573_v8 = vld [vmem:[%s21987_s4 + $0x2994] ss:$8 sps:$4 sm:$0xff]   ;;  %v19568_v9 = vld [vmem:[%s21987_s4 + $0x990] ss:$8 sps:$4 sm:$0xff]  }
 0x272   : > { %15149 = vmatprep.subr.bf16.mxu0 %v19489_v10  ;;  %v19571_v10 = vld [vmem:[%s21987_s4 + $0x2990] ss:$8 sps:$4 sm:$0xff]  }
 0x274   : > { %13838 = vmatpush1.bf16.msra.mxu1 %v19484_v11  ;;  %v19576_v11 = vld [vmem:[%s21987_s4 + $0x9a4] ss:$8 sps:$4 sm:$0xff]  }
 0x275   : > { %15150 = vmatpush1.bf16.msra.mxu0 %v19487_v12  ;;  %13839 = vmatprep.subr.bf16.mxu1 %v19492_v19  ;;  %v19579_v12 = vld [vmem:[%s21987_s4 + $0x29a4] ss:$8 sps:$4 sm:$0xff]   ;;  %v19574_v19 = vld [vmem:[%s21987_s4 + $0x9a0] ss:$8 sps:$4 sm:$0xff]  }
 0x276   : > { %15151 = vmatprep.subr.bf16.mxu0 %v19495_v20  ;;  %v19577_v20 = vld [vmem:[%s21987_s4 + $0x29a0] ss:$8 sps:$4 sm:$0xff]  }
 0x278   : > { %13840 = vmatpush1.bf16.msra.mxu1 %v19490_v21  ;;  %v19582_v21 = vld [vmem:[%s21987_s4 + $0x9b4] ss:$8 sps:$4 sm:$0xff]  }
 0x279   : > { %15152 = vmatpush1.bf16.msra.mxu0 %v19493_v22  ;;  %13841 = vmatprep.subr.bf16.mxu1 %v19498_v42  ;;  %v19585_v22 = vld [vmem:[%s21987_s4 + $0x29b4] ss:$8 sps:$4 sm:$0xff]   ;;  %v19580_v42 = vld [vmem:[%s21987_s4 + $0x9b0] ss:$8 sps:$4 sm:$0xff]  }
 0x27a   : > { %15153 = vmatprep.subr.bf16.mxu0 %v19501_v23  ;;  %v19583_v23 = vld [vmem:[%s21987_s4 + $0x29b0] ss:$8 sps:$4 sm:$0xff]  }
 0x27c   : > { %13842 = vmatpush1.bf16.msra.mxu1 %v19496_v2  ;;  %v19588_v2 = vld [vmem:[%s21987_s4 + $0x9c4] ss:$8 sps:$4 sm:$0xff]  }
 0x27d   : > { %15154 = vmatpush1.bf16.msra.mxu0 %v19499_v24  ;;  %13843 = vmatprep.subr.bf16.mxu1 %v19504_v13  ;;  %v19591_v24 = vld [vmem:[%s21987_s4 + $0x29c4] ss:$8 sps:$4 sm:$0xff]   ;;  %v19586_v13 = vld [vmem:[%s21987_s4 + $0x9c0] ss:$8 sps:$4 sm:$0xff]  }
 0x27e   : > { %15155 = vmatprep.subr.bf16.mxu0 %v19507_v53  ;;  %v19589_v53 = vld [vmem:[%s21987_s4 + $0x29c0] ss:$8 sps:$4 sm:$0xff]  }
 0x280   : > { %13844 = vmatpush1.bf16.msra.mxu1 %v19502_v59  ;;  %v19594_v59 = vld [vmem:[%s21987_s4 + $0x9d4] ss:$8 sps:$4 sm:$0xff]  }
 0x281   : > { %15156 = vmatpush1.bf16.msra.mxu0 %v19505_v57  ;;  %13845 = vmatprep.subr.bf16.mxu1 %v19510_v27  ;;  %v19597_v57 = vld [vmem:[%s21987_s4 + $0x29d4] ss:$8 sps:$4 sm:$0xff]   ;;  %v19592_v27 = vld [vmem:[%s21987_s4 + $0x9d0] ss:$8 sps:$4 sm:$0xff]  }
 0x282   : > { %15157 = vmatprep.subr.bf16.mxu0 %v19513_v28  ;;  %v19595_v28 = vld [vmem:[%s21987_s4 + $0x29d0] ss:$8 sps:$4 sm:$0xff]  }
 0x284   : > { %13846 = vmatpush1.bf16.msra.mxu1 %v19508_v29  ;;  %v19600_v29 = vld [vmem:[%s21987_s4 + $0x9e4] ss:$8 sps:$4 sm:$0xff]  }
 0x285   : > { %15158 = vmatpush1.bf16.msra.mxu0 %v19511_v30  ;;  %13856 = vmatprep.subr.bf16.mxu1 %v19516_v16  ;;  %v19603_v30 = vld [vmem:[%s21987_s4 + $0x29e4] ss:$8 sps:$4 sm:$0xff]   ;;  %v21736_v16 = vld [vmem:[%s22000_s6 + $0x10] sm:$0xff] }
 0x286   : > { %15168 = vmatprep.subr.bf16.mxu0 %v19519_v32  ;;  %v2433_v32 = vcombine.high %v21736_v16, %v21736_v16  ;;  %v19678_v16 = vld [vmem:[%s21987_s4 + $0xab4] ss:$8 sps:$4 sm:$0xff]  }
 0x287   : > { %13848 = vmatmul.mubr.bf16.vlgmr.msra.gmra.mrb[0].mxu1 %v22755_v33 }
 0x288   : > { %15160 = vmatmul.mubr.bf16.vlgmr.msra.gmra.mrb[0].mxu0 %v22759_v34  ;;  %13857 = vmatpush1.bf16.msra.mxu1 %v19514_v35  ;;  %v21737_v35 = vld [vmem:[%s22000_s6 + $0x50] sm:$0xff] }
 0x289   : > { %15169 = vmatpush1.bf16.msra.mxu0 %v19517_v36  ;;  %13858 = vmatprep.subr.bf16.mxu1 %v19522_v18  ;;  %v2825_v36 = vcombine.high %v21737_v35, %v21737_v35  ;;  %v19598_v18 = vld [vmem:[%s21987_s4 + $0x9e0] ss:$8 sps:$4 sm:$0xff]   ;;  %v19676_v35 = vld [vmem:[%s21987_s4 + $0xab0] ss:$8 sps:$4 sm:$0xff]  }
 0x28a   : > { %15170 = vmatprep.subr.bf16.mxu0 %v19525_v38  ;;  %13888 = vmatprep.mubr.bf16.mxu1 %v2480_v60  ;;  %v19601_v38 = vld [vmem:[%s21987_s4 + $0x29e0] ss:$8 sps:$4 sm:$0xff]   ;;  %v19606_v60 = vld [vmem:[%s21987_s4 + $0x9f4] ss:$8 sps:$4 sm:$0xff]  }
 0x28b   : > { %15200 = vmatprep.mubr.bf16.mxu0 %v2872_v43  ;;  %v19609_v43 = vld [vmem:[%s21987_s4 + $0x29f4] ss:$8 sps:$4 sm:$0xff]  }
 0x28c   : > { %13859 = vmatpush1.bf16.msra.mxu1 %v19520_v14  ;;  %v22830_v14 = vrot.slane %v2433_v32, %v22061_v50  ;;  %v19681_v32 = vld [vmem:[%s21987_s4 + $0x2ab4] ss:$8 sps:$4 sm:$0xff]  }
 0x28d   : > { %15171 = vmatpush1.bf16.msra.mxu0 %v19523_v45  ;;  %13860 = vmatprep.subr.bf16.mxu1 %v19528_v31  ;;  %v22833_v45 = vrot.slane %v2825_v36, %v22061_v50  ;;  %v19604_v31 = vld [vmem:[%s21987_s4 + $0x9f0] ss:$8 sps:$4 sm:$0xff]  }
 0x28e   : > { %15172 = vmatprep.subr.bf16.mxu0 %v19531_v25  ;;  %v19607_v25 = vld [vmem:[%s21987_s4 + $0x29f0] ss:$8 sps:$4 sm:$0xff]  }
 0x28f   : > { %v19679_v36 = vld [vmem:[%s21987_s4 + $0x2ab0] ss:$8 sps:$4 sm:$0xff]  }
 0x290   : > { %13861 = vmatpush1.bf16.msra.mxu1 %v19526_v15  ;;  %v19612_v15 = vld [vmem:[%s21987_s4 + $0xa04] ss:$8 sps:$4 sm:$0xff]  }
 0x291   : > { %15173 = vmatpush1.bf16.msra.mxu0 %v19529_v46  ;;  %13862 = vmatprep.subr.bf16.mxu1 %v19534_v26  ;;  %v19615_v46 = vld [vmem:[%s21987_s4 + $0x2a04] ss:$8 sps:$4 sm:$0xff]   ;;  %v2449_v26 = vcombine.high %v22830_v14, %v22830_v14 }
 0x292   : > { %15174 = vmatprep.subr.bf16.mxu0 %v19537_v47  ;;  %v2841_v47 = vcombine.high %v22833_v45, %v22833_v45 }
 0x294   : > { %13863 = vmatpush1.bf16.msra.mxu1 %v19532_v37  ;;  %v2478_v37 = vcombine.high %v22755_v33, %v22755_v33  ;;  %v22855_v33 = vrot.slane %v2841_v47, %v22061_v50  ;;  %v19699_v47 = vld [vmem:[%s21987_s4 + $0x2ae4] ss:$8 sps:$4 sm:$0xff]  }
 0x295   : > { %15175 = vmatpush1.bf16.msra.mxu0 %v19535_v48  ;;  %13864 = vmatprep.subr.bf16.mxu1 %v19540_v17  ;;  %v2870_v48 = vcombine.high %v22759_v34, %v22759_v34  ;;  %v19610_v17 = vld [vmem:[%s21987_s4 + $0xa00] ss:$8 sps:$4 sm:$0xff]   ;;  %v19616_v34 = vld [vmem:[%s21987_s4 + $0xa10] ss:$8 sps:$4 sm:$0xff]  }
 0x296   : > { %15176 = vmatprep.subr.bf16.mxu0 %v19543_v49  ;;  %v19613_v49 = vld [vmem:[%s21987_s4 + $0x2a00] ss:$8 sps:$4 sm:$0xff]  }
 0x298   : > { %13865 = vmatpush1.bf16.msra.mxu1 %v19538_v51  ;;  %v19618_v51 = vld [vmem:[%s21987_s4 + $0xa14] ss:$8 sps:$4 sm:$0xff]  }
 0x299   : > { %15177 = vmatpush1.bf16.msra.mxu0 %v19541_v52  ;;  %13866 = vmatprep.subr.bf16.mxu1 %v19546_v54  ;;  %v19621_v52 = vld [vmem:[%s21987_s4 + $0x2a14] ss:$8 sps:$4 sm:$0xff]   ;;  %v22852_v54 = vrot.slane %v2449_v26, %v22061_v50  ;;  %v19696_v26 = vld [vmem:[%s21987_s4 + $0xae4] ss:$8 sps:$4 sm:$0xff]  }
 0x29a   : > { %15178 = vmatprep.subr.bf16.mxu0 %v19549_v55  ;;  %v19619_v55 = vld [vmem:[%s21987_s4 + $0x2a10] ss:$8 sps:$4 sm:$0xff]  }
 0x29c   : > { %13867 = vmatpush1.bf16.msra.mxu1 %v19544_v39  ;;  %v19624_v39 = vld [vmem:[%s21987_s4 + $0xa24] ss:$8 sps:$4 sm:$0xff]  }
 0x29d   : > { %15179 = vmatpush1.bf16.msra.mxu0 %v19547_v40  ;;  %13868 = vmatprep.subr.bf16.mxu1 %v19552_v61  ;;  %v19627_v40 = vld [vmem:[%s21987_s4 + $0x2a24] ss:$8 sps:$4 sm:$0xff]   ;;  %v19622_v61 = vld [vmem:[%s21987_s4 + $0xa20] ss:$8 sps:$4 sm:$0xff]  }
 0x29e   : > { %15180 = vmatprep.subr.bf16.mxu0 %v19555_v62  ;;  %v19625_v62 = vld [vmem:[%s21987_s4 + $0x2a20] ss:$8 sps:$4 sm:$0xff]  }
 0x2a0   : > { %13869 = vmatpush1.bf16.msra.mxu1 %v19550_v63  ;;  %v19630_v63 = vld [vmem:[%s21987_s4 + $0xa34] ss:$8 sps:$4 sm:$0xff]  }
 0x2a1   : > { %15181 = vmatpush1.bf16.msra.mxu0 %v19553_v0  ;;  %13870 = vmatprep.subr.bf16.mxu1 %v19558_v41  ;;  %v19633_v0 = vld [vmem:[%s21987_s4 + $0x2a34] ss:$8 sps:$4 sm:$0xff]   ;;  %v19628_v41 = vld [vmem:[%s21987_s4 + $0xa30] ss:$8 sps:$4 sm:$0xff]  }
 0x2a2   : > { %15182 = vmatprep.subr.bf16.mxu0 %v19561_v1  ;;  %v19631_v1 = vld [vmem:[%s21987_s4 + $0x2a30] ss:$8 sps:$4 sm:$0xff]  }
 0x2a4   : > { %13871 = vmatpush1.bf16.msra.mxu1 %v19556_v56  ;;  %v19636_v56 = vld [vmem:[%s21987_s4 + $0xa44] ss:$8 sps:$4 sm:$0xff]  }
 0x2a5   : > { %15183 = vmatpush1.bf16.msra.mxu0 %v19559_v3  ;;  %13872 = vmatprep.subr.bf16.mxu1 %v19564_v58  ;;  %v19639_v3 = vld [vmem:[%s21987_s4 + $0x2a44] ss:$8 sps:$4 sm:$0xff]   ;;  %v19634_v58 = vld [vmem:[%s21987_s4 + $0xa40] ss:$8 sps:$4 sm:$0xff]  }
 0x2a6   : > { %15184 = vmatprep.subr.bf16.mxu0 %v19567_v4  ;;  %v19637_v4 = vld [vmem:[%s21987_s4 + $0x2a40] ss:$8 sps:$4 sm:$0xff]  }
 0x2a8   : > { %13873 = vmatpush1.bf16.msra.mxu1 %v19562_v5  ;;  %v19642_v5 = vld [vmem:[%s21987_s4 + $0xa54] ss:$8 sps:$4 sm:$0xff]  }
 0x2a9   : > { %15185 = vmatpush1.bf16.msra.mxu0 %v19565_v6  ;;  %13874 = vmatprep.subr.bf16.mxu1 %v19570_v7  ;;  %v19645_v6 = vld [vmem:[%s21987_s4 + $0x2a54] ss:$8 sps:$4 sm:$0xff]   ;;  %v19640_v7 = vld [vmem:[%s21987_s4 + $0xa50] ss:$8 sps:$4 sm:$0xff]  }
 0x2aa   : > { %15186 = vmatprep.subr.bf16.mxu0 %v19573_v8  ;;  %v19643_v8 = vld [vmem:[%s21987_s4 + $0x2a50] ss:$8 sps:$4 sm:$0xff]  }
 0x2ac   : > { %13875 = vmatpush1.bf16.msra.mxu1 %v19568_v9  ;;  %v19648_v9 = vld [vmem:[%s21987_s4 + $0xa64] ss:$8 sps:$4 sm:$0xff]  }
 0x2ad   : > { %15187 = vmatpush1.bf16.msra.mxu0 %v19571_v10  ;;  %13876 = vmatprep.subr.bf16.mxu1 %v19576_v11  ;;  %v19651_v10 = vld [vmem:[%s21987_s4 + $0x2a64] ss:$8 sps:$4 sm:$0xff]   ;;  %v19646_v11 = vld [vmem:[%s21987_s4 + $0xa60] ss:$8 sps:$4 sm:$0xff]  }
 0x2ae   : > { %15188 = vmatprep.subr.bf16.mxu0 %v19579_v12  ;;  %v19649_v12 = vld [vmem:[%s21987_s4 + $0x2a60] ss:$8 sps:$4 sm:$0xff]  }
 0x2b0   : > { %13877 = vmatpush1.bf16.msra.mxu1 %v19574_v19  ;;  %v19654_v19 = vld [vmem:[%s21987_s4 + $0xa74] ss:$8 sps:$4 sm:$0xff]  }
 0x2b1   : > { %15189 = vmatpush1.bf16.msra.mxu0 %v19577_v20  ;;  %13878 = vmatprep.subr.bf16.mxu1 %v19582_v21  ;;  %v19657_v20 = vld [vmem:[%s21987_s4 + $0x2a74] ss:$8 sps:$4 sm:$0xff]   ;;  %v19652_v21 = vld [vmem:[%s21987_s4 + $0xa70] ss:$8 sps:$4 sm:$0xff]  }
 0x2b2   : > { %15190 = vmatprep.subr.bf16.mxu0 %v19585_v22  ;;  %v19655_v22 = vld [vmem:[%s21987_s4 + $0x2a70] ss:$8 sps:$4 sm:$0xff]  }
 0x2b4   : > { %13879 = vmatpush1.bf16.msra.mxu1 %v19580_v42  ;;  %v19660_v42 = vld [vmem:[%s21987_s4 + $0xa84] ss:$8 sps:$4 sm:$0xff]  }
 0x2b5   : > { %15191 = vmatpush1.bf16.msra.mxu0 %v19583_v23  ;;  %13880 = vmatprep.subr.bf16.mxu1 %v19588_v2  ;;  %v19663_v23 = vld [vmem:[%s21987_s4 + $0x2a84] ss:$8 sps:$4 sm:$0xff]   ;;  %v19658_v2 = vld [vmem:[%s21987_s4 + $0xa80] ss:$8 sps:$4 sm:$0xff]  }
 0x2b6   : > { %15192 = vmatprep.subr.bf16.mxu0 %v19591_v24  ;;  %v19661_v24 = vld [vmem:[%s21987_s4 + $0x2a80] ss:$8 sps:$4 sm:$0xff]  }
 0x2b8   : > { %13881 = vmatpush1.bf16.msra.mxu1 %v19586_v13  ;;  %v19666_v13 = vld [vmem:[%s21987_s4 + $0xa94] ss:$8 sps:$4 sm:$0xff]  }
 0x2b9   : > { %15193 = vmatpush1.bf16.msra.mxu0 %v19589_v53  ;;  %13882 = vmatprep.subr.bf16.mxu1 %v19594_v59  ;;  %v19669_v53 = vld [vmem:[%s21987_s4 + $0x2a94] ss:$8 sps:$4 sm:$0xff]   ;;  %v19664_v59 = vld [vmem:[%s21987_s4 + $0xa90] ss:$8 sps:$4 sm:$0xff]  }
 0x2ba   : > { %15194 = vmatprep.subr.bf16.mxu0 %v19597_v57  ;;  %v19667_v57 = vld [vmem:[%s21987_s4 + $0x2a90] ss:$8 sps:$4 sm:$0xff]  }
 0x2bc   : > { %13883 = vmatpush1.bf16.msra.mxu1 %v19592_v27  ;;  %v19672_v27 = vld [vmem:[%s21987_s4 + $0xaa4] ss:$8 sps:$4 sm:$0xff]  }
 0x2bd   : > { %15195 = vmatpush1.bf16.msra.mxu0 %v19595_v28  ;;  %13884 = vmatprep.subr.bf16.mxu1 %v19600_v29  ;;  %v19675_v28 = vld [vmem:[%s21987_s4 + $0x2aa4] ss:$8 sps:$4 sm:$0xff]   ;;  %v19670_v29 = vld [vmem:[%s21987_s4 + $0xaa0] ss:$8 sps:$4 sm:$0xff]  }
 0x2be   : > { %15196 = vmatprep.subr.bf16.mxu0 %v19603_v30  ;;  %v19673_v30 = vld [vmem:[%s21987_s4 + $0x2aa0] ss:$8 sps:$4 sm:$0xff]  }
 0x2c0   : > { %13885 = vmatpush1.bf16.msra.mxu1 %v19598_v18  ;;  %v19684_v18 = vld [vmem:[%s21987_s4 + $0xac4] ss:$8 sps:$4 sm:$0xff]  }
 0x2c1   : > { %15197 = vmatpush1.bf16.msra.mxu0 %v19601_v38  ;;  %13886 = vmatprep.subr.bf16.mxu1 %v19606_v60  ;;  %v19687_v38 = vld [vmem:[%s21987_s4 + $0x2ac4] ss:$8 sps:$4 sm:$0xff]   ;;  %v19682_v60 = vld [vmem:[%s21987_s4 + $0xac0] ss:$8 sps:$4 sm:$0xff]  }
 0x2c2   : > { %15198 = vmatprep.subr.bf16.mxu0 %v19609_v43  ;;  %v19685_v43 = vld [vmem:[%s21987_s4 + $0x2ac0] ss:$8 sps:$4 sm:$0xff]  }
 0x2c4   : > { %13887 = vmatpush1.bf16.msra.mxu1 %v19604_v31  ;;  %v19690_v31 = vld [vmem:[%s21987_s4 + $0xad4] ss:$8 sps:$4 sm:$0xff]  }
 0x2c5   : > { %15199 = vmatpush1.bf16.msra.mxu0 %v19607_v25  ;;  %13897 = vmatprep.subr.bf16.mxu1 %v19612_v15  ;;  %v19693_v25 = vld [vmem:[%s21987_s4 + $0x2ad4] ss:$8 sps:$4 sm:$0xff]   ;;  %v19688_v15 = vld [vmem:[%s21987_s4 + $0xad0] ss:$8 sps:$4 sm:$0xff]  }
 0x2c6   : > { %15209 = vmatprep.subr.bf16.mxu0 %v19615_v46  ;;  %v19691_v46 = vld [vmem:[%s21987_s4 + $0x2ad0] ss:$8 sps:$4 sm:$0xff]  }
 0x2c7   : > { %13889 = vmatmul.mubr.bf16.vlgmr.msra.gmra.mrb[0].mxu1 %v2478_v37  ;;  %v19694_v37 = vld [vmem:[%s21987_s4 + $0xae0] ss:$8 sps:$4 sm:$0xff]  }
 0x2c8   : > { %15201 = vmatmul.mubr.bf16.vlgmr.msra.gmra.mrb[0].mxu0 %v2870_v48  ;;  %13898 = vmatpush1.bf16.msra.mxu1 %v19610_v17  ;;  %v19697_v48 = vld [vmem:[%s21987_s4 + $0x2ae0] ss:$8 sps:$4 sm:$0xff]   ;;  %v19702_v17 = vld [vmem:[%s21987_s4 + $0xaf4] ss:$8 sps:$4 sm:$0xff]  }
 0x2c9   : > { %15210 = vmatpush1.bf16.msra.mxu0 %v19613_v49  ;;  %13899 = vmatprep.subr.bf16.mxu1 %v19618_v51  ;;  %v19705_v49 = vld [vmem:[%s21987_s4 + $0x2af4] ss:$8 sps:$4 sm:$0xff]   ;;  %v19700_v51 = vld [vmem:[%s21987_s4 + $0xaf0] ss:$8 sps:$4 sm:$0xff]  }
 0x2ca   : > { %15211 = vmatprep.subr.bf16.mxu0 %v19621_v52  ;;  %13929 = vmatprep.mubr.bf16.mxu1 %v22852_v54  ;;  %v19703_v52 = vld [vmem:[%s21987_s4 + $0x2af0] ss:$8 sps:$4 sm:$0xff]  }
 0x2cb   : > { %15241 = vmatprep.mubr.bf16.mxu0 %v22855_v33 }
 0x2cc   : > { %13900 = vmatpush1.bf16.msra.mxu1 %v19616_v34  ;;  %v19709_v34 = vld [vmem:[%s21987_s4 + $0xb04] ss:$8 sps:$4 sm:$0xff]  }
 0x2cd   : > { %15212 = vmatpush1.bf16.msra.mxu0 %v19619_v55  ;;  %13901 = vmatprep.subr.bf16.mxu1 %v19624_v39  ;;  %v19713_v55 = vld [vmem:[%s21987_s4 + $0x2b04] ss:$8 sps:$4 sm:$0xff]   ;;  %v22921_v39 = vrot.slane %v22830_v14, %v22061_v50  ;;  %v2481_v14 = vcombine.high %v22852_v54, %v22852_v54 }
 0x2ce   : > { %15213 = vmatprep.subr.bf16.mxu0 %v19627_v40  ;;  %v22925_v40 = vrot.slane %v22833_v45, %v22061_v50  ;;  %v19714_v45 = vld [vmem:[%s21987_s4 + $0xb10] ss:$8 sps:$4 sm:$0xff]   ;;  %v19722_v54 = vld [vmem:[%s21987_s4 + $0xb24] ss:$8 sps:$4 sm:$0xff]  }
 0x2d0   : > { %13902 = vmatpush1.bf16.msra.mxu1 %v19622_v61  ;;  %v19707_v61 = vld [vmem:[%s21987_s4 + $0xb00] ss:$8 sps:$4 sm:$0xff]  }
 0x2d1   : > { %15214 = vmatpush1.bf16.msra.mxu0 %v19625_v62  ;;  %13903 = vmatprep.subr.bf16.mxu1 %v19630_v63  ;;  %v19711_v62 = vld [vmem:[%s21987_s4 + $0x2b00] ss:$8 sps:$4 sm:$0xff]   ;;  %v19716_v63 = vld [vmem:[%s21987_s4 + $0xb14] ss:$8 sps:$4 sm:$0xff]  }
 0x2d2   : > { %15215 = vmatprep.subr.bf16.mxu0 %v19633_v0  ;;  %v19719_v0 = vld [vmem:[%s21987_s4 + $0x2b14] ss:$8 sps:$4 sm:$0xff]  }
 0x2d4   : > { %13904 = vmatpush1.bf16.msra.mxu1 %v19628_v41  ;;  %v2873_v41 = vcombine.high %v22855_v33, %v22855_v33  ;;  %v19720_v33 = vld [vmem:[%s21987_s4 + $0xb20] ss:$8 sps:$4 sm:$0xff]  }
 0x2d5   : > { %15216 = vmatpush1.bf16.msra.mxu0 %v19631_v1  ;;  %13905 = vmatprep.subr.bf16.mxu1 %v19636_v56  ;;  %v19717_v1 = vld [vmem:[%s21987_s4 + $0x2b10] ss:$8 sps:$4 sm:$0xff]   ;;  %v19725_v56 = vld [vmem:[%s21987_s4 + $0x2b24] ss:$8 sps:$4 sm:$0xff]  }
 0x2d6   : > { %15217 = vmatprep.subr.bf16.mxu0 %v19639_v3  ;;  %v19723_v3 = vld [vmem:[%s21987_s4 + $0x2b20] ss:$8 sps:$4 sm:$0xff]  }
 0x2d8   : > { %13906 = vmatpush1.bf16.msra.mxu1 %v19634_v58  ;;  %v19728_v58 = vld [vmem:[%s21987_s4 + $0xb34] ss:$8 sps:$4 sm:$0xff]  }
 0x2d9   : > { %15218 = vmatpush1.bf16.msra.mxu0 %v19637_v4  ;;  %13907 = vmatprep.subr.bf16.mxu1 %v19642_v5  ;;  %v19731_v4 = vld [vmem:[%s21987_s4 + $0x2b34] ss:$8 sps:$4 sm:$0xff]   ;;  %v19726_v5 = vld [vmem:[%s21987_s4 + $0xb30] ss:$8 sps:$4 sm:$0xff]  }
 0x2da   : > { %15219 = vmatprep.subr.bf16.mxu0 %v19645_v6  ;;  %v19729_v6 = vld [vmem:[%s21987_s4 + $0x2b30] ss:$8 sps:$4 sm:$0xff]  }
 0x2dc   : > { %13908 = vmatpush1.bf16.msra.mxu1 %v19640_v7  ;;  %v19734_v7 = vld [vmem:[%s21987_s4 + $0xb44] ss:$8 sps:$4 sm:$0xff]  }
 0x2dd   : > { %15220 = vmatpush1.bf16.msra.mxu0 %v19643_v8  ;;  %13909 = vmatprep.subr.bf16.mxu1 %v19648_v9  ;;  %v19737_v8 = vld [vmem:[%s21987_s4 + $0x2b44] ss:$8 sps:$4 sm:$0xff]   ;;  %v19732_v9 = vld [vmem:[%s21987_s4 + $0xb40] ss:$8 sps:$4 sm:$0xff]  }
 0x2de   : > { %15221 = vmatprep.subr.bf16.mxu0 %v19651_v10  ;;  %v19735_v10 = vld [vmem:[%s21987_s4 + $0x2b40] ss:$8 sps:$4 sm:$0xff]  }
 0x2e0   : > { %13910 = vmatpush1.bf16.msra.mxu1 %v19646_v11  ;;  %v19740_v11 = vld [vmem:[%s21987_s4 + $0xb54] ss:$8 sps:$4 sm:$0xff]  }
 0x2e1   : > { %15222 = vmatpush1.bf16.msra.mxu0 %v19649_v12  ;;  %13911 = vmatprep.subr.bf16.mxu1 %v19654_v19  ;;  %v19743_v12 = vld [vmem:[%s21987_s4 + $0x2b54] ss:$8 sps:$4 sm:$0xff]   ;;  %v19738_v19 = vld [vmem:[%s21987_s4 + $0xb50] ss:$8 sps:$4 sm:$0xff]  }
 0x2e2   : > { %15223 = vmatprep.subr.bf16.mxu0 %v19657_v20  ;;  %v19741_v20 = vld [vmem:[%s21987_s4 + $0x2b50] ss:$8 sps:$4 sm:$0xff]  }
 0x2e4   : > { %13912 = vmatpush1.bf16.msra.mxu1 %v19652_v21  ;;  %v19746_v21 = vld [vmem:[%s21987_s4 + $0xb64] ss:$8 sps:$4 sm:$0xff]  }
 0x2e5   : > { %15224 = vmatpush1.bf16.msra.mxu0 %v19655_v22  ;;  %13913 = vmatprep.subr.bf16.mxu1 %v19660_v42  ;;  %v19749_v22 = vld [vmem:[%s21987_s4 + $0x2b64] ss:$8 sps:$4 sm:$0xff]   ;;  %v19744_v42 = vld [vmem:[%s21987_s4 + $0xb60] ss:$8 sps:$4 sm:$0xff]  }
 0x2e6   : > { %15225 = vmatprep.subr.bf16.mxu0 %v19663_v23  ;;  %v19747_v23 = vld [vmem:[%s21987_s4 + $0x2b60] ss:$8 sps:$4 sm:$0xff]  }
 0x2e8   : > { %13914 = vmatpush1.bf16.msra.mxu1 %v19658_v2  ;;  %v19752_v2 = vld [vmem:[%s21987_s4 + $0xb74] ss:$8 sps:$4 sm:$0xff]  }
 0x2e9   : > { %15226 = vmatpush1.bf16.msra.mxu0 %v19661_v24  ;;  %13915 = vmatprep.subr.bf16.mxu1 %v19666_v13  ;;  %v19755_v24 = vld [vmem:[%s21987_s4 + $0x2b74] ss:$8 sps:$4 sm:$0xff]   ;;  %v19750_v13 = vld [vmem:[%s21987_s4 + $0xb70] ss:$8 sps:$4 sm:$0xff]  }
 0x2ea   : > { %15227 = vmatprep.subr.bf16.mxu0 %v19669_v53  ;;  %v19753_v53 = vld [vmem:[%s21987_s4 + $0x2b70] ss:$8 sps:$4 sm:$0xff]  }
 0x2ec   : > { %13916 = vmatpush1.bf16.msra.mxu1 %v19664_v59  ;;  %v19758_v59 = vld [vmem:[%s21987_s4 + $0xb84] ss:$8 sps:$4 sm:$0xff]  }
 0x2ed   : > { %15228 = vmatpush1.bf16.msra.mxu0 %v19667_v57  ;;  %13917 = vmatprep.subr.bf16.mxu1 %v19672_v27  ;;  %v19761_v57 = vld [vmem:[%s21987_s4 + $0x2b84] ss:$8 sps:$4 sm:$0xff]   ;;  %v19756_v27 = vld [vmem:[%s21987_s4 + $0xb80] ss:$8 sps:$4 sm:$0xff]  }
 0x2ee   : > { %15229 = vmatprep.subr.bf16.mxu0 %v19675_v28  ;;  %v19759_v28 = vld [vmem:[%s21987_s4 + $0x2b80] ss:$8 sps:$4 sm:$0xff]  }
 0x2f0   : > { %13918 = vmatpush1.bf16.msra.mxu1 %v19670_v29  ;;  %v19764_v29 = vld [vmem:[%s21987_s4 + $0xb94] ss:$8 sps:$4 sm:$0xff]  }
 0x2f1   : > { %15230 = vmatpush1.bf16.msra.mxu0 %v19673_v30  ;;  %13919 = vmatprep.subr.bf16.mxu1 %v19678_v16  ;;  %v19767_v30 = vld [vmem:[%s21987_s4 + $0x2b94] ss:$8 sps:$4 sm:$0xff]   ;;  %v19762_v16 = vld [vmem:[%s21987_s4 + $0xb90] ss:$8 sps:$4 sm:$0xff]  }
 0x2f2   : > { %15231 = vmatprep.subr.bf16.mxu0 %v19681_v32  ;;  %v19765_v32 = vld [vmem:[%s21987_s4 + $0x2b90] ss:$8 sps:$4 sm:$0xff]  }
 0x2f4   : > { %13920 = vmatpush1.bf16.msra.mxu1 %v19676_v35  ;;  %v19770_v35 = vld [vmem:[%s21987_s4 + $0xba4] ss:$8 sps:$4 sm:$0xff]  }
 0x2f5   : > { %15232 = vmatpush1.bf16.msra.mxu0 %v19679_v36  ;;  %13921 = vmatprep.subr.bf16.mxu1 %v19684_v18  ;;  %v19773_v36 = vld [vmem:[%s21987_s4 + $0x2ba4] ss:$8 sps:$4 sm:$0xff]   ;;  %v19768_v18 = vld [vmem:[%s21987_s4 + $0xba0] ss:$8 sps:$4 sm:$0xff]  }
 0x2f6   : > { %15233 = vmatprep.subr.bf16.mxu0 %v19687_v38  ;;  %v19771_v38 = vld [vmem:[%s21987_s4 + $0x2ba0] ss:$8 sps:$4 sm:$0xff]  }
 0x2f8   : > { %13922 = vmatpush1.bf16.msra.mxu1 %v19682_v60  ;;  %v19776_v60 = vld [vmem:[%s21987_s4 + $0xbb4] ss:$8 sps:$4 sm:$0xff]  }
 0x2f9   : > { %15234 = vmatpush1.bf16.msra.mxu0 %v19685_v43  ;;  %13923 = vmatprep.subr.bf16.mxu1 %v19690_v31  ;;  %v19779_v43 = vld [vmem:[%s21987_s4 + $0x2bb4] ss:$8 sps:$4 sm:$0xff]   ;;  %v19774_v31 = vld [vmem:[%s21987_s4 + $0xbb0] ss:$8 sps:$4 sm:$0xff]  }
 0x2fa   : > { %15235 = vmatprep.subr.bf16.mxu0 %v19693_v25  ;;  %v19777_v25 = vld [vmem:[%s21987_s4 + $0x2bb0] ss:$8 sps:$4 sm:$0xff]  }
 0x2fc   : > { %13924 = vmatpush1.bf16.msra.mxu1 %v19688_v15  ;;  %v19782_v15 = vld [vmem:[%s21987_s4 + $0xbc4] ss:$8 sps:$4 sm:$0xff]  }
 0x2fd   : > { %15236 = vmatpush1.bf16.msra.mxu0 %v19691_v46  ;;  %13925 = vmatprep.subr.bf16.mxu1 %v19696_v26  ;;  %v19785_v46 = vld [vmem:[%s21987_s4 + $0x2bc4] ss:$8 sps:$4 sm:$0xff]   ;;  %v19780_v26 = vld [vmem:[%s21987_s4 + $0xbc0] ss:$8 sps:$4 sm:$0xff]  }
 0x2fe   : > { %15237 = vmatprep.subr.bf16.mxu0 %v19699_v47  ;;  %v19783_v47 = vld [vmem:[%s21987_s4 + $0x2bc0] ss:$8 sps:$4 sm:$0xff]  }
 0x300   : > { %13926 = vmatpush1.bf16.msra.mxu1 %v19694_v37  ;;  %v19788_v37 = vld [vmem:[%s21987_s4 + $0xbd4] ss:$8 sps:$4 sm:$0xff]  }
 0x301   : > { %15238 = vmatpush1.bf16.msra.mxu0 %v19697_v48  ;;  %13927 = vmatprep.subr.bf16.mxu1 %v19702_v17  ;;  %v19791_v48 = vld [vmem:[%s21987_s4 + $0x2bd4] ss:$8 sps:$4 sm:$0xff]   ;;  %v19786_v17 = vld [vmem:[%s21987_s4 + $0xbd0] ss:$8 sps:$4 sm:$0xff]  }
 0x302   : > { %15239 = vmatprep.subr.bf16.mxu0 %v19705_v49  ;;  %v19789_v49 = vld [vmem:[%s21987_s4 + $0x2bd0] ss:$8 sps:$4 sm:$0xff]  }
 0x304   : > { %13928 = vmatpush1.bf16.msra.mxu1 %v19700_v51  ;;  %v19794_v51 = vld [vmem:[%s21987_s4 + $0xbe4] ss:$8 sps:$4 sm:$0xff]  }
 0x305   : > { %15240 = vmatpush1.bf16.msra.mxu0 %v19703_v52  ;;  %13938 = vmatprep.subr.bf16.mxu1 %v19709_v34  ;;  %v19797_v52 = vld [vmem:[%s21987_s4 + $0x2be4] ss:$8 sps:$4 sm:$0xff]   ;;  %v22990_v34 = vld.sshfl [vmem:[%s22000_s6 + $0x18] sm:$0xff pattern:$0x75316420] }
 0x306   : > { %15250 = vmatprep.subr.bf16.mxu0 %v19713_v55  ;;  %v22993_v55 = vld.sshfl [vmem:[%s22000_s6 + $0x58] sm:$0xff pattern:$0x75316420] }
 0x307   : > { %13930 = vmatmul.mubr.bf16.vlgmr.msra.gmra.mrb[0].mxu1 %v22921_v39 }
 0x308   : > { %15242 = vmatmul.mubr.bf16.vlgmr.msra.gmra.mrb[0].mxu0 %v22925_v40  ;;  %13939 = vmatpush1.bf16.msra.mxu1 %v19707_v61  ;;  %v19792_v61 = vld [vmem:[%s21987_s4 + $0xbe0] ss:$8 sps:$4 sm:$0xff]  }
 0x309   : > { %15251 = vmatpush1.bf16.msra.mxu0 %v19711_v62  ;;  %13940 = vmatprep.subr.bf16.mxu1 %v19716_v63  ;;  %v19795_v62 = vld [vmem:[%s21987_s4 + $0x2be0] ss:$8 sps:$4 sm:$0xff]   ;;  %v19800_v63 = vld [vmem:[%s21987_s4 + $0xbf4] ss:$8 sps:$4 sm:$0xff]  }
 0x30a   : > { %15252 = vmatprep.subr.bf16.mxu0 %v19719_v0  ;;  %13970 = vmatprep.mubr.bf16.mxu1 %v2481_v14  ;;  %v19803_v0 = vld [vmem:[%s21987_s4 + $0x2bf4] ss:$8 sps:$4 sm:$0xff]   ;;  %v19798_v14 = vld [vmem:[%s21987_s4 + $0xbf0] ss:$8 sps:$4 sm:$0xff]  }
 0x30b   : > { %15282 = vmatprep.mubr.bf16.mxu0 %v2873_v41  ;;  %v19801_v41 = vld [vmem:[%s21987_s4 + $0x2bf0] ss:$8 sps:$4 sm:$0xff]  }
 0x30c   : > { %13941 = vmatpush1.bf16.msra.mxu1 %v19714_v45  ;;  %v19806_v45 = vld [vmem:[%s21987_s4 + $0xc04] ss:$8 sps:$4 sm:$0xff]  }
 0x30d   : > { %15253 = vmatpush1.bf16.msra.mxu0 %v19717_v1  ;;  %13942 = vmatprep.subr.bf16.mxu1 %v19722_v54  ;;  %v19809_v1 = vld [vmem:[%s21987_s4 + $0x2c04] ss:$8 sps:$4 sm:$0xff]   ;;  %v2497_v54 = vcombine.high %v22990_v34, %v22990_v34 }
 0x30e   : > { %15254 = vmatprep.subr.bf16.mxu0 %v19725_v56  ;;  %v2889_v56 = vcombine.high %v22993_v55, %v22993_v55 }
 0x310   : > { %13943 = vmatpush1.bf16.msra.mxu1 %v19720_v33  ;;  %v2479_v33 = vcombine.high %v22921_v39, %v22921_v39  ;;  %v23019_v39 = vrot.slane %v2889_v56, %v22061_v50  ;;  %v19893_v56 = vld [vmem:[%s21987_s4 + $0x2ce4] ss:$8 sps:$4 sm:$0xff]  }
 0x311   : > { %15255 = vmatpush1.bf16.msra.mxu0 %v19723_v3  ;;  %13944 = vmatprep.subr.bf16.mxu1 %v19728_v58  ;;  %v2871_v3 = vcombine.high %v22925_v40, %v22925_v40  ;;  %v19804_v58 = vld [vmem:[%s21987_s4 + $0xc00] ss:$8 sps:$4 sm:$0xff]   ;;  %v19810_v40 = vld [vmem:[%s21987_s4 + $0xc10] ss:$8 sps:$4 sm:$0xff]  }
 0x312   : > { %15256 = vmatprep.subr.bf16.mxu0 %v19731_v4  ;;  %v19807_v4 = vld [vmem:[%s21987_s4 + $0x2c00] ss:$8 sps:$4 sm:$0xff]  }
 0x314   : > { %13945 = vmatpush1.bf16.msra.mxu1 %v19726_v5  ;;  %v19812_v5 = vld [vmem:[%s21987_s4 + $0xc14] ss:$8 sps:$4 sm:$0xff]  }
 0x315   : > { %15257 = vmatpush1.bf16.msra.mxu0 %v19729_v6  ;;  %13946 = vmatprep.subr.bf16.mxu1 %v19734_v7  ;;  %v19815_v6 = vld [vmem:[%s21987_s4 + $0x2c14] ss:$8 sps:$4 sm:$0xff]   ;;  %v23016_v7 = vrot.slane %v2497_v54, %v22061_v50  ;;  %v19890_v54 = vld [vmem:[%s21987_s4 + $0xce4] ss:$8 sps:$4 sm:$0xff]  }
 0x316   : > { %15258 = vmatprep.subr.bf16.mxu0 %v19737_v8  ;;  %v19813_v8 = vld [vmem:[%s21987_s4 + $0x2c10] ss:$8 sps:$4 sm:$0xff]  }
 0x318   : > { %13947 = vmatpush1.bf16.msra.mxu1 %v19732_v9  ;;  %v19818_v9 = vld [vmem:[%s21987_s4 + $0xc24] ss:$8 sps:$4 sm:$0xff]  }
 0x319   : > { %15259 = vmatpush1.bf16.msra.mxu0 %v19735_v10  ;;  %13948 = vmatprep.subr.bf16.mxu1 %v19740_v11  ;;  %v19821_v10 = vld [vmem:[%s21987_s4 + $0x2c24] ss:$8 sps:$4 sm:$0xff]   ;;  %v19816_v11 = vld [vmem:[%s21987_s4 + $0xc20] ss:$8 sps:$4 sm:$0xff]  }
 0x31a   : > { %15260 = vmatprep.subr.bf16.mxu0 %v19743_v12  ;;  %v19819_v12 = vld [vmem:[%s21987_s4 + $0x2c20] ss:$8 sps:$4 sm:$0xff]  }
 0x31c   : > { %13949 = vmatpush1.bf16.msra.mxu1 %v19738_v19  ;;  %v19824_v19 = vld [vmem:[%s21987_s4 + $0xc34] ss:$8 sps:$4 sm:$0xff]  }
 0x31d   : > { %15261 = vmatpush1.bf16.msra.mxu0 %v19741_v20  ;;  %13950 = vmatprep.subr.bf16.mxu1 %v19746_v21  ;;  %v19827_v20 = vld [vmem:[%s21987_s4 + $0x2c34] ss:$8 sps:$4 sm:$0xff]   ;;  %v19822_v21 = vld [vmem:[%s21987_s4 + $0xc30] ss:$8 sps:$4 sm:$0xff]  }
 0x31e   : > { %15262 = vmatprep.subr.bf16.mxu0 %v19749_v22  ;;  %v19825_v22 = vld [vmem:[%s21987_s4 + $0x2c30] ss:$8 sps:$4 sm:$0xff]  }
 0x320   : > { %13951 = vmatpush1.bf16.msra.mxu1 %v19744_v42  ;;  %v19830_v42 = vld [vmem:[%s21987_s4 + $0xc44] ss:$8 sps:$4 sm:$0xff]  }
 0x321   : > { %15263 = vmatpush1.bf16.msra.mxu0 %v19747_v23  ;;  %13952 = vmatprep.subr.bf16.mxu1 %v19752_v2  ;;  %v19833_v23 = vld [vmem:[%s21987_s4 + $0x2c44] ss:$8 sps:$4 sm:$0xff]   ;;  %v19828_v2 = vld [vmem:[%s21987_s4 + $0xc40] ss:$8 sps:$4 sm:$0xff]  }
 0x322   : > { %15264 = vmatprep.subr.bf16.mxu0 %v19755_v24  ;;  %v19831_v24 = vld [vmem:[%s21987_s4 + $0x2c40] ss:$8 sps:$4 sm:$0xff]  }
 0x324   : > { %13953 = vmatpush1.bf16.msra.mxu1 %v19750_v13  ;;  %v19836_v13 = vld [vmem:[%s21987_s4 + $0xc54] ss:$8 sps:$4 sm:$0xff]  }
 0x325   : > { %15265 = vmatpush1.bf16.msra.mxu0 %v19753_v53  ;;  %13954 = vmatprep.subr.bf16.mxu1 %v19758_v59  ;;  %v19839_v53 = vld [vmem:[%s21987_s4 + $0x2c54] ss:$8 sps:$4 sm:$0xff]   ;;  %v19834_v59 = vld [vmem:[%s21987_s4 + $0xc50] ss:$8 sps:$4 sm:$0xff]  }
 0x326   : > { %15266 = vmatprep.subr.bf16.mxu0 %v19761_v57  ;;  %v19837_v57 = vld [vmem:[%s21987_s4 + $0x2c50] ss:$8 sps:$4 sm:$0xff]  }
 0x328   : > { %13955 = vmatpush1.bf16.msra.mxu1 %v19756_v27  ;;  %v19842_v27 = vld [vmem:[%s21987_s4 + $0xc64] ss:$8 sps:$4 sm:$0xff]  }
 0x329   : > { %15267 = vmatpush1.bf16.msra.mxu0 %v19759_v28  ;;  %13956 = vmatprep.subr.bf16.mxu1 %v19764_v29  ;;  %v19845_v28 = vld [vmem:[%s21987_s4 + $0x2c64] ss:$8 sps:$4 sm:$0xff]   ;;  %v19840_v29 = vld [vmem:[%s21987_s4 + $0xc60] ss:$8 sps:$4 sm:$0xff]  }
 0x32a   : > { %15268 = vmatprep.subr.bf16.mxu0 %v19767_v30  ;;  %v19843_v30 = vld [vmem:[%s21987_s4 + $0x2c60] ss:$8 sps:$4 sm:$0xff]  }
 0x32c   : > { %13957 = vmatpush1.bf16.msra.mxu1 %v19762_v16  ;;  %v19848_v16 = vld [vmem:[%s21987_s4 + $0xc74] ss:$8 sps:$4 sm:$0xff]  }
 0x32d   : > { %15269 = vmatpush1.bf16.msra.mxu0 %v19765_v32  ;;  %13958 = vmatprep.subr.bf16.mxu1 %v19770_v35  ;;  %v19851_v32 = vld [vmem:[%s21987_s4 + $0x2c74] ss:$8 sps:$4 sm:$0xff]   ;;  %v19846_v35 = vld [vmem:[%s21987_s4 + $0xc70] ss:$8 sps:$4 sm:$0xff]  }
 0x32e   : > { %15270 = vmatprep.subr.bf16.mxu0 %v19773_v36  ;;  %v19849_v36 = vld [vmem:[%s21987_s4 + $0x2c70] ss:$8 sps:$4 sm:$0xff]  }
 0x330   : > { %13959 = vmatpush1.bf16.msra.mxu1 %v19768_v18  ;;  %v19854_v18 = vld [vmem:[%s21987_s4 + $0xc84] ss:$8 sps:$4 sm:$0xff]  }
 0x331   : > { %15271 = vmatpush1.bf16.msra.mxu0 %v19771_v38  ;;  %13960 = vmatprep.subr.bf16.mxu1 %v19776_v60  ;;  %v19857_v38 = vld [vmem:[%s21987_s4 + $0x2c84] ss:$8 sps:$4 sm:$0xff]   ;;  %v19852_v60 = vld [vmem:[%s21987_s4 + $0xc80] ss:$8 sps:$4 sm:$0xff]  }
 0x332   : > { %15272 = vmatprep.subr.bf16.mxu0 %v19779_v43  ;;  %v19855_v43 = vld [vmem:[%s21987_s4 + $0x2c80] ss:$8 sps:$4 sm:$0xff]  }
 0x334   : > { %13961 = vmatpush1.bf16.msra.mxu1 %v19774_v31  ;;  %v19860_v31 = vld [vmem:[%s21987_s4 + $0xc94] ss:$8 sps:$4 sm:$0xff]  }
 0x335   : > { %15273 = vmatpush1.bf16.msra.mxu0 %v19777_v25  ;;  %13962 = vmatprep.subr.bf16.mxu1 %v19782_v15  ;;  %v19863_v25 = vld [vmem:[%s21987_s4 + $0x2c94] ss:$8 sps:$4 sm:$0xff]   ;;  %v19858_v15 = vld [vmem:[%s21987_s4 + $0xc90] ss:$8 sps:$4 sm:$0xff]  }
 0x336   : > { %15274 = vmatprep.subr.bf16.mxu0 %v19785_v46  ;;  %v19861_v46 = vld [vmem:[%s21987_s4 + $0x2c90] ss:$8 sps:$4 sm:$0xff]  }
 0x338   : > { %13963 = vmatpush1.bf16.msra.mxu1 %v19780_v26  ;;  %v19866_v26 = vld [vmem:[%s21987_s4 + $0xca4] ss:$8 sps:$4 sm:$0xff]  }
 0x339   : > { %15275 = vmatpush1.bf16.msra.mxu0 %v19783_v47  ;;  %13964 = vmatprep.subr.bf16.mxu1 %v19788_v37  ;;  %v19869_v47 = vld [vmem:[%s21987_s4 + $0x2ca4] ss:$8 sps:$4 sm:$0xff]   ;;  %v19864_v37 = vld [vmem:[%s21987_s4 + $0xca0] ss:$8 sps:$4 sm:$0xff]  }
 0x33a   : > { %15276 = vmatprep.subr.bf16.mxu0 %v19791_v48  ;;  %v19867_v48 = vld [vmem:[%s21987_s4 + $0x2ca0] ss:$8 sps:$4 sm:$0xff]  }
 0x33c   : > { %13965 = vmatpush1.bf16.msra.mxu1 %v19786_v17  ;;  %v19872_v17 = vld [vmem:[%s21987_s4 + $0xcb4] ss:$8 sps:$4 sm:$0xff]  }
 0x33d   : > { %15277 = vmatpush1.bf16.msra.mxu0 %v19789_v49  ;;  %13966 = vmatprep.subr.bf16.mxu1 %v19794_v51  ;;  %v19875_v49 = vld [vmem:[%s21987_s4 + $0x2cb4] ss:$8 sps:$4 sm:$0xff]   ;;  %v19870_v51 = vld [vmem:[%s21987_s4 + $0xcb0] ss:$8 sps:$4 sm:$0xff]  }
 0x33e   : > { %15278 = vmatprep.subr.bf16.mxu0 %v19797_v52  ;;  %v19873_v52 = vld [vmem:[%s21987_s4 + $0x2cb0] ss:$8 sps:$4 sm:$0xff]  }
 0x340   : > { %13967 = vmatpush1.bf16.msra.mxu1 %v19792_v61  ;;  %v19878_v61 = vld [vmem:[%s21987_s4 + $0xcc4] ss:$8 sps:$4 sm:$0xff]  }
 0x341   : > { %15279 = vmatpush1.bf16.msra.mxu0 %v19795_v62  ;;  %13968 = vmatprep.subr.bf16.mxu1 %v19800_v63  ;;  %v19881_v62 = vld [vmem:[%s21987_s4 + $0x2cc4] ss:$8 sps:$4 sm:$0xff]   ;;  %v19876_v63 = vld [vmem:[%s21987_s4 + $0xcc0] ss:$8 sps:$4 sm:$0xff]  }
 0x342   : > { %15280 = vmatprep.subr.bf16.mxu0 %v19803_v0  ;;  %v19879_v0 = vld [vmem:[%s21987_s4 + $0x2cc0] ss:$8 sps:$4 sm:$0xff]  }
 0x344   : > { %13969 = vmatpush1.bf16.msra.mxu1 %v19798_v14  ;;  %v19884_v14 = vld [vmem:[%s21987_s4 + $0xcd4] ss:$8 sps:$4 sm:$0xff]  }
 0x345   : > { %15281 = vmatpush1.bf16.msra.mxu0 %v19801_v41  ;;  %13979 = vmatprep.subr.bf16.mxu1 %v19806_v45  ;;  %v19887_v41 = vld [vmem:[%s21987_s4 + $0x2cd4] ss:$8 sps:$4 sm:$0xff]   ;;  %v19882_v45 = vld [vmem:[%s21987_s4 + $0xcd0] ss:$8 sps:$4 sm:$0xff]  }
 0x346   : > { %15291 = vmatprep.subr.bf16.mxu0 %v19809_v1  ;;  %v19885_v1 = vld [vmem:[%s21987_s4 + $0x2cd0] ss:$8 sps:$4 sm:$0xff]  }
 0x347   : > { %13971 = vmatmul.mubr.bf16.vlgmr.msra.gmra.mrb[0].mxu1 %v2479_v33  ;;  %v19888_v33 = vld [vmem:[%s21987_s4 + $0xce0] ss:$8 sps:$4 sm:$0xff]  }
 0x348   : > { %15283 = vmatmul.mubr.bf16.vlgmr.msra.gmra.mrb[0].mxu0 %v2871_v3  ;;  %13980 = vmatpush1.bf16.msra.mxu1 %v19804_v58  ;;  %v19891_v3 = vld [vmem:[%s21987_s4 + $0x2ce0] ss:$8 sps:$4 sm:$0xff]   ;;  %v19896_v58 = vld [vmem:[%s21987_s4 + $0xcf4] ss:$8 sps:$4 sm:$0xff]  }
 0x349   : > { %15292 = vmatpush1.bf16.msra.mxu0 %v19807_v4  ;;  %13981 = vmatprep.subr.bf16.mxu1 %v19812_v5  ;;  %v19899_v4 = vld [vmem:[%s21987_s4 + $0x2cf4] ss:$8 sps:$4 sm:$0xff]   ;;  %v19894_v5 = vld [vmem:[%s21987_s4 + $0xcf0] ss:$8 sps:$4 sm:$0xff]  }
 0x34a   : > { %15293 = vmatprep.subr.bf16.mxu0 %v19815_v6  ;;  %14011 = vmatprep.mubr.bf16.mxu1 %v23016_v7  ;;  %v19897_v6 = vld [vmem:[%s21987_s4 + $0x2cf0] ss:$8 sps:$4 sm:$0xff]  }
 0x34b   : > { %15323 = vmatprep.mubr.bf16.mxu0 %v23019_v39 }
 0x34c   : > { %13982 = vmatpush1.bf16.msra.mxu1 %v19810_v40  ;;  %v19902_v40 = vld [vmem:[%s21987_s4 + $0xd04] ss:$8 sps:$4 sm:$0xff]  }
 0x34d   : > { %15294 = vmatpush1.bf16.msra.mxu0 %v19813_v8  ;;  %13983 = vmatprep.subr.bf16.mxu1 %v19818_v9  ;;  %v19905_v8 = vld [vmem:[%s21987_s4 + $0x2d04] ss:$8 sps:$4 sm:$0xff]   ;;  %v23085_v9 = vrot.slane %v22990_v34, %v22061_v50  ;;  %v2529_v34 = vcombine.high %v23016_v7, %v23016_v7 }
 0x34e   : > { %15295 = vmatprep.subr.bf16.mxu0 %v19821_v10  ;;  %v23089_v10 = vrot.slane %v22993_v55, %v22061_v50  ;;  %v19906_v55 = vld [vmem:[%s21987_s4 + $0xd10] ss:$8 sps:$4 sm:$0xff]   ;;  %v19914_v7 = vld [vmem:[%s21987_s4 + $0xd24] ss:$8 sps:$4 sm:$0xff]  }
 0x350   : > { %13984 = vmatpush1.bf16.msra.mxu1 %v19816_v11  ;;  %v19900_v11 = vld [vmem:[%s21987_s4 + $0xd00] ss:$8 sps:$4 sm:$0xff]  }
 0x351   : > { %15296 = vmatpush1.bf16.msra.mxu0 %v19819_v12  ;;  %13985 = vmatprep.subr.bf16.mxu1 %v19824_v19  ;;  %v19903_v12 = vld [vmem:[%s21987_s4 + $0x2d00] ss:$8 sps:$4 sm:$0xff]   ;;  %v19908_v19 = vld [vmem:[%s21987_s4 + $0xd14] ss:$8 sps:$4 sm:$0xff]  }
 0x352   : > { %15297 = vmatprep.subr.bf16.mxu0 %v19827_v20  ;;  %v19911_v20 = vld [vmem:[%s21987_s4 + $0x2d14] ss:$8 sps:$4 sm:$0xff]  }
 0x354   : > { %13986 = vmatpush1.bf16.msra.mxu1 %v19822_v21  ;;  %v2921_v21 = vcombine.high %v23019_v39, %v23019_v39  ;;  %v19912_v39 = vld [vmem:[%s21987_s4 + $0xd20] ss:$8 sps:$4 sm:$0xff]  }
 0x355   : > { %15298 = vmatpush1.bf16.msra.mxu0 %v19825_v22  ;;  %13987 = vmatprep.subr.bf16.mxu1 %v19830_v42  ;;  %v19909_v22 = vld [vmem:[%s21987_s4 + $0x2d10] ss:$8 sps:$4 sm:$0xff]   ;;  %v19917_v42 = vld [vmem:[%s21987_s4 + $0x2d24] ss:$8 sps:$4 sm:$0xff]  }
 0x356   : > { %15299 = vmatprep.subr.bf16.mxu0 %v19833_v23  ;;  %v19915_v23 = vld [vmem:[%s21987_s4 + $0x2d20] ss:$8 sps:$4 sm:$0xff]  }
 0x358   : > { %13988 = vmatpush1.bf16.msra.mxu1 %v19828_v2  ;;  %v19920_v2 = vld [vmem:[%s21987_s4 + $0xd34] ss:$8 sps:$4 sm:$0xff]  }
 0x359   : > { %15300 = vmatpush1.bf16.msra.mxu0 %v19831_v24  ;;  %13989 = vmatprep.subr.bf16.mxu1 %v19836_v13  ;;  %v19923_v24 = vld [vmem:[%s21987_s4 + $0x2d34] ss:$8 sps:$4 sm:$0xff]   ;;  %v19918_v13 = vld [vmem:[%s21987_s4 + $0xd30] ss:$8 sps:$4 sm:$0xff]  }
 0x35a   : > { %15301 = vmatprep.subr.bf16.mxu0 %v19839_v53  ;;  %v19921_v53 = vld [vmem:[%s21987_s4 + $0x2d30] ss:$8 sps:$4 sm:$0xff]  }
 0x35c   : > { %13990 = vmatpush1.bf16.msra.mxu1 %v19834_v59  ;;  %v19926_v59 = vld [vmem:[%s21987_s4 + $0xd44] ss:$8 sps:$4 sm:$0xff]  }
 0x35d   : > { %15302 = vmatpush1.bf16.msra.mxu0 %v19837_v57  ;;  %13991 = vmatprep.subr.bf16.mxu1 %v19842_v27  ;;  %v19929_v57 = vld [vmem:[%s21987_s4 + $0x2d44] ss:$8 sps:$4 sm:$0xff]   ;;  %v19924_v27 = vld [vmem:[%s21987_s4 + $0xd40] ss:$8 sps:$4 sm:$0xff]  }
 0x35e   : > { %15303 = vmatprep.subr.bf16.mxu0 %v19845_v28  ;;  %v19927_v28 = vld [vmem:[%s21987_s4 + $0x2d40] ss:$8 sps:$4 sm:$0xff]  }
 0x360   : > { %13992 = vmatpush1.bf16.msra.mxu1 %v19840_v29  ;;  %v19932_v29 = vld [vmem:[%s21987_s4 + $0xd54] ss:$8 sps:$4 sm:$0xff]  }
 0x361   : > { %15304 = vmatpush1.bf16.msra.mxu0 %v19843_v30  ;;  %13993 = vmatprep.subr.bf16.mxu1 %v19848_v16  ;;  %v19935_v30 = vld [vmem:[%s21987_s4 + $0x2d54] ss:$8 sps:$4 sm:$0xff]   ;;  %v19930_v16 = vld [vmem:[%s21987_s4 + $0xd50] ss:$8 sps:$4 sm:$0xff]  }
 0x362   : > { %15305 = vmatprep.subr.bf16.mxu0 %v19851_v32  ;;  %v19933_v32 = vld [vmem:[%s21987_s4 + $0x2d50] ss:$8 sps:$4 sm:$0xff]  }
 0x364   : > { %13994 = vmatpush1.bf16.msra.mxu1 %v19846_v35  ;;  %v19938_v35 = vld [vmem:[%s21987_s4 + $0xd64] ss:$8 sps:$4 sm:$0xff]  }
 0x365   : > { %15306 = vmatpush1.bf16.msra.mxu0 %v19849_v36  ;;  %13995 = vmatprep.subr.bf16.mxu1 %v19854_v18  ;;  %v19941_v36 = vld [vmem:[%s21987_s4 + $0x2d64] ss:$8 sps:$4 sm:$0xff]   ;;  %v19936_v18 = vld [vmem:[%s21987_s4 + $0xd60] ss:$8 sps:$4 sm:$0xff]  }
 0x366   : > { %15307 = vmatprep.subr.bf16.mxu0 %v19857_v38  ;;  %v19939_v38 = vld [vmem:[%s21987_s4 + $0x2d60] ss:$8 sps:$4 sm:$0xff]  }
 0x368   : > { %13996 = vmatpush1.bf16.msra.mxu1 %v19852_v60  ;;  %v19944_v60 = vld [vmem:[%s21987_s4 + $0xd74] ss:$8 sps:$4 sm:$0xff]  }
 0x369   : > { %15308 = vmatpush1.bf16.msra.mxu0 %v19855_v43  ;;  %13997 = vmatprep.subr.bf16.mxu1 %v19860_v31  ;;  %v19947_v43 = vld [vmem:[%s21987_s4 + $0x2d74] ss:$8 sps:$4 sm:$0xff]   ;;  %v19942_v31 = vld [vmem:[%s21987_s4 + $0xd70] ss:$8 sps:$4 sm:$0xff]  }
 0x36a   : > { %15309 = vmatprep.subr.bf16.mxu0 %v19863_v25  ;;  %v19945_v25 = vld [vmem:[%s21987_s4 + $0x2d70] ss:$8 sps:$4 sm:$0xff]  }
 0x36c   : > { %13998 = vmatpush1.bf16.msra.mxu1 %v19858_v15  ;;  %v19950_v15 = vld [vmem:[%s21987_s4 + $0xd84] ss:$8 sps:$4 sm:$0xff]  }
 0x36d   : > { %15310 = vmatpush1.bf16.msra.mxu0 %v19861_v46  ;;  %13999 = vmatprep.subr.bf16.mxu1 %v19866_v26  ;;  %v19953_v46 = vld [vmem:[%s21987_s4 + $0x2d84] ss:$8 sps:$4 sm:$0xff]   ;;  %v19948_v26 = vld [vmem:[%s21987_s4 + $0xd80] ss:$8 sps:$4 sm:$0xff]  }
 0x36e   : > { %15311 = vmatprep.subr.bf16.mxu0 %v19869_v47  ;;  %v19951_v47 = vld [vmem:[%s21987_s4 + $0x2d80] ss:$8 sps:$4 sm:$0xff]  }
 0x370   : > { %14000 = vmatpush1.bf16.msra.mxu1 %v19864_v37  ;;  %v19956_v37 = vld [vmem:[%s21987_s4 + $0xd94] ss:$8 sps:$4 sm:$0xff]  }
 0x371   : > { %15312 = vmatpush1.bf16.msra.mxu0 %v19867_v48  ;;  %14001 = vmatprep.subr.bf16.mxu1 %v19872_v17  ;;  %v19959_v48 = vld [vmem:[%s21987_s4 + $0x2d94] ss:$8 sps:$4 sm:$0xff]   ;;  %v19954_v17 = vld [vmem:[%s21987_s4 + $0xd90] ss:$8 sps:$4 sm:$0xff]  }
 0x372   : > { %15313 = vmatprep.subr.bf16.mxu0 %v19875_v49  ;;  %v19957_v49 = vld [vmem:[%s21987_s4 + $0x2d90] ss:$8 sps:$4 sm:$0xff]  }
 0x374   : > { %14002 = vmatpush1.bf16.msra.mxu1 %v19870_v51  ;;  %v19962_v51 = vld [vmem:[%s21987_s4 + $0xda4] ss:$8 sps:$4 sm:$0xff]  }
 0x375   : > { %15314 = vmatpush1.bf16.msra.mxu0 %v19873_v52  ;;  %14003 = vmatprep.subr.bf16.mxu1 %v19878_v61  ;;  %v19965_v52 = vld [vmem:[%s21987_s4 + $0x2da4] ss:$8 sps:$4 sm:$0xff]   ;;  %v19960_v61 = vld [vmem:[%s21987_s4 + $0xda0] ss:$8 sps:$4 sm:$0xff]  }
 0x376   : > { %15315 = vmatprep.subr.bf16.mxu0 %v19881_v62  ;;  %v19963_v62 = vld [vmem:[%s21987_s4 + $0x2da0] ss:$8 sps:$4 sm:$0xff]  }
 0x378   : > { %14004 = vmatpush1.bf16.msra.mxu1 %v19876_v63  ;;  %v19968_v63 = vld [vmem:[%s21987_s4 + $0xdb4] ss:$8 sps:$4 sm:$0xff]  }
 0x379   : > { %15316 = vmatpush1.bf16.msra.mxu0 %v19879_v0  ;;  %14005 = vmatprep.subr.bf16.mxu1 %v19884_v14  ;;  %v19971_v0 = vld [vmem:[%s21987_s4 + $0x2db4] ss:$8 sps:$4 sm:$0xff]   ;;  %v19966_v14 = vld [vmem:[%s21987_s4 + $0xdb0] ss:$8 sps:$4 sm:$0xff]  }
 0x37a   : > { %15317 = vmatprep.subr.bf16.mxu0 %v19887_v41  ;;  %v19969_v41 = vld [vmem:[%s21987_s4 + $0x2db0] ss:$8 sps:$4 sm:$0xff]  }
 0x37c   : > { %14006 = vmatpush1.bf16.msra.mxu1 %v19882_v45  ;;  %v19974_v45 = vld [vmem:[%s21987_s4 + $0xdc4] ss:$8 sps:$4 sm:$0xff]  }
 0x37d   : > { %15318 = vmatpush1.bf16.msra.mxu0 %v19885_v1  ;;  %14007 = vmatprep.subr.bf16.mxu1 %v19890_v54  ;;  %v19977_v1 = vld [vmem:[%s21987_s4 + $0x2dc4] ss:$8 sps:$4 sm:$0xff]   ;;  %v19972_v54 = vld [vmem:[%s21987_s4 + $0xdc0] ss:$8 sps:$4 sm:$0xff]  }
 0x37e   : > { %15319 = vmatprep.subr.bf16.mxu0 %v19893_v56  ;;  %v19975_v56 = vld [vmem:[%s21987_s4 + $0x2dc0] ss:$8 sps:$4 sm:$0xff]  }
 0x380   : > { %14008 = vmatpush1.bf16.msra.mxu1 %v19888_v33  ;;  %v19980_v33 = vld [vmem:[%s21987_s4 + $0xdd4] ss:$8 sps:$4 sm:$0xff]  }
 0x381   : > { %15320 = vmatpush1.bf16.msra.mxu0 %v19891_v3  ;;  %14009 = vmatprep.subr.bf16.mxu1 %v19896_v58  ;;  %v19983_v3 = vld [vmem:[%s21987_s4 + $0x2dd4] ss:$8 sps:$4 sm:$0xff]   ;;  %v19978_v58 = vld [vmem:[%s21987_s4 + $0xdd0] ss:$8 sps:$4 sm:$0xff]  }
 0x382   : > { %15321 = vmatprep.subr.bf16.mxu0 %v19899_v4  ;;  %v19981_v4 = vld [vmem:[%s21987_s4 + $0x2dd0] ss:$8 sps:$4 sm:$0xff]  }
 0x384   : > { %14010 = vmatpush1.bf16.msra.mxu1 %v19894_v5  ;;  %v19986_v5 = vld [vmem:[%s21987_s4 + $0xde4] ss:$8 sps:$4 sm:$0xff]  }
 0x385   : > { %15322 = vmatpush1.bf16.msra.mxu0 %v19897_v6  ;;  %14020 = vmatprep.subr.bf16.mxu1 %v19902_v40  ;;  %v19989_v6 = vld [vmem:[%s21987_s4 + $0x2de4] ss:$8 sps:$4 sm:$0xff]   ;;  %v21738_v40 = vld [vmem:[%s22000_s6 + $0x18] sm:$0xff] }
 0x386   : > { %15332 = vmatprep.subr.bf16.mxu0 %v19905_v8  ;;  %v2482_v8 = vcombine.high %v21738_v40, %v21738_v40  ;;  %v20064_v40 = vld [vmem:[%s21987_s4 + $0xeb4] ss:$8 sps:$4 sm:$0xff]  }
 0x387   : > { %14012 = vmatmul.mubr.bf16.vlgmr.msra.gmra.mrb[0].mxu1 %v23085_v9 }
 0x388   : > { %15324 = vmatmul.mubr.bf16.vlgmr.msra.gmra.mrb[0].mxu0 %v23089_v10  ;;  %14021 = vmatpush1.bf16.msra.mxu1 %v19900_v11  ;;  %v21739_v11 = vld [vmem:[%s22000_s6 + $0x58] sm:$0xff] }
 0x389   : > { %15333 = vmatpush1.bf16.msra.mxu0 %v19903_v12  ;;  %14022 = vmatprep.subr.bf16.mxu1 %v19908_v19  ;;  %v2874_v12 = vcombine.high %v21739_v11, %v21739_v11  ;;  %v19984_v19 = vld [vmem:[%s21987_s4 + $0xde0] ss:$8 sps:$4 sm:$0xff]   ;;  %v20062_v11 = vld [vmem:[%s21987_s4 + $0xeb0] ss:$8 sps:$4 sm:$0xff]  }
 0x38a   : > { %15334 = vmatprep.subr.bf16.mxu0 %v19911_v20  ;;  %14052 = vmatprep.mubr.bf16.mxu1 %v2529_v34  ;;  %v19987_v20 = vld [vmem:[%s21987_s4 + $0x2de0] ss:$8 sps:$4 sm:$0xff]   ;;  %v19992_v34 = vld [vmem:[%s21987_s4 + $0xdf4] ss:$8 sps:$4 sm:$0xff]  }
 0x38b   : > { %15364 = vmatprep.mubr.bf16.mxu0 %v2921_v21  ;;  %v19995_v21 = vld [vmem:[%s21987_s4 + $0x2df4] ss:$8 sps:$4 sm:$0xff]  }
 0x38c   : > { %14023 = vmatpush1.bf16.msra.mxu1 %v19906_v55  ;;  %v23160_v55 = vrot.slane %v2482_v8, %v22061_v50  ;;  %v20067_v8 = vld [vmem:[%s21987_s4 + $0x2eb4] ss:$8 sps:$4 sm:$0xff]  }
 0x38d   : > { %15335 = vmatpush1.bf16.msra.mxu0 %v19909_v22  ;;  %14024 = vmatprep.subr.bf16.mxu1 %v19914_v7  ;;  %v23163_v22 = vrot.slane %v2874_v12, %v22061_v50  ;;  %v19990_v7 = vld [vmem:[%s21987_s4 + $0xdf0] ss:$8 sps:$4 sm:$0xff]  }
 0x38e   : > { %15336 = vmatprep.subr.bf16.mxu0 %v19917_v42  ;;  %v19993_v42 = vld [vmem:[%s21987_s4 + $0x2df0] ss:$8 sps:$4 sm:$0xff]  }
 0x38f   : > { %v20065_v12 = vld [vmem:[%s21987_s4 + $0x2eb0] ss:$8 sps:$4 sm:$0xff]  }
 0x390   : > { %14025 = vmatpush1.bf16.msra.mxu1 %v19912_v39  ;;  %v19998_v39 = vld [vmem:[%s21987_s4 + $0xe04] ss:$8 sps:$4 sm:$0xff]  }
 0x391   : > { %15337 = vmatpush1.bf16.msra.mxu0 %v19915_v23  ;;  %14026 = vmatprep.subr.bf16.mxu1 %v19920_v2  ;;  %v20001_v23 = vld [vmem:[%s21987_s4 + $0x2e04] ss:$8 sps:$4 sm:$0xff]   ;;  %v2498_v2 = vcombine.high %v23160_v55, %v23160_v55 }
 0x392   : > { %15338 = vmatprep.subr.bf16.mxu0 %v19923_v24  ;;  %v2890_v24 = vcombine.high %v23163_v22, %v23163_v22 }
 0x394   : > { %14027 = vmatpush1.bf16.msra.mxu1 %v19918_v13  ;;  %v2527_v13 = vcombine.high %v23085_v9, %v23085_v9  ;;  %v23185_v9 = vrot.slane %v2890_v24, %v22061_v50  ;;  %v20085_v24 = vld [vmem:[%s21987_s4 + $0x2ee4] ss:$8 sps:$4 sm:$0xff]  }
 0x395   : > { %15339 = vmatpush1.bf16.msra.mxu0 %v19921_v53  ;;  %14028 = vmatprep.subr.bf16.mxu1 %v19926_v59  ;;  %v2919_v53 = vcombine.high %v23089_v10, %v23089_v10  ;;  %v19996_v59 = vld [vmem:[%s21987_s4 + $0xe00] ss:$8 sps:$4 sm:$0xff]   ;;  %v20002_v10 = vld [vmem:[%s21987_s4 + $0xe10] ss:$8 sps:$4 sm:$0xff]  }
 0x396   : > { %15340 = vmatprep.subr.bf16.mxu0 %v19929_v57  ;;  %v19999_v57 = vld [vmem:[%s21987_s4 + $0x2e00] ss:$8 sps:$4 sm:$0xff]  }
 0x398   : > { %14029 = vmatpush1.bf16.msra.mxu1 %v19924_v27  ;;  %v20004_v27 = vld [vmem:[%s21987_s4 + $0xe14] ss:$8 sps:$4 sm:$0xff]  }
 0x399   : > { %15341 = vmatpush1.bf16.msra.mxu0 %v19927_v28  ;;  %14030 = vmatprep.subr.bf16.mxu1 %v19932_v29  ;;  %v20007_v28 = vld [vmem:[%s21987_s4 + $0x2e14] ss:$8 sps:$4 sm:$0xff]   ;;  %v23182_v29 = vrot.slane %v2498_v2, %v22061_v50  ;;  %v20082_v2 = vld [vmem:[%s21987_s4 + $0xee4] ss:$8 sps:$4 sm:$0xff]  }
 0x39a   : > { %15342 = vmatprep.subr.bf16.mxu0 %v19935_v30  ;;  %v20005_v30 = vld [vmem:[%s21987_s4 + $0x2e10] ss:$8 sps:$4 sm:$0xff]  }
 0x39c   : > { %14031 = vmatpush1.bf16.msra.mxu1 %v19930_v16  ;;  %v20010_v16 = vld [vmem:[%s21987_s4 + $0xe24] ss:$8 sps:$4 sm:$0xff]  }
 0x39d   : > { %15343 = vmatpush1.bf16.msra.mxu0 %v19933_v32  ;;  %14032 = vmatprep.subr.bf16.mxu1 %v19938_v35  ;;  %v20013_v32 = vld [vmem:[%s21987_s4 + $0x2e24] ss:$8 sps:$4 sm:$0xff]   ;;  %v20008_v35 = vld [vmem:[%s21987_s4 + $0xe20] ss:$8 sps:$4 sm:$0xff]  }
 0x39e   : > { %15344 = vmatprep.subr.bf16.mxu0 %v19941_v36  ;;  %v20011_v36 = vld [vmem:[%s21987_s4 + $0x2e20] ss:$8 sps:$4 sm:$0xff]  }
 0x3a0   : > { %14033 = vmatpush1.bf16.msra.mxu1 %v19936_v18  ;;  %v20016_v18 = vld [vmem:[%s21987_s4 + $0xe34] ss:$8 sps:$4 sm:$0xff]  }
 0x3a1   : > { %15345 = vmatpush1.bf16.msra.mxu0 %v19939_v38  ;;  %14034 = vmatprep.subr.bf16.mxu1 %v19944_v60  ;;  %v20019_v38 = vld [vmem:[%s21987_s4 + $0x2e34] ss:$8 sps:$4 sm:$0xff]   ;;  %v20014_v60 = vld [vmem:[%s21987_s4 + $0xe30] ss:$8 sps:$4 sm:$0xff]  }
 0x3a2   : > { %15346 = vmatprep.subr.bf16.mxu0 %v19947_v43  ;;  %v20017_v43 = vld [vmem:[%s21987_s4 + $0x2e30] ss:$8 sps:$4 sm:$0xff]  }
 0x3a4   : > { %14035 = vmatpush1.bf16.msra.mxu1 %v19942_v31  ;;  %v20022_v31 = vld [vmem:[%s21987_s4 + $0xe44] ss:$8 sps:$4 sm:$0xff]  }
 0x3a5   : > { %15347 = vmatpush1.bf16.msra.mxu0 %v19945_v25  ;;  %14036 = vmatprep.subr.bf16.mxu1 %v19950_v15  ;;  %v20025_v25 = vld [vmem:[%s21987_s4 + $0x2e44] ss:$8 sps:$4 sm:$0xff]   ;;  %v20020_v15 = vld [vmem:[%s21987_s4 + $0xe40] ss:$8 sps:$4 sm:$0xff]  }
 0x3a6   : > { %15348 = vmatprep.subr.bf16.mxu0 %v19953_v46  ;;  %v20023_v46 = vld [vmem:[%s21987_s4 + $0x2e40] ss:$8 sps:$4 sm:$0xff]  }
 0x3a8   : > { %14037 = vmatpush1.bf16.msra.mxu1 %v19948_v26  ;;  %v20028_v26 = vld [vmem:[%s21987_s4 + $0xe54] ss:$8 sps:$4 sm:$0xff]  }
 0x3a9   : > { %15349 = vmatpush1.bf16.msra.mxu0 %v19951_v47  ;;  %14038 = vmatprep.subr.bf16.mxu1 %v19956_v37  ;;  %v20031_v47 = vld [vmem:[%s21987_s4 + $0x2e54] ss:$8 sps:$4 sm:$0xff]   ;;  %v20026_v37 = vld [vmem:[%s21987_s4 + $0xe50] ss:$8 sps:$4 sm:$0xff]  }
 0x3aa   : > { %15350 = vmatprep.subr.bf16.mxu0 %v19959_v48  ;;  %v20029_v48 = vld [vmem:[%s21987_s4 + $0x2e50] ss:$8 sps:$4 sm:$0xff]  }
 0x3ac   : > { %14039 = vmatpush1.bf16.msra.mxu1 %v19954_v17  ;;  %v20034_v17 = vld [vmem:[%s21987_s4 + $0xe64] ss:$8 sps:$4 sm:$0xff]  }
 0x3ad   : > { %15351 = vmatpush1.bf16.msra.mxu0 %v19957_v49  ;;  %14040 = vmatprep.subr.bf16.mxu1 %v19962_v51  ;;  %v20037_v49 = vld [vmem:[%s21987_s4 + $0x2e64] ss:$8 sps:$4 sm:$0xff]   ;;  %v20032_v51 = vld [vmem:[%s21987_s4 + $0xe60] ss:$8 sps:$4 sm:$0xff]  }
 0x3ae   : > { %15352 = vmatprep.subr.bf16.mxu0 %v19965_v52  ;;  %v20035_v52 = vld [vmem:[%s21987_s4 + $0x2e60] ss:$8 sps:$4 sm:$0xff]  }
 0x3b0   : > { %14041 = vmatpush1.bf16.msra.mxu1 %v19960_v61  ;;  %v20040_v61 = vld [vmem:[%s21987_s4 + $0xe74] ss:$8 sps:$4 sm:$0xff]  }
 0x3b1   : > { %15353 = vmatpush1.bf16.msra.mxu0 %v19963_v62  ;;  %14042 = vmatprep.subr.bf16.mxu1 %v19968_v63  ;;  %v20043_v62 = vld [vmem:[%s21987_s4 + $0x2e74] ss:$8 sps:$4 sm:$0xff]   ;;  %v20038_v63 = vld [vmem:[%s21987_s4 + $0xe70] ss:$8 sps:$4 sm:$0xff]  }
 0x3b2   : > { %15354 = vmatprep.subr.bf16.mxu0 %v19971_v0  ;;  %v20041_v0 = vld [vmem:[%s21987_s4 + $0x2e70] ss:$8 sps:$4 sm:$0xff]  }
 0x3b4   : > { %14043 = vmatpush1.bf16.msra.mxu1 %v19966_v14  ;;  %v20046_v14 = vld [vmem:[%s21987_s4 + $0xe84] ss:$8 sps:$4 sm:$0xff]  }
 0x3b5   : > { %15355 = vmatpush1.bf16.msra.mxu0 %v19969_v41  ;;  %14044 = vmatprep.subr.bf16.mxu1 %v19974_v45  ;;  %v20049_v41 = vld [vmem:[%s21987_s4 + $0x2e84] ss:$8 sps:$4 sm:$0xff]   ;;  %v20044_v45 = vld [vmem:[%s21987_s4 + $0xe80] ss:$8 sps:$4 sm:$0xff]  }
 0x3b6   : > { %15356 = vmatprep.subr.bf16.mxu0 %v19977_v1  ;;  %v20047_v1 = vld [vmem:[%s21987_s4 + $0x2e80] ss:$8 sps:$4 sm:$0xff]  }
 0x3b8   : > { %14045 = vmatpush1.bf16.msra.mxu1 %v19972_v54  ;;  %v20052_v54 = vld [vmem:[%s21987_s4 + $0xe94] ss:$8 sps:$4 sm:$0xff]  }
 0x3b9   : > { %15357 = vmatpush1.bf16.msra.mxu0 %v19975_v56  ;;  %14046 = vmatprep.subr.bf16.mxu1 %v19980_v33  ;;  %v20055_v56 = vld [vmem:[%s21987_s4 + $0x2e94] ss:$8 sps:$4 sm:$0xff]   ;;  %v20050_v33 = vld [vmem:[%s21987_s4 + $0xe90] ss:$8 sps:$4 sm:$0xff]  }
 0x3ba   : > { %15358 = vmatprep.subr.bf16.mxu0 %v19983_v3  ;;  %v20053_v3 = vld [vmem:[%s21987_s4 + $0x2e90] ss:$8 sps:$4 sm:$0xff]  }
 0x3bc   : > { %14047 = vmatpush1.bf16.msra.mxu1 %v19978_v58  ;;  %v20058_v58 = vld [vmem:[%s21987_s4 + $0xea4] ss:$8 sps:$4 sm:$0xff]  }
 0x3bd   : > { %15359 = vmatpush1.bf16.msra.mxu0 %v19981_v4  ;;  %14048 = vmatprep.subr.bf16.mxu1 %v19986_v5  ;;  %v20061_v4 = vld [vmem:[%s21987_s4 + $0x2ea4] ss:$8 sps:$4 sm:$0xff]   ;;  %v20056_v5 = vld [vmem:[%s21987_s4 + $0xea0] ss:$8 sps:$4 sm:$0xff]  }
 0x3be   : > { %15360 = vmatprep.subr.bf16.mxu0 %v19989_v6  ;;  %v20059_v6 = vld [vmem:[%s21987_s4 + $0x2ea0] ss:$8 sps:$4 sm:$0xff]  }
 0x3c0   : > { %14049 = vmatpush1.bf16.msra.mxu1 %v19984_v19  ;;  %v20070_v19 = vld [vmem:[%s21987_s4 + $0xec4] ss:$8 sps:$4 sm:$0xff]  }
 0x3c1   : > { %15361 = vmatpush1.bf16.msra.mxu0 %v19987_v20  ;;  %14050 = vmatprep.subr.bf16.mxu1 %v19992_v34  ;;  %v20073_v20 = vld [vmem:[%s21987_s4 + $0x2ec4] ss:$8 sps:$4 sm:$0xff]   ;;  %v20068_v34 = vld [vmem:[%s21987_s4 + $0xec0] ss:$8 sps:$4 sm:$0xff]  }
 0x3c2   : > { %15362 = vmatprep.subr.bf16.mxu0 %v19995_v21  ;;  %v20071_v21 = vld [vmem:[%s21987_s4 + $0x2ec0] ss:$8 sps:$4 sm:$0xff]  }
 0x3c4   : > { %14051 = vmatpush1.bf16.msra.mxu1 %v19990_v7  ;;  %v20076_v7 = vld [vmem:[%s21987_s4 + $0xed4] ss:$8 sps:$4 sm:$0xff]  }
 0x3c5   : > { %15363 = vmatpush1.bf16.msra.mxu0 %v19993_v42  ;;  %14061 = vmatprep.subr.bf16.mxu1 %v19998_v39  ;;  %v20079_v42 = vld [vmem:[%s21987_s4 + $0x2ed4] ss:$8 sps:$4 sm:$0xff]   ;;  %v20074_v39 = vld [vmem:[%s21987_s4 + $0xed0] ss:$8 sps:$4 sm:$0xff]  }
 0x3c6   : > { %15373 = vmatprep.subr.bf16.mxu0 %v20001_v23  ;;  %v20077_v23 = vld [vmem:[%s21987_s4 + $0x2ed0] ss:$8 sps:$4 sm:$0xff]  }
 0x3c7   : > { %14053 = vmatmul.mubr.bf16.vlgmr.msra.gmra.mrb[0].mxu1 %v2527_v13  ;;  %v20080_v13 = vld [vmem:[%s21987_s4 + $0xee0] ss:$8 sps:$4 sm:$0xff]  }
 0x3c8   : > { %15365 = vmatmul.mubr.bf16.vlgmr.msra.gmra.mrb[0].mxu0 %v2919_v53  ;;  %14062 = vmatpush1.bf16.msra.mxu1 %v19996_v59  ;;  %v20083_v53 = vld [vmem:[%s21987_s4 + $0x2ee0] ss:$8 sps:$4 sm:$0xff]   ;;  %v20088_v59 = vld [vmem:[%s21987_s4 + $0xef4] ss:$8 sps:$4 sm:$0xff]  }
 0x3c9   : > { %15374 = vmatpush1.bf16.msra.mxu0 %v19999_v57  ;;  %14063 = vmatprep.subr.bf16.mxu1 %v20004_v27  ;;  %v20091_v57 = vld [vmem:[%s21987_s4 + $0x2ef4] ss:$8 sps:$4 sm:$0xff]   ;;  %v20086_v27 = vld [vmem:[%s21987_s4 + $0xef0] ss:$8 sps:$4 sm:$0xff]  }
 0x3ca   : > { %15375 = vmatprep.subr.bf16.mxu0 %v20007_v28  ;;  %14093 = vmatprep.mubr.bf16.mxu1 %v23182_v29  ;;  %v20089_v28 = vld [vmem:[%s21987_s4 + $0x2ef0] ss:$8 sps:$4 sm:$0xff]  }
 0x3cb   : > { %15405 = vmatprep.mubr.bf16.mxu0 %v23185_v9 }
 0x3cc   : > { %14064 = vmatpush1.bf16.msra.mxu1 %v20002_v10  ;;  %v20095_v10 = vld [vmem:[%s21987_s4 + $0xf04] ss:$8 sps:$4 sm:$0xff]  }
 0x3cd   : > { %15376 = vmatpush1.bf16.msra.mxu0 %v20005_v30  ;;  %14065 = vmatprep.subr.bf16.mxu1 %v20010_v16  ;;  %v20099_v30 = vld [vmem:[%s21987_s4 + $0x2f04] ss:$8 sps:$4 sm:$0xff]   ;;  %v23251_v16 = vrot.slane %v23160_v55, %v22061_v50  ;;  %v2530_v55 = vcombine.high %v23182_v29, %v23182_v29 }
 0x3ce   : > { %15377 = vmatprep.subr.bf16.mxu0 %v20013_v32  ;;  %v23255_v32 = vrot.slane %v23163_v22, %v22061_v50  ;;  %v20100_v22 = vld [vmem:[%s21987_s4 + $0xf10] ss:$8 sps:$4 sm:$0xff]   ;;  %v20108_v29 = vld [vmem:[%s21987_s4 + $0xf24] ss:$8 sps:$4 sm:$0xff]  }
 0x3d0   : > { %14066 = vmatpush1.bf16.msra.mxu1 %v20008_v35  ;;  %v20093_v35 = vld [vmem:[%s21987_s4 + $0xf00] ss:$8 sps:$4 sm:$0xff]  }
 0x3d1   : > { %15378 = vmatpush1.bf16.msra.mxu0 %v20011_v36  ;;  %14067 = vmatprep.subr.bf16.mxu1 %v20016_v18  ;;  %v20097_v36 = vld [vmem:[%s21987_s4 + $0x2f00] ss:$8 sps:$4 sm:$0xff]   ;;  %v20102_v18 = vld [vmem:[%s21987_s4 + $0xf14] ss:$8 sps:$4 sm:$0xff]  }
 0x3d2   : > { %15379 = vmatprep.subr.bf16.mxu0 %v20019_v38  ;;  %v20105_v38 = vld [vmem:[%s21987_s4 + $0x2f14] ss:$8 sps:$4 sm:$0xff]  }
 0x3d4   : > { %14068 = vmatpush1.bf16.msra.mxu1 %v20014_v60  ;;  %v2922_v60 = vcombine.high %v23185_v9, %v23185_v9  ;;  %v20106_v9 = vld [vmem:[%s21987_s4 + $0xf20] ss:$8 sps:$4 sm:$0xff]  }
 0x3d5   : > { %15380 = vmatpush1.bf16.msra.mxu0 %v20017_v43  ;;  %14069 = vmatprep.subr.bf16.mxu1 %v20022_v31  ;;  %v20103_v43 = vld [vmem:[%s21987_s4 + $0x2f10] ss:$8 sps:$4 sm:$0xff]   ;;  %v20111_v31 = vld [vmem:[%s21987_s4 + $0x2f24] ss:$8 sps:$4 sm:$0xff]  }
 0x3d6   : > { %15381 = vmatprep.subr.bf16.mxu0 %v20025_v25  ;;  %v20109_v25 = vld [vmem:[%s21987_s4 + $0x2f20] ss:$8 sps:$4 sm:$0xff]  }
 0x3d8   : > { %14070 = vmatpush1.bf16.msra.mxu1 %v20020_v15  ;;  %v20114_v15 = vld [vmem:[%s21987_s4 + $0xf34] ss:$8 sps:$4 sm:$0xff]  }
 0x3d9   : > { %15382 = vmatpush1.bf16.msra.mxu0 %v20023_v46  ;;  %14071 = vmatprep.subr.bf16.mxu1 %v20028_v26  ;;  %v20117_v46 = vld [vmem:[%s21987_s4 + $0x2f34] ss:$8 sps:$4 sm:$0xff]   ;;  %v20112_v26 = vld [vmem:[%s21987_s4 + $0xf30] ss:$8 sps:$4 sm:$0xff]  }
 0x3da   : > { %15383 = vmatprep.subr.bf16.mxu0 %v20031_v47  ;;  %v20115_v47 = vld [vmem:[%s21987_s4 + $0x2f30] ss:$8 sps:$4 sm:$0xff]  }
 0x3dc   : > { %14072 = vmatpush1.bf16.msra.mxu1 %v20026_v37  ;;  %v20120_v37 = vld [vmem:[%s21987_s4 + $0xf44] ss:$8 sps:$4 sm:$0xff]  }
 0x3dd   : > { %15384 = vmatpush1.bf16.msra.mxu0 %v20029_v48  ;;  %14073 = vmatprep.subr.bf16.mxu1 %v20034_v17  ;;  %v20123_v48 = vld [vmem:[%s21987_s4 + $0x2f44] ss:$8 sps:$4 sm:$0xff]   ;;  %v20118_v17 = vld [vmem:[%s21987_s4 + $0xf40] ss:$8 sps:$4 sm:$0xff]  }
 0x3de   : > { %15385 = vmatprep.subr.bf16.mxu0 %v20037_v49  ;;  %v20121_v49 = vld [vmem:[%s21987_s4 + $0x2f40] ss:$8 sps:$4 sm:$0xff]  }
 0x3e0   : > { %14074 = vmatpush1.bf16.msra.mxu1 %v20032_v51  ;;  %v20126_v51 = vld [vmem:[%s21987_s4 + $0xf54] ss:$8 sps:$4 sm:$0xff]  }
 0x3e1   : > { %15386 = vmatpush1.bf16.msra.mxu0 %v20035_v52  ;;  %14075 = vmatprep.subr.bf16.mxu1 %v20040_v61  ;;  %v20129_v52 = vld [vmem:[%s21987_s4 + $0x2f54] ss:$8 sps:$4 sm:$0xff]   ;;  %v20124_v61 = vld [vmem:[%s21987_s4 + $0xf50] ss:$8 sps:$4 sm:$0xff]  }
 0x3e2   : > { %15387 = vmatprep.subr.bf16.mxu0 %v20043_v62  ;;  %v20127_v62 = vld [vmem:[%s21987_s4 + $0x2f50] ss:$8 sps:$4 sm:$0xff]  }
 0x3e4   : > { %14076 = vmatpush1.bf16.msra.mxu1 %v20038_v63  ;;  %v20132_v63 = vld [vmem:[%s21987_s4 + $0xf64] ss:$8 sps:$4 sm:$0xff]  }
 0x3e5   : > { %15388 = vmatpush1.bf16.msra.mxu0 %v20041_v0  ;;  %14077 = vmatprep.subr.bf16.mxu1 %v20046_v14  ;;  %v20135_v0 = vld [vmem:[%s21987_s4 + $0x2f64] ss:$8 sps:$4 sm:$0xff]   ;;  %v20130_v14 = vld [vmem:[%s21987_s4 + $0xf60] ss:$8 sps:$4 sm:$0xff]  }
 0x3e6   : > { %15389 = vmatprep.subr.bf16.mxu0 %v20049_v41  ;;  %v20133_v41 = vld [vmem:[%s21987_s4 + $0x2f60] ss:$8 sps:$4 sm:$0xff]  }
 0x3e8   : > { %14078 = vmatpush1.bf16.msra.mxu1 %v20044_v45  ;;  %v20138_v45 = vld [vmem:[%s21987_s4 + $0xf74] ss:$8 sps:$4 sm:$0xff]  }
 0x3e9   : > { %15390 = vmatpush1.bf16.msra.mxu0 %v20047_v1  ;;  %14079 = vmatprep.subr.bf16.mxu1 %v20052_v54  ;;  %v20141_v1 = vld [vmem:[%s21987_s4 + $0x2f74] ss:$8 sps:$4 sm:$0xff]   ;;  %v20136_v54 = vld [vmem:[%s21987_s4 + $0xf70] ss:$8 sps:$4 sm:$0xff]  }
 0x3ea   : > { %15391 = vmatprep.subr.bf16.mxu0 %v20055_v56  ;;  %v20139_v56 = vld [vmem:[%s21987_s4 + $0x2f70] ss:$8 sps:$4 sm:$0xff]  }
 0x3ec   : > { %14080 = vmatpush1.bf16.msra.mxu1 %v20050_v33  ;;  %v20144_v33 = vld [vmem:[%s21987_s4 + $0xf84] ss:$8 sps:$4 sm:$0xff]  }
 0x3ed   : > { %15392 = vmatpush1.bf16.msra.mxu0 %v20053_v3  ;;  %14081 = vmatprep.subr.bf16.mxu1 %v20058_v58  ;;  %v20147_v3 = vld [vmem:[%s21987_s4 + $0x2f84] ss:$8 sps:$4 sm:$0xff]   ;;  %v20142_v58 = vld [vmem:[%s21987_s4 + $0xf80] ss:$8 sps:$4 sm:$0xff]  }
 0x3ee   : > { %15393 = vmatprep.subr.bf16.mxu0 %v20061_v4  ;;  %v20145_v4 = vld [vmem:[%s21987_s4 + $0x2f80] ss:$8 sps:$4 sm:$0xff]  }
 0x3f0   : > { %14082 = vmatpush1.bf16.msra.mxu1 %v20056_v5  ;;  %v20150_v5 = vld [vmem:[%s21987_s4 + $0xf94] ss:$8 sps:$4 sm:$0xff]  }
 0x3f1   : > { %15394 = vmatpush1.bf16.msra.mxu0 %v20059_v6  ;;  %14083 = vmatprep.subr.bf16.mxu1 %v20064_v40  ;;  %v20153_v6 = vld [vmem:[%s21987_s4 + $0x2f94] ss:$8 sps:$4 sm:$0xff]   ;;  %v20148_v40 = vld [vmem:[%s21987_s4 + $0xf90] ss:$8 sps:$4 sm:$0xff]  }
 0x3f2   : > { %15395 = vmatprep.subr.bf16.mxu0 %v20067_v8  ;;  %v20151_v8 = vld [vmem:[%s21987_s4 + $0x2f90] ss:$8 sps:$4 sm:$0xff]  }
 0x3f4   : > { %14084 = vmatpush1.bf16.msra.mxu1 %v20062_v11  ;;  %v20156_v11 = vld [vmem:[%s21987_s4 + $0xfa4] ss:$8 sps:$4 sm:$0xff]  }
 0x3f5   : > { %15396 = vmatpush1.bf16.msra.mxu0 %v20065_v12  ;;  %14085 = vmatprep.subr.bf16.mxu1 %v20070_v19  ;;  %v20159_v12 = vld [vmem:[%s21987_s4 + $0x2fa4] ss:$8 sps:$4 sm:$0xff]   ;;  %v20154_v19 = vld [vmem:[%s21987_s4 + $0xfa0] ss:$8 sps:$4 sm:$0xff]  }
 0x3f6   : > { %15397 = vmatprep.subr.bf16.mxu0 %v20073_v20  ;;  %v20157_v20 = vld [vmem:[%s21987_s4 + $0x2fa0] ss:$8 sps:$4 sm:$0xff]  }
 0x3f8   : > { %14086 = vmatpush1.bf16.msra.mxu1 %v20068_v34  ;;  %v20162_v34 = vld [vmem:[%s21987_s4 + $0xfb4] ss:$8 sps:$4 sm:$0xff]  }
 0x3f9   : > { %15398 = vmatpush1.bf16.msra.mxu0 %v20071_v21  ;;  %14087 = vmatprep.subr.bf16.mxu1 %v20076_v7  ;;  %v20165_v21 = vld [vmem:[%s21987_s4 + $0x2fb4] ss:$8 sps:$4 sm:$0xff]   ;;  %v20160_v7 = vld [vmem:[%s21987_s4 + $0xfb0] ss:$8 sps:$4 sm:$0xff]  }
 0x3fa   : > { %15399 = vmatprep.subr.bf16.mxu0 %v20079_v42  ;;  %v20163_v42 = vld [vmem:[%s21987_s4 + $0x2fb0] ss:$8 sps:$4 sm:$0xff]  }
 0x3fc   : > { %14088 = vmatpush1.bf16.msra.mxu1 %v20074_v39  ;;  %v20168_v39 = vld [vmem:[%s21987_s4 + $0xfc4] ss:$8 sps:$4 sm:$0xff]  }
 0x3fd   : > { %15400 = vmatpush1.bf16.msra.mxu0 %v20077_v23  ;;  %14089 = vmatprep.subr.bf16.mxu1 %v20082_v2  ;;  %v20171_v23 = vld [vmem:[%s21987_s4 + $0x2fc4] ss:$8 sps:$4 sm:$0xff]   ;;  %v20166_v2 = vld [vmem:[%s21987_s4 + $0xfc0] ss:$8 sps:$4 sm:$0xff]  }
 0x3fe   : > { %15401 = vmatprep.subr.bf16.mxu0 %v20085_v24  ;;  %v20169_v24 = vld [vmem:[%s21987_s4 + $0x2fc0] ss:$8 sps:$4 sm:$0xff]  }
 0x400   : > { %14090 = vmatpush1.bf16.msra.mxu1 %v20080_v13  ;;  %v20174_v13 = vld [vmem:[%s21987_s4 + $0xfd4] ss:$8 sps:$4 sm:$0xff]  }
 0x401   : > { %15402 = vmatpush1.bf16.msra.mxu0 %v20083_v53  ;;  %14091 = vmatprep.subr.bf16.mxu1 %v20088_v59  ;;  %v20177_v53 = vld [vmem:[%s21987_s4 + $0x2fd4] ss:$8 sps:$4 sm:$0xff]   ;;  %v20172_v59 = vld [vmem:[%s21987_s4 + $0xfd0] ss:$8 sps:$4 sm:$0xff]  }
 0x402   : > { %15403 = vmatprep.subr.bf16.mxu0 %v20091_v57  ;;  %v20175_v57 = vld [vmem:[%s21987_s4 + $0x2fd0] ss:$8 sps:$4 sm:$0xff]  }
 0x404   : > { %14092 = vmatpush1.bf16.msra.mxu1 %v20086_v27  ;;  %v20180_v27 = vld [vmem:[%s21987_s4 + $0xfe4] ss:$8 sps:$4 sm:$0xff]  }
 0x405   : > { %15404 = vmatpush1.bf16.msra.mxu0 %v20089_v28  ;;  %14102 = vmatprep.subr.bf16.mxu1 %v20095_v10  ;;  %v20183_v28 = vld [vmem:[%s21987_s4 + $0x2fe4] ss:$8 sps:$4 sm:$0xff]  }
 0x406   : > { %15414 = vmatprep.subr.bf16.mxu0 %v20099_v30  ;;  %v23320_v10 = vld [vmem:[%s22000_s6 + $0x20] sm:$0xff] }
 0x407   : > { %14094 = vmatmul.mubr.bf16.vlgmr.msra.gmra.mrb[0].mxu1 %v23251_v16  ;;  %v23323_v30 = vld [vmem:[%s22000_s6 + $0x60] sm:$0xff] }
 0x408   : > { %15406 = vmatmul.mubr.bf16.vlgmr.msra.gmra.mrb[0].mxu0 %v23255_v32  ;;  %14103 = vmatpush1.bf16.msra.mxu1 %v20093_v35  ;;  %v20178_v35 = vld [vmem:[%s21987_s4 + $0xfe0] ss:$8 sps:$4 sm:$0xff]  }
 0x409   : > { %15415 = vmatpush1.bf16.msra.mxu0 %v20097_v36  ;;  %14104 = vmatprep.subr.bf16.mxu1 %v20102_v18  ;;  %v20181_v36 = vld [vmem:[%s21987_s4 + $0x2fe0] ss:$8 sps:$4 sm:$0xff]   ;;  %v20186_v18 = vld [vmem:[%s21987_s4 + $0xff4] ss:$8 sps:$4 sm:$0xff]  }
 0x40a   : > { %15416 = vmatprep.subr.bf16.mxu0 %v20105_v38  ;;  %14134 = vmatprep.mubr.bf16.mxu1 %v2530_v55  ;;  %v20189_v38 = vld [vmem:[%s21987_s4 + $0x2ff4] ss:$8 sps:$4 sm:$0xff]   ;;  %v23331_v55 = vrot.slane %v23320_v10, %v22061_v50 }
 0x40b   : > { %15446 = vmatprep.mubr.bf16.mxu0 %v2922_v60  ;;  %v23335_v60 = vrot.slane %v23323_v30, %v22061_v50 }
 0x40c   : > { %14105 = vmatpush1.bf16.msra.mxu1 %v20100_v22  ;;  %v20184_v22 = vld [vmem:[%s21987_s4 + $0xff0] ss:$8 sps:$4 sm:$0xff]  }
 0x40d   : > { %15417 = vmatpush1.bf16.msra.mxu0 %v20103_v43  ;;  %14106 = vmatprep.subr.bf16.mxu1 %v20108_v29  ;;  %v20187_v43 = vld [vmem:[%s21987_s4 + $0x2ff0] ss:$8 sps:$4 sm:$0xff]   ;;  %v20192_v29 = vld [vmem:[%s21987_s4 + $0x1004] ss:$8 sps:$4 sm:$0xff]  }
 0x40e   : > { %15418 = vmatprep.subr.bf16.mxu0 %v20111_v31  ;;  %v20195_v31 = vld [vmem:[%s21987_s4 + $0x3004] ss:$8 sps:$4 sm:$0xff]  }
 0x410   : > { %14107 = vmatpush1.bf16.msra.mxu1 %v20106_v9  ;;  %v2546_v9 = vcombine.high %v23331_v55, %v23331_v55 }
 0x411   : > { %15419 = vmatpush1.bf16.msra.mxu0 %v20109_v25  ;;  %14108 = vmatprep.subr.bf16.mxu1 %v20114_v15  ;;  %v2938_v25 = vcombine.high %v23335_v60, %v23335_v60  ;;  %v2528_v15 = vcombine.high %v23251_v16, %v23251_v16 }
 0x412   : > { %15420 = vmatprep.subr.bf16.mxu0 %v20117_v46  ;;  %v2920_v46 = vcombine.high %v23255_v32, %v23255_v32  ;;  %v20196_v32 = vld [vmem:[%s21987_s4 + $0x1010] ss:$8 sps:$4 sm:$0xff]  }
 0x413   : > { %v23357_v16 = vrot.slane %v2938_v25, %v22061_v50  ;;  %v20271_v25 = vld [vmem:[%s21987_s4 + $0x30d0] ss:$8 sps:$4 sm:$0xff]  }
 0x414   : > { %14109 = vmatpush1.bf16.msra.mxu1 %v20112_v26  ;;  %v20190_v26 = vld [vmem:[%s21987_s4 + $0x1000] ss:$8 sps:$4 sm:$0xff]  }
 0x415   : > { %15421 = vmatpush1.bf16.msra.mxu0 %v20115_v47  ;;  %14110 = vmatprep.subr.bf16.mxu1 %v20120_v37  ;;  %v20193_v47 = vld [vmem:[%s21987_s4 + $0x3000] ss:$8 sps:$4 sm:$0xff]   ;;  %v20198_v37 = vld [vmem:[%s21987_s4 + $0x1014] ss:$8 sps:$4 sm:$0xff]  }
 0x416   : > { %15422 = vmatprep.subr.bf16.mxu0 %v20123_v48  ;;  %v20201_v48 = vld [vmem:[%s21987_s4 + $0x3014] ss:$8 sps:$4 sm:$0xff]  }
 0x418   : > { %14111 = vmatpush1.bf16.msra.mxu1 %v20118_v17  ;;  %v23354_v17 = vrot.slane %v2546_v9, %v22061_v50  ;;  %v20268_v9 = vld [vmem:[%s21987_s4 + $0x10d0] ss:$8 sps:$4 sm:$0xff]  }
 0x419   : > { %15423 = vmatpush1.bf16.msra.mxu0 %v20121_v49  ;;  %14112 = vmatprep.subr.bf16.mxu1 %v20126_v51  ;;  %v20199_v49 = vld [vmem:[%s21987_s4 + $0x3010] ss:$8 sps:$4 sm:$0xff]   ;;  %v20204_v51 = vld [vmem:[%s21987_s4 + $0x1024] ss:$8 sps:$4 sm:$0xff]  }
 0x41a   : > { %15424 = vmatprep.subr.bf16.mxu0 %v20129_v52  ;;  %v20207_v52 = vld [vmem:[%s21987_s4 + $0x3024] ss:$8 sps:$4 sm:$0xff]  }
 0x41c   : > { %14113 = vmatpush1.bf16.msra.mxu1 %v20124_v61  ;;  %v20202_v61 = vld [vmem:[%s21987_s4 + $0x1020] ss:$8 sps:$4 sm:$0xff]  }
 0x41d   : > { %15425 = vmatpush1.bf16.msra.mxu0 %v20127_v62  ;;  %14114 = vmatprep.subr.bf16.mxu1 %v20132_v63  ;;  %v20205_v62 = vld [vmem:[%s21987_s4 + $0x3020] ss:$8 sps:$4 sm:$0xff]   ;;  %v20210_v63 = vld [vmem:[%s21987_s4 + $0x1034] ss:$8 sps:$4 sm:$0xff]  }
 0x41e   : > { %15426 = vmatprep.subr.bf16.mxu0 %v20135_v0  ;;  %v20213_v0 = vld [vmem:[%s21987_s4 + $0x3034] ss:$8 sps:$4 sm:$0xff]  }
 0x420   : > { %14115 = vmatpush1.bf16.msra.mxu1 %v20130_v14  ;;  %v20208_v14 = vld [vmem:[%s21987_s4 + $0x1030] ss:$8 sps:$4 sm:$0xff]  }
 0x421   : > { %15427 = vmatpush1.bf16.msra.mxu0 %v20133_v41  ;;  %14116 = vmatprep.subr.bf16.mxu1 %v20138_v45  ;;  %v20211_v41 = vld [vmem:[%s21987_s4 + $0x3030] ss:$8 sps:$4 sm:$0xff]   ;;  %v20216_v45 = vld [vmem:[%s21987_s4 + $0x1044] ss:$8 sps:$4 sm:$0xff]  }
 0x422   : > { %15428 = vmatprep.subr.bf16.mxu0 %v20141_v1  ;;  %v20219_v1 = vld [vmem:[%s21987_s4 + $0x3044] ss:$8 sps:$4 sm:$0xff]  }
 0x424   : > { %14117 = vmatpush1.bf16.msra.mxu1 %v20136_v54  ;;  %v20214_v54 = vld [vmem:[%s21987_s4 + $0x1040] ss:$8 sps:$4 sm:$0xff]  }
 0x425   : > { %15429 = vmatpush1.bf16.msra.mxu0 %v20139_v56  ;;  %14118 = vmatprep.subr.bf16.mxu1 %v20144_v33  ;;  %v20217_v56 = vld [vmem:[%s21987_s4 + $0x3040] ss:$8 sps:$4 sm:$0xff]   ;;  %v20222_v33 = vld [vmem:[%s21987_s4 + $0x1054] ss:$8 sps:$4 sm:$0xff]  }
 0x426   : > { %15430 = vmatprep.subr.bf16.mxu0 %v20147_v3  ;;  %v20225_v3 = vld [vmem:[%s21987_s4 + $0x3054] ss:$8 sps:$4 sm:$0xff]  }
 0x428   : > { %14119 = vmatpush1.bf16.msra.mxu1 %v20142_v58  ;;  %v20220_v58 = vld [vmem:[%s21987_s4 + $0x1050] ss:$8 sps:$4 sm:$0xff]  }
 0x429   : > { %15431 = vmatpush1.bf16.msra.mxu0 %v20145_v4  ;;  %14120 = vmatprep.subr.bf16.mxu1 %v20150_v5  ;;  %v20223_v4 = vld [vmem:[%s21987_s4 + $0x3050] ss:$8 sps:$4 sm:$0xff]   ;;  %v20228_v5 = vld [vmem:[%s21987_s4 + $0x1064] ss:$8 sps:$4 sm:$0xff]  }
 0x42a   : > { %15432 = vmatprep.subr.bf16.mxu0 %v20153_v6  ;;  %v20231_v6 = vld [vmem:[%s21987_s4 + $0x3064] ss:$8 sps:$4 sm:$0xff]  }
 0x42c   : > { %14121 = vmatpush1.bf16.msra.mxu1 %v20148_v40  ;;  %v20226_v40 = vld [vmem:[%s21987_s4 + $0x1060] ss:$8 sps:$4 sm:$0xff]  }
 0x42d   : > { %15433 = vmatpush1.bf16.msra.mxu0 %v20151_v8  ;;  %14122 = vmatprep.subr.bf16.mxu1 %v20156_v11  ;;  %v20229_v8 = vld [vmem:[%s21987_s4 + $0x3060] ss:$8 sps:$4 sm:$0xff]   ;;  %v20234_v11 = vld [vmem:[%s21987_s4 + $0x1074] ss:$8 sps:$4 sm:$0xff]  }
 0x42e   : > { %15434 = vmatprep.subr.bf16.mxu0 %v20159_v12  ;;  %v20237_v12 = vld [vmem:[%s21987_s4 + $0x3074] ss:$8 sps:$4 sm:$0xff]  }
 0x430   : > { %14123 = vmatpush1.bf16.msra.mxu1 %v20154_v19  ;;  %v20232_v19 = vld [vmem:[%s21987_s4 + $0x1070] ss:$8 sps:$4 sm:$0xff]  }
 0x431   : > { %15435 = vmatpush1.bf16.msra.mxu0 %v20157_v20  ;;  %14124 = vmatprep.subr.bf16.mxu1 %v20162_v34  ;;  %v20235_v20 = vld [vmem:[%s21987_s4 + $0x3070] ss:$8 sps:$4 sm:$0xff]   ;;  %v20240_v34 = vld [vmem:[%s21987_s4 + $0x1084] ss:$8 sps:$4 sm:$0xff]  }
 0x432   : > { %15436 = vmatprep.subr.bf16.mxu0 %v20165_v21  ;;  %v20243_v21 = vld [vmem:[%s21987_s4 + $0x3084] ss:$8 sps:$4 sm:$0xff]  }
 0x434   : > { %14125 = vmatpush1.bf16.msra.mxu1 %v20160_v7  ;;  %v20238_v7 = vld [vmem:[%s21987_s4 + $0x1080] ss:$8 sps:$4 sm:$0xff]  }
 0x435   : > { %15437 = vmatpush1.bf16.msra.mxu0 %v20163_v42  ;;  %14126 = vmatprep.subr.bf16.mxu1 %v20168_v39  ;;  %v20241_v42 = vld [vmem:[%s21987_s4 + $0x3080] ss:$8 sps:$4 sm:$0xff]   ;;  %v20246_v39 = vld [vmem:[%s21987_s4 + $0x1094] ss:$8 sps:$4 sm:$0xff]  }
 0x436   : > { %15438 = vmatprep.subr.bf16.mxu0 %v20171_v23  ;;  %v20249_v23 = vld [vmem:[%s21987_s4 + $0x3094] ss:$8 sps:$4 sm:$0xff]  }
 0x438   : > { %14127 = vmatpush1.bf16.msra.mxu1 %v20166_v2  ;;  %v20244_v2 = vld [vmem:[%s21987_s4 + $0x1090] ss:$8 sps:$4 sm:$0xff]  }
 0x439   : > { %15439 = vmatpush1.bf16.msra.mxu0 %v20169_v24  ;;  %14128 = vmatprep.subr.bf16.mxu1 %v20174_v13  ;;  %v20247_v24 = vld [vmem:[%s21987_s4 + $0x3090] ss:$8 sps:$4 sm:$0xff]   ;;  %v20252_v13 = vld [vmem:[%s21987_s4 + $0x10a4] ss:$8 sps:$4 sm:$0xff]  }
 0x43a   : > { %15440 = vmatprep.subr.bf16.mxu0 %v20177_v53  ;;  %v20255_v53 = vld [vmem:[%s21987_s4 + $0x30a4] ss:$8 sps:$4 sm:$0xff]  }
 0x43c   : > { %14129 = vmatpush1.bf16.msra.mxu1 %v20172_v59  ;;  %v20250_v59 = vld [vmem:[%s21987_s4 + $0x10a0] ss:$8 sps:$4 sm:$0xff]  }
 0x43d   : > { %15441 = vmatpush1.bf16.msra.mxu0 %v20175_v57  ;;  %14130 = vmatprep.subr.bf16.mxu1 %v20180_v27  ;;  %v20253_v57 = vld [vmem:[%s21987_s4 + $0x30a0] ss:$8 sps:$4 sm:$0xff]   ;;  %v20258_v27 = vld [vmem:[%s21987_s4 + $0x10b4] ss:$8 sps:$4 sm:$0xff]  }
 0x43e   : > { %15442 = vmatprep.subr.bf16.mxu0 %v20183_v28  ;;  %v20261_v28 = vld [vmem:[%s21987_s4 + $0x30b4] ss:$8 sps:$4 sm:$0xff]  }
 0x440   : > { %14131 = vmatpush1.bf16.msra.mxu1 %v20178_v35  ;;  %v20256_v35 = vld [vmem:[%s21987_s4 + $0x10b0] ss:$8 sps:$4 sm:$0xff]  }
 0x441   : > { %15443 = vmatpush1.bf16.msra.mxu0 %v20181_v36  ;;  %14132 = vmatprep.subr.bf16.mxu1 %v20186_v18  ;;  %v20259_v36 = vld [vmem:[%s21987_s4 + $0x30b0] ss:$8 sps:$4 sm:$0xff]   ;;  %v20264_v18 = vld [vmem:[%s21987_s4 + $0x10c4] ss:$8 sps:$4 sm:$0xff]  }
 0x442   : > { %15444 = vmatprep.subr.bf16.mxu0 %v20189_v38  ;;  %v20267_v38 = vld [vmem:[%s21987_s4 + $0x30c4] ss:$8 sps:$4 sm:$0xff]  }
 0x444   : > { %14133 = vmatpush1.bf16.msra.mxu1 %v20184_v22  ;;  %v20262_v22 = vld [vmem:[%s21987_s4 + $0x10c0] ss:$8 sps:$4 sm:$0xff]  }
 0x445   : > { %15445 = vmatpush1.bf16.msra.mxu0 %v20187_v43  ;;  %14143 = vmatprep.subr.bf16.mxu1 %v20192_v29  ;;  %v20265_v43 = vld [vmem:[%s21987_s4 + $0x30c0] ss:$8 sps:$4 sm:$0xff]   ;;  %v20270_v29 = vld [vmem:[%s21987_s4 + $0x10d4] ss:$8 sps:$4 sm:$0xff]  }
 0x446   : > { %15455 = vmatprep.subr.bf16.mxu0 %v20195_v31  ;;  %v20273_v31 = vld [vmem:[%s21987_s4 + $0x30d4] ss:$8 sps:$4 sm:$0xff]  }
 0x447   : > { %14135 = vmatmul.mubr.bf16.vlgmr.msra.gmra.mrb[0].mxu1 %v2528_v15  ;;  %v20276_v15 = vld [vmem:[%s21987_s4 + $0x10e4] ss:$8 sps:$4 sm:$0xff]  }
 0x448   : > { %15447 = vmatmul.mubr.bf16.vlgmr.msra.gmra.mrb[0].mxu0 %v2920_v46  ;;  %14144 = vmatpush1.bf16.msra.mxu1 %v20190_v26  ;;  %v20279_v46 = vld [vmem:[%s21987_s4 + $0x30e4] ss:$8 sps:$4 sm:$0xff]   ;;  %v20274_v26 = vld [vmem:[%s21987_s4 + $0x10e0] ss:$8 sps:$4 sm:$0xff]  }
 0x449   : > { %15456 = vmatpush1.bf16.msra.mxu0 %v20193_v47  ;;  %14145 = vmatprep.subr.bf16.mxu1 %v20198_v37  ;;  %v20277_v47 = vld [vmem:[%s21987_s4 + $0x30e0] ss:$8 sps:$4 sm:$0xff]   ;;  %v20282_v37 = vld [vmem:[%s21987_s4 + $0x10f4] ss:$8 sps:$4 sm:$0xff]  }
 0x44a   : > { %15457 = vmatprep.subr.bf16.mxu0 %v20201_v48  ;;  %14175 = vmatprep.mubr.bf16.mxu1 %v23354_v17  ;;  %v20285_v48 = vld [vmem:[%s21987_s4 + $0x30f4] ss:$8 sps:$4 sm:$0xff]  }
 0x44b   : > { %15487 = vmatprep.mubr.bf16.mxu0 %v23357_v16 }
 0x44c   : > { %14146 = vmatpush1.bf16.msra.mxu1 %v20196_v32  ;;  %v20280_v32 = vld [vmem:[%s21987_s4 + $0x10f0] ss:$8 sps:$4 sm:$0xff]  }
 0x44d   : > { %15458 = vmatpush1.bf16.msra.mxu0 %v20199_v49  ;;  %14147 = vmatprep.subr.bf16.mxu1 %v20204_v51  ;;  %v20283_v49 = vld [vmem:[%s21987_s4 + $0x30f0] ss:$8 sps:$4 sm:$0xff]   ;;  %v20288_v51 = vld [vmem:[%s21987_s4 + $0x1104] ss:$8 sps:$4 sm:$0xff]  }
 0x44e   : > { %15459 = vmatprep.subr.bf16.mxu0 %v20207_v52  ;;  %v20291_v52 = vld [vmem:[%s21987_s4 + $0x3104] ss:$8 sps:$4 sm:$0xff]  }
 0x450   : > { %14148 = vmatpush1.bf16.msra.mxu1 %v20202_v61  ;;  %v23423_v61 = vrot.slane %v23331_v55, %v22061_v50  ;;  %v2578_v55 = vcombine.high %v23354_v17, %v23354_v17  ;;  %v20300_v17 = vld [vmem:[%s21987_s4 + $0x1124] ss:$8 sps:$4 sm:$0xff]  }
 0x451   : > { %15460 = vmatpush1.bf16.msra.mxu0 %v20205_v62  ;;  %14149 = vmatprep.subr.bf16.mxu1 %v20210_v63  ;;  %v23427_v62 = vrot.slane %v23335_v60, %v22061_v50  ;;  %v20286_v63 = vld [vmem:[%s21987_s4 + $0x1100] ss:$8 sps:$4 sm:$0xff]   ;;  %v20292_v60 = vld [vmem:[%s21987_s4 + $0x1110] ss:$8 sps:$4 sm:$0xff]  }
 0x452   : > { %15461 = vmatprep.subr.bf16.mxu0 %v20213_v0  ;;  %v20289_v0 = vld [vmem:[%s21987_s4 + $0x3100] ss:$8 sps:$4 sm:$0xff]  }
 0x454   : > { %14150 = vmatpush1.bf16.msra.mxu1 %v20208_v14  ;;  %v20294_v14 = vld [vmem:[%s21987_s4 + $0x1114] ss:$8 sps:$4 sm:$0xff]  }
 0x455   : > { %15462 = vmatpush1.bf16.msra.mxu0 %v20211_v41  ;;  %14151 = vmatprep.subr.bf16.mxu1 %v20216_v45  ;;  %v20297_v41 = vld [vmem:[%s21987_s4 + $0x3114] ss:$8 sps:$4 sm:$0xff]   ;;  %v2970_v45 = vcombine.high %v23357_v16, %v23357_v16  ;;  %v20298_v16 = vld [vmem:[%s21987_s4 + $0x1120] ss:$8 sps:$4 sm:$0xff]  }
 0x456   : > { %15463 = vmatprep.subr.bf16.mxu0 %v20219_v1  ;;  %v20295_v1 = vld [vmem:[%s21987_s4 + $0x3110] ss:$8 sps:$4 sm:$0xff]  }
 0x458   : > { %14152 = vmatpush1.bf16.msra.mxu1 %v20214_v54  ;;  %v20303_v54 = vld [vmem:[%s21987_s4 + $0x3124] ss:$8 sps:$4 sm:$0xff]  }
 0x459   : > { %15464 = vmatpush1.bf16.msra.mxu0 %v20217_v56  ;;  %14153 = vmatprep.subr.bf16.mxu1 %v20222_v33  ;;  %v20301_v56 = vld [vmem:[%s21987_s4 + $0x3120] ss:$8 sps:$4 sm:$0xff]   ;;  %v20306_v33 = vld [vmem:[%s21987_s4 + $0x1134] ss:$8 sps:$4 sm:$0xff]  }
 0x45a   : > { %15465 = vmatprep.subr.bf16.mxu0 %v20225_v3  ;;  %v20309_v3 = vld [vmem:[%s21987_s4 + $0x3134] ss:$8 sps:$4 sm:$0xff]  }
 0x45c   : > { %14154 = vmatpush1.bf16.msra.mxu1 %v20220_v58  ;;  %v20304_v58 = vld [vmem:[%s21987_s4 + $0x1130] ss:$8 sps:$4 sm:$0xff]  }
 0x45d   : > { %15466 = vmatpush1.bf16.msra.mxu0 %v20223_v4  ;;  %14155 = vmatprep.subr.bf16.mxu1 %v20228_v5  ;;  %v20307_v4 = vld [vmem:[%s21987_s4 + $0x3130] ss:$8 sps:$4 sm:$0xff]   ;;  %v20312_v5 = vld [vmem:[%s21987_s4 + $0x1144] ss:$8 sps:$4 sm:$0xff]  }
 0x45e   : > { %15467 = vmatprep.subr.bf16.mxu0 %v20231_v6  ;;  %v20315_v6 = vld [vmem:[%s21987_s4 + $0x3144] ss:$8 sps:$4 sm:$0xff]  }
 0x460   : > { %14156 = vmatpush1.bf16.msra.mxu1 %v20226_v40  ;;  %v20310_v40 = vld [vmem:[%s21987_s4 + $0x1140] ss:$8 sps:$4 sm:$0xff]  }
 0x461   : > { %15468 = vmatpush1.bf16.msra.mxu0 %v20229_v8  ;;  %14157 = vmatprep.subr.bf16.mxu1 %v20234_v11  ;;  %v20313_v8 = vld [vmem:[%s21987_s4 + $0x3140] ss:$8 sps:$4 sm:$0xff]   ;;  %v20318_v11 = vld [vmem:[%s21987_s4 + $0x1154] ss:$8 sps:$4 sm:$0xff]  }
 0x462   : > { %15469 = vmatprep.subr.bf16.mxu0 %v20237_v12  ;;  %v20321_v12 = vld [vmem:[%s21987_s4 + $0x3154] ss:$8 sps:$4 sm:$0xff]  }
 0x464   : > { %14158 = vmatpush1.bf16.msra.mxu1 %v20232_v19  ;;  %v20316_v19 = vld [vmem:[%s21987_s4 + $0x1150] ss:$8 sps:$4 sm:$0xff]  }
 0x465   : > { %15470 = vmatpush1.bf16.msra.mxu0 %v20235_v20  ;;  %14159 = vmatprep.subr.bf16.mxu1 %v20240_v34  ;;  %v20319_v20 = vld [vmem:[%s21987_s4 + $0x3150] ss:$8 sps:$4 sm:$0xff]   ;;  %v20324_v34 = vld [vmem:[%s21987_s4 + $0x1164] ss:$8 sps:$4 sm:$0xff]  }
 0x466   : > { %15471 = vmatprep.subr.bf16.mxu0 %v20243_v21  ;;  %v20327_v21 = vld [vmem:[%s21987_s4 + $0x3164] ss:$8 sps:$4 sm:$0xff]  }
 0x468   : > { %14160 = vmatpush1.bf16.msra.mxu1 %v20238_v7  ;;  %v20322_v7 = vld [vmem:[%s21987_s4 + $0x1160] ss:$8 sps:$4 sm:$0xff]  }
 0x469   : > { %15472 = vmatpush1.bf16.msra.mxu0 %v20241_v42  ;;  %14161 = vmatprep.subr.bf16.mxu1 %v20246_v39  ;;  %v20325_v42 = vld [vmem:[%s21987_s4 + $0x3160] ss:$8 sps:$4 sm:$0xff]   ;;  %v20330_v39 = vld [vmem:[%s21987_s4 + $0x1174] ss:$8 sps:$4 sm:$0xff]  }
 0x46a   : > { %15473 = vmatprep.subr.bf16.mxu0 %v20249_v23  ;;  %v20333_v23 = vld [vmem:[%s21987_s4 + $0x3174] ss:$8 sps:$4 sm:$0xff]  }
 0x46c   : > { %14162 = vmatpush1.bf16.msra.mxu1 %v20244_v2  ;;  %v20328_v2 = vld [vmem:[%s21987_s4 + $0x1170] ss:$8 sps:$4 sm:$0xff]  }
 0x46d   : > { %15474 = vmatpush1.bf16.msra.mxu0 %v20247_v24  ;;  %14163 = vmatprep.subr.bf16.mxu1 %v20252_v13  ;;  %v20331_v24 = vld [vmem:[%s21987_s4 + $0x3170] ss:$8 sps:$4 sm:$0xff]   ;;  %v20336_v13 = vld [vmem:[%s21987_s4 + $0x1184] ss:$8 sps:$4 sm:$0xff]  }
 0x46e   : > { %15475 = vmatprep.subr.bf16.mxu0 %v20255_v53  ;;  %v20339_v53 = vld [vmem:[%s21987_s4 + $0x3184] ss:$8 sps:$4 sm:$0xff]  }
 0x470   : > { %14164 = vmatpush1.bf16.msra.mxu1 %v20250_v59  ;;  %v20334_v59 = vld [vmem:[%s21987_s4 + $0x1180] ss:$8 sps:$4 sm:$0xff]  }
 0x471   : > { %15476 = vmatpush1.bf16.msra.mxu0 %v20253_v57  ;;  %14165 = vmatprep.subr.bf16.mxu1 %v20258_v27  ;;  %v20337_v57 = vld [vmem:[%s21987_s4 + $0x3180] ss:$8 sps:$4 sm:$0xff]   ;;  %v20342_v27 = vld [vmem:[%s21987_s4 + $0x1194] ss:$8 sps:$4 sm:$0xff]  }
 0x472   : > { %15477 = vmatprep.subr.bf16.mxu0 %v20261_v28  ;;  %v20345_v28 = vld [vmem:[%s21987_s4 + $0x3194] ss:$8 sps:$4 sm:$0xff]  }
 0x474   : > { %14166 = vmatpush1.bf16.msra.mxu1 %v20256_v35  ;;  %v20340_v35 = vld [vmem:[%s21987_s4 + $0x1190] ss:$8 sps:$4 sm:$0xff]  }
 0x475   : > { %15478 = vmatpush1.bf16.msra.mxu0 %v20259_v36  ;;  %14167 = vmatprep.subr.bf16.mxu1 %v20264_v18  ;;  %v20343_v36 = vld [vmem:[%s21987_s4 + $0x3190] ss:$8 sps:$4 sm:$0xff]   ;;  %v20348_v18 = vld [vmem:[%s21987_s4 + $0x11a4] ss:$8 sps:$4 sm:$0xff]  }
 0x476   : > { %15479 = vmatprep.subr.bf16.mxu0 %v20267_v38  ;;  %v20351_v38 = vld [vmem:[%s21987_s4 + $0x31a4] ss:$8 sps:$4 sm:$0xff]  }
 0x478   : > { %14168 = vmatpush1.bf16.msra.mxu1 %v20262_v22  ;;  %v20346_v22 = vld [vmem:[%s21987_s4 + $0x11a0] ss:$8 sps:$4 sm:$0xff]  }
 0x479   : > { %15480 = vmatpush1.bf16.msra.mxu0 %v20265_v43  ;;  %14169 = vmatprep.subr.bf16.mxu1 %v20270_v29  ;;  %v20349_v43 = vld [vmem:[%s21987_s4 + $0x31a0] ss:$8 sps:$4 sm:$0xff]   ;;  %v20354_v29 = vld [vmem:[%s21987_s4 + $0x11b4] ss:$8 sps:$4 sm:$0xff]  }
 0x47a   : > { %15481 = vmatprep.subr.bf16.mxu0 %v20273_v31  ;;  %v20357_v31 = vld [vmem:[%s21987_s4 + $0x31b4] ss:$8 sps:$4 sm:$0xff]  }
 0x47c   : > { %14170 = vmatpush1.bf16.msra.mxu1 %v20268_v9  ;;  %v20352_v9 = vld [vmem:[%s21987_s4 + $0x11b0] ss:$8 sps:$4 sm:$0xff]  }
 0x47d   : > { %15482 = vmatpush1.bf16.msra.mxu0 %v20271_v25  ;;  %14171 = vmatprep.subr.bf16.mxu1 %v20276_v15  ;;  %v20355_v25 = vld [vmem:[%s21987_s4 + $0x31b0] ss:$8 sps:$4 sm:$0xff]   ;;  %v20360_v15 = vld [vmem:[%s21987_s4 + $0x11c4] ss:$8 sps:$4 sm:$0xff]  }
 0x47e   : > { %15483 = vmatprep.subr.bf16.mxu0 %v20279_v46  ;;  %v20363_v46 = vld [vmem:[%s21987_s4 + $0x31c4] ss:$8 sps:$4 sm:$0xff]  }
 0x480   : > { %14172 = vmatpush1.bf16.msra.mxu1 %v20274_v26  ;;  %v20358_v26 = vld [vmem:[%s21987_s4 + $0x11c0] ss:$8 sps:$4 sm:$0xff]  }
 0x481   : > { %15484 = vmatpush1.bf16.msra.mxu0 %v20277_v47  ;;  %14173 = vmatprep.subr.bf16.mxu1 %v20282_v37  ;;  %v20361_v47 = vld [vmem:[%s21987_s4 + $0x31c0] ss:$8 sps:$4 sm:$0xff]   ;;  %v20366_v37 = vld [vmem:[%s21987_s4 + $0x11d4] ss:$8 sps:$4 sm:$0xff]  }
 0x482   : > { %15485 = vmatprep.subr.bf16.mxu0 %v20285_v48  ;;  %v20369_v48 = vld [vmem:[%s21987_s4 + $0x31d4] ss:$8 sps:$4 sm:$0xff]  }
 0x484   : > { %14174 = vmatpush1.bf16.msra.mxu1 %v20280_v32  ;;  %v20364_v32 = vld [vmem:[%s21987_s4 + $0x11d0] ss:$8 sps:$4 sm:$0xff]  }
 0x485   : > { %15486 = vmatpush1.bf16.msra.mxu0 %v20283_v49  ;;  %14184 = vmatprep.subr.bf16.mxu1 %v20288_v51  ;;  %v20367_v49 = vld [vmem:[%s21987_s4 + $0x31d0] ss:$8 sps:$4 sm:$0xff]   ;;  %v20372_v51 = vld [vmem:[%s21987_s4 + $0x11e4] ss:$8 sps:$4 sm:$0xff]  }
 0x486   : > { %15496 = vmatprep.subr.bf16.mxu0 %v20291_v52  ;;  %v20375_v52 = vld [vmem:[%s21987_s4 + $0x31e4] ss:$8 sps:$4 sm:$0xff]  }
 0x487   : > { %14176 = vmatmul.mubr.bf16.vlgmr.msra.gmra.mrb[0].mxu1 %v23423_v61 }
 0x488   : > { %15488 = vmatmul.mubr.bf16.vlgmr.msra.gmra.mrb[0].mxu0 %v23427_v62  ;;  %14185 = vmatpush1.bf16.msra.mxu1 %v20286_v63  ;;  %v2531_v63 = vcombine.high %v23320_v10, %v23320_v10  ;;  %v20376_v10 = vld [vmem:[%s21987_s4 + $0x11f0] ss:$8 sps:$4 sm:$0xff]  }
 0x489   : > { %15497 = vmatpush1.bf16.msra.mxu0 %v20289_v0  ;;  %14186 = vmatprep.subr.bf16.mxu1 %v20294_v14  ;;  %v2923_v0 = vcombine.high %v23323_v30, %v23323_v30  ;;  %v20370_v14 = vld [vmem:[%s21987_s4 + $0x11e0] ss:$8 sps:$4 sm:$0xff]   ;;  %v20379_v30 = vld [vmem:[%s21987_s4 + $0x31f0] ss:$8 sps:$4 sm:$0xff]  }
 0x48a   : > { %15498 = vmatprep.subr.bf16.mxu0 %v20297_v41  ;;  %14216 = vmatprep.mubr.bf16.mxu1 %v2578_v55  ;;  %v20373_v41 = vld [vmem:[%s21987_s4 + $0x31e0] ss:$8 sps:$4 sm:$0xff]   ;;  %v20378_v55 = vld [vmem:[%s21987_s4 + $0x11f4] ss:$8 sps:$4 sm:$0xff]  }
 0x48b   : > { %15528 = vmatprep.mubr.bf16.mxu0 %v2970_v45  ;;  %v20381_v45 = vld [vmem:[%s21987_s4 + $0x31f4] ss:$8 sps:$4 sm:$0xff]  }
 0x48c   : > { %14187 = vmatpush1.bf16.msra.mxu1 %v20292_v60  ;;  %v23500_v60 = vrot.slane %v2531_v63, %v22061_v50  ;;  %v20448_v63 = vld [vmem:[%s21987_s4 + $0x12b0] ss:$8 sps:$4 sm:$0xff]  }
 0x48d   : > { %15499 = vmatpush1.bf16.msra.mxu0 %v20295_v1  ;;  %14188 = vmatprep.subr.bf16.mxu1 %v20300_v17  ;;  %v23503_v1 = vrot.slane %v2923_v0, %v22061_v50  ;;  %v20384_v17 = vld [vmem:[%s21987_s4 + $0x1204] ss:$8 sps:$4 sm:$0xff]   ;;  %v20451_v0 = vld [vmem:[%s21987_s4 + $0x32b0] ss:$8 sps:$4 sm:$0xff]  }
 0x48e   : > { %15500 = vmatprep.subr.bf16.mxu0 %v20303_v54  ;;  %v20387_v54 = vld [vmem:[%s21987_s4 + $0x3204] ss:$8 sps:$4 sm:$0xff]  }
 0x490   : > { %14189 = vmatpush1.bf16.msra.mxu1 %v20298_v16  ;;  %v2547_v16 = vcombine.high %v23500_v60, %v23500_v60 }
 0x491   : > { %15501 = vmatpush1.bf16.msra.mxu0 %v20301_v56  ;;  %14190 = vmatprep.subr.bf16.mxu1 %v20306_v33  ;;  %v2939_v56 = vcombine.high %v23503_v1, %v23503_v1  ;;  %v2576_v33 = vcombine.high %v23423_v61, %v23423_v61 }
 0x492   : > { %15502 = vmatprep.subr.bf16.mxu0 %v20309_v3  ;;  %v2968_v3 = vcombine.high %v23427_v62, %v23427_v62  ;;  %v20388_v62 = vld [vmem:[%s21987_s4 + $0x1210] ss:$8 sps:$4 sm:$0xff]  }
 0x493   : > { %v23525_v61 = vrot.slane %v2939_v56, %v22061_v50  ;;  %v20471_v56 = vld [vmem:[%s21987_s4 + $0x32e4] ss:$8 sps:$4 sm:$0xff]  }
 0x494   : > { %14191 = vmatpush1.bf16.msra.mxu1 %v20304_v58  ;;  %v20382_v58 = vld [vmem:[%s21987_s4 + $0x1200] ss:$8 sps:$4 sm:$0xff]  }
 0x495   : > { %15503 = vmatpush1.bf16.msra.mxu0 %v20307_v4  ;;  %14192 = vmatprep.subr.bf16.mxu1 %v20312_v5  ;;  %v20385_v4 = vld [vmem:[%s21987_s4 + $0x3200] ss:$8 sps:$4 sm:$0xff]   ;;  %v20390_v5 = vld [vmem:[%s21987_s4 + $0x1214] ss:$8 sps:$4 sm:$0xff]  }
 0x496   : > { %15504 = vmatprep.subr.bf16.mxu0 %v20315_v6  ;;  %v20393_v6 = vld [vmem:[%s21987_s4 + $0x3214] ss:$8 sps:$4 sm:$0xff]  }
 0x498   : > { %14193 = vmatpush1.bf16.msra.mxu1 %v20310_v40  ;;  %v23522_v40 = vrot.slane %v2547_v16, %v22061_v50  ;;  %v20468_v16 = vld [vmem:[%s21987_s4 + $0x12e4] ss:$8 sps:$4 sm:$0xff]  }
 0x499   : > { %15505 = vmatpush1.bf16.msra.mxu0 %v20313_v8  ;;  %14194 = vmatprep.subr.bf16.mxu1 %v20318_v11  ;;  %v20391_v8 = vld [vmem:[%s21987_s4 + $0x3210] ss:$8 sps:$4 sm:$0xff]   ;;  %v20396_v11 = vld [vmem:[%s21987_s4 + $0x1224] ss:$8 sps:$4 sm:$0xff]  }
 0x49a   : > { %15506 = vmatprep.subr.bf16.mxu0 %v20321_v12  ;;  %v20399_v12 = vld [vmem:[%s21987_s4 + $0x3224] ss:$8 sps:$4 sm:$0xff]  }
 0x49c   : > { %14195 = vmatpush1.bf16.msra.mxu1 %v20316_v19  ;;  %v20394_v19 = vld [vmem:[%s21987_s4 + $0x1220] ss:$8 sps:$4 sm:$0xff]  }
 0x49d   : > { %15507 = vmatpush1.bf16.msra.mxu0 %v20319_v20  ;;  %14196 = vmatprep.subr.bf16.mxu1 %v20324_v34  ;;  %v20397_v20 = vld [vmem:[%s21987_s4 + $0x3220] ss:$8 sps:$4 sm:$0xff]   ;;  %v20402_v34 = vld [vmem:[%s21987_s4 + $0x1234] ss:$8 sps:$4 sm:$0xff]  }
 0x49e   : > { %15508 = vmatprep.subr.bf16.mxu0 %v20327_v21  ;;  %v20405_v21 = vld [vmem:[%s21987_s4 + $0x3234] ss:$8 sps:$4 sm:$0xff]  }
 0x4a0   : > { %14197 = vmatpush1.bf16.msra.mxu1 %v20322_v7  ;;  %v20400_v7 = vld [vmem:[%s21987_s4 + $0x1230] ss:$8 sps:$4 sm:$0xff]  }
 0x4a1   : > { %15509 = vmatpush1.bf16.msra.mxu0 %v20325_v42  ;;  %14198 = vmatprep.subr.bf16.mxu1 %v20330_v39  ;;  %v20403_v42 = vld [vmem:[%s21987_s4 + $0x3230] ss:$8 sps:$4 sm:$0xff]   ;;  %v20408_v39 = vld [vmem:[%s21987_s4 + $0x1244] ss:$8 sps:$4 sm:$0xff]  }
 0x4a2   : > { %15510 = vmatprep.subr.bf16.mxu0 %v20333_v23  ;;  %v20411_v23 = vld [vmem:[%s21987_s4 + $0x3244] ss:$8 sps:$4 sm:$0xff]  }
 0x4a4   : > { %14199 = vmatpush1.bf16.msra.mxu1 %v20328_v2  ;;  %v20406_v2 = vld [vmem:[%s21987_s4 + $0x1240] ss:$8 sps:$4 sm:$0xff]  }
 0x4a5   : > { %15511 = vmatpush1.bf16.msra.mxu0 %v20331_v24  ;;  %14200 = vmatprep.subr.bf16.mxu1 %v20336_v13  ;;  %v20409_v24 = vld [vmem:[%s21987_s4 + $0x3240] ss:$8 sps:$4 sm:$0xff]   ;;  %v20414_v13 = vld [vmem:[%s21987_s4 + $0x1254] ss:$8 sps:$4 sm:$0xff]  }
 0x4a6   : > { %15512 = vmatprep.subr.bf16.mxu0 %v20339_v53  ;;  %v20417_v53 = vld [vmem:[%s21987_s4 + $0x3254] ss:$8 sps:$4 sm:$0xff]  }
 0x4a8   : > { %14201 = vmatpush1.bf16.msra.mxu1 %v20334_v59  ;;  %v20412_v59 = vld [vmem:[%s21987_s4 + $0x1250] ss:$8 sps:$4 sm:$0xff]  }
 0x4a9   : > { %15513 = vmatpush1.bf16.msra.mxu0 %v20337_v57  ;;  %14202 = vmatprep.subr.bf16.mxu1 %v20342_v27  ;;  %v20415_v57 = vld [vmem:[%s21987_s4 + $0x3250] ss:$8 sps:$4 sm:$0xff]   ;;  %v20420_v27 = vld [vmem:[%s21987_s4 + $0x1264] ss:$8 sps:$4 sm:$0xff]  }
 0x4aa   : > { %15514 = vmatprep.subr.bf16.mxu0 %v20345_v28  ;;  %v20423_v28 = vld [vmem:[%s21987_s4 + $0x3264] ss:$8 sps:$4 sm:$0xff]  }
 0x4ac   : > { %14203 = vmatpush1.bf16.msra.mxu1 %v20340_v35  ;;  %v20418_v35 = vld [vmem:[%s21987_s4 + $0x1260] ss:$8 sps:$4 sm:$0xff]  }
 0x4ad   : > { %15515 = vmatpush1.bf16.msra.mxu0 %v20343_v36  ;;  %14204 = vmatprep.subr.bf16.mxu1 %v20348_v18  ;;  %v20421_v36 = vld [vmem:[%s21987_s4 + $0x3260] ss:$8 sps:$4 sm:$0xff]   ;;  %v20426_v18 = vld [vmem:[%s21987_s4 + $0x1274] ss:$8 sps:$4 sm:$0xff]  }
 0x4ae   : > { %15516 = vmatprep.subr.bf16.mxu0 %v20351_v38  ;;  %v20429_v38 = vld [vmem:[%s21987_s4 + $0x3274] ss:$8 sps:$4 sm:$0xff]  }
 0x4b0   : > { %14205 = vmatpush1.bf16.msra.mxu1 %v20346_v22  ;;  %v20424_v22 = vld [vmem:[%s21987_s4 + $0x1270] ss:$8 sps:$4 sm:$0xff]  }
 0x4b1   : > { %15517 = vmatpush1.bf16.msra.mxu0 %v20349_v43  ;;  %14206 = vmatprep.subr.bf16.mxu1 %v20354_v29  ;;  %v20427_v43 = vld [vmem:[%s21987_s4 + $0x3270] ss:$8 sps:$4 sm:$0xff]   ;;  %v20432_v29 = vld [vmem:[%s21987_s4 + $0x1284] ss:$8 sps:$4 sm:$0xff]  }
 0x4b2   : > { %15518 = vmatprep.subr.bf16.mxu0 %v20357_v31  ;;  %v20435_v31 = vld [vmem:[%s21987_s4 + $0x3284] ss:$8 sps:$4 sm:$0xff]  }
 0x4b4   : > { %14207 = vmatpush1.bf16.msra.mxu1 %v20352_v9  ;;  %v20430_v9 = vld [vmem:[%s21987_s4 + $0x1280] ss:$8 sps:$4 sm:$0xff]  }
 0x4b5   : > { %15519 = vmatpush1.bf16.msra.mxu0 %v20355_v25  ;;  %14208 = vmatprep.subr.bf16.mxu1 %v20360_v15  ;;  %v20433_v25 = vld [vmem:[%s21987_s4 + $0x3280] ss:$8 sps:$4 sm:$0xff]   ;;  %v20438_v15 = vld [vmem:[%s21987_s4 + $0x1294] ss:$8 sps:$4 sm:$0xff]  }
 0x4b6   : > { %15520 = vmatprep.subr.bf16.mxu0 %v20363_v46  ;;  %v20441_v46 = vld [vmem:[%s21987_s4 + $0x3294] ss:$8 sps:$4 sm:$0xff]  }
 0x4b8   : > { %14209 = vmatpush1.bf16.msra.mxu1 %v20358_v26  ;;  %v20436_v26 = vld [vmem:[%s21987_s4 + $0x1290] ss:$8 sps:$4 sm:$0xff]  }
 0x4b9   : > { %15521 = vmatpush1.bf16.msra.mxu0 %v20361_v47  ;;  %14210 = vmatprep.subr.bf16.mxu1 %v20366_v37  ;;  %v20439_v47 = vld [vmem:[%s21987_s4 + $0x3290] ss:$8 sps:$4 sm:$0xff]   ;;  %v20444_v37 = vld [vmem:[%s21987_s4 + $0x12a4] ss:$8 sps:$4 sm:$0xff]  }
 0x4ba   : > { %15522 = vmatprep.subr.bf16.mxu0 %v20369_v48  ;;  %v20447_v48 = vld [vmem:[%s21987_s4 + $0x32a4] ss:$8 sps:$4 sm:$0xff]  }
 0x4bc   : > { %14211 = vmatpush1.bf16.msra.mxu1 %v20364_v32  ;;  %v20442_v32 = vld [vmem:[%s21987_s4 + $0x12a0] ss:$8 sps:$4 sm:$0xff]  }
 0x4bd   : > { %15523 = vmatpush1.bf16.msra.mxu0 %v20367_v49  ;;  %14212 = vmatprep.subr.bf16.mxu1 %v20372_v51  ;;  %v20445_v49 = vld [vmem:[%s21987_s4 + $0x32a0] ss:$8 sps:$4 sm:$0xff]   ;;  %v20450_v51 = vld [vmem:[%s21987_s4 + $0x12b4] ss:$8 sps:$4 sm:$0xff]  }
 0x4be   : > { %15524 = vmatprep.subr.bf16.mxu0 %v20375_v52  ;;  %v20453_v52 = vld [vmem:[%s21987_s4 + $0x32b4] ss:$8 sps:$4 sm:$0xff]  }
 0x4c0   : > { %14213 = vmatpush1.bf16.msra.mxu1 %v20370_v14  ;;  %v20456_v14 = vld [vmem:[%s21987_s4 + $0x12c4] ss:$8 sps:$4 sm:$0xff]  }
 0x4c1   : > { %15525 = vmatpush1.bf16.msra.mxu0 %v20373_v41  ;;  %14214 = vmatprep.subr.bf16.mxu1 %v20378_v55  ;;  %v20459_v41 = vld [vmem:[%s21987_s4 + $0x32c4] ss:$8 sps:$4 sm:$0xff]   ;;  %v20454_v55 = vld [vmem:[%s21987_s4 + $0x12c0] ss:$8 sps:$4 sm:$0xff]  }
 0x4c2   : > { %15526 = vmatprep.subr.bf16.mxu0 %v20381_v45  ;;  %v20457_v45 = vld [vmem:[%s21987_s4 + $0x32c0] ss:$8 sps:$4 sm:$0xff]  }
 0x4c4   : > { %14215 = vmatpush1.bf16.msra.mxu1 %v20376_v10  ;;  %v20462_v10 = vld [vmem:[%s21987_s4 + $0x12d4] ss:$8 sps:$4 sm:$0xff]  }
 0x4c5   : > { %15527 = vmatpush1.bf16.msra.mxu0 %v20379_v30  ;;  %14225 = vmatprep.subr.bf16.mxu1 %v20384_v17  ;;  %v20465_v30 = vld [vmem:[%s21987_s4 + $0x32d4] ss:$8 sps:$4 sm:$0xff]   ;;  %v20460_v17 = vld [vmem:[%s21987_s4 + $0x12d0] ss:$8 sps:$4 sm:$0xff]  }
 0x4c6   : > { %15537 = vmatprep.subr.bf16.mxu0 %v20387_v54  ;;  %v20463_v54 = vld [vmem:[%s21987_s4 + $0x32d0] ss:$8 sps:$4 sm:$0xff]  }
 0x4c7   : > { %14217 = vmatmul.mubr.bf16.vlgmr.msra.gmra.mrb[0].mxu1 %v2576_v33  ;;  %v20466_v33 = vld [vmem:[%s21987_s4 + $0x12e0] ss:$8 sps:$4 sm:$0xff]  }
 0x4c8   : > { %15529 = vmatmul.mubr.bf16.vlgmr.msra.gmra.mrb[0].mxu0 %v2968_v3  ;;  %14226 = vmatpush1.bf16.msra.mxu1 %v20382_v58  ;;  %v20469_v3 = vld [vmem:[%s21987_s4 + $0x32e0] ss:$8 sps:$4 sm:$0xff]   ;;  %v20474_v58 = vld [vmem:[%s21987_s4 + $0x12f4] ss:$8 sps:$4 sm:$0xff]  }
 0x4c9   : > { %15538 = vmatpush1.bf16.msra.mxu0 %v20385_v4  ;;  %14227 = vmatprep.subr.bf16.mxu1 %v20390_v5  ;;  %v20477_v4 = vld [vmem:[%s21987_s4 + $0x32f4] ss:$8 sps:$4 sm:$0xff]   ;;  %v20472_v5 = vld [vmem:[%s21987_s4 + $0x12f0] ss:$8 sps:$4 sm:$0xff]  }
 0x4ca   : > { %15539 = vmatprep.subr.bf16.mxu0 %v20393_v6  ;;  %14257 = vmatprep.mubr.bf16.mxu1 %v23522_v40  ;;  %v20475_v6 = vld [vmem:[%s21987_s4 + $0x32f0] ss:$8 sps:$4 sm:$0xff]  }
 0x4cb   : > { %15569 = vmatprep.mubr.bf16.mxu0 %v23525_v61 }
 0x4cc   : > { %14228 = vmatpush1.bf16.msra.mxu1 %v20388_v62  ;;  %v20481_v62 = vld [vmem:[%s21987_s4 + $0x1304] ss:$8 sps:$4 sm:$0xff]  }
 0x4cd   : > { %15540 = vmatpush1.bf16.msra.mxu0 %v20391_v8  ;;  %14229 = vmatprep.subr.bf16.mxu1 %v20396_v11  ;;  %v20485_v8 = vld [vmem:[%s21987_s4 + $0x3304] ss:$8 sps:$4 sm:$0xff]   ;;  %v23591_v11 = vrot.slane %v23500_v60, %v22061_v50  ;;  %v2579_v60 = vcombine.high %v23522_v40, %v23522_v40 }
 0x4ce   : > { %15541 = vmatprep.subr.bf16.mxu0 %v20399_v12  ;;  %v23595_v12 = vrot.slane %v23503_v1, %v22061_v50  ;;  %v20486_v1 = vld [vmem:[%s21987_s4 + $0x1310] ss:$8 sps:$4 sm:$0xff]   ;;  %v20494_v40 = vld [vmem:[%s21987_s4 + $0x1324] ss:$8 sps:$4 sm:$0xff]  }
 0x4d0   : > { %14230 = vmatpush1.bf16.msra.mxu1 %v20394_v19  ;;  %v20479_v19 = vld [vmem:[%s21987_s4 + $0x1300] ss:$8 sps:$4 sm:$0xff]  }
 0x4d1   : > { %15542 = vmatpush1.bf16.msra.mxu0 %v20397_v20  ;;  %14231 = vmatprep.subr.bf16.mxu1 %v20402_v34  ;;  %v20483_v20 = vld [vmem:[%s21987_s4 + $0x3300] ss:$8 sps:$4 sm:$0xff]   ;;  %v20488_v34 = vld [vmem:[%s21987_s4 + $0x1314] ss:$8 sps:$4 sm:$0xff]  }
 0x4d2   : > { %15543 = vmatprep.subr.bf16.mxu0 %v20405_v21  ;;  %v20491_v21 = vld [vmem:[%s21987_s4 + $0x3314] ss:$8 sps:$4 sm:$0xff]  }
 0x4d4   : > { %14232 = vmatpush1.bf16.msra.mxu1 %v20400_v7  ;;  %v2971_v7 = vcombine.high %v23525_v61, %v23525_v61  ;;  %v20492_v61 = vld [vmem:[%s21987_s4 + $0x1320] ss:$8 sps:$4 sm:$0xff]  }
 0x4d5   : > { %15544 = vmatpush1.bf16.msra.mxu0 %v20403_v42  ;;  %14233 = vmatprep.subr.bf16.mxu1 %v20408_v39  ;;  %v20489_v42 = vld [vmem:[%s21987_s4 + $0x3310] ss:$8 sps:$4 sm:$0xff]   ;;  %v20497_v39 = vld [vmem:[%s21987_s4 + $0x3324] ss:$8 sps:$4 sm:$0xff]  }
 0x4d6   : > { %15545 = vmatprep.subr.bf16.mxu0 %v20411_v23  ;;  %v20495_v23 = vld [vmem:[%s21987_s4 + $0x3320] ss:$8 sps:$4 sm:$0xff]  }
 0x4d8   : > { %14234 = vmatpush1.bf16.msra.mxu1 %v20406_v2  ;;  %v20500_v2 = vld [vmem:[%s21987_s4 + $0x1334] ss:$8 sps:$4 sm:$0xff]  }
 0x4d9   : > { %15546 = vmatpush1.bf16.msra.mxu0 %v20409_v24  ;;  %14235 = vmatprep.subr.bf16.mxu1 %v20414_v13  ;;  %v20503_v24 = vld [vmem:[%s21987_s4 + $0x3334] ss:$8 sps:$4 sm:$0xff]   ;;  %v20498_v13 = vld [vmem:[%s21987_s4 + $0x1330] ss:$8 sps:$4 sm:$0xff]  }
 0x4da   : > { %15547 = vmatprep.subr.bf16.mxu0 %v20417_v53  ;;  %v20501_v53 = vld [vmem:[%s21987_s4 + $0x3330] ss:$8 sps:$4 sm:$0xff]  }
 0x4dc   : > { %14236 = vmatpush1.bf16.msra.mxu1 %v20412_v59  ;;  %v20506_v59 = vld [vmem:[%s21987_s4 + $0x1344] ss:$8 sps:$4 sm:$0xff]  }
 0x4dd   : > { %15548 = vmatpush1.bf16.msra.mxu0 %v20415_v57  ;;  %14237 = vmatprep.subr.bf16.mxu1 %v20420_v27  ;;  %v20509_v57 = vld [vmem:[%s21987_s4 + $0x3344] ss:$8 sps:$4 sm:$0xff]   ;;  %v20504_v27 = vld [vmem:[%s21987_s4 + $0x1340] ss:$8 sps:$4 sm:$0xff]  }
 0x4de   : > { %15549 = vmatprep.subr.bf16.mxu0 %v20423_v28  ;;  %v20507_v28 = vld [vmem:[%s21987_s4 + $0x3340] ss:$8 sps:$4 sm:$0xff]  }
 0x4e0   : > { %14238 = vmatpush1.bf16.msra.mxu1 %v20418_v35  ;;  %v20512_v35 = vld [vmem:[%s21987_s4 + $0x1354] ss:$8 sps:$4 sm:$0xff]  }
 0x4e1   : > { %15550 = vmatpush1.bf16.msra.mxu0 %v20421_v36  ;;  %14239 = vmatprep.subr.bf16.mxu1 %v20426_v18  ;;  %v20515_v36 = vld [vmem:[%s21987_s4 + $0x3354] ss:$8 sps:$4 sm:$0xff]   ;;  %v20510_v18 = vld [vmem:[%s21987_s4 + $0x1350] ss:$8 sps:$4 sm:$0xff]  }
 0x4e2   : > { %15551 = vmatprep.subr.bf16.mxu0 %v20429_v38  ;;  %v20513_v38 = vld [vmem:[%s21987_s4 + $0x3350] ss:$8 sps:$4 sm:$0xff]  }
 0x4e4   : > { %14240 = vmatpush1.bf16.msra.mxu1 %v20424_v22  ;;  %v20518_v22 = vld [vmem:[%s21987_s4 + $0x1364] ss:$8 sps:$4 sm:$0xff]  }
 0x4e5   : > { %15552 = vmatpush1.bf16.msra.mxu0 %v20427_v43  ;;  %14241 = vmatprep.subr.bf16.mxu1 %v20432_v29  ;;  %v20521_v43 = vld [vmem:[%s21987_s4 + $0x3364] ss:$8 sps:$4 sm:$0xff]   ;;  %v20516_v29 = vld [vmem:[%s21987_s4 + $0x1360] ss:$8 sps:$4 sm:$0xff]  }
 0x4e6   : > { %15553 = vmatprep.subr.bf16.mxu0 %v20435_v31  ;;  %v20519_v31 = vld [vmem:[%s21987_s4 + $0x3360] ss:$8 sps:$4 sm:$0xff]  }
 0x4e8   : > { %14242 = vmatpush1.bf16.msra.mxu1 %v20430_v9  ;;  %v20524_v9 = vld [vmem:[%s21987_s4 + $0x1374] ss:$8 sps:$4 sm:$0xff]  }
 0x4e9   : > { %15554 = vmatpush1.bf16.msra.mxu0 %v20433_v25  ;;  %14243 = vmatprep.subr.bf16.mxu1 %v20438_v15  ;;  %v20527_v25 = vld [vmem:[%s21987_s4 + $0x3374] ss:$8 sps:$4 sm:$0xff]   ;;  %v20522_v15 = vld [vmem:[%s21987_s4 + $0x1370] ss:$8 sps:$4 sm:$0xff]  }
 0x4ea   : > { %15555 = vmatprep.subr.bf16.mxu0 %v20441_v46  ;;  %v20525_v46 = vld [vmem:[%s21987_s4 + $0x3370] ss:$8 sps:$4 sm:$0xff]  }
 0x4ec   : > { %14244 = vmatpush1.bf16.msra.mxu1 %v20436_v26  ;;  %v20530_v26 = vld [vmem:[%s21987_s4 + $0x1384] ss:$8 sps:$4 sm:$0xff]  }
 0x4ed   : > { %15556 = vmatpush1.bf16.msra.mxu0 %v20439_v47  ;;  %14245 = vmatprep.subr.bf16.mxu1 %v20444_v37  ;;  %v20533_v47 = vld [vmem:[%s21987_s4 + $0x3384] ss:$8 sps:$4 sm:$0xff]   ;;  %v20528_v37 = vld [vmem:[%s21987_s4 + $0x1380] ss:$8 sps:$4 sm:$0xff]  }
 0x4ee   : > { %15557 = vmatprep.subr.bf16.mxu0 %v20447_v48  ;;  %v20531_v48 = vld [vmem:[%s21987_s4 + $0x3380] ss:$8 sps:$4 sm:$0xff]  }
 0x4f0   : > { %14246 = vmatpush1.bf16.msra.mxu1 %v20442_v32  ;;  %v20536_v32 = vld [vmem:[%s21987_s4 + $0x1394] ss:$8 sps:$4 sm:$0xff]  }
 0x4f1   : > { %15558 = vmatpush1.bf16.msra.mxu0 %v20445_v49  ;;  %14247 = vmatprep.subr.bf16.mxu1 %v20450_v51  ;;  %v20539_v49 = vld [vmem:[%s21987_s4 + $0x3394] ss:$8 sps:$4 sm:$0xff]   ;;  %v20534_v51 = vld [vmem:[%s21987_s4 + $0x1390] ss:$8 sps:$4 sm:$0xff]  }
 0x4f2   : > { %15559 = vmatprep.subr.bf16.mxu0 %v20453_v52  ;;  %v20537_v52 = vld [vmem:[%s21987_s4 + $0x3390] ss:$8 sps:$4 sm:$0xff]  }
 0x4f4   : > { %14248 = vmatpush1.bf16.msra.mxu1 %v20448_v63  ;;  %v20542_v63 = vld [vmem:[%s21987_s4 + $0x13a4] ss:$8 sps:$4 sm:$0xff]  }
 0x4f5   : > { %15560 = vmatpush1.bf16.msra.mxu0 %v20451_v0  ;;  %14249 = vmatprep.subr.bf16.mxu1 %v20456_v14  ;;  %v20545_v0 = vld [vmem:[%s21987_s4 + $0x33a4] ss:$8 sps:$4 sm:$0xff]   ;;  %v20540_v14 = vld [vmem:[%s21987_s4 + $0x13a0] ss:$8 sps:$4 sm:$0xff]  }
 0x4f6   : > { %15561 = vmatprep.subr.bf16.mxu0 %v20459_v41  ;;  %v20543_v41 = vld [vmem:[%s21987_s4 + $0x33a0] ss:$8 sps:$4 sm:$0xff]  }
 0x4f8   : > { %14250 = vmatpush1.bf16.msra.mxu1 %v20454_v55  ;;  %v20548_v55 = vld [vmem:[%s21987_s4 + $0x13b4] ss:$8 sps:$4 sm:$0xff]  }
 0x4f9   : > { %15562 = vmatpush1.bf16.msra.mxu0 %v20457_v45  ;;  %14251 = vmatprep.subr.bf16.mxu1 %v20462_v10  ;;  %v20551_v45 = vld [vmem:[%s21987_s4 + $0x33b4] ss:$8 sps:$4 sm:$0xff]   ;;  %v20546_v10 = vld [vmem:[%s21987_s4 + $0x13b0] ss:$8 sps:$4 sm:$0xff]  }
 0x4fa   : > { %15563 = vmatprep.subr.bf16.mxu0 %v20465_v30  ;;  %v20549_v30 = vld [vmem:[%s21987_s4 + $0x33b0] ss:$8 sps:$4 sm:$0xff]  }
 0x4fc   : > { %14252 = vmatpush1.bf16.msra.mxu1 %v20460_v17  ;;  %v20554_v17 = vld [vmem:[%s21987_s4 + $0x13c4] ss:$8 sps:$4 sm:$0xff]  }
 0x4fd   : > { %15564 = vmatpush1.bf16.msra.mxu0 %v20463_v54  ;;  %14253 = vmatprep.subr.bf16.mxu1 %v20468_v16  ;;  %v20557_v54 = vld [vmem:[%s21987_s4 + $0x33c4] ss:$8 sps:$4 sm:$0xff]   ;;  %v20552_v16 = vld [vmem:[%s21987_s4 + $0x13c0] ss:$8 sps:$4 sm:$0xff]  }
 0x4fe   : > { %15565 = vmatprep.subr.bf16.mxu0 %v20471_v56  ;;  %v20555_v56 = vld [vmem:[%s21987_s4 + $0x33c0] ss:$8 sps:$4 sm:$0xff]  }
 0x500   : > { %14254 = vmatpush1.bf16.msra.mxu1 %v20466_v33  ;;  %v20560_v33 = vld [vmem:[%s21987_s4 + $0x13d4] ss:$8 sps:$4 sm:$0xff]  }
 0x501   : > { %15566 = vmatpush1.bf16.msra.mxu0 %v20469_v3  ;;  %14255 = vmatprep.subr.bf16.mxu1 %v20474_v58  ;;  %v20563_v3 = vld [vmem:[%s21987_s4 + $0x33d4] ss:$8 sps:$4 sm:$0xff]   ;;  %v20558_v58 = vld [vmem:[%s21987_s4 + $0x13d0] ss:$8 sps:$4 sm:$0xff]  }
 0x502   : > { %15567 = vmatprep.subr.bf16.mxu0 %v20477_v4  ;;  %v20561_v4 = vld [vmem:[%s21987_s4 + $0x33d0] ss:$8 sps:$4 sm:$0xff]  }
 0x504   : > { %14256 = vmatpush1.bf16.msra.mxu1 %v20472_v5  ;;  %v20566_v5 = vld [vmem:[%s21987_s4 + $0x13e4] ss:$8 sps:$4 sm:$0xff]  }
 0x505   : > { %15568 = vmatpush1.bf16.msra.mxu0 %v20475_v6  ;;  %14266 = vmatprep.subr.bf16.mxu1 %v20481_v62  ;;  %v20569_v6 = vld [vmem:[%s21987_s4 + $0x33e4] ss:$8 sps:$4 sm:$0xff]  }
 0x506   : > { %15578 = vmatprep.subr.bf16.mxu0 %v20485_v8  ;;  %v23660_v62 = vld [vmem:[%s22000_s6 + $0x28] sm:$0xff] }
 0x507   : > { %14258 = vmatmul.mubr.bf16.vlgmr.msra.gmra.mrb[0].mxu1 %v23591_v11  ;;  %v23663_v8 = vld [vmem:[%s22000_s6 + $0x68] sm:$0xff] }
 0x508   : > { %15570 = vmatmul.mubr.bf16.vlgmr.msra.gmra.mrb[0].mxu0 %v23595_v12  ;;  %14267 = vmatpush1.bf16.msra.mxu1 %v20479_v19  ;;  %v20564_v19 = vld [vmem:[%s21987_s4 + $0x13e0] ss:$8 sps:$4 sm:$0xff]  }
 0x509   : > { %15579 = vmatpush1.bf16.msra.mxu0 %v20483_v20  ;;  %14268 = vmatprep.subr.bf16.mxu1 %v20488_v34  ;;  %v20567_v20 = vld [vmem:[%s21987_s4 + $0x33e0] ss:$8 sps:$4 sm:$0xff]   ;;  %v20572_v34 = vld [vmem:[%s21987_s4 + $0x13f4] ss:$8 sps:$4 sm:$0xff]  }
 0x50a   : > { %15580 = vmatprep.subr.bf16.mxu0 %v20491_v21  ;;  %14298 = vmatprep.mubr.bf16.mxu1 %v2579_v60  ;;  %v20575_v21 = vld [vmem:[%s21987_s4 + $0x33f4] ss:$8 sps:$4 sm:$0xff]   ;;  %v23671_v60 = vrot.slane %v23660_v62, %v22061_v50 }
 0x50b   : > { %15610 = vmatprep.mubr.bf16.mxu0 %v2971_v7  ;;  %v23675_v7 = vrot.slane %v23663_v8, %v22061_v50 }
 0x50c   : > { %14269 = vmatpush1.bf16.msra.mxu1 %v20486_v1  ;;  %v20570_v1 = vld [vmem:[%s21987_s4 + $0x13f0] ss:$8 sps:$4 sm:$0xff]  }
 0x50d   : > { %15581 = vmatpush1.bf16.msra.mxu0 %v20489_v42  ;;  %14270 = vmatprep.subr.bf16.mxu1 %v20494_v40  ;;  %v20573_v42 = vld [vmem:[%s21987_s4 + $0x33f0] ss:$8 sps:$4 sm:$0xff]   ;;  %v20578_v40 = vld [vmem:[%s21987_s4 + $0x1404] ss:$8 sps:$4 sm:$0xff]  }
 0x50e   : > { %15582 = vmatprep.subr.bf16.mxu0 %v20497_v39  ;;  %v20581_v39 = vld [vmem:[%s21987_s4 + $0x3404] ss:$8 sps:$4 sm:$0xff]  }
 0x510   : > { %14271 = vmatpush1.bf16.msra.mxu1 %v20492_v61  ;;  %v2595_v61 = vcombine.high %v23671_v60, %v23671_v60 }
 0x511   : > { %15583 = vmatpush1.bf16.msra.mxu0 %v20495_v23  ;;  %14272 = vmatprep.subr.bf16.mxu1 %v20500_v2  ;;  %v2987_v23 = vcombine.high %v23675_v7, %v23675_v7  ;;  %v2577_v2 = vcombine.high %v23591_v11, %v23591_v11 }
 0x512   : > { %15584 = vmatprep.subr.bf16.mxu0 %v20503_v24  ;;  %v2969_v24 = vcombine.high %v23595_v12, %v23595_v12  ;;  %v20582_v12 = vld [vmem:[%s21987_s4 + $0x1410] ss:$8 sps:$4 sm:$0xff]  }
 0x513   : > { %v23697_v11 = vrot.slane %v2987_v23, %v22061_v50  ;;  %v20657_v23 = vld [vmem:[%s21987_s4 + $0x34d0] ss:$8 sps:$4 sm:$0xff]  }
 0x514   : > { %14273 = vmatpush1.bf16.msra.mxu1 %v20498_v13  ;;  %v20576_v13 = vld [vmem:[%s21987_s4 + $0x1400] ss:$8 sps:$4 sm:$0xff]  }
 0x515   : > { %15585 = vmatpush1.bf16.msra.mxu0 %v20501_v53  ;;  %14274 = vmatprep.subr.bf16.mxu1 %v20506_v59  ;;  %v20579_v53 = vld [vmem:[%s21987_s4 + $0x3400] ss:$8 sps:$4 sm:$0xff]   ;;  %v20584_v59 = vld [vmem:[%s21987_s4 + $0x1414] ss:$8 sps:$4 sm:$0xff]  }
 0x516   : > { %15586 = vmatprep.subr.bf16.mxu0 %v20509_v57  ;;  %v20587_v57 = vld [vmem:[%s21987_s4 + $0x3414] ss:$8 sps:$4 sm:$0xff]  }
 0x518   : > { %14275 = vmatpush1.bf16.msra.mxu1 %v20504_v27  ;;  %v23694_v27 = vrot.slane %v2595_v61, %v22061_v50  ;;  %v20654_v61 = vld [vmem:[%s21987_s4 + $0x14d0] ss:$8 sps:$4 sm:$0xff]  }
 0x519   : > { %15587 = vmatpush1.bf16.msra.mxu0 %v20507_v28  ;;  %14276 = vmatprep.subr.bf16.mxu1 %v20512_v35  ;;  %v20585_v28 = vld [vmem:[%s21987_s4 + $0x3410] ss:$8 sps:$4 sm:$0xff]   ;;  %v20590_v35 = vld [vmem:[%s21987_s4 + $0x1424] ss:$8 sps:$4 sm:$0xff]  }
 0x51a   : > { %15588 = vmatprep.subr.bf16.mxu0 %v20515_v36  ;;  %v20593_v36 = vld [vmem:[%s21987_s4 + $0x3424] ss:$8 sps:$4 sm:$0xff]  }
 0x51c   : > { %14277 = vmatpush1.bf16.msra.mxu1 %v20510_v18  ;;  %v20588_v18 = vld [vmem:[%s21987_s4 + $0x1420] ss:$8 sps:$4 sm:$0xff]  }
 0x51d   : > { %15589 = vmatpush1.bf16.msra.mxu0 %v20513_v38  ;;  %14278 = vmatprep.subr.bf16.mxu1 %v20518_v22  ;;  %v20591_v38 = vld [vmem:[%s21987_s4 + $0x3420] ss:$8 sps:$4 sm:$0xff]   ;;  %v20596_v22 = vld [vmem:[%s21987_s4 + $0x1434] ss:$8 sps:$4 sm:$0xff]  }
 0x51e   : > { %15590 = vmatprep.subr.bf16.mxu0 %v20521_v43  ;;  %v20599_v43 = vld [vmem:[%s21987_s4 + $0x3434] ss:$8 sps:$4 sm:$0xff]  }
 0x520   : > { %14279 = vmatpush1.bf16.msra.mxu1 %v20516_v29  ;;  %v20594_v29 = vld [vmem:[%s21987_s4 + $0x1430] ss:$8 sps:$4 sm:$0xff]  }
 0x521   : > { %15591 = vmatpush1.bf16.msra.mxu0 %v20519_v31  ;;  %14280 = vmatprep.subr.bf16.mxu1 %v20524_v9  ;;  %v20597_v31 = vld [vmem:[%s21987_s4 + $0x3430] ss:$8 sps:$4 sm:$0xff]   ;;  %v20602_v9 = vld [vmem:[%s21987_s4 + $0x1444] ss:$8 sps:$4 sm:$0xff]  }
 0x522   : > { %15592 = vmatprep.subr.bf16.mxu0 %v20527_v25  ;;  %v20605_v25 = vld [vmem:[%s21987_s4 + $0x3444] ss:$8 sps:$4 sm:$0xff]  }
 0x524   : > { %14281 = vmatpush1.bf16.msra.mxu1 %v20522_v15  ;;  %v20600_v15 = vld [vmem:[%s21987_s4 + $0x1440] ss:$8 sps:$4 sm:$0xff]  }
 0x525   : > { %15593 = vmatpush1.bf16.msra.mxu0 %v20525_v46  ;;  %14282 = vmatprep.subr.bf16.mxu1 %v20530_v26  ;;  %v20603_v46 = vld [vmem:[%s21987_s4 + $0x3440] ss:$8 sps:$4 sm:$0xff]   ;;  %v20608_v26 = vld [vmem:[%s21987_s4 + $0x1454] ss:$8 sps:$4 sm:$0xff]  }
 0x526   : > { %15594 = vmatprep.subr.bf16.mxu0 %v20533_v47  ;;  %v20611_v47 = vld [vmem:[%s21987_s4 + $0x3454] ss:$8 sps:$4 sm:$0xff]  }
 0x528   : > { %14283 = vmatpush1.bf16.msra.mxu1 %v20528_v37  ;;  %v20606_v37 = vld [vmem:[%s21987_s4 + $0x1450] ss:$8 sps:$4 sm:$0xff]  }
 0x529   : > { %15595 = vmatpush1.bf16.msra.mxu0 %v20531_v48  ;;  %14284 = vmatprep.subr.bf16.mxu1 %v20536_v32  ;;  %v20609_v48 = vld [vmem:[%s21987_s4 + $0x3450] ss:$8 sps:$4 sm:$0xff]   ;;  %v20614_v32 = vld [vmem:[%s21987_s4 + $0x1464] ss:$8 sps:$4 sm:$0xff]  }
 0x52a   : > { %15596 = vmatprep.subr.bf16.mxu0 %v20539_v49  ;;  %v20617_v49 = vld [vmem:[%s21987_s4 + $0x3464] ss:$8 sps:$4 sm:$0xff]  }
 0x52c   : > { %14285 = vmatpush1.bf16.msra.mxu1 %v20534_v51  ;;  %v20612_v51 = vld [vmem:[%s21987_s4 + $0x1460] ss:$8 sps:$4 sm:$0xff]  }
 0x52d   : > { %15597 = vmatpush1.bf16.msra.mxu0 %v20537_v52  ;;  %14286 = vmatprep.subr.bf16.mxu1 %v20542_v63  ;;  %v20615_v52 = vld [vmem:[%s21987_s4 + $0x3460] ss:$8 sps:$4 sm:$0xff]   ;;  %v20620_v63 = vld [vmem:[%s21987_s4 + $0x1474] ss:$8 sps:$4 sm:$0xff]  }
 0x52e   : > { %15598 = vmatprep.subr.bf16.mxu0 %v20545_v0  ;;  %v20623_v0 = vld [vmem:[%s21987_s4 + $0x3474] ss:$8 sps:$4 sm:$0xff]  }
 0x530   : > { %14287 = vmatpush1.bf16.msra.mxu1 %v20540_v14  ;;  %v20618_v14 = vld [vmem:[%s21987_s4 + $0x1470] ss:$8 sps:$4 sm:$0xff]  }
 0x531   : > { %15599 = vmatpush1.bf16.msra.mxu0 %v20543_v41  ;;  %14288 = vmatprep.subr.bf16.mxu1 %v20548_v55  ;;  %v20621_v41 = vld [vmem:[%s21987_s4 + $0x3470] ss:$8 sps:$4 sm:$0xff]   ;;  %v20626_v55 = vld [vmem:[%s21987_s4 + $0x1484] ss:$8 sps:$4 sm:$0xff]  }
 0x532   : > { %15600 = vmatprep.subr.bf16.mxu0 %v20551_v45  ;;  %v20629_v45 = vld [vmem:[%s21987_s4 + $0x3484] ss:$8 sps:$4 sm:$0xff]  }
 0x534   : > { %14289 = vmatpush1.bf16.msra.mxu1 %v20546_v10  ;;  %v20624_v10 = vld [vmem:[%s21987_s4 + $0x1480] ss:$8 sps:$4 sm:$0xff]  }
 0x535   : > { %15601 = vmatpush1.bf16.msra.mxu0 %v20549_v30  ;;  %14290 = vmatprep.subr.bf16.mxu1 %v20554_v17  ;;  %v20627_v30 = vld [vmem:[%s21987_s4 + $0x3480] ss:$8 sps:$4 sm:$0xff]   ;;  %v20632_v17 = vld [vmem:[%s21987_s4 + $0x1494] ss:$8 sps:$4 sm:$0xff]  }
 0x536   : > { %15602 = vmatprep.subr.bf16.mxu0 %v20557_v54  ;;  %v20635_v54 = vld [vmem:[%s21987_s4 + $0x3494] ss:$8 sps:$4 sm:$0xff]  }
 0x538   : > { %14291 = vmatpush1.bf16.msra.mxu1 %v20552_v16  ;;  %v20630_v16 = vld [vmem:[%s21987_s4 + $0x1490] ss:$8 sps:$4 sm:$0xff]  }
 0x539   : > { %15603 = vmatpush1.bf16.msra.mxu0 %v20555_v56  ;;  %14292 = vmatprep.subr.bf16.mxu1 %v20560_v33  ;;  %v20633_v56 = vld [vmem:[%s21987_s4 + $0x3490] ss:$8 sps:$4 sm:$0xff]   ;;  %v20638_v33 = vld [vmem:[%s21987_s4 + $0x14a4] ss:$8 sps:$4 sm:$0xff]  }
 0x53a   : > { %15604 = vmatprep.subr.bf16.mxu0 %v20563_v3  ;;  %v20641_v3 = vld [vmem:[%s21987_s4 + $0x34a4] ss:$8 sps:$4 sm:$0xff]  }
 0x53c   : > { %14293 = vmatpush1.bf16.msra.mxu1 %v20558_v58  ;;  %v20636_v58 = vld [vmem:[%s21987_s4 + $0x14a0] ss:$8 sps:$4 sm:$0xff]  }
 0x53d   : > { %15605 = vmatpush1.bf16.msra.mxu0 %v20561_v4  ;;  %14294 = vmatprep.subr.bf16.mxu1 %v20566_v5  ;;  %v20639_v4 = vld [vmem:[%s21987_s4 + $0x34a0] ss:$8 sps:$4 sm:$0xff]   ;;  %v20644_v5 = vld [vmem:[%s21987_s4 + $0x14b4] ss:$8 sps:$4 sm:$0xff]  }
 0x53e   : > { %15606 = vmatprep.subr.bf16.mxu0 %v20569_v6  ;;  %v20647_v6 = vld [vmem:[%s21987_s4 + $0x34b4] ss:$8 sps:$4 sm:$0xff]  }
 0x540   : > { %14295 = vmatpush1.bf16.msra.mxu1 %v20564_v19  ;;  %v20642_v19 = vld [vmem:[%s21987_s4 + $0x14b0] ss:$8 sps:$4 sm:$0xff]  }
 0x541   : > { %15607 = vmatpush1.bf16.msra.mxu0 %v20567_v20  ;;  %14296 = vmatprep.subr.bf16.mxu1 %v20572_v34  ;;  %v20645_v20 = vld [vmem:[%s21987_s4 + $0x34b0] ss:$8 sps:$4 sm:$0xff]   ;;  %v20650_v34 = vld [vmem:[%s21987_s4 + $0x14c4] ss:$8 sps:$4 sm:$0xff]  }
 0x542   : > { %15608 = vmatprep.subr.bf16.mxu0 %v20575_v21  ;;  %v20653_v21 = vld [vmem:[%s21987_s4 + $0x34c4] ss:$8 sps:$4 sm:$0xff]  }
 0x544   : > { %14297 = vmatpush1.bf16.msra.mxu1 %v20570_v1  ;;  %v20648_v1 = vld [vmem:[%s21987_s4 + $0x14c0] ss:$8 sps:$4 sm:$0xff]  }
 0x545   : > { %15609 = vmatpush1.bf16.msra.mxu0 %v20573_v42  ;;  %14307 = vmatprep.subr.bf16.mxu1 %v20578_v40  ;;  %v20651_v42 = vld [vmem:[%s21987_s4 + $0x34c0] ss:$8 sps:$4 sm:$0xff]   ;;  %v20656_v40 = vld [vmem:[%s21987_s4 + $0x14d4] ss:$8 sps:$4 sm:$0xff]  }
 0x546   : > { %15619 = vmatprep.subr.bf16.mxu0 %v20581_v39  ;;  %v20659_v39 = vld [vmem:[%s21987_s4 + $0x34d4] ss:$8 sps:$4 sm:$0xff]  }
 0x547   : > { %14299 = vmatmul.mubr.bf16.vlgmr.msra.gmra.mrb[0].mxu1 %v2577_v2  ;;  %v20662_v2 = vld [vmem:[%s21987_s4 + $0x14e4] ss:$8 sps:$4 sm:$0xff]  }
 0x548   : > { %15611 = vmatmul.mubr.bf16.vlgmr.msra.gmra.mrb[0].mxu0 %v2969_v24  ;;  %14308 = vmatpush1.bf16.msra.mxu1 %v20576_v13  ;;  %v20665_v24 = vld [vmem:[%s21987_s4 + $0x34e4] ss:$8 sps:$4 sm:$0xff]   ;;  %v20660_v13 = vld [vmem:[%s21987_s4 + $0x14e0] ss:$8 sps:$4 sm:$0xff]  }
 0x549   : > { %15620 = vmatpush1.bf16.msra.mxu0 %v20579_v53  ;;  %14309 = vmatprep.subr.bf16.mxu1 %v20584_v59  ;;  %v20663_v53 = vld [vmem:[%s21987_s4 + $0x34e0] ss:$8 sps:$4 sm:$0xff]   ;;  %v20668_v59 = vld [vmem:[%s21987_s4 + $0x14f4] ss:$8 sps:$4 sm:$0xff]  }
 0x54a   : > { %15621 = vmatprep.subr.bf16.mxu0 %v20587_v57  ;;  %14339 = vmatprep.mubr.bf16.mxu1 %v23694_v27  ;;  %v20671_v57 = vld [vmem:[%s21987_s4 + $0x34f4] ss:$8 sps:$4 sm:$0xff]  }
 0x54b   : > { %15651 = vmatprep.mubr.bf16.mxu0 %v23697_v11 }
 0x54c   : > { %14310 = vmatpush1.bf16.msra.mxu1 %v20582_v12  ;;  %v20666_v12 = vld [vmem:[%s21987_s4 + $0x14f0] ss:$8 sps:$4 sm:$0xff]  }
 0x54d   : > { %15622 = vmatpush1.bf16.msra.mxu0 %v20585_v28  ;;  %14311 = vmatprep.subr.bf16.mxu1 %v20590_v35  ;;  %v20669_v28 = vld [vmem:[%s21987_s4 + $0x34f0] ss:$8 sps:$4 sm:$0xff]   ;;  %v20674_v35 = vld [vmem:[%s21987_s4 + $0x1504] ss:$8 sps:$4 sm:$0xff]  }
 0x54e   : > { %15623 = vmatprep.subr.bf16.mxu0 %v20593_v36  ;;  %v20677_v36 = vld [vmem:[%s21987_s4 + $0x3504] ss:$8 sps:$4 sm:$0xff]  }
 0x550   : > { %14312 = vmatpush1.bf16.msra.mxu1 %v20588_v18  ;;  %v23763_v18 = vrot.slane %v23671_v60, %v22061_v50  ;;  %v2627_v60 = vcombine.high %v23694_v27, %v23694_v27  ;;  %v20686_v27 = vld [vmem:[%s21987_s4 + $0x1524] ss:$8 sps:$4 sm:$0xff]  }
 0x551   : > { %15624 = vmatpush1.bf16.msra.mxu0 %v20591_v38  ;;  %14313 = vmatprep.subr.bf16.mxu1 %v20596_v22  ;;  %v23767_v38 = vrot.slane %v23675_v7, %v22061_v50  ;;  %v20672_v22 = vld [vmem:[%s21987_s4 + $0x1500] ss:$8 sps:$4 sm:$0xff]   ;;  %v20678_v7 = vld [vmem:[%s21987_s4 + $0x1510] ss:$8 sps:$4 sm:$0xff]  }
 0x552   : > { %15625 = vmatprep.subr.bf16.mxu0 %v20599_v43  ;;  %v20675_v43 = vld [vmem:[%s21987_s4 + $0x3500] ss:$8 sps:$4 sm:$0xff]  }
 0x554   : > { %14314 = vmatpush1.bf16.msra.mxu1 %v20594_v29  ;;  %v20680_v29 = vld [vmem:[%s21987_s4 + $0x1514] ss:$8 sps:$4 sm:$0xff]  }
 0x555   : > { %15626 = vmatpush1.bf16.msra.mxu0 %v20597_v31  ;;  %14315 = vmatprep.subr.bf16.mxu1 %v20602_v9  ;;  %v20683_v31 = vld [vmem:[%s21987_s4 + $0x3514] ss:$8 sps:$4 sm:$0xff]   ;;  %v3019_v9 = vcombine.high %v23697_v11, %v23697_v11  ;;  %v20684_v11 = vld [vmem:[%s21987_s4 + $0x1520] ss:$8 sps:$4 sm:$0xff]  }
 0x556   : > { %15627 = vmatprep.subr.bf16.mxu0 %v20605_v25  ;;  %v20681_v25 = vld [vmem:[%s21987_s4 + $0x3510] ss:$8 sps:$4 sm:$0xff]  }
 0x558   : > { %14316 = vmatpush1.bf16.msra.mxu1 %v20600_v15  ;;  %v20689_v15 = vld [vmem:[%s21987_s4 + $0x3524] ss:$8 sps:$4 sm:$0xff]  }
 0x559   : > { %15628 = vmatpush1.bf16.msra.mxu0 %v20603_v46  ;;  %14317 = vmatprep.subr.bf16.mxu1 %v20608_v26  ;;  %v20687_v46 = vld [vmem:[%s21987_s4 + $0x3520] ss:$8 sps:$4 sm:$0xff]   ;;  %v20692_v26 = vld [vmem:[%s21987_s4 + $0x1534] ss:$8 sps:$4 sm:$0xff]  }
 0x55a   : > { %15629 = vmatprep.subr.bf16.mxu0 %v20611_v47  ;;  %v20695_v47 = vld [vmem:[%s21987_s4 + $0x3534] ss:$8 sps:$4 sm:$0xff]  }
 0x55c   : > { %14318 = vmatpush1.bf16.msra.mxu1 %v20606_v37  ;;  %v20690_v37 = vld [vmem:[%s21987_s4 + $0x1530] ss:$8 sps:$4 sm:$0xff]  }
 0x55d   : > { %15630 = vmatpush1.bf16.msra.mxu0 %v20609_v48  ;;  %14319 = vmatprep.subr.bf16.mxu1 %v20614_v32  ;;  %v20693_v48 = vld [vmem:[%s21987_s4 + $0x3530] ss:$8 sps:$4 sm:$0xff]   ;;  %v20698_v32 = vld [vmem:[%s21987_s4 + $0x1544] ss:$8 sps:$4 sm:$0xff]  }
 0x55e   : > { %15631 = vmatprep.subr.bf16.mxu0 %v20617_v49  ;;  %v20701_v49 = vld [vmem:[%s21987_s4 + $0x3544] ss:$8 sps:$4 sm:$0xff]  }
 0x560   : > { %14320 = vmatpush1.bf16.msra.mxu1 %v20612_v51  ;;  %v20696_v51 = vld [vmem:[%s21987_s4 + $0x1540] ss:$8 sps:$4 sm:$0xff]  }
 0x561   : > { %15632 = vmatpush1.bf16.msra.mxu0 %v20615_v52  ;;  %14321 = vmatprep.subr.bf16.mxu1 %v20620_v63  ;;  %v20699_v52 = vld [vmem:[%s21987_s4 + $0x3540] ss:$8 sps:$4 sm:$0xff]   ;;  %v20704_v63 = vld [vmem:[%s21987_s4 + $0x1554] ss:$8 sps:$4 sm:$0xff]  }
 0x562   : > { %15633 = vmatprep.subr.bf16.mxu0 %v20623_v0  ;;  %v20707_v0 = vld [vmem:[%s21987_s4 + $0x3554] ss:$8 sps:$4 sm:$0xff]  }
 0x564   : > { %14322 = vmatpush1.bf16.msra.mxu1 %v20618_v14  ;;  %v20702_v14 = vld [vmem:[%s21987_s4 + $0x1550] ss:$8 sps:$4 sm:$0xff]  }
 0x565   : > { %15634 = vmatpush1.bf16.msra.mxu0 %v20621_v41  ;;  %14323 = vmatprep.subr.bf16.mxu1 %v20626_v55  ;;  %v20705_v41 = vld [vmem:[%s21987_s4 + $0x3550] ss:$8 sps:$4 sm:$0xff]   ;;  %v20710_v55 = vld [vmem:[%s21987_s4 + $0x1564] ss:$8 sps:$4 sm:$0xff]  }
 0x566   : > { %15635 = vmatprep.subr.bf16.mxu0 %v20629_v45  ;;  %v20713_v45 = vld [vmem:[%s21987_s4 + $0x3564] ss:$8 sps:$4 sm:$0xff]  }
 0x568   : > { %14324 = vmatpush1.bf16.msra.mxu1 %v20624_v10  ;;  %v20708_v10 = vld [vmem:[%s21987_s4 + $0x1560] ss:$8 sps:$4 sm:$0xff]  }
 0x569   : > { %15636 = vmatpush1.bf16.msra.mxu0 %v20627_v30  ;;  %14325 = vmatprep.subr.bf16.mxu1 %v20632_v17  ;;  %v20711_v30 = vld [vmem:[%s21987_s4 + $0x3560] ss:$8 sps:$4 sm:$0xff]   ;;  %v20716_v17 = vld [vmem:[%s21987_s4 + $0x1574] ss:$8 sps:$4 sm:$0xff]  }
 0x56a   : > { %15637 = vmatprep.subr.bf16.mxu0 %v20635_v54  ;;  %v20719_v54 = vld [vmem:[%s21987_s4 + $0x3574] ss:$8 sps:$4 sm:$0xff]  }
 0x56c   : > { %14326 = vmatpush1.bf16.msra.mxu1 %v20630_v16  ;;  %v20714_v16 = vld [vmem:[%s21987_s4 + $0x1570] ss:$8 sps:$4 sm:$0xff]  }
 0x56d   : > { %15638 = vmatpush1.bf16.msra.mxu0 %v20633_v56  ;;  %14327 = vmatprep.subr.bf16.mxu1 %v20638_v33  ;;  %v20717_v56 = vld [vmem:[%s21987_s4 + $0x3570] ss:$8 sps:$4 sm:$0xff]   ;;  %v20722_v33 = vld [vmem:[%s21987_s4 + $0x1584] ss:$8 sps:$4 sm:$0xff]  }
 0x56e   : > { %15639 = vmatprep.subr.bf16.mxu0 %v20641_v3  ;;  %v20725_v3 = vld [vmem:[%s21987_s4 + $0x3584] ss:$8 sps:$4 sm:$0xff]  }
 0x570   : > { %14328 = vmatpush1.bf16.msra.mxu1 %v20636_v58  ;;  %v20720_v58 = vld [vmem:[%s21987_s4 + $0x1580] ss:$8 sps:$4 sm:$0xff]  }
 0x571   : > { %15640 = vmatpush1.bf16.msra.mxu0 %v20639_v4  ;;  %14329 = vmatprep.subr.bf16.mxu1 %v20644_v5  ;;  %v20723_v4 = vld [vmem:[%s21987_s4 + $0x3580] ss:$8 sps:$4 sm:$0xff]   ;;  %v20728_v5 = vld [vmem:[%s21987_s4 + $0x1594] ss:$8 sps:$4 sm:$0xff]  }
 0x572   : > { %15641 = vmatprep.subr.bf16.mxu0 %v20647_v6  ;;  %v20731_v6 = vld [vmem:[%s21987_s4 + $0x3594] ss:$8 sps:$4 sm:$0xff]  }
 0x574   : > { %14330 = vmatpush1.bf16.msra.mxu1 %v20642_v19  ;;  %v20726_v19 = vld [vmem:[%s21987_s4 + $0x1590] ss:$8 sps:$4 sm:$0xff]  }
 0x575   : > { %15642 = vmatpush1.bf16.msra.mxu0 %v20645_v20  ;;  %14331 = vmatprep.subr.bf16.mxu1 %v20650_v34  ;;  %v20729_v20 = vld [vmem:[%s21987_s4 + $0x3590] ss:$8 sps:$4 sm:$0xff]   ;;  %v20734_v34 = vld [vmem:[%s21987_s4 + $0x15a4] ss:$8 sps:$4 sm:$0xff]  }
 0x576   : > { %15643 = vmatprep.subr.bf16.mxu0 %v20653_v21  ;;  %v20737_v21 = vld [vmem:[%s21987_s4 + $0x35a4] ss:$8 sps:$4 sm:$0xff]  }
 0x578   : > { %14332 = vmatpush1.bf16.msra.mxu1 %v20648_v1  ;;  %v20732_v1 = vld [vmem:[%s21987_s4 + $0x15a0] ss:$8 sps:$4 sm:$0xff]  }
 0x579   : > { %15644 = vmatpush1.bf16.msra.mxu0 %v20651_v42  ;;  %14333 = vmatprep.subr.bf16.mxu1 %v20656_v40  ;;  %v20735_v42 = vld [vmem:[%s21987_s4 + $0x35a0] ss:$8 sps:$4 sm:$0xff]   ;;  %v20740_v40 = vld [vmem:[%s21987_s4 + $0x15b4] ss:$8 sps:$4 sm:$0xff]  }
 0x57a   : > { %15645 = vmatprep.subr.bf16.mxu0 %v20659_v39  ;;  %v20743_v39 = vld [vmem:[%s21987_s4 + $0x35b4] ss:$8 sps:$4 sm:$0xff]  }
 0x57c   : > { %14334 = vmatpush1.bf16.msra.mxu1 %v20654_v61  ;;  %v20738_v61 = vld [vmem:[%s21987_s4 + $0x15b0] ss:$8 sps:$4 sm:$0xff]  }
 0x57d   : > { %15646 = vmatpush1.bf16.msra.mxu0 %v20657_v23  ;;  %14335 = vmatprep.subr.bf16.mxu1 %v20662_v2  ;;  %v20741_v23 = vld [vmem:[%s21987_s4 + $0x35b0] ss:$8 sps:$4 sm:$0xff]   ;;  %v20746_v2 = vld [vmem:[%s21987_s4 + $0x15c4] ss:$8 sps:$4 sm:$0xff]  }
 0x57e   : > { %15647 = vmatprep.subr.bf16.mxu0 %v20665_v24  ;;  %v20749_v24 = vld [vmem:[%s21987_s4 + $0x35c4] ss:$8 sps:$4 sm:$0xff]  }
 0x580   : > { %14336 = vmatpush1.bf16.msra.mxu1 %v20660_v13  ;;  %v20744_v13 = vld [vmem:[%s21987_s4 + $0x15c0] ss:$8 sps:$4 sm:$0xff]  }
 0x581   : > { %15648 = vmatpush1.bf16.msra.mxu0 %v20663_v53  ;;  %14337 = vmatprep.subr.bf16.mxu1 %v20668_v59  ;;  %v20747_v53 = vld [vmem:[%s21987_s4 + $0x35c0] ss:$8 sps:$4 sm:$0xff]   ;;  %v20752_v59 = vld [vmem:[%s21987_s4 + $0x15d4] ss:$8 sps:$4 sm:$0xff]  }
 0x582   : > { %15649 = vmatprep.subr.bf16.mxu0 %v20671_v57  ;;  %v20755_v57 = vld [vmem:[%s21987_s4 + $0x35d4] ss:$8 sps:$4 sm:$0xff]  }
 0x584   : > { %14338 = vmatpush1.bf16.msra.mxu1 %v20666_v12  ;;  %v20750_v12 = vld [vmem:[%s21987_s4 + $0x15d0] ss:$8 sps:$4 sm:$0xff]  }
 0x585   : > { %15650 = vmatpush1.bf16.msra.mxu0 %v20669_v28  ;;  %14348 = vmatprep.subr.bf16.mxu1 %v20674_v35  ;;  %v20753_v28 = vld [vmem:[%s21987_s4 + $0x35d0] ss:$8 sps:$4 sm:$0xff]   ;;  %v20758_v35 = vld [vmem:[%s21987_s4 + $0x15e4] ss:$8 sps:$4 sm:$0xff]  }
 0x586   : > { %15660 = vmatprep.subr.bf16.mxu0 %v20677_v36  ;;  %v20761_v36 = vld [vmem:[%s21987_s4 + $0x35e4] ss:$8 sps:$4 sm:$0xff]  }
 0x587   : > { %14340 = vmatmul.mubr.bf16.vlgmr.msra.gmra.mrb[0].mxu1 %v23763_v18 }
 0x588   : > { %15652 = vmatmul.mubr.bf16.vlgmr.msra.gmra.mrb[0].mxu0 %v23767_v38  ;;  %14349 = vmatpush1.bf16.msra.mxu1 %v20672_v22  ;;  %v2580_v22 = vcombine.high %v23660_v62, %v23660_v62  ;;  %v20762_v62 = vld [vmem:[%s21987_s4 + $0x15f0] ss:$8 sps:$4 sm:$0xff]  }
 0x589   : > { %15661 = vmatpush1.bf16.msra.mxu0 %v20675_v43  ;;  %14350 = vmatprep.subr.bf16.mxu1 %v20680_v29  ;;  %v2972_v43 = vcombine.high %v23663_v8, %v23663_v8  ;;  %v20756_v29 = vld [vmem:[%s21987_s4 + $0x15e0] ss:$8 sps:$4 sm:$0xff]   ;;  %v20765_v8 = vld [vmem:[%s21987_s4 + $0x35f0] ss:$8 sps:$4 sm:$0xff]  }
 0x58a   : > { %15662 = vmatprep.subr.bf16.mxu0 %v20683_v31  ;;  %14380 = vmatprep.mubr.bf16.mxu1 %v2627_v60  ;;  %v20759_v31 = vld [vmem:[%s21987_s4 + $0x35e0] ss:$8 sps:$4 sm:$0xff]   ;;  %v20764_v60 = vld [vmem:[%s21987_s4 + $0x15f4] ss:$8 sps:$4 sm:$0xff]  }
 0x58b   : > { %15692 = vmatprep.mubr.bf16.mxu0 %v3019_v9  ;;  %v20767_v9 = vld [vmem:[%s21987_s4 + $0x35f4] ss:$8 sps:$4 sm:$0xff]  }
 0x58c   : > { %14351 = vmatpush1.bf16.msra.mxu1 %v20678_v7  ;;  %v23840_v7 = vrot.slane %v2580_v22, %v22061_v50  ;;  %v20834_v22 = vld [vmem:[%s21987_s4 + $0x16b0] ss:$8 sps:$4 sm:$0xff]  }
 0x58d   : > { %15663 = vmatpush1.bf16.msra.mxu0 %v20681_v25  ;;  %14352 = vmatprep.subr.bf16.mxu1 %v20686_v27  ;;  %v23843_v25 = vrot.slane %v2972_v43, %v22061_v50  ;;  %v20770_v27 = vld [vmem:[%s21987_s4 + $0x1604] ss:$8 sps:$4 sm:$0xff]   ;;  %v20837_v43 = vld [vmem:[%s21987_s4 + $0x36b0] ss:$8 sps:$4 sm:$0xff]  }
 0x58e   : > { %15664 = vmatprep.subr.bf16.mxu0 %v20689_v15  ;;  %v20773_v15 = vld [vmem:[%s21987_s4 + $0x3604] ss:$8 sps:$4 sm:$0xff]  }
 0x590   : > { %14353 = vmatpush1.bf16.msra.mxu1 %v20684_v11  ;;  %v2596_v11 = vcombine.high %v23840_v7, %v23840_v7 }
 0x591   : > { %15665 = vmatpush1.bf16.msra.mxu0 %v20687_v46  ;;  %14354 = vmatprep.subr.bf16.mxu1 %v20692_v26  ;;  %v2988_v46 = vcombine.high %v23843_v25, %v23843_v25  ;;  %v2625_v26 = vcombine.high %v23763_v18, %v23763_v18 }
 0x592   : > { %15666 = vmatprep.subr.bf16.mxu0 %v20695_v47  ;;  %v3017_v47 = vcombine.high %v23767_v38, %v23767_v38  ;;  %v20774_v38 = vld [vmem:[%s21987_s4 + $0x1610] ss:$8 sps:$4 sm:$0xff]  }
 0x593   : > { %v23865_v18 = vrot.slane %v2988_v46, %v22061_v50  ;;  %v20857_v46 = vld [vmem:[%s21987_s4 + $0x36e4] ss:$8 sps:$4 sm:$0xff]  }
 0x594   : > { %14355 = vmatpush1.bf16.msra.mxu1 %v20690_v37  ;;  %v20768_v37 = vld [vmem:[%s21987_s4 + $0x1600] ss:$8 sps:$4 sm:$0xff]  }
 0x595   : > { %15667 = vmatpush1.bf16.msra.mxu0 %v20693_v48  ;;  %14356 = vmatprep.subr.bf16.mxu1 %v20698_v32  ;;  %v20771_v48 = vld [vmem:[%s21987_s4 + $0x3600] ss:$8 sps:$4 sm:$0xff]   ;;  %v20776_v32 = vld [vmem:[%s21987_s4 + $0x1614] ss:$8 sps:$4 sm:$0xff]  }
 0x596   : > { %15668 = vmatprep.subr.bf16.mxu0 %v20701_v49  ;;  %v20779_v49 = vld [vmem:[%s21987_s4 + $0x3614] ss:$8 sps:$4 sm:$0xff]  }
 0x598   : > { %14357 = vmatpush1.bf16.msra.mxu1 %v20696_v51  ;;  %v23862_v51 = vrot.slane %v2596_v11, %v22061_v50  ;;  %v20854_v11 = vld [vmem:[%s21987_s4 + $0x16e4] ss:$8 sps:$4 sm:$0xff]  }
 0x599   : > { %15669 = vmatpush1.bf16.msra.mxu0 %v20699_v52  ;;  %14358 = vmatprep.subr.bf16.mxu1 %v20704_v63  ;;  %v20777_v52 = vld [vmem:[%s21987_s4 + $0x3610] ss:$8 sps:$4 sm:$0xff]   ;;  %v20782_v63 = vld [vmem:[%s21987_s4 + $0x1624] ss:$8 sps:$4 sm:$0xff]  }
 0x59a   : > { %15670 = vmatprep.subr.bf16.mxu0 %v20707_v0  ;;  %v20785_v0 = vld [vmem:[%s21987_s4 + $0x3624] ss:$8 sps:$4 sm:$0xff]  }
 0x59c   : > { %14359 = vmatpush1.bf16.msra.mxu1 %v20702_v14  ;;  %v20780_v14 = vld [vmem:[%s21987_s4 + $0x1620] ss:$8 sps:$4 sm:$0xff]  }
 0x59d   : > { %15671 = vmatpush1.bf16.msra.mxu0 %v20705_v41  ;;  %14360 = vmatprep.subr.bf16.mxu1 %v20710_v55  ;;  %v20783_v41 = vld [vmem:[%s21987_s4 + $0x3620] ss:$8 sps:$4 sm:$0xff]   ;;  %v20788_v55 = vld [vmem:[%s21987_s4 + $0x1634] ss:$8 sps:$4 sm:$0xff]  }
 0x59e   : > { %15672 = vmatprep.subr.bf16.mxu0 %v20713_v45  ;;  %v20791_v45 = vld [vmem:[%s21987_s4 + $0x3634] ss:$8 sps:$4 sm:$0xff]  }
 0x5a0   : > { %14361 = vmatpush1.bf16.msra.mxu1 %v20708_v10  ;;  %v20786_v10 = vld [vmem:[%s21987_s4 + $0x1630] ss:$8 sps:$4 sm:$0xff]  }
 0x5a1   : > { %15673 = vmatpush1.bf16.msra.mxu0 %v20711_v30  ;;  %14362 = vmatprep.subr.bf16.mxu1 %v20716_v17  ;;  %v20789_v30 = vld [vmem:[%s21987_s4 + $0x3630] ss:$8 sps:$4 sm:$0xff]   ;;  %v20794_v17 = vld [vmem:[%s21987_s4 + $0x1644] ss:$8 sps:$4 sm:$0xff]  }
 0x5a2   : > { %15674 = vmatprep.subr.bf16.mxu0 %v20719_v54  ;;  %v20797_v54 = vld [vmem:[%s21987_s4 + $0x3644] ss:$8 sps:$4 sm:$0xff]  }
 0x5a4   : > { %14363 = vmatpush1.bf16.msra.mxu1 %v20714_v16  ;;  %v20792_v16 = vld [vmem:[%s21987_s4 + $0x1640] ss:$8 sps:$4 sm:$0xff]  }
 0x5a5   : > { %15675 = vmatpush1.bf16.msra.mxu0 %v20717_v56  ;;  %14364 = vmatprep.subr.bf16.mxu1 %v20722_v33  ;;  %v20795_v56 = vld [vmem:[%s21987_s4 + $0x3640] ss:$8 sps:$4 sm:$0xff]   ;;  %v20800_v33 = vld [vmem:[%s21987_s4 + $0x1654] ss:$8 sps:$4 sm:$0xff]  }
 0x5a6   : > { %15676 = vmatprep.subr.bf16.mxu0 %v20725_v3  ;;  %v20803_v3 = vld [vmem:[%s21987_s4 + $0x3654] ss:$8 sps:$4 sm:$0xff]  }
 0x5a8   : > { %14365 = vmatpush1.bf16.msra.mxu1 %v20720_v58  ;;  %v20798_v58 = vld [vmem:[%s21987_s4 + $0x1650] ss:$8 sps:$4 sm:$0xff]  }
 0x5a9   : > { %15677 = vmatpush1.bf16.msra.mxu0 %v20723_v4  ;;  %14366 = vmatprep.subr.bf16.mxu1 %v20728_v5  ;;  %v20801_v4 = vld [vmem:[%s21987_s4 + $0x3650] ss:$8 sps:$4 sm:$0xff]   ;;  %v20806_v5 = vld [vmem:[%s21987_s4 + $0x1664] ss:$8 sps:$4 sm:$0xff]  }
 0x5aa   : > { %15678 = vmatprep.subr.bf16.mxu0 %v20731_v6  ;;  %v20809_v6 = vld [vmem:[%s21987_s4 + $0x3664] ss:$8 sps:$4 sm:$0xff]  }
 0x5ac   : > { %14367 = vmatpush1.bf16.msra.mxu1 %v20726_v19  ;;  %v20804_v19 = vld [vmem:[%s21987_s4 + $0x1660] ss:$8 sps:$4 sm:$0xff]  }
 0x5ad   : > { %15679 = vmatpush1.bf16.msra.mxu0 %v20729_v20  ;;  %14368 = vmatprep.subr.bf16.mxu1 %v20734_v34  ;;  %v20807_v20 = vld [vmem:[%s21987_s4 + $0x3660] ss:$8 sps:$4 sm:$0xff]   ;;  %v20812_v34 = vld [vmem:[%s21987_s4 + $0x1674] ss:$8 sps:$4 sm:$0xff]  }
 0x5ae   : > { %15680 = vmatprep.subr.bf16.mxu0 %v20737_v21  ;;  %v20815_v21 = vld [vmem:[%s21987_s4 + $0x3674] ss:$8 sps:$4 sm:$0xff]  }
 0x5b0   : > { %14369 = vmatpush1.bf16.msra.mxu1 %v20732_v1  ;;  %v20810_v1 = vld [vmem:[%s21987_s4 + $0x1670] ss:$8 sps:$4 sm:$0xff]  }
 0x5b1   : > { %15681 = vmatpush1.bf16.msra.mxu0 %v20735_v42  ;;  %14370 = vmatprep.subr.bf16.mxu1 %v20740_v40  ;;  %v20813_v42 = vld [vmem:[%s21987_s4 + $0x3670] ss:$8 sps:$4 sm:$0xff]   ;;  %v20818_v40 = vld [vmem:[%s21987_s4 + $0x1684] ss:$8 sps:$4 sm:$0xff]  }
 0x5b2   : > { %15682 = vmatprep.subr.bf16.mxu0 %v20743_v39  ;;  %v20821_v39 = vld [vmem:[%s21987_s4 + $0x3684] ss:$8 sps:$4 sm:$0xff]  }
 0x5b4   : > { %14371 = vmatpush1.bf16.msra.mxu1 %v20738_v61  ;;  %v20816_v61 = vld [vmem:[%s21987_s4 + $0x1680] ss:$8 sps:$4 sm:$0xff]  }
 0x5b5   : > { %15683 = vmatpush1.bf16.msra.mxu0 %v20741_v23  ;;  %14372 = vmatprep.subr.bf16.mxu1 %v20746_v2  ;;  %v20819_v23 = vld [vmem:[%s21987_s4 + $0x3680] ss:$8 sps:$4 sm:$0xff]   ;;  %v20824_v2 = vld [vmem:[%s21987_s4 + $0x1694] ss:$8 sps:$4 sm:$0xff]  }
 0x5b6   : > { %15684 = vmatprep.subr.bf16.mxu0 %v20749_v24  ;;  %v20827_v24 = vld [vmem:[%s21987_s4 + $0x3694] ss:$8 sps:$4 sm:$0xff]  }
 0x5b8   : > { %14373 = vmatpush1.bf16.msra.mxu1 %v20744_v13  ;;  %v20822_v13 = vld [vmem:[%s21987_s4 + $0x1690] ss:$8 sps:$4 sm:$0xff]  }
 0x5b9   : > { %15685 = vmatpush1.bf16.msra.mxu0 %v20747_v53  ;;  %14374 = vmatprep.subr.bf16.mxu1 %v20752_v59  ;;  %v20825_v53 = vld [vmem:[%s21987_s4 + $0x3690] ss:$8 sps:$4 sm:$0xff]   ;;  %v20830_v59 = vld [vmem:[%s21987_s4 + $0x16a4] ss:$8 sps:$4 sm:$0xff]  }
 0x5ba   : > { %15686 = vmatprep.subr.bf16.mxu0 %v20755_v57  ;;  %v20833_v57 = vld [vmem:[%s21987_s4 + $0x36a4] ss:$8 sps:$4 sm:$0xff]  }
 0x5bc   : > { %14375 = vmatpush1.bf16.msra.mxu1 %v20750_v12  ;;  %v20828_v12 = vld [vmem:[%s21987_s4 + $0x16a0] ss:$8 sps:$4 sm:$0xff]  }
 0x5bd   : > { %15687 = vmatpush1.bf16.msra.mxu0 %v20753_v28  ;;  %14376 = vmatprep.subr.bf16.mxu1 %v20758_v35  ;;  %v20831_v28 = vld [vmem:[%s21987_s4 + $0x36a0] ss:$8 sps:$4 sm:$0xff]   ;;  %v20836_v35 = vld [vmem:[%s21987_s4 + $0x16b4] ss:$8 sps:$4 sm:$0xff]  }
 0x5be   : > { %15688 = vmatprep.subr.bf16.mxu0 %v20761_v36  ;;  %v20839_v36 = vld [vmem:[%s21987_s4 + $0x36b4] ss:$8 sps:$4 sm:$0xff]  }
 0x5c0   : > { %14377 = vmatpush1.bf16.msra.mxu1 %v20756_v29  ;;  %v20842_v29 = vld [vmem:[%s21987_s4 + $0x16c4] ss:$8 sps:$4 sm:$0xff]  }
 0x5c1   : > { %15689 = vmatpush1.bf16.msra.mxu0 %v20759_v31  ;;  %14378 = vmatprep.subr.bf16.mxu1 %v20764_v60  ;;  %v20845_v31 = vld [vmem:[%s21987_s4 + $0x36c4] ss:$8 sps:$4 sm:$0xff]   ;;  %v20840_v60 = vld [vmem:[%s21987_s4 + $0x16c0] ss:$8 sps:$4 sm:$0xff]  }
 0x5c2   : > { %15690 = vmatprep.subr.bf16.mxu0 %v20767_v9  ;;  %v20843_v9 = vld [vmem:[%s21987_s4 + $0x36c0] ss:$8 sps:$4 sm:$0xff]  }
 0x5c4   : > { %14379 = vmatpush1.bf16.msra.mxu1 %v20762_v62  ;;  %v20848_v62 = vld [vmem:[%s21987_s4 + $0x16d4] ss:$8 sps:$4 sm:$0xff]  }
 0x5c5   : > { %15691 = vmatpush1.bf16.msra.mxu0 %v20765_v8  ;;  %14389 = vmatprep.subr.bf16.mxu1 %v20770_v27  ;;  %v20851_v8 = vld [vmem:[%s21987_s4 + $0x36d4] ss:$8 sps:$4 sm:$0xff]   ;;  %v20846_v27 = vld [vmem:[%s21987_s4 + $0x16d0] ss:$8 sps:$4 sm:$0xff]  }
 0x5c6   : > { %15701 = vmatprep.subr.bf16.mxu0 %v20773_v15  ;;  %v20849_v15 = vld [vmem:[%s21987_s4 + $0x36d0] ss:$8 sps:$4 sm:$0xff]  }
 0x5c7   : > { %14381 = vmatmul.mubr.bf16.vlgmr.msra.gmra.mrb[0].mxu1 %v2625_v26  ;;  %v20852_v26 = vld [vmem:[%s21987_s4 + $0x16e0] ss:$8 sps:$4 sm:$0xff]  }
 0x5c8   : > { %15693 = vmatmul.mubr.bf16.vlgmr.msra.gmra.mrb[0].mxu0 %v3017_v47  ;;  %14390 = vmatpush1.bf16.msra.mxu1 %v20768_v37  ;;  %v20855_v47 = vld [vmem:[%s21987_s4 + $0x36e0] ss:$8 sps:$4 sm:$0xff]   ;;  %v20860_v37 = vld [vmem:[%s21987_s4 + $0x16f4] ss:$8 sps:$4 sm:$0xff]  }
 0x5c9   : > { %15702 = vmatpush1.bf16.msra.mxu0 %v20771_v48  ;;  %14391 = vmatprep.subr.bf16.mxu1 %v20776_v32  ;;  %v20863_v48 = vld [vmem:[%s21987_s4 + $0x36f4] ss:$8 sps:$4 sm:$0xff]   ;;  %v20858_v32 = vld [vmem:[%s21987_s4 + $0x16f0] ss:$8 sps:$4 sm:$0xff]  }
 0x5ca   : > { %15703 = vmatprep.subr.bf16.mxu0 %v20779_v49  ;;  %14421 = vmatprep.mubr.bf16.mxu1 %v23862_v51  ;;  %v20861_v49 = vld [vmem:[%s21987_s4 + $0x36f0] ss:$8 sps:$4 sm:$0xff]  }
 0x5cb   : > { %15733 = vmatprep.mubr.bf16.mxu0 %v23865_v18 }
 0x5cc   : > { %14392 = vmatpush1.bf16.msra.mxu1 %v20774_v38  ;;  %v20867_v38 = vld [vmem:[%s21987_s4 + $0x1704] ss:$8 sps:$4 sm:$0xff]  }
 0x5cd   : > { %15704 = vmatpush1.bf16.msra.mxu0 %v20777_v52  ;;  %14393 = vmatprep.subr.bf16.mxu1 %v20782_v63  ;;  %v20871_v52 = vld [vmem:[%s21987_s4 + $0x3704] ss:$8 sps:$4 sm:$0xff]   ;;  %v23931_v63 = vrot.slane %v23840_v7, %v22061_v50  ;;  %v2628_v7 = vcombine.high %v23862_v51, %v23862_v51 }
 0x5ce   : > { %15705 = vmatprep.subr.bf16.mxu0 %v20785_v0  ;;  %v23935_v0 = vrot.slane %v23843_v25, %v22061_v50  ;;  %v20872_v25 = vld [vmem:[%s21987_s4 + $0x1710] ss:$8 sps:$4 sm:$0xff]   ;;  %v20880_v51 = vld [vmem:[%s21987_s4 + $0x1724] ss:$8 sps:$4 sm:$0xff]  }
 0x5d0   : > { %14394 = vmatpush1.bf16.msra.mxu1 %v20780_v14  ;;  %v20865_v14 = vld [vmem:[%s21987_s4 + $0x1700] ss:$8 sps:$4 sm:$0xff]  }
 0x5d1   : > { %15706 = vmatpush1.bf16.msra.mxu0 %v20783_v41  ;;  %14395 = vmatprep.subr.bf16.mxu1 %v20788_v55  ;;  %v20869_v41 = vld [vmem:[%s21987_s4 + $0x3700] ss:$8 sps:$4 sm:$0xff]   ;;  %v20874_v55 = vld [vmem:[%s21987_s4 + $0x1714] ss:$8 sps:$4 sm:$0xff]  }
 0x5d2   : > { %15707 = vmatprep.subr.bf16.mxu0 %v20791_v45  ;;  %v20877_v45 = vld [vmem:[%s21987_s4 + $0x3714] ss:$8 sps:$4 sm:$0xff]  }
 0x5d4   : > { %14396 = vmatpush1.bf16.msra.mxu1 %v20786_v10  ;;  %v3020_v10 = vcombine.high %v23865_v18, %v23865_v18  ;;  %v20878_v18 = vld [vmem:[%s21987_s4 + $0x1720] ss:$8 sps:$4 sm:$0xff]  }
 0x5d5   : > { %15708 = vmatpush1.bf16.msra.mxu0 %v20789_v30  ;;  %14397 = vmatprep.subr.bf16.mxu1 %v20794_v17  ;;  %v20875_v30 = vld [vmem:[%s21987_s4 + $0x3710] ss:$8 sps:$4 sm:$0xff]   ;;  %v20883_v17 = vld [vmem:[%s21987_s4 + $0x3724] ss:$8 sps:$4 sm:$0xff]  }
 0x5d6   : > { %15709 = vmatprep.subr.bf16.mxu0 %v20797_v54  ;;  %v20881_v54 = vld [vmem:[%s21987_s4 + $0x3720] ss:$8 sps:$4 sm:$0xff]  }
 0x5d8   : > { %14398 = vmatpush1.bf16.msra.mxu1 %v20792_v16  ;;  %v20886_v16 = vld [vmem:[%s21987_s4 + $0x1734] ss:$8 sps:$4 sm:$0xff]  }
 0x5d9   : > { %15710 = vmatpush1.bf16.msra.mxu0 %v20795_v56  ;;  %14399 = vmatprep.subr.bf16.mxu1 %v20800_v33  ;;  %v20889_v56 = vld [vmem:[%s21987_s4 + $0x3734] ss:$8 sps:$4 sm:$0xff]   ;;  %v20884_v33 = vld [vmem:[%s21987_s4 + $0x1730] ss:$8 sps:$4 sm:$0xff]  }
 0x5da   : > { %15711 = vmatprep.subr.bf16.mxu0 %v20803_v3  ;;  %v20887_v3 = vld [vmem:[%s21987_s4 + $0x3730] ss:$8 sps:$4 sm:$0xff]  }
 0x5dc   : > { %14400 = vmatpush1.bf16.msra.mxu1 %v20798_v58  ;;  %v20892_v58 = vld [vmem:[%s21987_s4 + $0x1744] ss:$8 sps:$4 sm:$0xff]  }
 0x5dd   : > { %15712 = vmatpush1.bf16.msra.mxu0 %v20801_v4  ;;  %14401 = vmatprep.subr.bf16.mxu1 %v20806_v5  ;;  %v20895_v4 = vld [vmem:[%s21987_s4 + $0x3744] ss:$8 sps:$4 sm:$0xff]   ;;  %v20890_v5 = vld [vmem:[%s21987_s4 + $0x1740] ss:$8 sps:$4 sm:$0xff]  }
 0x5de   : > { %15713 = vmatprep.subr.bf16.mxu0 %v20809_v6  ;;  %v20893_v6 = vld [vmem:[%s21987_s4 + $0x3740] ss:$8 sps:$4 sm:$0xff]  }
 0x5e0   : > { %14402 = vmatpush1.bf16.msra.mxu1 %v20804_v19  ;;  %v20898_v19 = vld [vmem:[%s21987_s4 + $0x1754] ss:$8 sps:$4 sm:$0xff]  }
 0x5e1   : > { %15714 = vmatpush1.bf16.msra.mxu0 %v20807_v20  ;;  %14403 = vmatprep.subr.bf16.mxu1 %v20812_v34  ;;  %v20901_v20 = vld [vmem:[%s21987_s4 + $0x3754] ss:$8 sps:$4 sm:$0xff]   ;;  %v20896_v34 = vld [vmem:[%s21987_s4 + $0x1750] ss:$8 sps:$4 sm:$0xff]  }
 0x5e2   : > { %15715 = vmatprep.subr.bf16.mxu0 %v20815_v21  ;;  %v20899_v21 = vld [vmem:[%s21987_s4 + $0x3750] ss:$8 sps:$4 sm:$0xff]  }
 0x5e4   : > { %14404 = vmatpush1.bf16.msra.mxu1 %v20810_v1  ;;  %v20904_v1 = vld [vmem:[%s21987_s4 + $0x1764] ss:$8 sps:$4 sm:$0xff]  }
 0x5e5   : > { %15716 = vmatpush1.bf16.msra.mxu0 %v20813_v42  ;;  %14405 = vmatprep.subr.bf16.mxu1 %v20818_v40  ;;  %v20907_v42 = vld [vmem:[%s21987_s4 + $0x3764] ss:$8 sps:$4 sm:$0xff]   ;;  %v20902_v40 = vld [vmem:[%s21987_s4 + $0x1760] ss:$8 sps:$4 sm:$0xff]  }
 0x5e6   : > { %15717 = vmatprep.subr.bf16.mxu0 %v20821_v39  ;;  %v20905_v39 = vld [vmem:[%s21987_s4 + $0x3760] ss:$8 sps:$4 sm:$0xff]  }
 0x5e8   : > { %14406 = vmatpush1.bf16.msra.mxu1 %v20816_v61  ;;  %v20910_v61 = vld [vmem:[%s21987_s4 + $0x1774] ss:$8 sps:$4 sm:$0xff]  }
 0x5e9   : > { %15718 = vmatpush1.bf16.msra.mxu0 %v20819_v23  ;;  %14407 = vmatprep.subr.bf16.mxu1 %v20824_v2  ;;  %v20913_v23 = vld [vmem:[%s21987_s4 + $0x3774] ss:$8 sps:$4 sm:$0xff]   ;;  %v20908_v2 = vld [vmem:[%s21987_s4 + $0x1770] ss:$8 sps:$4 sm:$0xff]  }
 0x5ea   : > { %15719 = vmatprep.subr.bf16.mxu0 %v20827_v24  ;;  %v20911_v24 = vld [vmem:[%s21987_s4 + $0x3770] ss:$8 sps:$4 sm:$0xff]  }
 0x5ec   : > { %14408 = vmatpush1.bf16.msra.mxu1 %v20822_v13  ;;  %v20916_v13 = vld [vmem:[%s21987_s4 + $0x1784] ss:$8 sps:$4 sm:$0xff]  }
 0x5ed   : > { %15720 = vmatpush1.bf16.msra.mxu0 %v20825_v53  ;;  %14409 = vmatprep.subr.bf16.mxu1 %v20830_v59  ;;  %v20919_v53 = vld [vmem:[%s21987_s4 + $0x3784] ss:$8 sps:$4 sm:$0xff]   ;;  %v20914_v59 = vld [vmem:[%s21987_s4 + $0x1780] ss:$8 sps:$4 sm:$0xff]  }
 0x5ee   : > { %15721 = vmatprep.subr.bf16.mxu0 %v20833_v57  ;;  %v20917_v57 = vld [vmem:[%s21987_s4 + $0x3780] ss:$8 sps:$4 sm:$0xff]  }
 0x5f0   : > { %14410 = vmatpush1.bf16.msra.mxu1 %v20828_v12  ;;  %v20922_v12 = vld [vmem:[%s21987_s4 + $0x1794] ss:$8 sps:$4 sm:$0xff]  }
 0x5f1   : > { %15722 = vmatpush1.bf16.msra.mxu0 %v20831_v28  ;;  %14411 = vmatprep.subr.bf16.mxu1 %v20836_v35  ;;  %v20925_v28 = vld [vmem:[%s21987_s4 + $0x3794] ss:$8 sps:$4 sm:$0xff]   ;;  %v20920_v35 = vld [vmem:[%s21987_s4 + $0x1790] ss:$8 sps:$4 sm:$0xff]  }
 0x5f2   : > { %15723 = vmatprep.subr.bf16.mxu0 %v20839_v36  ;;  %v20923_v36 = vld [vmem:[%s21987_s4 + $0x3790] ss:$8 sps:$4 sm:$0xff]  }
 0x5f4   : > { %14412 = vmatpush1.bf16.msra.mxu1 %v20834_v22  ;;  %v20928_v22 = vld [vmem:[%s21987_s4 + $0x17a4] ss:$8 sps:$4 sm:$0xff]  }
 0x5f5   : > { %15724 = vmatpush1.bf16.msra.mxu0 %v20837_v43  ;;  %14413 = vmatprep.subr.bf16.mxu1 %v20842_v29  ;;  %v20931_v43 = vld [vmem:[%s21987_s4 + $0x37a4] ss:$8 sps:$4 sm:$0xff]   ;;  %v20926_v29 = vld [vmem:[%s21987_s4 + $0x17a0] ss:$8 sps:$4 sm:$0xff]  }
 0x5f6   : > { %15725 = vmatprep.subr.bf16.mxu0 %v20845_v31  ;;  %v20929_v31 = vld [vmem:[%s21987_s4 + $0x37a0] ss:$8 sps:$4 sm:$0xff]  }
 0x5f8   : > { %14414 = vmatpush1.bf16.msra.mxu1 %v20840_v60  ;;  %v20934_v60 = vld [vmem:[%s21987_s4 + $0x17b4] ss:$8 sps:$4 sm:$0xff]  }
 0x5f9   : > { %15726 = vmatpush1.bf16.msra.mxu0 %v20843_v9  ;;  %14415 = vmatprep.subr.bf16.mxu1 %v20848_v62  ;;  %v20937_v9 = vld [vmem:[%s21987_s4 + $0x37b4] ss:$8 sps:$4 sm:$0xff]   ;;  %v20932_v62 = vld [vmem:[%s21987_s4 + $0x17b0] ss:$8 sps:$4 sm:$0xff]  }
 0x5fa   : > { %15727 = vmatprep.subr.bf16.mxu0 %v20851_v8  ;;  %v20935_v8 = vld [vmem:[%s21987_s4 + $0x37b0] ss:$8 sps:$4 sm:$0xff]  }
 0x5fc   : > { %14416 = vmatpush1.bf16.msra.mxu1 %v20846_v27  ;;  %v20940_v27 = vld [vmem:[%s21987_s4 + $0x17c4] ss:$8 sps:$4 sm:$0xff]  }
 0x5fd   : > { %15728 = vmatpush1.bf16.msra.mxu0 %v20849_v15  ;;  %14417 = vmatprep.subr.bf16.mxu1 %v20854_v11  ;;  %v20943_v15 = vld [vmem:[%s21987_s4 + $0x37c4] ss:$8 sps:$4 sm:$0xff]   ;;  %v20938_v11 = vld [vmem:[%s21987_s4 + $0x17c0] ss:$8 sps:$4 sm:$0xff]  }
 0x5fe   : > { %15729 = vmatprep.subr.bf16.mxu0 %v20857_v46  ;;  %v20941_v46 = vld [vmem:[%s21987_s4 + $0x37c0] ss:$8 sps:$4 sm:$0xff]  }
 0x600   : > { %14418 = vmatpush1.bf16.msra.mxu1 %v20852_v26  ;;  %v20946_v26 = vld [vmem:[%s21987_s4 + $0x17d4] ss:$8 sps:$4 sm:$0xff]  }
 0x601   : > { %15730 = vmatpush1.bf16.msra.mxu0 %v20855_v47  ;;  %14419 = vmatprep.subr.bf16.mxu1 %v20860_v37  ;;  %v20949_v47 = vld [vmem:[%s21987_s4 + $0x37d4] ss:$8 sps:$4 sm:$0xff]   ;;  %v20944_v37 = vld [vmem:[%s21987_s4 + $0x17d0] ss:$8 sps:$4 sm:$0xff]  }
 0x602   : > { %15731 = vmatprep.subr.bf16.mxu0 %v20863_v48  ;;  %v20947_v48 = vld [vmem:[%s21987_s4 + $0x37d0] ss:$8 sps:$4 sm:$0xff]  }
 0x604   : > { %14420 = vmatpush1.bf16.msra.mxu1 %v20858_v32  ;;  %v20952_v32 = vld [vmem:[%s21987_s4 + $0x17e4] ss:$8 sps:$4 sm:$0xff]  }
 0x605   : > { %15732 = vmatpush1.bf16.msra.mxu0 %v20861_v49  ;;  %14430 = vmatprep.subr.bf16.mxu1 %v20867_v38  ;;  %v20955_v49 = vld [vmem:[%s21987_s4 + $0x37e4] ss:$8 sps:$4 sm:$0xff]   ;;  %v24000_v38 = vld [vmem:[%s22000_s6 + $0x30] sm:$0xff] }
 0x606   : > { %15742 = vmatprep.subr.bf16.mxu0 %v20871_v52  ;;  %v24003_v52 = vld [vmem:[%s22000_s6 + $0x70] sm:$0xff] }
 0x607   : > { %14422 = vmatmul.mubr.bf16.vlgmr.msra.gmra.mrb[0].mxu1 %v23931_v63 }
 0x608   : > { %15734 = vmatmul.mubr.bf16.vlgmr.msra.gmra.mrb[0].mxu0 %v23935_v0  ;;  %14431 = vmatpush1.bf16.msra.mxu1 %v20865_v14  ;;  %v20950_v14 = vld [vmem:[%s21987_s4 + $0x17e0] ss:$8 sps:$4 sm:$0xff]  }
 0x609   : > { %15743 = vmatpush1.bf16.msra.mxu0 %v20869_v41  ;;  %14432 = vmatprep.subr.bf16.mxu1 %v20874_v55  ;;  %v20953_v41 = vld [vmem:[%s21987_s4 + $0x37e0] ss:$8 sps:$4 sm:$0xff]   ;;  %v20958_v55 = vld [vmem:[%s21987_s4 + $0x17f4] ss:$8 sps:$4 sm:$0xff]  }
 0x60a   : > { %15744 = vmatprep.subr.bf16.mxu0 %v20877_v45  ;;  %14462 = vmatprep.mubr.bf16.mxu1 %v2628_v7  ;;  %v20961_v45 = vld [vmem:[%s21987_s4 + $0x37f4] ss:$8 sps:$4 sm:$0xff]   ;;  %v24011_v7 = vrot.slane %v24000_v38, %v22061_v50 }
 0x60b   : > { %15774 = vmatprep.mubr.bf16.mxu0 %v3020_v10  ;;  %v24015_v10 = vrot.slane %v24003_v52, %v22061_v50 }
 0x60c   : > { %14433 = vmatpush1.bf16.msra.mxu1 %v20872_v25  ;;  %v20956_v25 = vld [vmem:[%s21987_s4 + $0x17f0] ss:$8 sps:$4 sm:$0xff]  }
 0x60d   : > { %15745 = vmatpush1.bf16.msra.mxu0 %v20875_v30  ;;  %14434 = vmatprep.subr.bf16.mxu1 %v20880_v51  ;;  %v20959_v30 = vld [vmem:[%s21987_s4 + $0x37f0] ss:$8 sps:$4 sm:$0xff]   ;;  %v20964_v51 = vld [vmem:[%s21987_s4 + $0x1804] ss:$8 sps:$4 sm:$0xff]  }
 0x60e   : > { %15746 = vmatprep.subr.bf16.mxu0 %v20883_v17  ;;  %v20967_v17 = vld [vmem:[%s21987_s4 + $0x3804] ss:$8 sps:$4 sm:$0xff]  }
 0x610   : > { %14435 = vmatpush1.bf16.msra.mxu1 %v20878_v18  ;;  %v2644_v18 = vcombine.high %v24011_v7, %v24011_v7 }
 0x611   : > { %15747 = vmatpush1.bf16.msra.mxu0 %v20881_v54  ;;  %14436 = vmatprep.subr.bf16.mxu1 %v20886_v16  ;;  %v3036_v54 = vcombine.high %v24015_v10, %v24015_v10  ;;  %v2626_v16 = vcombine.high %v23931_v63, %v23931_v63 }
 0x612   : > { %15748 = vmatprep.subr.bf16.mxu0 %v20889_v56  ;;  %v3018_v56 = vcombine.high %v23935_v0, %v23935_v0  ;;  %v20968_v0 = vld [vmem:[%s21987_s4 + $0x1810] ss:$8 sps:$4 sm:$0xff]  }
 0x613   : > { %v24037_v63 = vrot.slane %v3036_v54, %v22061_v50  ;;  %v21043_v54 = vld [vmem:[%s21987_s4 + $0x38d0] ss:$8 sps:$4 sm:$0xff]  }
 0x614   : > { %14437 = vmatpush1.bf16.msra.mxu1 %v20884_v33  ;;  %v20962_v33 = vld [vmem:[%s21987_s4 + $0x1800] ss:$8 sps:$4 sm:$0xff]  }
 0x615   : > { %15749 = vmatpush1.bf16.msra.mxu0 %v20887_v3  ;;  %14438 = vmatprep.subr.bf16.mxu1 %v20892_v58  ;;  %v20965_v3 = vld [vmem:[%s21987_s4 + $0x3800] ss:$8 sps:$4 sm:$0xff]   ;;  %v20970_v58 = vld [vmem:[%s21987_s4 + $0x1814] ss:$8 sps:$4 sm:$0xff]  }
 0x616   : > { %15750 = vmatprep.subr.bf16.mxu0 %v20895_v4  ;;  %v20973_v4 = vld [vmem:[%s21987_s4 + $0x3814] ss:$8 sps:$4 sm:$0xff]  }
 0x618   : > { %14439 = vmatpush1.bf16.msra.mxu1 %v20890_v5  ;;  %v24034_v5 = vrot.slane %v2644_v18, %v22061_v50  ;;  %v21040_v18 = vld [vmem:[%s21987_s4 + $0x18d0] ss:$8 sps:$4 sm:$0xff]  }
 0x619   : > { %15751 = vmatpush1.bf16.msra.mxu0 %v20893_v6  ;;  %14440 = vmatprep.subr.bf16.mxu1 %v20898_v19  ;;  %v20971_v6 = vld [vmem:[%s21987_s4 + $0x3810] ss:$8 sps:$4 sm:$0xff]   ;;  %v20976_v19 = vld [vmem:[%s21987_s4 + $0x1824] ss:$8 sps:$4 sm:$0xff]  }
 0x61a   : > { %15752 = vmatprep.subr.bf16.mxu0 %v20901_v20  ;;  %v20979_v20 = vld [vmem:[%s21987_s4 + $0x3824] ss:$8 sps:$4 sm:$0xff]  }
 0x61c   : > { %14441 = vmatpush1.bf16.msra.mxu1 %v20896_v34  ;;  %v20974_v34 = vld [vmem:[%s21987_s4 + $0x1820] ss:$8 sps:$4 sm:$0xff]  }
 0x61d   : > { %15753 = vmatpush1.bf16.msra.mxu0 %v20899_v21  ;;  %14442 = vmatprep.subr.bf16.mxu1 %v20904_v1  ;;  %v20977_v21 = vld [vmem:[%s21987_s4 + $0x3820] ss:$8 sps:$4 sm:$0xff]   ;;  %v20982_v1 = vld [vmem:[%s21987_s4 + $0x1834] ss:$8 sps:$4 sm:$0xff]  }
 0x61e   : > { %15754 = vmatprep.subr.bf16.mxu0 %v20907_v42  ;;  %v20985_v42 = vld [vmem:[%s21987_s4 + $0x3834] ss:$8 sps:$4 sm:$0xff]  }
 0x620   : > { %14443 = vmatpush1.bf16.msra.mxu1 %v20902_v40  ;;  %v20980_v40 = vld [vmem:[%s21987_s4 + $0x1830] ss:$8 sps:$4 sm:$0xff]  }
 0x621   : > { %15755 = vmatpush1.bf16.msra.mxu0 %v20905_v39  ;;  %14444 = vmatprep.subr.bf16.mxu1 %v20910_v61  ;;  %v20983_v39 = vld [vmem:[%s21987_s4 + $0x3830] ss:$8 sps:$4 sm:$0xff]   ;;  %v20988_v61 = vld [vmem:[%s21987_s4 + $0x1844] ss:$8 sps:$4 sm:$0xff]  }
 0x622   : > { %15756 = vmatprep.subr.bf16.mxu0 %v20913_v23  ;;  %v20991_v23 = vld [vmem:[%s21987_s4 + $0x3844] ss:$8 sps:$4 sm:$0xff]  }
 0x624   : > { %14445 = vmatpush1.bf16.msra.mxu1 %v20908_v2  ;;  %v20986_v2 = vld [vmem:[%s21987_s4 + $0x1840] ss:$8 sps:$4 sm:$0xff]  }
 0x625   : > { %15757 = vmatpush1.bf16.msra.mxu0 %v20911_v24  ;;  %14446 = vmatprep.subr.bf16.mxu1 %v20916_v13  ;;  %v20989_v24 = vld [vmem:[%s21987_s4 + $0x3840] ss:$8 sps:$4 sm:$0xff]   ;;  %v20994_v13 = vld [vmem:[%s21987_s4 + $0x1854] ss:$8 sps:$4 sm:$0xff]  }
 0x626   : > { %15758 = vmatprep.subr.bf16.mxu0 %v20919_v53  ;;  %v20997_v53 = vld [vmem:[%s21987_s4 + $0x3854] ss:$8 sps:$4 sm:$0xff]  }
 0x628   : > { %14447 = vmatpush1.bf16.msra.mxu1 %v20914_v59  ;;  %v20992_v59 = vld [vmem:[%s21987_s4 + $0x1850] ss:$8 sps:$4 sm:$0xff]  }
 0x629   : > { %15759 = vmatpush1.bf16.msra.mxu0 %v20917_v57  ;;  %14448 = vmatprep.subr.bf16.mxu1 %v20922_v12  ;;  %v20995_v57 = vld [vmem:[%s21987_s4 + $0x3850] ss:$8 sps:$4 sm:$0xff]   ;;  %v21000_v12 = vld [vmem:[%s21987_s4 + $0x1864] ss:$8 sps:$4 sm:$0xff]  }
 0x62a   : > { %15760 = vmatprep.subr.bf16.mxu0 %v20925_v28  ;;  %v21003_v28 = vld [vmem:[%s21987_s4 + $0x3864] ss:$8 sps:$4 sm:$0xff]  }
 0x62c   : > { %14449 = vmatpush1.bf16.msra.mxu1 %v20920_v35  ;;  %v20998_v35 = vld [vmem:[%s21987_s4 + $0x1860] ss:$8 sps:$4 sm:$0xff]  }
 0x62d   : > { %15761 = vmatpush1.bf16.msra.mxu0 %v20923_v36  ;;  %14450 = vmatprep.subr.bf16.mxu1 %v20928_v22  ;;  %v21001_v36 = vld [vmem:[%s21987_s4 + $0x3860] ss:$8 sps:$4 sm:$0xff]   ;;  %v21006_v22 = vld [vmem:[%s21987_s4 + $0x1874] ss:$8 sps:$4 sm:$0xff]  }
 0x62e   : > { %15762 = vmatprep.subr.bf16.mxu0 %v20931_v43  ;;  %v21009_v43 = vld [vmem:[%s21987_s4 + $0x3874] ss:$8 sps:$4 sm:$0xff]  }
 0x630   : > { %14451 = vmatpush1.bf16.msra.mxu1 %v20926_v29  ;;  %v21004_v29 = vld [vmem:[%s21987_s4 + $0x1870] ss:$8 sps:$4 sm:$0xff]  }
 0x631   : > { %15763 = vmatpush1.bf16.msra.mxu0 %v20929_v31  ;;  %14452 = vmatprep.subr.bf16.mxu1 %v20934_v60  ;;  %v21007_v31 = vld [vmem:[%s21987_s4 + $0x3870] ss:$8 sps:$4 sm:$0xff]   ;;  %v21012_v60 = vld [vmem:[%s21987_s4 + $0x1884] ss:$8 sps:$4 sm:$0xff]  }
 0x632   : > { %15764 = vmatprep.subr.bf16.mxu0 %v20937_v9  ;;  %v21015_v9 = vld [vmem:[%s21987_s4 + $0x3884] ss:$8 sps:$4 sm:$0xff]  }
 0x634   : > { %14453 = vmatpush1.bf16.msra.mxu1 %v20932_v62  ;;  %v21010_v62 = vld [vmem:[%s21987_s4 + $0x1880] ss:$8 sps:$4 sm:$0xff]  }
 0x635   : > { %15765 = vmatpush1.bf16.msra.mxu0 %v20935_v8  ;;  %14454 = vmatprep.subr.bf16.mxu1 %v20940_v27  ;;  %v21013_v8 = vld [vmem:[%s21987_s4 + $0x3880] ss:$8 sps:$4 sm:$0xff]   ;;  %v21018_v27 = vld [vmem:[%s21987_s4 + $0x1894] ss:$8 sps:$4 sm:$0xff]  }
 0x636   : > { %15766 = vmatprep.subr.bf16.mxu0 %v20943_v15  ;;  %v21021_v15 = vld [vmem:[%s21987_s4 + $0x3894] ss:$8 sps:$4 sm:$0xff]  }
 0x638   : > { %14455 = vmatpush1.bf16.msra.mxu1 %v20938_v11  ;;  %v21016_v11 = vld [vmem:[%s21987_s4 + $0x1890] ss:$8 sps:$4 sm:$0xff]  }
 0x639   : > { %15767 = vmatpush1.bf16.msra.mxu0 %v20941_v46  ;;  %14456 = vmatprep.subr.bf16.mxu1 %v20946_v26  ;;  %v21019_v46 = vld [vmem:[%s21987_s4 + $0x3890] ss:$8 sps:$4 sm:$0xff]   ;;  %v21024_v26 = vld [vmem:[%s21987_s4 + $0x18a4] ss:$8 sps:$4 sm:$0xff]  }
 0x63a   : > { %15768 = vmatprep.subr.bf16.mxu0 %v20949_v47  ;;  %v21027_v47 = vld [vmem:[%s21987_s4 + $0x38a4] ss:$8 sps:$4 sm:$0xff]  }
 0x63c   : > { %14457 = vmatpush1.bf16.msra.mxu1 %v20944_v37  ;;  %v21022_v37 = vld [vmem:[%s21987_s4 + $0x18a0] ss:$8 sps:$4 sm:$0xff]  }
 0x63d   : > { %15769 = vmatpush1.bf16.msra.mxu0 %v20947_v48  ;;  %14458 = vmatprep.subr.bf16.mxu1 %v20952_v32  ;;  %v21025_v48 = vld [vmem:[%s21987_s4 + $0x38a0] ss:$8 sps:$4 sm:$0xff]   ;;  %v21030_v32 = vld [vmem:[%s21987_s4 + $0x18b4] ss:$8 sps:$4 sm:$0xff]  }
 0x63e   : > { %15770 = vmatprep.subr.bf16.mxu0 %v20955_v49  ;;  %v21033_v49 = vld [vmem:[%s21987_s4 + $0x38b4] ss:$8 sps:$4 sm:$0xff]  }
 0x640   : > { %14459 = vmatpush1.bf16.msra.mxu1 %v20950_v14  ;;  %v21028_v14 = vld [vmem:[%s21987_s4 + $0x18b0] ss:$8 sps:$4 sm:$0xff]  }
 0x641   : > { %15771 = vmatpush1.bf16.msra.mxu0 %v20953_v41  ;;  %14460 = vmatprep.subr.bf16.mxu1 %v20958_v55  ;;  %v21031_v41 = vld [vmem:[%s21987_s4 + $0x38b0] ss:$8 sps:$4 sm:$0xff]   ;;  %v21036_v55 = vld [vmem:[%s21987_s4 + $0x18c4] ss:$8 sps:$4 sm:$0xff]  }
 0x642   : > { %15772 = vmatprep.subr.bf16.mxu0 %v20961_v45  ;;  %v21039_v45 = vld [vmem:[%s21987_s4 + $0x38c4] ss:$8 sps:$4 sm:$0xff]  }
 0x644   : > { %14461 = vmatpush1.bf16.msra.mxu1 %v20956_v25  ;;  %v21034_v25 = vld [vmem:[%s21987_s4 + $0x18c0] ss:$8 sps:$4 sm:$0xff]  }
 0x645   : > { %15773 = vmatpush1.bf16.msra.mxu0 %v20959_v30  ;;  %14471 = vmatprep.subr.bf16.mxu1 %v20964_v51  ;;  %v21037_v30 = vld [vmem:[%s21987_s4 + $0x38c0] ss:$8 sps:$4 sm:$0xff]   ;;  %v21042_v51 = vld [vmem:[%s21987_s4 + $0x18d4] ss:$8 sps:$4 sm:$0xff]  }
 0x646   : > { %15783 = vmatprep.subr.bf16.mxu0 %v20967_v17  ;;  %v21045_v17 = vld [vmem:[%s21987_s4 + $0x38d4] ss:$8 sps:$4 sm:$0xff]  }
 0x647   : > { %14463 = vmatmul.mubr.bf16.vlgmr.msra.gmra.mrb[0].mxu1 %v2626_v16  ;;  %v21048_v16 = vld [vmem:[%s21987_s4 + $0x18e4] ss:$8 sps:$4 sm:$0xff]  }
 0x648   : > { %15775 = vmatmul.mubr.bf16.vlgmr.msra.gmra.mrb[0].mxu0 %v3018_v56  ;;  %14472 = vmatpush1.bf16.msra.mxu1 %v20962_v33  ;;  %v21051_v56 = vld [vmem:[%s21987_s4 + $0x38e4] ss:$8 sps:$4 sm:$0xff]   ;;  %v21046_v33 = vld [vmem:[%s21987_s4 + $0x18e0] ss:$8 sps:$4 sm:$0xff]  }
 0x649   : > { %15784 = vmatpush1.bf16.msra.mxu0 %v20965_v3  ;;  %14473 = vmatprep.subr.bf16.mxu1 %v20970_v58  ;;  %v21049_v3 = vld [vmem:[%s21987_s4 + $0x38e0] ss:$8 sps:$4 sm:$0xff]   ;;  %v21054_v58 = vld [vmem:[%s21987_s4 + $0x18f4] ss:$8 sps:$4 sm:$0xff]  }
 0x64a   : > { %15785 = vmatprep.subr.bf16.mxu0 %v20973_v4  ;;  %14503 = vmatprep.mubr.bf16.mxu1 %v24034_v5  ;;  %v21057_v4 = vld [vmem:[%s21987_s4 + $0x38f4] ss:$8 sps:$4 sm:$0xff]  }
 0x64b   : > { %15815 = vmatprep.mubr.bf16.mxu0 %v24037_v63 }
 0x64c   : > { %14474 = vmatpush1.bf16.msra.mxu1 %v20968_v0  ;;  %v21052_v0 = vld [vmem:[%s21987_s4 + $0x18f0] ss:$8 sps:$4 sm:$0xff]  }
 0x64d   : > { %15786 = vmatpush1.bf16.msra.mxu0 %v20971_v6  ;;  %14475 = vmatprep.subr.bf16.mxu1 %v20976_v19  ;;  %v21055_v6 = vld [vmem:[%s21987_s4 + $0x38f0] ss:$8 sps:$4 sm:$0xff]   ;;  %v21060_v19 = vld [vmem:[%s21987_s4 + $0x1904] ss:$8 sps:$4 sm:$0xff]  }
 0x64e   : > { %15787 = vmatprep.subr.bf16.mxu0 %v20979_v20  ;;  %v21063_v20 = vld [vmem:[%s21987_s4 + $0x3904] ss:$8 sps:$4 sm:$0xff]  }
 0x650   : > { %14476 = vmatpush1.bf16.msra.mxu1 %v20974_v34  ;;  %v24103_v34 = vrot.slane %v24011_v7, %v22061_v50  ;;  %v2676_v7 = vcombine.high %v24034_v5, %v24034_v5  ;;  %v21072_v5 = vld [vmem:[%s21987_s4 + $0x1924] ss:$8 sps:$4 sm:$0xff]  }
 0x651   : > { %15788 = vmatpush1.bf16.msra.mxu0 %v20977_v21  ;;  %14477 = vmatprep.subr.bf16.mxu1 %v20982_v1  ;;  %v24107_v21 = vrot.slane %v24015_v10, %v22061_v50  ;;  %v21058_v1 = vld [vmem:[%s21987_s4 + $0x1900] ss:$8 sps:$4 sm:$0xff]   ;;  %v21064_v10 = vld [vmem:[%s21987_s4 + $0x1910] ss:$8 sps:$4 sm:$0xff]  }
 0x652   : > { %15789 = vmatprep.subr.bf16.mxu0 %v20985_v42  ;;  %v21061_v42 = vld [vmem:[%s21987_s4 + $0x3900] ss:$8 sps:$4 sm:$0xff]  }
 0x654   : > { %14478 = vmatpush1.bf16.msra.mxu1 %v20980_v40  ;;  %v21066_v40 = vld [vmem:[%s21987_s4 + $0x1914] ss:$8 sps:$4 sm:$0xff]  }
 0x655   : > { %15790 = vmatpush1.bf16.msra.mxu0 %v20983_v39  ;;  %14479 = vmatprep.subr.bf16.mxu1 %v20988_v61  ;;  %v21069_v39 = vld [vmem:[%s21987_s4 + $0x3914] ss:$8 sps:$4 sm:$0xff]   ;;  %v3068_v61 = vcombine.high %v24037_v63, %v24037_v63  ;;  %v21070_v63 = vld [vmem:[%s21987_s4 + $0x1920] ss:$8 sps:$4 sm:$0xff]  }
 0x656   : > { %15791 = vmatprep.subr.bf16.mxu0 %v20991_v23  ;;  %v21067_v23 = vld [vmem:[%s21987_s4 + $0x3910] ss:$8 sps:$4 sm:$0xff]  }
 0x658   : > { %14480 = vmatpush1.bf16.msra.mxu1 %v20986_v2  ;;  %v21075_v2 = vld [vmem:[%s21987_s4 + $0x3924] ss:$8 sps:$4 sm:$0xff]  }
 0x659   : > { %15792 = vmatpush1.bf16.msra.mxu0 %v20989_v24  ;;  %14481 = vmatprep.subr.bf16.mxu1 %v20994_v13  ;;  %v21073_v24 = vld [vmem:[%s21987_s4 + $0x3920] ss:$8 sps:$4 sm:$0xff]   ;;  %v21078_v13 = vld [vmem:[%s21987_s4 + $0x1934] ss:$8 sps:$4 sm:$0xff]  }
 0x65a   : > { %15793 = vmatprep.subr.bf16.mxu0 %v20997_v53  ;;  %v21081_v53 = vld [vmem:[%s21987_s4 + $0x3934] ss:$8 sps:$4 sm:$0xff]  }
 0x65c   : > { %14482 = vmatpush1.bf16.msra.mxu1 %v20992_v59  ;;  %v21076_v59 = vld [vmem:[%s21987_s4 + $0x1930] ss:$8 sps:$4 sm:$0xff]  }
 0x65d   : > { %15794 = vmatpush1.bf16.msra.mxu0 %v20995_v57  ;;  %14483 = vmatprep.subr.bf16.mxu1 %v21000_v12  ;;  %v21079_v57 = vld [vmem:[%s21987_s4 + $0x3930] ss:$8 sps:$4 sm:$0xff]   ;;  %v21084_v12 = vld [vmem:[%s21987_s4 + $0x1944] ss:$8 sps:$4 sm:$0xff]  }
 0x65e   : > { %15795 = vmatprep.subr.bf16.mxu0 %v21003_v28  ;;  %v21087_v28 = vld [vmem:[%s21987_s4 + $0x3944] ss:$8 sps:$4 sm:$0xff]  }
 0x660   : > { %14484 = vmatpush1.bf16.msra.mxu1 %v20998_v35  ;;  %v21082_v35 = vld [vmem:[%s21987_s4 + $0x1940] ss:$8 sps:$4 sm:$0xff]  }
 0x661   : > { %15796 = vmatpush1.bf16.msra.mxu0 %v21001_v36  ;;  %14485 = vmatprep.subr.bf16.mxu1 %v21006_v22  ;;  %v21085_v36 = vld [vmem:[%s21987_s4 + $0x3940] ss:$8 sps:$4 sm:$0xff]   ;;  %v21090_v22 = vld [vmem:[%s21987_s4 + $0x1954] ss:$8 sps:$4 sm:$0xff]  }
 0x662   : > { %15797 = vmatprep.subr.bf16.mxu0 %v21009_v43  ;;  %v21093_v43 = vld [vmem:[%s21987_s4 + $0x3954] ss:$8 sps:$4 sm:$0xff]  }
 0x664   : > { %14486 = vmatpush1.bf16.msra.mxu1 %v21004_v29  ;;  %v21088_v29 = vld [vmem:[%s21987_s4 + $0x1950] ss:$8 sps:$4 sm:$0xff]  }
 0x665   : > { %15798 = vmatpush1.bf16.msra.mxu0 %v21007_v31  ;;  %14487 = vmatprep.subr.bf16.mxu1 %v21012_v60  ;;  %v21091_v31 = vld [vmem:[%s21987_s4 + $0x3950] ss:$8 sps:$4 sm:$0xff]   ;;  %v21096_v60 = vld [vmem:[%s21987_s4 + $0x1964] ss:$8 sps:$4 sm:$0xff]  }
 0x666   : > { %15799 = vmatprep.subr.bf16.mxu0 %v21015_v9  ;;  %v21099_v9 = vld [vmem:[%s21987_s4 + $0x3964] ss:$8 sps:$4 sm:$0xff]  }
 0x668   : > { %14488 = vmatpush1.bf16.msra.mxu1 %v21010_v62  ;;  %v21094_v62 = vld [vmem:[%s21987_s4 + $0x1960] ss:$8 sps:$4 sm:$0xff]  }
 0x669   : > { %15800 = vmatpush1.bf16.msra.mxu0 %v21013_v8  ;;  %14489 = vmatprep.subr.bf16.mxu1 %v21018_v27  ;;  %v21097_v8 = vld [vmem:[%s21987_s4 + $0x3960] ss:$8 sps:$4 sm:$0xff]   ;;  %v21102_v27 = vld [vmem:[%s21987_s4 + $0x1974] ss:$8 sps:$4 sm:$0xff]  }
 0x66a   : > { %15801 = vmatprep.subr.bf16.mxu0 %v21021_v15  ;;  %v21105_v15 = vld [vmem:[%s21987_s4 + $0x3974] ss:$8 sps:$4 sm:$0xff]  }
 0x66c   : > { %14490 = vmatpush1.bf16.msra.mxu1 %v21016_v11  ;;  %v21100_v11 = vld [vmem:[%s21987_s4 + $0x1970] ss:$8 sps:$4 sm:$0xff]  }
 0x66d   : > { %15802 = vmatpush1.bf16.msra.mxu0 %v21019_v46  ;;  %14491 = vmatprep.subr.bf16.mxu1 %v21024_v26  ;;  %v21103_v46 = vld [vmem:[%s21987_s4 + $0x3970] ss:$8 sps:$4 sm:$0xff]   ;;  %v21108_v26 = vld [vmem:[%s21987_s4 + $0x1984] ss:$8 sps:$4 sm:$0xff]  }
 0x66e   : > { %15803 = vmatprep.subr.bf16.mxu0 %v21027_v47  ;;  %v21111_v47 = vld [vmem:[%s21987_s4 + $0x3984] ss:$8 sps:$4 sm:$0xff]  }
 0x670   : > { %14492 = vmatpush1.bf16.msra.mxu1 %v21022_v37  ;;  %v21106_v37 = vld [vmem:[%s21987_s4 + $0x1980] ss:$8 sps:$4 sm:$0xff]  }
 0x671   : > { %15804 = vmatpush1.bf16.msra.mxu0 %v21025_v48  ;;  %14493 = vmatprep.subr.bf16.mxu1 %v21030_v32  ;;  %v21109_v48 = vld [vmem:[%s21987_s4 + $0x3980] ss:$8 sps:$4 sm:$0xff]   ;;  %v21114_v32 = vld [vmem:[%s21987_s4 + $0x1994] ss:$8 sps:$4 sm:$0xff]  }
 0x672   : > { %15805 = vmatprep.subr.bf16.mxu0 %v21033_v49  ;;  %v21117_v49 = vld [vmem:[%s21987_s4 + $0x3994] ss:$8 sps:$4 sm:$0xff]  }
 0x674   : > { %14494 = vmatpush1.bf16.msra.mxu1 %v21028_v14  ;;  %v21112_v14 = vld [vmem:[%s21987_s4 + $0x1990] ss:$8 sps:$4 sm:$0xff]  }
 0x675   : > { %15806 = vmatpush1.bf16.msra.mxu0 %v21031_v41  ;;  %14495 = vmatprep.subr.bf16.mxu1 %v21036_v55  ;;  %v21115_v41 = vld [vmem:[%s21987_s4 + $0x3990] ss:$8 sps:$4 sm:$0xff]   ;;  %v21120_v55 = vld [vmem:[%s21987_s4 + $0x19a4] ss:$8 sps:$4 sm:$0xff]  }
 0x676   : > { %15807 = vmatprep.subr.bf16.mxu0 %v21039_v45  ;;  %v21123_v45 = vld [vmem:[%s21987_s4 + $0x39a4] ss:$8 sps:$4 sm:$0xff]  }
 0x678   : > { %14496 = vmatpush1.bf16.msra.mxu1 %v21034_v25  ;;  %v21118_v25 = vld [vmem:[%s21987_s4 + $0x19a0] ss:$8 sps:$4 sm:$0xff]  }
 0x679   : > { %15808 = vmatpush1.bf16.msra.mxu0 %v21037_v30  ;;  %14497 = vmatprep.subr.bf16.mxu1 %v21042_v51  ;;  %v21121_v30 = vld [vmem:[%s21987_s4 + $0x39a0] ss:$8 sps:$4 sm:$0xff]   ;;  %v21126_v51 = vld [vmem:[%s21987_s4 + $0x19b4] ss:$8 sps:$4 sm:$0xff]  }
 0x67a   : > { %15809 = vmatprep.subr.bf16.mxu0 %v21045_v17  ;;  %v21129_v17 = vld [vmem:[%s21987_s4 + $0x39b4] ss:$8 sps:$4 sm:$0xff]  }
 0x67c   : > { %14498 = vmatpush1.bf16.msra.mxu1 %v21040_v18  ;;  %v21124_v18 = vld [vmem:[%s21987_s4 + $0x19b0] ss:$8 sps:$4 sm:$0xff]  }
 0x67d   : > { %15810 = vmatpush1.bf16.msra.mxu0 %v21043_v54  ;;  %14499 = vmatprep.subr.bf16.mxu1 %v21048_v16  ;;  %v21127_v54 = vld [vmem:[%s21987_s4 + $0x39b0] ss:$8 sps:$4 sm:$0xff]   ;;  %v21132_v16 = vld [vmem:[%s21987_s4 + $0x19c4] ss:$8 sps:$4 sm:$0xff]  }
 0x67e   : > { %15811 = vmatprep.subr.bf16.mxu0 %v21051_v56  ;;  %v21135_v56 = vld [vmem:[%s21987_s4 + $0x39c4] ss:$8 sps:$4 sm:$0xff]  }
 0x680   : > { %14500 = vmatpush1.bf16.msra.mxu1 %v21046_v33  ;;  %v21130_v33 = vld [vmem:[%s21987_s4 + $0x19c0] ss:$8 sps:$4 sm:$0xff]  }
 0x681   : > { %15812 = vmatpush1.bf16.msra.mxu0 %v21049_v3  ;;  %14501 = vmatprep.subr.bf16.mxu1 %v21054_v58  ;;  %v21133_v3 = vld [vmem:[%s21987_s4 + $0x39c0] ss:$8 sps:$4 sm:$0xff]   ;;  %v21138_v58 = vld [vmem:[%s21987_s4 + $0x19d4] ss:$8 sps:$4 sm:$0xff]  }
 0x682   : > { %15813 = vmatprep.subr.bf16.mxu0 %v21057_v4  ;;  %v21141_v4 = vld [vmem:[%s21987_s4 + $0x39d4] ss:$8 sps:$4 sm:$0xff]  }
 0x684   : > { %14502 = vmatpush1.bf16.msra.mxu1 %v21052_v0  ;;  %v21136_v0 = vld [vmem:[%s21987_s4 + $0x19d0] ss:$8 sps:$4 sm:$0xff]  }
 0x685   : > { %15814 = vmatpush1.bf16.msra.mxu0 %v21055_v6  ;;  %14512 = vmatprep.subr.bf16.mxu1 %v21060_v19  ;;  %v21139_v6 = vld [vmem:[%s21987_s4 + $0x39d0] ss:$8 sps:$4 sm:$0xff]   ;;  %v21144_v19 = vld [vmem:[%s21987_s4 + $0x19e4] ss:$8 sps:$4 sm:$0xff]  }
 0x686   : > { %15824 = vmatprep.subr.bf16.mxu0 %v21063_v20  ;;  %v21147_v20 = vld [vmem:[%s21987_s4 + $0x39e4] ss:$8 sps:$4 sm:$0xff]  }
 0x687   : > { %14504 = vmatmul.mubr.bf16.vlgmr.msra.gmra.mrb[0].mxu1 %v24103_v34 }
 0x688   : > { %15816 = vmatmul.mubr.bf16.vlgmr.msra.gmra.mrb[0].mxu0 %v24107_v21  ;;  %14513 = vmatpush1.bf16.msra.mxu1 %v21058_v1  ;;  %v2629_v1 = vcombine.high %v24000_v38, %v24000_v38  ;;  %v21148_v38 = vld [vmem:[%s21987_s4 + $0x19f0] ss:$8 sps:$4 sm:$0xff]  }
 0x689   : > { %15825 = vmatpush1.bf16.msra.mxu0 %v21061_v42  ;;  %14514 = vmatprep.subr.bf16.mxu1 %v21066_v40  ;;  %v3021_v42 = vcombine.high %v24003_v52, %v24003_v52  ;;  %v21142_v40 = vld [vmem:[%s21987_s4 + $0x19e0] ss:$8 sps:$4 sm:$0xff]   ;;  %v21151_v52 = vld [vmem:[%s21987_s4 + $0x39f0] ss:$8 sps:$4 sm:$0xff]  }
 0x68a   : > { %15826 = vmatprep.subr.bf16.mxu0 %v21069_v39  ;;  %14544 = vmatprep.mubr.bf16.mxu1 %v2676_v7  ;;  %v21145_v39 = vld [vmem:[%s21987_s4 + $0x39e0] ss:$8 sps:$4 sm:$0xff]   ;;  %v21150_v7 = vld [vmem:[%s21987_s4 + $0x19f4] ss:$8 sps:$4 sm:$0xff]  }
 0x68b   : > { %15856 = vmatprep.mubr.bf16.mxu0 %v3068_v61  ;;  %v21153_v61 = vld [vmem:[%s21987_s4 + $0x39f4] ss:$8 sps:$4 sm:$0xff]  }
 0x68c   : > { %14515 = vmatpush1.bf16.msra.mxu1 %v21064_v10  ;;  %v24180_v10 = vrot.slane %v2629_v1, %v22061_v50  ;;  %v21220_v1 = vld [vmem:[%s21987_s4 + $0x1ab0] ss:$8 sps:$4 sm:$0xff]  }
 0x68d   : > { %15827 = vmatpush1.bf16.msra.mxu0 %v21067_v23  ;;  %14516 = vmatprep.subr.bf16.mxu1 %v21072_v5  ;;  %v24183_v23 = vrot.slane %v3021_v42, %v22061_v50  ;;  %v21156_v5 = vld [vmem:[%s21987_s4 + $0x1a04] ss:$8 sps:$4 sm:$0xff]   ;;  %v21223_v42 = vld [vmem:[%s21987_s4 + $0x3ab0] ss:$8 sps:$4 sm:$0xff]  }
 0x68e   : > { %15828 = vmatprep.subr.bf16.mxu0 %v21075_v2  ;;  %v21159_v2 = vld [vmem:[%s21987_s4 + $0x3a04] ss:$8 sps:$4 sm:$0xff]  }
 0x690   : > { %14517 = vmatpush1.bf16.msra.mxu1 %v21070_v63  ;;  %v2645_v63 = vcombine.high %v24180_v10, %v24180_v10 }
 0x691   : > { %15829 = vmatpush1.bf16.msra.mxu0 %v21073_v24  ;;  %14518 = vmatprep.subr.bf16.mxu1 %v21078_v13  ;;  %v3037_v24 = vcombine.high %v24183_v23, %v24183_v23  ;;  %v2674_v13 = vcombine.high %v24103_v34, %v24103_v34 }
 0x692   : > { %15830 = vmatprep.subr.bf16.mxu0 %v21081_v53  ;;  %v3066_v53 = vcombine.high %v24107_v21, %v24107_v21  ;;  %v21160_v21 = vld [vmem:[%s21987_s4 + $0x1a10] ss:$8 sps:$4 sm:$0xff]  }
 0x693   : > { %v24205_v34 = vrot.slane %v3037_v24, %v22061_v50  ;;  %v21243_v24 = vld [vmem:[%s21987_s4 + $0x3ae4] ss:$8 sps:$4 sm:$0xff]  }
 0x694   : > { %14519 = vmatpush1.bf16.msra.mxu1 %v21076_v59  ;;  %v21154_v59 = vld [vmem:[%s21987_s4 + $0x1a00] ss:$8 sps:$4 sm:$0xff]  }
 0x695   : > { %15831 = vmatpush1.bf16.msra.mxu0 %v21079_v57  ;;  %14520 = vmatprep.subr.bf16.mxu1 %v21084_v12  ;;  %v21157_v57 = vld [vmem:[%s21987_s4 + $0x3a00] ss:$8 sps:$4 sm:$0xff]   ;;  %v21162_v12 = vld [vmem:[%s21987_s4 + $0x1a14] ss:$8 sps:$4 sm:$0xff]  }
 0x696   : > { %15832 = vmatprep.subr.bf16.mxu0 %v21087_v28  ;;  %v21165_v28 = vld [vmem:[%s21987_s4 + $0x3a14] ss:$8 sps:$4 sm:$0xff]  }
 0x698   : > { %14521 = vmatpush1.bf16.msra.mxu1 %v21082_v35  ;;  %v24202_v35 = vrot.slane %v2645_v63, %v22061_v50  ;;  %v21240_v63 = vld [vmem:[%s21987_s4 + $0x1ae4] ss:$8 sps:$4 sm:$0xff]  }
 0x699   : > { %15833 = vmatpush1.bf16.msra.mxu0 %v21085_v36  ;;  %14522 = vmatprep.subr.bf16.mxu1 %v21090_v22  ;;  %v21163_v36 = vld [vmem:[%s21987_s4 + $0x3a10] ss:$8 sps:$4 sm:$0xff]   ;;  %v21168_v22 = vld [vmem:[%s21987_s4 + $0x1a24] ss:$8 sps:$4 sm:$0xff]  }
 0x69a   : > { %15834 = vmatprep.subr.bf16.mxu0 %v21093_v43  ;;  %v21171_v43 = vld [vmem:[%s21987_s4 + $0x3a24] ss:$8 sps:$4 sm:$0xff]  }
 0x69c   : > { %14523 = vmatpush1.bf16.msra.mxu1 %v21088_v29  ;;  %v21166_v29 = vld [vmem:[%s21987_s4 + $0x1a20] ss:$8 sps:$4 sm:$0xff]  }
 0x69d   : > { %15835 = vmatpush1.bf16.msra.mxu0 %v21091_v31  ;;  %14524 = vmatprep.subr.bf16.mxu1 %v21096_v60  ;;  %v21169_v31 = vld [vmem:[%s21987_s4 + $0x3a20] ss:$8 sps:$4 sm:$0xff]   ;;  %v21174_v60 = vld [vmem:[%s21987_s4 + $0x1a34] ss:$8 sps:$4 sm:$0xff]  }
 0x69e   : > { %15836 = vmatprep.subr.bf16.mxu0 %v21099_v9  ;;  %v21177_v9 = vld [vmem:[%s21987_s4 + $0x3a34] ss:$8 sps:$4 sm:$0xff]  }
 0x6a0   : > { %14525 = vmatpush1.bf16.msra.mxu1 %v21094_v62  ;;  %v21172_v62 = vld [vmem:[%s21987_s4 + $0x1a30] ss:$8 sps:$4 sm:$0xff]  }
 0x6a1   : > { %15837 = vmatpush1.bf16.msra.mxu0 %v21097_v8  ;;  %14526 = vmatprep.subr.bf16.mxu1 %v21102_v27  ;;  %v21175_v8 = vld [vmem:[%s21987_s4 + $0x3a30] ss:$8 sps:$4 sm:$0xff]   ;;  %v21180_v27 = vld [vmem:[%s21987_s4 + $0x1a44] ss:$8 sps:$4 sm:$0xff]  }
 0x6a2   : > { %15838 = vmatprep.subr.bf16.mxu0 %v21105_v15  ;;  %v21183_v15 = vld [vmem:[%s21987_s4 + $0x3a44] ss:$8 sps:$4 sm:$0xff]  }
 0x6a4   : > { %14527 = vmatpush1.bf16.msra.mxu1 %v21100_v11  ;;  %v21178_v11 = vld [vmem:[%s21987_s4 + $0x1a40] ss:$8 sps:$4 sm:$0xff]  }
 0x6a5   : > { %15839 = vmatpush1.bf16.msra.mxu0 %v21103_v46  ;;  %14528 = vmatprep.subr.bf16.mxu1 %v21108_v26  ;;  %v21181_v46 = vld [vmem:[%s21987_s4 + $0x3a40] ss:$8 sps:$4 sm:$0xff]   ;;  %v21186_v26 = vld [vmem:[%s21987_s4 + $0x1a54] ss:$8 sps:$4 sm:$0xff]  }
 0x6a6   : > { %15840 = vmatprep.subr.bf16.mxu0 %v21111_v47  ;;  %v21189_v47 = vld [vmem:[%s21987_s4 + $0x3a54] ss:$8 sps:$4 sm:$0xff]  }
 0x6a8   : > { %14529 = vmatpush1.bf16.msra.mxu1 %v21106_v37  ;;  %v21184_v37 = vld [vmem:[%s21987_s4 + $0x1a50] ss:$8 sps:$4 sm:$0xff]  }
 0x6a9   : > { %15841 = vmatpush1.bf16.msra.mxu0 %v21109_v48  ;;  %14530 = vmatprep.subr.bf16.mxu1 %v21114_v32  ;;  %v21187_v48 = vld [vmem:[%s21987_s4 + $0x3a50] ss:$8 sps:$4 sm:$0xff]   ;;  %v21192_v32 = vld [vmem:[%s21987_s4 + $0x1a64] ss:$8 sps:$4 sm:$0xff]  }
 0x6aa   : > { %15842 = vmatprep.subr.bf16.mxu0 %v21117_v49  ;;  %v21195_v49 = vld [vmem:[%s21987_s4 + $0x3a64] ss:$8 sps:$4 sm:$0xff]  }
 0x6ac   : > { %14531 = vmatpush1.bf16.msra.mxu1 %v21112_v14  ;;  %v21190_v14 = vld [vmem:[%s21987_s4 + $0x1a60] ss:$8 sps:$4 sm:$0xff]  }
 0x6ad   : > { %15843 = vmatpush1.bf16.msra.mxu0 %v21115_v41  ;;  %14532 = vmatprep.subr.bf16.mxu1 %v21120_v55  ;;  %v21193_v41 = vld [vmem:[%s21987_s4 + $0x3a60] ss:$8 sps:$4 sm:$0xff]   ;;  %v21198_v55 = vld [vmem:[%s21987_s4 + $0x1a74] ss:$8 sps:$4 sm:$0xff]  }
 0x6ae   : > { %15844 = vmatprep.subr.bf16.mxu0 %v21123_v45  ;;  %v21201_v45 = vld [vmem:[%s21987_s4 + $0x3a74] ss:$8 sps:$4 sm:$0xff]  }
 0x6b0   : > { %14533 = vmatpush1.bf16.msra.mxu1 %v21118_v25  ;;  %v21196_v25 = vld [vmem:[%s21987_s4 + $0x1a70] ss:$8 sps:$4 sm:$0xff]  }
 0x6b1   : > { %15845 = vmatpush1.bf16.msra.mxu0 %v21121_v30  ;;  %14534 = vmatprep.subr.bf16.mxu1 %v21126_v51  ;;  %v21199_v30 = vld [vmem:[%s21987_s4 + $0x3a70] ss:$8 sps:$4 sm:$0xff]   ;;  %v21204_v51 = vld [vmem:[%s21987_s4 + $0x1a84] ss:$8 sps:$4 sm:$0xff]  }
 0x6b2   : > { %15846 = vmatprep.subr.bf16.mxu0 %v21129_v17  ;;  %v21207_v17 = vld [vmem:[%s21987_s4 + $0x3a84] ss:$8 sps:$4 sm:$0xff]  }
 0x6b4   : > { %14535 = vmatpush1.bf16.msra.mxu1 %v21124_v18  ;;  %v21202_v18 = vld [vmem:[%s21987_s4 + $0x1a80] ss:$8 sps:$4 sm:$0xff]  }
 0x6b5   : > { %15847 = vmatpush1.bf16.msra.mxu0 %v21127_v54  ;;  %14536 = vmatprep.subr.bf16.mxu1 %v21132_v16  ;;  %v21205_v54 = vld [vmem:[%s21987_s4 + $0x3a80] ss:$8 sps:$4 sm:$0xff]   ;;  %v21210_v16 = vld [vmem:[%s21987_s4 + $0x1a94] ss:$8 sps:$4 sm:$0xff]  }
 0x6b6   : > { %15848 = vmatprep.subr.bf16.mxu0 %v21135_v56  ;;  %v21213_v56 = vld [vmem:[%s21987_s4 + $0x3a94] ss:$8 sps:$4 sm:$0xff]  }
 0x6b8   : > { %14537 = vmatpush1.bf16.msra.mxu1 %v21130_v33  ;;  %v21208_v33 = vld [vmem:[%s21987_s4 + $0x1a90] ss:$8 sps:$4 sm:$0xff]  }
 0x6b9   : > { %15849 = vmatpush1.bf16.msra.mxu0 %v21133_v3  ;;  %14538 = vmatprep.subr.bf16.mxu1 %v21138_v58  ;;  %v21211_v3 = vld [vmem:[%s21987_s4 + $0x3a90] ss:$8 sps:$4 sm:$0xff]   ;;  %v21216_v58 = vld [vmem:[%s21987_s4 + $0x1aa4] ss:$8 sps:$4 sm:$0xff]  }
 0x6ba   : > { %15850 = vmatprep.subr.bf16.mxu0 %v21141_v4  ;;  %v21219_v4 = vld [vmem:[%s21987_s4 + $0x3aa4] ss:$8 sps:$4 sm:$0xff]  }
 0x6bc   : > { %14539 = vmatpush1.bf16.msra.mxu1 %v21136_v0  ;;  %v21214_v0 = vld [vmem:[%s21987_s4 + $0x1aa0] ss:$8 sps:$4 sm:$0xff]  }
 0x6bd   : > { %15851 = vmatpush1.bf16.msra.mxu0 %v21139_v6  ;;  %14540 = vmatprep.subr.bf16.mxu1 %v21144_v19  ;;  %v21217_v6 = vld [vmem:[%s21987_s4 + $0x3aa0] ss:$8 sps:$4 sm:$0xff]   ;;  %v21222_v19 = vld [vmem:[%s21987_s4 + $0x1ab4] ss:$8 sps:$4 sm:$0xff]  }
 0x6be   : > { %15852 = vmatprep.subr.bf16.mxu0 %v21147_v20  ;;  %v21225_v20 = vld [vmem:[%s21987_s4 + $0x3ab4] ss:$8 sps:$4 sm:$0xff]  }
 0x6c0   : > { %14541 = vmatpush1.bf16.msra.mxu1 %v21142_v40  ;;  %v21228_v40 = vld [vmem:[%s21987_s4 + $0x1ac4] ss:$8 sps:$4 sm:$0xff]  }
 0x6c1   : > { %15853 = vmatpush1.bf16.msra.mxu0 %v21145_v39  ;;  %14542 = vmatprep.subr.bf16.mxu1 %v21150_v7  ;;  %v21231_v39 = vld [vmem:[%s21987_s4 + $0x3ac4] ss:$8 sps:$4 sm:$0xff]   ;;  %v21226_v7 = vld [vmem:[%s21987_s4 + $0x1ac0] ss:$8 sps:$4 sm:$0xff]  }
 0x6c2   : > { %15854 = vmatprep.subr.bf16.mxu0 %v21153_v61  ;;  %v21229_v61 = vld [vmem:[%s21987_s4 + $0x3ac0] ss:$8 sps:$4 sm:$0xff]  }
 0x6c4   : > { %14543 = vmatpush1.bf16.msra.mxu1 %v21148_v38  ;;  %v21234_v38 = vld [vmem:[%s21987_s4 + $0x1ad4] ss:$8 sps:$4 sm:$0xff]  }
 0x6c5   : > { %15855 = vmatpush1.bf16.msra.mxu0 %v21151_v52  ;;  %14553 = vmatprep.subr.bf16.mxu1 %v21156_v5  ;;  %v21237_v52 = vld [vmem:[%s21987_s4 + $0x3ad4] ss:$8 sps:$4 sm:$0xff]   ;;  %v21232_v5 = vld [vmem:[%s21987_s4 + $0x1ad0] ss:$8 sps:$4 sm:$0xff]  }
 0x6c6   : > { %15865 = vmatprep.subr.bf16.mxu0 %v21159_v2  ;;  %v21235_v2 = vld [vmem:[%s21987_s4 + $0x3ad0] ss:$8 sps:$4 sm:$0xff]  }
 0x6c7   : > { %14545 = vmatmul.mubr.bf16.vlgmr.msra.gmra.mrb[0].mxu1 %v2674_v13  ;;  %v21238_v13 = vld [vmem:[%s21987_s4 + $0x1ae0] ss:$8 sps:$4 sm:$0xff]  }
 0x6c8   : > { %15857 = vmatmul.mubr.bf16.vlgmr.msra.gmra.mrb[0].mxu0 %v3066_v53  ;;  %14554 = vmatpush1.bf16.msra.mxu1 %v21154_v59  ;;  %v21241_v53 = vld [vmem:[%s21987_s4 + $0x3ae0] ss:$8 sps:$4 sm:$0xff]   ;;  %v21246_v59 = vld [vmem:[%s21987_s4 + $0x1af4] ss:$8 sps:$4 sm:$0xff]  }
 0x6c9   : > { %15866 = vmatpush1.bf16.msra.mxu0 %v21157_v57  ;;  %14555 = vmatprep.subr.bf16.mxu1 %v21162_v12  ;;  %v21249_v57 = vld [vmem:[%s21987_s4 + $0x3af4] ss:$8 sps:$4 sm:$0xff]   ;;  %v21244_v12 = vld [vmem:[%s21987_s4 + $0x1af0] ss:$8 sps:$4 sm:$0xff]  }
 0x6ca   : > { %15867 = vmatprep.subr.bf16.mxu0 %v21165_v28  ;;  %14585 = vmatprep.mubr.bf16.mxu1 %v24202_v35  ;;  %v21247_v28 = vld [vmem:[%s21987_s4 + $0x3af0] ss:$8 sps:$4 sm:$0xff]  }
 0x6cb   : > { %15897 = vmatprep.mubr.bf16.mxu0 %v24205_v34 }
 0x6cc   : > { %14556 = vmatpush1.bf16.msra.mxu1 %v21160_v21  ;;  %v21253_v21 = vld [vmem:[%s21987_s4 + $0x1b04] ss:$8 sps:$4 sm:$0xff]  }
 0x6cd   : > { %15868 = vmatpush1.bf16.msra.mxu0 %v21163_v36  ;;  %14557 = vmatprep.subr.bf16.mxu1 %v21168_v22  ;;  %v21257_v36 = vld [vmem:[%s21987_s4 + $0x3b04] ss:$8 sps:$4 sm:$0xff]   ;;  %v24271_v22 = vrot.slane %v24180_v10, %v22061_v50  ;;  %v2677_v10 = vcombine.high %v24202_v35, %v24202_v35 }
 0x6ce   : > { %15869 = vmatprep.subr.bf16.mxu0 %v21171_v43  ;;  %v24275_v43 = vrot.slane %v24183_v23, %v22061_v50  ;;  %v21258_v23 = vld [vmem:[%s21987_s4 + $0x1b10] ss:$8 sps:$4 sm:$0xff]   ;;  %v21266_v35 = vld [vmem:[%s21987_s4 + $0x1b24] ss:$8 sps:$4 sm:$0xff]  }
 0x6d0   : > { %14558 = vmatpush1.bf16.msra.mxu1 %v21166_v29  ;;  %v21251_v29 = vld [vmem:[%s21987_s4 + $0x1b00] ss:$8 sps:$4 sm:$0xff]  }
 0x6d1   : > { %15870 = vmatpush1.bf16.msra.mxu0 %v21169_v31  ;;  %14559 = vmatprep.subr.bf16.mxu1 %v21174_v60  ;;  %v21255_v31 = vld [vmem:[%s21987_s4 + $0x3b00] ss:$8 sps:$4 sm:$0xff]   ;;  %v21260_v60 = vld [vmem:[%s21987_s4 + $0x1b14] ss:$8 sps:$4 sm:$0xff]  }
 0x6d2   : > { %15871 = vmatprep.subr.bf16.mxu0 %v21177_v9  ;;  %v21263_v9 = vld [vmem:[%s21987_s4 + $0x3b14] ss:$8 sps:$4 sm:$0xff]  }
 0x6d4   : > { %14560 = vmatpush1.bf16.msra.mxu1 %v21172_v62  ;;  %v3069_v62 = vcombine.high %v24205_v34, %v24205_v34  ;;  %v21264_v34 = vld [vmem:[%s21987_s4 + $0x1b20] ss:$8 sps:$4 sm:$0xff]  }
 0x6d5   : > { %15872 = vmatpush1.bf16.msra.mxu0 %v21175_v8  ;;  %14561 = vmatprep.subr.bf16.mxu1 %v21180_v27  ;;  %v21261_v8 = vld [vmem:[%s21987_s4 + $0x3b10] ss:$8 sps:$4 sm:$0xff]   ;;  %v21269_v27 = vld [vmem:[%s21987_s4 + $0x3b24] ss:$8 sps:$4 sm:$0xff]  }
 0x6d6   : > { %15873 = vmatprep.subr.bf16.mxu0 %v21183_v15  ;;  %v21267_v15 = vld [vmem:[%s21987_s4 + $0x3b20] ss:$8 sps:$4 sm:$0xff]  }
 0x6d8   : > { %14562 = vmatpush1.bf16.msra.mxu1 %v21178_v11  ;;  %v21272_v11 = vld [vmem:[%s21987_s4 + $0x1b34] ss:$8 sps:$4 sm:$0xff]  }
 0x6d9   : > { %15874 = vmatpush1.bf16.msra.mxu0 %v21181_v46  ;;  %14563 = vmatprep.subr.bf16.mxu1 %v21186_v26  ;;  %v21275_v46 = vld [vmem:[%s21987_s4 + $0x3b34] ss:$8 sps:$4 sm:$0xff]   ;;  %v21270_v26 = vld [vmem:[%s21987_s4 + $0x1b30] ss:$8 sps:$4 sm:$0xff]  }
 0x6da   : > { %15875 = vmatprep.subr.bf16.mxu0 %v21189_v47  ;;  %v21273_v47 = vld [vmem:[%s21987_s4 + $0x3b30] ss:$8 sps:$4 sm:$0xff]  }
 0x6dc   : > { %14564 = vmatpush1.bf16.msra.mxu1 %v21184_v37  ;;  %v21278_v37 = vld [vmem:[%s21987_s4 + $0x1b44] ss:$8 sps:$4 sm:$0xff]  }
 0x6dd   : > { %15876 = vmatpush1.bf16.msra.mxu0 %v21187_v48  ;;  %14565 = vmatprep.subr.bf16.mxu1 %v21192_v32  ;;  %v21281_v48 = vld [vmem:[%s21987_s4 + $0x3b44] ss:$8 sps:$4 sm:$0xff]   ;;  %v21276_v32 = vld [vmem:[%s21987_s4 + $0x1b40] ss:$8 sps:$4 sm:$0xff]  }
 0x6de   : > { %15877 = vmatprep.subr.bf16.mxu0 %v21195_v49  ;;  %v21279_v49 = vld [vmem:[%s21987_s4 + $0x3b40] ss:$8 sps:$4 sm:$0xff]  }
 0x6e0   : > { %14566 = vmatpush1.bf16.msra.mxu1 %v21190_v14  ;;  %v21284_v14 = vld [vmem:[%s21987_s4 + $0x1b54] ss:$8 sps:$4 sm:$0xff]  }
 0x6e1   : > { %15878 = vmatpush1.bf16.msra.mxu0 %v21193_v41  ;;  %14567 = vmatprep.subr.bf16.mxu1 %v21198_v55  ;;  %v21287_v41 = vld [vmem:[%s21987_s4 + $0x3b54] ss:$8 sps:$4 sm:$0xff]   ;;  %v21282_v55 = vld [vmem:[%s21987_s4 + $0x1b50] ss:$8 sps:$4 sm:$0xff]  }
 0x6e2   : > { %15879 = vmatprep.subr.bf16.mxu0 %v21201_v45  ;;  %v21285_v45 = vld [vmem:[%s21987_s4 + $0x3b50] ss:$8 sps:$4 sm:$0xff]  }
 0x6e4   : > { %14568 = vmatpush1.bf16.msra.mxu1 %v21196_v25  ;;  %v21290_v25 = vld [vmem:[%s21987_s4 + $0x1b64] ss:$8 sps:$4 sm:$0xff]  }
 0x6e5   : > { %15880 = vmatpush1.bf16.msra.mxu0 %v21199_v30  ;;  %14569 = vmatprep.subr.bf16.mxu1 %v21204_v51  ;;  %v21293_v30 = vld [vmem:[%s21987_s4 + $0x3b64] ss:$8 sps:$4 sm:$0xff]   ;;  %v21288_v51 = vld [vmem:[%s21987_s4 + $0x1b60] ss:$8 sps:$4 sm:$0xff]  }
 0x6e6   : > { %15881 = vmatprep.subr.bf16.mxu0 %v21207_v17  ;;  %v21291_v17 = vld [vmem:[%s21987_s4 + $0x3b60] ss:$8 sps:$4 sm:$0xff]  }
 0x6e8   : > { %14570 = vmatpush1.bf16.msra.mxu1 %v21202_v18  ;;  %v21296_v18 = vld [vmem:[%s21987_s4 + $0x1b74] ss:$8 sps:$4 sm:$0xff]  }
 0x6e9   : > { %15882 = vmatpush1.bf16.msra.mxu0 %v21205_v54  ;;  %14571 = vmatprep.subr.bf16.mxu1 %v21210_v16  ;;  %v21299_v54 = vld [vmem:[%s21987_s4 + $0x3b74] ss:$8 sps:$4 sm:$0xff]   ;;  %v21294_v16 = vld [vmem:[%s21987_s4 + $0x1b70] ss:$8 sps:$4 sm:$0xff]  }
 0x6ea   : > { %15883 = vmatprep.subr.bf16.mxu0 %v21213_v56  ;;  %v21297_v56 = vld [vmem:[%s21987_s4 + $0x3b70] ss:$8 sps:$4 sm:$0xff]  }
 0x6ec   : > { %14572 = vmatpush1.bf16.msra.mxu1 %v21208_v33  ;;  %v21302_v33 = vld [vmem:[%s21987_s4 + $0x1b84] ss:$8 sps:$4 sm:$0xff]  }
 0x6ed   : > { %15884 = vmatpush1.bf16.msra.mxu0 %v21211_v3  ;;  %14573 = vmatprep.subr.bf16.mxu1 %v21216_v58  ;;  %v21305_v3 = vld [vmem:[%s21987_s4 + $0x3b84] ss:$8 sps:$4 sm:$0xff]   ;;  %v21300_v58 = vld [vmem:[%s21987_s4 + $0x1b80] ss:$8 sps:$4 sm:$0xff]  }
 0x6ee   : > { %15885 = vmatprep.subr.bf16.mxu0 %v21219_v4  ;;  %v21303_v4 = vld [vmem:[%s21987_s4 + $0x3b80] ss:$8 sps:$4 sm:$0xff]  }
 0x6f0   : > { %14574 = vmatpush1.bf16.msra.mxu1 %v21214_v0  ;;  %v21308_v0 = vld [vmem:[%s21987_s4 + $0x1b94] ss:$8 sps:$4 sm:$0xff]  }
 0x6f1   : > { %15886 = vmatpush1.bf16.msra.mxu0 %v21217_v6  ;;  %14575 = vmatprep.subr.bf16.mxu1 %v21222_v19  ;;  %v21311_v6 = vld [vmem:[%s21987_s4 + $0x3b94] ss:$8 sps:$4 sm:$0xff]   ;;  %v21306_v19 = vld [vmem:[%s21987_s4 + $0x1b90] ss:$8 sps:$4 sm:$0xff]  }
 0x6f2   : > { %15887 = vmatprep.subr.bf16.mxu0 %v21225_v20  ;;  %v21309_v20 = vld [vmem:[%s21987_s4 + $0x3b90] ss:$8 sps:$4 sm:$0xff]  }
 0x6f4   : > { %14576 = vmatpush1.bf16.msra.mxu1 %v21220_v1  ;;  %v21314_v1 = vld [vmem:[%s21987_s4 + $0x1ba4] ss:$8 sps:$4 sm:$0xff]  }
 0x6f5   : > { %15888 = vmatpush1.bf16.msra.mxu0 %v21223_v42  ;;  %14577 = vmatprep.subr.bf16.mxu1 %v21228_v40  ;;  %v21317_v42 = vld [vmem:[%s21987_s4 + $0x3ba4] ss:$8 sps:$4 sm:$0xff]   ;;  %v21312_v40 = vld [vmem:[%s21987_s4 + $0x1ba0] ss:$8 sps:$4 sm:$0xff]  }
 0x6f6   : > { %15889 = vmatprep.subr.bf16.mxu0 %v21231_v39  ;;  %v21315_v39 = vld [vmem:[%s21987_s4 + $0x3ba0] ss:$8 sps:$4 sm:$0xff]  }
 0x6f8   : > { %14578 = vmatpush1.bf16.msra.mxu1 %v21226_v7  ;;  %v21320_v7 = vld [vmem:[%s21987_s4 + $0x1bb4] ss:$8 sps:$4 sm:$0xff]  }
 0x6f9   : > { %15890 = vmatpush1.bf16.msra.mxu0 %v21229_v61  ;;  %14579 = vmatprep.subr.bf16.mxu1 %v21234_v38  ;;  %v21323_v61 = vld [vmem:[%s21987_s4 + $0x3bb4] ss:$8 sps:$4 sm:$0xff]   ;;  %v21318_v38 = vld [vmem:[%s21987_s4 + $0x1bb0] ss:$8 sps:$4 sm:$0xff]  }
 0x6fa   : > { %15891 = vmatprep.subr.bf16.mxu0 %v21237_v52  ;;  %v21321_v52 = vld [vmem:[%s21987_s4 + $0x3bb0] ss:$8 sps:$4 sm:$0xff]  }
 0x6fc   : > { %14580 = vmatpush1.bf16.msra.mxu1 %v21232_v5  ;;  %v21326_v5 = vld [vmem:[%s21987_s4 + $0x1bc4] ss:$8 sps:$4 sm:$0xff]  }
 0x6fd   : > { %15892 = vmatpush1.bf16.msra.mxu0 %v21235_v2  ;;  %14581 = vmatprep.subr.bf16.mxu1 %v21240_v63  ;;  %v21329_v2 = vld [vmem:[%s21987_s4 + $0x3bc4] ss:$8 sps:$4 sm:$0xff]   ;;  %v21324_v63 = vld [vmem:[%s21987_s4 + $0x1bc0] ss:$8 sps:$4 sm:$0xff]  }
 0x6fe   : > { %15893 = vmatprep.subr.bf16.mxu0 %v21243_v24  ;;  %v21327_v24 = vld [vmem:[%s21987_s4 + $0x3bc0] ss:$8 sps:$4 sm:$0xff]  }
 0x700   : > { %14582 = vmatpush1.bf16.msra.mxu1 %v21238_v13  ;;  %v21332_v13 = vld [vmem:[%s21987_s4 + $0x1bd4] ss:$8 sps:$4 sm:$0xff]  }
 0x701   : > { %15894 = vmatpush1.bf16.msra.mxu0 %v21241_v53  ;;  %14583 = vmatprep.subr.bf16.mxu1 %v21246_v59  ;;  %v21335_v53 = vld [vmem:[%s21987_s4 + $0x3bd4] ss:$8 sps:$4 sm:$0xff]   ;;  %v21330_v59 = vld [vmem:[%s21987_s4 + $0x1bd0] ss:$8 sps:$4 sm:$0xff]  }
 0x702   : > { %15895 = vmatprep.subr.bf16.mxu0 %v21249_v57  ;;  %v21333_v57 = vld [vmem:[%s21987_s4 + $0x3bd0] ss:$8 sps:$4 sm:$0xff]  }
 0x704   : > { %14584 = vmatpush1.bf16.msra.mxu1 %v21244_v12  ;;  %v21338_v12 = vld [vmem:[%s21987_s4 + $0x1be4] ss:$8 sps:$4 sm:$0xff]  }
 0x705   : > { %15896 = vmatpush1.bf16.msra.mxu0 %v21247_v28  ;;  %14594 = vmatprep.subr.bf16.mxu1 %v21253_v21  ;;  %v21341_v28 = vld [vmem:[%s21987_s4 + $0x3be4] ss:$8 sps:$4 sm:$0xff]   ;;  %v24340_v21 = vld [vmem:[%s22000_s6 + $0x38] sm:$0xff] }
 0x706   : > { %15906 = vmatprep.subr.bf16.mxu0 %v21257_v36  ;;  %v24343_v36 = vld [vmem:[%s22000_s6 + $0x78] sm:$0xff] }
 0x707   : > { %14586 = vmatmul.mubr.bf16.vlgmr.msra.gmra.mrb[0].mxu1 %v24271_v22 }
 0x708   : > { %15898 = vmatmul.mubr.bf16.vlgmr.msra.gmra.mrb[0].mxu0 %v24275_v43  ;;  %14595 = vmatpush1.bf16.msra.mxu1 %v21251_v29  ;;  %v21336_v29 = vld [vmem:[%s21987_s4 + $0x1be0] ss:$8 sps:$4 sm:$0xff]  }
 0x709   : > { %15907 = vmatpush1.bf16.msra.mxu0 %v21255_v31  ;;  %14596 = vmatprep.subr.bf16.mxu1 %v21260_v60  ;;  %v21339_v31 = vld [vmem:[%s21987_s4 + $0x3be0] ss:$8 sps:$4 sm:$0xff]   ;;  %v21344_v60 = vld [vmem:[%s21987_s4 + $0x1bf4] ss:$8 sps:$4 sm:$0xff]  }
 0x70a   : > { %15908 = vmatprep.subr.bf16.mxu0 %v21263_v9  ;;  %14626 = vmatprep.mubr.bf16.mxu1 %v2677_v10  ;;  %v21347_v9 = vld [vmem:[%s21987_s4 + $0x3bf4] ss:$8 sps:$4 sm:$0xff]   ;;  %v24351_v10 = vrot.slane %v24340_v21, %v22061_v50 }
 0x70b   : > { %15938 = vmatprep.mubr.bf16.mxu0 %v3069_v62  ;;  %v24355_v62 = vrot.slane %v24343_v36, %v22061_v50 }
 0x70c   : > { %14597 = vmatpush1.bf16.msra.mxu1 %v21258_v23  ;;  %v21342_v23 = vld [vmem:[%s21987_s4 + $0x1bf0] ss:$8 sps:$4 sm:$0xff]  }
 0x70d   : > { %15909 = vmatpush1.bf16.msra.mxu0 %v21261_v8  ;;  %14598 = vmatprep.subr.bf16.mxu1 %v21266_v35  ;;  %v21345_v8 = vld [vmem:[%s21987_s4 + $0x3bf0] ss:$8 sps:$4 sm:$0xff]   ;;  %v21350_v35 = vld [vmem:[%s21987_s4 + $0x1c04] ss:$8 sps:$4 sm:$0xff]  }
 0x70e   : > { %15910 = vmatprep.subr.bf16.mxu0 %v21269_v27  ;;  %v21353_v27 = vld [vmem:[%s21987_s4 + $0x3c04] ss:$8 sps:$4 sm:$0xff]  }
 0x710   : > { %14599 = vmatpush1.bf16.msra.mxu1 %v21264_v34  ;;  %v2693_v34 = vcombine.high %v24351_v10, %v24351_v10 }
 0x711   : > { %15911 = vmatpush1.bf16.msra.mxu0 %v21267_v15  ;;  %14600 = vmatprep.subr.bf16.mxu1 %v21272_v11  ;;  %v3085_v15 = vcombine.high %v24355_v62, %v24355_v62  ;;  %v2675_v11 = vcombine.high %v24271_v22, %v24271_v22 }
 0x712   : > { %15912 = vmatprep.subr.bf16.mxu0 %v21275_v46  ;;  %v3067_v46 = vcombine.high %v24275_v43, %v24275_v43  ;;  %v21354_v43 = vld [vmem:[%s21987_s4 + $0x1c10] ss:$8 sps:$4 sm:$0xff]  }
 0x713   : > { %v24377_v22 = vrot.slane %v3085_v15, %v22061_v50  ;;  %v21429_v15 = vld [vmem:[%s21987_s4 + $0x3cd0] ss:$8 sps:$4 sm:$0xff]  }
 0x714   : > { %14601 = vmatpush1.bf16.msra.mxu1 %v21270_v26  ;;  %v21348_v26 = vld [vmem:[%s21987_s4 + $0x1c00] ss:$8 sps:$4 sm:$0xff]  }
 0x715   : > { %15913 = vmatpush1.bf16.msra.mxu0 %v21273_v47  ;;  %14602 = vmatprep.subr.bf16.mxu1 %v21278_v37  ;;  %v21351_v47 = vld [vmem:[%s21987_s4 + $0x3c00] ss:$8 sps:$4 sm:$0xff]   ;;  %v21356_v37 = vld [vmem:[%s21987_s4 + $0x1c14] ss:$8 sps:$4 sm:$0xff]  }
 0x716   : > { %15914 = vmatprep.subr.bf16.mxu0 %v21281_v48  ;;  %v21359_v48 = vld [vmem:[%s21987_s4 + $0x3c14] ss:$8 sps:$4 sm:$0xff]  }
 0x718   : > { %14603 = vmatpush1.bf16.msra.mxu1 %v21276_v32  ;;  %v24374_v32 = vrot.slane %v2693_v34, %v22061_v50  ;;  %v21426_v34 = vld [vmem:[%s21987_s4 + $0x1cd0] ss:$8 sps:$4 sm:$0xff]  }
 0x719   : > { %15915 = vmatpush1.bf16.msra.mxu0 %v21279_v49  ;;  %14604 = vmatprep.subr.bf16.mxu1 %v21284_v14  ;;  %v21357_v49 = vld [vmem:[%s21987_s4 + $0x3c10] ss:$8 sps:$4 sm:$0xff]   ;;  %v21362_v14 = vld [vmem:[%s21987_s4 + $0x1c24] ss:$8 sps:$4 sm:$0xff]  }
 0x71a   : > { %15916 = vmatprep.subr.bf16.mxu0 %v21287_v41  ;;  %v21365_v41 = vld [vmem:[%s21987_s4 + $0x3c24] ss:$8 sps:$4 sm:$0xff]  }
 0x71c   : > { %14605 = vmatpush1.bf16.msra.mxu1 %v21282_v55  ;;  %v21360_v55 = vld [vmem:[%s21987_s4 + $0x1c20] ss:$8 sps:$4 sm:$0xff]  }
 0x71d   : > { %15917 = vmatpush1.bf16.msra.mxu0 %v21285_v45  ;;  %14606 = vmatprep.subr.bf16.mxu1 %v21290_v25  ;;  %v21363_v45 = vld [vmem:[%s21987_s4 + $0x3c20] ss:$8 sps:$4 sm:$0xff]   ;;  %v21368_v25 = vld [vmem:[%s21987_s4 + $0x1c34] ss:$8 sps:$4 sm:$0xff]  }
 0x71e   : > { %15918 = vmatprep.subr.bf16.mxu0 %v21293_v30  ;;  %v21371_v30 = vld [vmem:[%s21987_s4 + $0x3c34] ss:$8 sps:$4 sm:$0xff]  }
 0x720   : > { %14607 = vmatpush1.bf16.msra.mxu1 %v21288_v51  ;;  %v21366_v51 = vld [vmem:[%s21987_s4 + $0x1c30] ss:$8 sps:$4 sm:$0xff]  }
 0x721   : > { %15919 = vmatpush1.bf16.msra.mxu0 %v21291_v17  ;;  %14608 = vmatprep.subr.bf16.mxu1 %v21296_v18  ;;  %v21369_v17 = vld [vmem:[%s21987_s4 + $0x3c30] ss:$8 sps:$4 sm:$0xff]   ;;  %v21374_v18 = vld [vmem:[%s21987_s4 + $0x1c44] ss:$8 sps:$4 sm:$0xff]  }
 0x722   : > { %15920 = vmatprep.subr.bf16.mxu0 %v21299_v54  ;;  %v21377_v54 = vld [vmem:[%s21987_s4 + $0x3c44] ss:$8 sps:$4 sm:$0xff]  }
 0x724   : > { %14609 = vmatpush1.bf16.msra.mxu1 %v21294_v16  ;;  %v21372_v16 = vld [vmem:[%s21987_s4 + $0x1c40] ss:$8 sps:$4 sm:$0xff]  }
 0x725   : > { %15921 = vmatpush1.bf16.msra.mxu0 %v21297_v56  ;;  %14610 = vmatprep.subr.bf16.mxu1 %v21302_v33  ;;  %v21375_v56 = vld [vmem:[%s21987_s4 + $0x3c40] ss:$8 sps:$4 sm:$0xff]   ;;  %v21380_v33 = vld [vmem:[%s21987_s4 + $0x1c54] ss:$8 sps:$4 sm:$0xff]  }
 0x726   : > { %15922 = vmatprep.subr.bf16.mxu0 %v21305_v3  ;;  %v21383_v3 = vld [vmem:[%s21987_s4 + $0x3c54] ss:$8 sps:$4 sm:$0xff]  }
 0x728   : > { %14611 = vmatpush1.bf16.msra.mxu1 %v21300_v58  ;;  %v21378_v58 = vld [vmem:[%s21987_s4 + $0x1c50] ss:$8 sps:$4 sm:$0xff]  }
 0x729   : > { %15923 = vmatpush1.bf16.msra.mxu0 %v21303_v4  ;;  %14612 = vmatprep.subr.bf16.mxu1 %v21308_v0  ;;  %v21381_v4 = vld [vmem:[%s21987_s4 + $0x3c50] ss:$8 sps:$4 sm:$0xff]   ;;  %v21386_v0 = vld [vmem:[%s21987_s4 + $0x1c64] ss:$8 sps:$4 sm:$0xff]  }
 0x72a   : > { %15924 = vmatprep.subr.bf16.mxu0 %v21311_v6  ;;  %v21389_v6 = vld [vmem:[%s21987_s4 + $0x3c64] ss:$8 sps:$4 sm:$0xff]  }
 0x72c   : > { %14613 = vmatpush1.bf16.msra.mxu1 %v21306_v19  ;;  %v21384_v19 = vld [vmem:[%s21987_s4 + $0x1c60] ss:$8 sps:$4 sm:$0xff]  }
 0x72d   : > { %15925 = vmatpush1.bf16.msra.mxu0 %v21309_v20  ;;  %14614 = vmatprep.subr.bf16.mxu1 %v21314_v1  ;;  %v21387_v20 = vld [vmem:[%s21987_s4 + $0x3c60] ss:$8 sps:$4 sm:$0xff]   ;;  %v21392_v1 = vld [vmem:[%s21987_s4 + $0x1c74] ss:$8 sps:$4 sm:$0xff]  }
 0x72e   : > { %15926 = vmatprep.subr.bf16.mxu0 %v21317_v42  ;;  %v21395_v42 = vld [vmem:[%s21987_s4 + $0x3c74] ss:$8 sps:$4 sm:$0xff]  }
 0x730   : > { %14615 = vmatpush1.bf16.msra.mxu1 %v21312_v40  ;;  %v21390_v40 = vld [vmem:[%s21987_s4 + $0x1c70] ss:$8 sps:$4 sm:$0xff]  }
 0x731   : > { %15927 = vmatpush1.bf16.msra.mxu0 %v21315_v39  ;;  %14616 = vmatprep.subr.bf16.mxu1 %v21320_v7  ;;  %v21393_v39 = vld [vmem:[%s21987_s4 + $0x3c70] ss:$8 sps:$4 sm:$0xff]   ;;  %v21398_v7 = vld [vmem:[%s21987_s4 + $0x1c84] ss:$8 sps:$4 sm:$0xff]  }
 0x732   : > { %15928 = vmatprep.subr.bf16.mxu0 %v21323_v61  ;;  %v21401_v61 = vld [vmem:[%s21987_s4 + $0x3c84] ss:$8 sps:$4 sm:$0xff]  }
 0x734   : > { %14617 = vmatpush1.bf16.msra.mxu1 %v21318_v38  ;;  %v21396_v38 = vld [vmem:[%s21987_s4 + $0x1c80] ss:$8 sps:$4 sm:$0xff]  }
 0x735   : > { %15929 = vmatpush1.bf16.msra.mxu0 %v21321_v52  ;;  %14618 = vmatprep.subr.bf16.mxu1 %v21326_v5  ;;  %v21399_v52 = vld [vmem:[%s21987_s4 + $0x3c80] ss:$8 sps:$4 sm:$0xff]   ;;  %v21404_v5 = vld [vmem:[%s21987_s4 + $0x1c94] ss:$8 sps:$4 sm:$0xff]  }
 0x736   : > { %15930 = vmatprep.subr.bf16.mxu0 %v21329_v2  ;;  %v21407_v2 = vld [vmem:[%s21987_s4 + $0x3c94] ss:$8 sps:$4 sm:$0xff]  }
 0x738   : > { %14619 = vmatpush1.bf16.msra.mxu1 %v21324_v63  ;;  %v21402_v63 = vld [vmem:[%s21987_s4 + $0x1c90] ss:$8 sps:$4 sm:$0xff]  }
 0x739   : > { %15931 = vmatpush1.bf16.msra.mxu0 %v21327_v24  ;;  %14620 = vmatprep.subr.bf16.mxu1 %v21332_v13  ;;  %v21405_v24 = vld [vmem:[%s21987_s4 + $0x3c90] ss:$8 sps:$4 sm:$0xff]   ;;  %v21410_v13 = vld [vmem:[%s21987_s4 + $0x1ca4] ss:$8 sps:$4 sm:$0xff]  }
 0x73a   : > { %15932 = vmatprep.subr.bf16.mxu0 %v21335_v53  ;;  %v21413_v53 = vld [vmem:[%s21987_s4 + $0x3ca4] ss:$8 sps:$4 sm:$0xff]  }
 0x73c   : > { %14621 = vmatpush1.bf16.msra.mxu1 %v21330_v59  ;;  %v21408_v59 = vld [vmem:[%s21987_s4 + $0x1ca0] ss:$8 sps:$4 sm:$0xff]  }
 0x73d   : > { %15933 = vmatpush1.bf16.msra.mxu0 %v21333_v57  ;;  %14622 = vmatprep.subr.bf16.mxu1 %v21338_v12  ;;  %v21411_v57 = vld [vmem:[%s21987_s4 + $0x3ca0] ss:$8 sps:$4 sm:$0xff]   ;;  %v21416_v12 = vld [vmem:[%s21987_s4 + $0x1cb4] ss:$8 sps:$4 sm:$0xff]  }
 0x73e   : > { %15934 = vmatprep.subr.bf16.mxu0 %v21341_v28  ;;  %v21419_v28 = vld [vmem:[%s21987_s4 + $0x3cb4] ss:$8 sps:$4 sm:$0xff]  }
 0x740   : > { %14623 = vmatpush1.bf16.msra.mxu1 %v21336_v29  ;;  %v21414_v29 = vld [vmem:[%s21987_s4 + $0x1cb0] ss:$8 sps:$4 sm:$0xff]  }
 0x741   : > { %15935 = vmatpush1.bf16.msra.mxu0 %v21339_v31  ;;  %14624 = vmatprep.subr.bf16.mxu1 %v21344_v60  ;;  %v21417_v31 = vld [vmem:[%s21987_s4 + $0x3cb0] ss:$8 sps:$4 sm:$0xff]   ;;  %v21422_v60 = vld [vmem:[%s21987_s4 + $0x1cc4] ss:$8 sps:$4 sm:$0xff]  }
 0x742   : > { %15936 = vmatprep.subr.bf16.mxu0 %v21347_v9  ;;  %v21425_v9 = vld [vmem:[%s21987_s4 + $0x3cc4] ss:$8 sps:$4 sm:$0xff]  }
 0x744   : > { %14625 = vmatpush1.bf16.msra.mxu1 %v21342_v23  ;;  %v21420_v23 = vld [vmem:[%s21987_s4 + $0x1cc0] ss:$8 sps:$4 sm:$0xff]  }
 0x745   : > { %15937 = vmatpush1.bf16.msra.mxu0 %v21345_v8  ;;  %14635 = vmatprep.subr.bf16.mxu1 %v21350_v35  ;;  %v21423_v8 = vld [vmem:[%s21987_s4 + $0x3cc0] ss:$8 sps:$4 sm:$0xff]   ;;  %v21428_v35 = vld [vmem:[%s21987_s4 + $0x1cd4] ss:$8 sps:$4 sm:$0xff]  }
 0x746   : > { %15947 = vmatprep.subr.bf16.mxu0 %v21353_v27  ;;  %v21431_v27 = vld [vmem:[%s21987_s4 + $0x3cd4] ss:$8 sps:$4 sm:$0xff]  }
 0x747   : > { %14627 = vmatmul.mubr.bf16.vlgmr.msra.gmra.mrb[0].mxu1 %v2675_v11  ;;  %v21434_v11 = vld [vmem:[%s21987_s4 + $0x1ce4] ss:$8 sps:$4 sm:$0xff]  }
 0x748   : > { %15939 = vmatmul.mubr.bf16.vlgmr.msra.gmra.mrb[0].mxu0 %v3067_v46  ;;  %14636 = vmatpush1.bf16.msra.mxu1 %v21348_v26  ;;  %v21437_v46 = vld [vmem:[%s21987_s4 + $0x3ce4] ss:$8 sps:$4 sm:$0xff]   ;;  %v21432_v26 = vld [vmem:[%s21987_s4 + $0x1ce0] ss:$8 sps:$4 sm:$0xff]  }
 0x749   : > { %15948 = vmatpush1.bf16.msra.mxu0 %v21351_v47  ;;  %14637 = vmatprep.subr.bf16.mxu1 %v21356_v37  ;;  %v21435_v47 = vld [vmem:[%s21987_s4 + $0x3ce0] ss:$8 sps:$4 sm:$0xff]   ;;  %v21440_v37 = vld [vmem:[%s21987_s4 + $0x1cf4] ss:$8 sps:$4 sm:$0xff]  }
 0x74a   : > { %15949 = vmatprep.subr.bf16.mxu0 %v21359_v48  ;;  %14667 = vmatprep.mubr.bf16.mxu1 %v24374_v32  ;;  %v21443_v48 = vld [vmem:[%s21987_s4 + $0x3cf4] ss:$8 sps:$4 sm:$0xff]  }
 0x74b   : > { %15979 = vmatprep.mubr.bf16.mxu0 %v24377_v22 }
 0x74c   : > { %14638 = vmatpush1.bf16.msra.mxu1 %v21354_v43  ;;  %v21438_v43 = vld [vmem:[%s21987_s4 + $0x1cf0] ss:$8 sps:$4 sm:$0xff]  }
 0x74d   : > { %15950 = vmatpush1.bf16.msra.mxu0 %v21357_v49  ;;  %14639 = vmatprep.subr.bf16.mxu1 %v21362_v14  ;;  %v21441_v49 = vld [vmem:[%s21987_s4 + $0x3cf0] ss:$8 sps:$4 sm:$0xff]   ;;  %v21446_v14 = vld [vmem:[%s21987_s4 + $0x1d04] ss:$8 sps:$4 sm:$0xff]  }
 0x74e   : > { %15951 = vmatprep.subr.bf16.mxu0 %v21365_v41  ;;  %v21449_v41 = vld [vmem:[%s21987_s4 + $0x3d04] ss:$8 sps:$4 sm:$0xff]  }
 0x750   : > { %14640 = vmatpush1.bf16.msra.mxu1 %v21360_v55  ;;  %v24443_v55 = vrot.slane %v24351_v10, %v22061_v50  ;;  %v2725_v10 = vcombine.high %v24374_v32, %v24374_v32  ;;  %v21458_v32 = vld [vmem:[%s21987_s4 + $0x1d24] ss:$8 sps:$4 sm:$0xff]  }
 0x751   : > { %15952 = vmatpush1.bf16.msra.mxu0 %v21363_v45  ;;  %14641 = vmatprep.subr.bf16.mxu1 %v21368_v25  ;;  %v24447_v45 = vrot.slane %v24355_v62, %v22061_v50  ;;  %v21444_v25 = vld [vmem:[%s21987_s4 + $0x1d00] ss:$8 sps:$4 sm:$0xff]   ;;  %v21450_v62 = vld [vmem:[%s21987_s4 + $0x1d10] ss:$8 sps:$4 sm:$0xff]  }
 0x752   : > { %15953 = vmatprep.subr.bf16.mxu0 %v21371_v30  ;;  %v21447_v30 = vld [vmem:[%s21987_s4 + $0x3d00] ss:$8 sps:$4 sm:$0xff]  }
 0x754   : > { %14642 = vmatpush1.bf16.msra.mxu1 %v21366_v51  ;;  %v21452_v51 = vld [vmem:[%s21987_s4 + $0x1d14] ss:$8 sps:$4 sm:$0xff]  }
 0x755   : > { %15954 = vmatpush1.bf16.msra.mxu0 %v21369_v17  ;;  %14643 = vmatprep.subr.bf16.mxu1 %v21374_v18  ;;  %v21455_v17 = vld [vmem:[%s21987_s4 + $0x3d14] ss:$8 sps:$4 sm:$0xff]   ;;  %v3117_v18 = vcombine.high %v24377_v22, %v24377_v22  ;;  %v21456_v22 = vld [vmem:[%s21987_s4 + $0x1d20] ss:$8 sps:$4 sm:$0xff]  }
 0x756   : > { %15955 = vmatprep.subr.bf16.mxu0 %v21377_v54  ;;  %v21453_v54 = vld [vmem:[%s21987_s4 + $0x3d10] ss:$8 sps:$4 sm:$0xff]  }
 0x758   : > { %14644 = vmatpush1.bf16.msra.mxu1 %v21372_v16  ;;  %v21461_v16 = vld [vmem:[%s21987_s4 + $0x3d24] ss:$8 sps:$4 sm:$0xff]  }
 0x759   : > { %15956 = vmatpush1.bf16.msra.mxu0 %v21375_v56  ;;  %14645 = vmatprep.subr.bf16.mxu1 %v21380_v33  ;;  %v21459_v56 = vld [vmem:[%s21987_s4 + $0x3d20] ss:$8 sps:$4 sm:$0xff]   ;;  %v21464_v33 = vld [vmem:[%s21987_s4 + $0x1d34] ss:$8 sps:$4 sm:$0xff]  }
 0x75a   : > { %15957 = vmatprep.subr.bf16.mxu0 %v21383_v3  ;;  %v21467_v3 = vld [vmem:[%s21987_s4 + $0x3d34] ss:$8 sps:$4 sm:$0xff]  }
 0x75c   : > { %14646 = vmatpush1.bf16.msra.mxu1 %v21378_v58  ;;  %v21462_v58 = vld [vmem:[%s21987_s4 + $0x1d30] ss:$8 sps:$4 sm:$0xff]  }
 0x75d   : > { %15958 = vmatpush1.bf16.msra.mxu0 %v21381_v4  ;;  %14647 = vmatprep.subr.bf16.mxu1 %v21386_v0  ;;  %v21465_v4 = vld [vmem:[%s21987_s4 + $0x3d30] ss:$8 sps:$4 sm:$0xff]   ;;  %v21470_v0 = vld [vmem:[%s21987_s4 + $0x1d44] ss:$8 sps:$4 sm:$0xff]  }
 0x75e   : > { %15959 = vmatprep.subr.bf16.mxu0 %v21389_v6  ;;  %v21473_v6 = vld [vmem:[%s21987_s4 + $0x3d44] ss:$8 sps:$4 sm:$0xff]  }
 0x760   : > { %14648 = vmatpush1.bf16.msra.mxu1 %v21384_v19  ;;  %v21468_v19 = vld [vmem:[%s21987_s4 + $0x1d40] ss:$8 sps:$4 sm:$0xff]  }
 0x761   : > { %15960 = vmatpush1.bf16.msra.mxu0 %v21387_v20  ;;  %14649 = vmatprep.subr.bf16.mxu1 %v21392_v1  ;;  %v21471_v20 = vld [vmem:[%s21987_s4 + $0x3d40] ss:$8 sps:$4 sm:$0xff]   ;;  %v21476_v1 = vld [vmem:[%s21987_s4 + $0x1d54] ss:$8 sps:$4 sm:$0xff]  }
 0x762   : > { %15961 = vmatprep.subr.bf16.mxu0 %v21395_v42  ;;  %v21479_v42 = vld [vmem:[%s21987_s4 + $0x3d54] ss:$8 sps:$4 sm:$0xff]  }
 0x764   : > { %14650 = vmatpush1.bf16.msra.mxu1 %v21390_v40  ;;  %v21474_v40 = vld [vmem:[%s21987_s4 + $0x1d50] ss:$8 sps:$4 sm:$0xff]  }
 0x765   : > { %15962 = vmatpush1.bf16.msra.mxu0 %v21393_v39  ;;  %14651 = vmatprep.subr.bf16.mxu1 %v21398_v7  ;;  %v21477_v39 = vld [vmem:[%s21987_s4 + $0x3d50] ss:$8 sps:$4 sm:$0xff]   ;;  %v21482_v7 = vld [vmem:[%s21987_s4 + $0x1d64] ss:$8 sps:$4 sm:$0xff]  }
 0x766   : > { %15963 = vmatprep.subr.bf16.mxu0 %v21401_v61  ;;  %v21485_v61 = vld [vmem:[%s21987_s4 + $0x3d64] ss:$8 sps:$4 sm:$0xff]  }
 0x768   : > { %14652 = vmatpush1.bf16.msra.mxu1 %v21396_v38  ;;  %v21480_v38 = vld [vmem:[%s21987_s4 + $0x1d60] ss:$8 sps:$4 sm:$0xff]  }
 0x769   : > { %15964 = vmatpush1.bf16.msra.mxu0 %v21399_v52  ;;  %14653 = vmatprep.subr.bf16.mxu1 %v21404_v5  ;;  %v21483_v52 = vld [vmem:[%s21987_s4 + $0x3d60] ss:$8 sps:$4 sm:$0xff]   ;;  %v21488_v5 = vld [vmem:[%s21987_s4 + $0x1d74] ss:$8 sps:$4 sm:$0xff]  }
 0x76a   : > { %15965 = vmatprep.subr.bf16.mxu0 %v21407_v2  ;;  %v21491_v2 = vld [vmem:[%s21987_s4 + $0x3d74] ss:$8 sps:$4 sm:$0xff]  }
 0x76c   : > { %14654 = vmatpush1.bf16.msra.mxu1 %v21402_v63  ;;  %v21486_v63 = vld [vmem:[%s21987_s4 + $0x1d70] ss:$8 sps:$4 sm:$0xff]  }
 0x76d   : > { %15966 = vmatpush1.bf16.msra.mxu0 %v21405_v24  ;;  %14655 = vmatprep.subr.bf16.mxu1 %v21410_v13  ;;  %v21489_v24 = vld [vmem:[%s21987_s4 + $0x3d70] ss:$8 sps:$4 sm:$0xff]   ;;  %v21494_v13 = vld [vmem:[%s21987_s4 + $0x1d84] ss:$8 sps:$4 sm:$0xff]  }
 0x76e   : > { %15967 = vmatprep.subr.bf16.mxu0 %v21413_v53  ;;  %v21497_v53 = vld [vmem:[%s21987_s4 + $0x3d84] ss:$8 sps:$4 sm:$0xff]  }
 0x770   : > { %14656 = vmatpush1.bf16.msra.mxu1 %v21408_v59  ;;  %v21492_v59 = vld [vmem:[%s21987_s4 + $0x1d80] ss:$8 sps:$4 sm:$0xff]  }
 0x771   : > { %15968 = vmatpush1.bf16.msra.mxu0 %v21411_v57  ;;  %14657 = vmatprep.subr.bf16.mxu1 %v21416_v12  ;;  %v21495_v57 = vld [vmem:[%s21987_s4 + $0x3d80] ss:$8 sps:$4 sm:$0xff]   ;;  %v21500_v12 = vld [vmem:[%s21987_s4 + $0x1d94] ss:$8 sps:$4 sm:$0xff]  }
 0x772   : > { %15969 = vmatprep.subr.bf16.mxu0 %v21419_v28  ;;  %v21503_v28 = vld [vmem:[%s21987_s4 + $0x3d94] ss:$8 sps:$4 sm:$0xff]  }
 0x774   : > { %14658 = vmatpush1.bf16.msra.mxu1 %v21414_v29  ;;  %v21498_v29 = vld [vmem:[%s21987_s4 + $0x1d90] ss:$8 sps:$4 sm:$0xff]  }
 0x775   : > { %15970 = vmatpush1.bf16.msra.mxu0 %v21417_v31  ;;  %14659 = vmatprep.subr.bf16.mxu1 %v21422_v60  ;;  %v21501_v31 = vld [vmem:[%s21987_s4 + $0x3d90] ss:$8 sps:$4 sm:$0xff]   ;;  %v21506_v60 = vld [vmem:[%s21987_s4 + $0x1da4] ss:$8 sps:$4 sm:$0xff]  }
 0x776   : > { %15971 = vmatprep.subr.bf16.mxu0 %v21425_v9  ;;  %v21509_v9 = vld [vmem:[%s21987_s4 + $0x3da4] ss:$8 sps:$4 sm:$0xff]  }
 0x778   : > { %14660 = vmatpush1.bf16.msra.mxu1 %v21420_v23  ;;  %v21504_v23 = vld [vmem:[%s21987_s4 + $0x1da0] ss:$8 sps:$4 sm:$0xff]  }
 0x779   : > { %15972 = vmatpush1.bf16.msra.mxu0 %v21423_v8  ;;  %14661 = vmatprep.subr.bf16.mxu1 %v21428_v35  ;;  %v21507_v8 = vld [vmem:[%s21987_s4 + $0x3da0] ss:$8 sps:$4 sm:$0xff]   ;;  %v21512_v35 = vld [vmem:[%s21987_s4 + $0x1db4] ss:$8 sps:$4 sm:$0xff]  }
 0x77a   : > { %15973 = vmatprep.subr.bf16.mxu0 %v21431_v27  ;;  %v21515_v27 = vld [vmem:[%s21987_s4 + $0x3db4] ss:$8 sps:$4 sm:$0xff]  }
 0x77c   : > { %14662 = vmatpush1.bf16.msra.mxu1 %v21426_v34  ;;  %v21510_v34 = vld [vmem:[%s21987_s4 + $0x1db0] ss:$8 sps:$4 sm:$0xff]  }
 0x77d   : > { %15974 = vmatpush1.bf16.msra.mxu0 %v21429_v15  ;;  %14663 = vmatprep.subr.bf16.mxu1 %v21434_v11  ;;  %v21513_v15 = vld [vmem:[%s21987_s4 + $0x3db0] ss:$8 sps:$4 sm:$0xff]   ;;  %v21518_v11 = vld [vmem:[%s21987_s4 + $0x1dc4] ss:$8 sps:$4 sm:$0xff]  }
 0x77e   : > { %15975 = vmatprep.subr.bf16.mxu0 %v21437_v46  ;;  %v21521_v46 = vld [vmem:[%s21987_s4 + $0x3dc4] ss:$8 sps:$4 sm:$0xff]  }
 0x780   : > { %14664 = vmatpush1.bf16.msra.mxu1 %v21432_v26  ;;  %v21516_v26 = vld [vmem:[%s21987_s4 + $0x1dc0] ss:$8 sps:$4 sm:$0xff]  }
 0x781   : > { %15976 = vmatpush1.bf16.msra.mxu0 %v21435_v47  ;;  %14665 = vmatprep.subr.bf16.mxu1 %v21440_v37  ;;  %v21519_v47 = vld [vmem:[%s21987_s4 + $0x3dc0] ss:$8 sps:$4 sm:$0xff]   ;;  %v21524_v37 = vld [vmem:[%s21987_s4 + $0x1dd4] ss:$8 sps:$4 sm:$0xff]  }
 0x782   : > { %15977 = vmatprep.subr.bf16.mxu0 %v21443_v48  ;;  %v21527_v48 = vld [vmem:[%s21987_s4 + $0x3dd4] ss:$8 sps:$4 sm:$0xff]  }
 0x784   : > { %14666 = vmatpush1.bf16.msra.mxu1 %v21438_v43  ;;  %v21522_v43 = vld [vmem:[%s21987_s4 + $0x1dd0] ss:$8 sps:$4 sm:$0xff]  }
 0x785   : > { %15978 = vmatpush1.bf16.msra.mxu0 %v21441_v49  ;;  %14676 = vmatprep.subr.bf16.mxu1 %v21446_v14  ;;  %v21525_v49 = vld [vmem:[%s21987_s4 + $0x3dd0] ss:$8 sps:$4 sm:$0xff]   ;;  %v21530_v14 = vld [vmem:[%s21987_s4 + $0x1de4] ss:$8 sps:$4 sm:$0xff]  }
 0x786   : > { %15988 = vmatprep.subr.bf16.mxu0 %v21449_v41  ;;  %v21533_v41 = vld [vmem:[%s21987_s4 + $0x3de4] ss:$8 sps:$4 sm:$0xff]  }
 0x787   : > { %14668 = vmatmul.mubr.bf16.vlgmr.msra.gmra.mrb[0].mxu1 %v24443_v55 }
 0x788   : > { %15980 = vmatmul.mubr.bf16.vlgmr.msra.gmra.mrb[0].mxu0 %v24447_v45  ;;  %14677 = vmatpush1.bf16.msra.mxu1 %v21444_v25  ;;  %v2678_v25 = vcombine.high %v24340_v21, %v24340_v21  ;;  %v21534_v21 = vld [vmem:[%s21987_s4 + $0x1df0] ss:$8 sps:$4 sm:$0xff]  }
 0x789   : > { %15989 = vmatpush1.bf16.msra.mxu0 %v21447_v30  ;;  %14678 = vmatprep.subr.bf16.mxu1 %v21452_v51  ;;  %v3070_v30 = vcombine.high %v24343_v36, %v24343_v36  ;;  %v21528_v51 = vld [vmem:[%s21987_s4 + $0x1de0] ss:$8 sps:$4 sm:$0xff]   ;;  %v21537_v36 = vld [vmem:[%s21987_s4 + $0x3df0] ss:$8 sps:$4 sm:$0xff]  }
 0x78a   : > { %15990 = vmatprep.subr.bf16.mxu0 %v21455_v17  ;;  %14708 = vmatprep.mubr.bf16.mxu1 %v2725_v10  ;;  %v21531_v17 = vld [vmem:[%s21987_s4 + $0x3de0] ss:$8 sps:$4 sm:$0xff]   ;;  %v21536_v10 = vld [vmem:[%s21987_s4 + $0x1df4] ss:$8 sps:$4 sm:$0xff]  }
 0x78b   : > { %16020 = vmatprep.mubr.bf16.mxu0 %v3117_v18  ;;  %v21539_v18 = vld [vmem:[%s21987_s4 + $0x3df4] ss:$8 sps:$4 sm:$0xff]  }
 0x78c   : > { %14679 = vmatpush1.bf16.msra.mxu1 %v21450_v62  ;;  %v24520_v62 = vrot.slane %v2678_v25, %v22061_v50  ;;  %v21606_v25 = vld [vmem:[%s21987_s4 + $0x1eb0] ss:$8 sps:$4 sm:$0xff]  }
 0x78d   : > { %15991 = vmatpush1.bf16.msra.mxu0 %v21453_v54  ;;  %14680 = vmatprep.subr.bf16.mxu1 %v21458_v32  ;;  %v24523_v54 = vrot.slane %v3070_v30, %v22061_v50  ;;  %v21542_v32 = vld [vmem:[%s21987_s4 + $0x1e04] ss:$8 sps:$4 sm:$0xff]   ;;  %v21609_v30 = vld [vmem:[%s21987_s4 + $0x3eb0] ss:$8 sps:$4 sm:$0xff]  }
 0x78e   : > { %15992 = vmatprep.subr.bf16.mxu0 %v21461_v16  ;;  %v21545_v16 = vld [vmem:[%s21987_s4 + $0x3e04] ss:$8 sps:$4 sm:$0xff]  }
 0x790   : > { %14681 = vmatpush1.bf16.msra.mxu1 %v21456_v22  ;;  %v2694_v22 = vcombine.high %v24520_v62, %v24520_v62 }
 0x791   : > { %15993 = vmatpush1.bf16.msra.mxu0 %v21459_v56  ;;  %14682 = vmatprep.subr.bf16.mxu1 %v21464_v33  ;;  %v3086_v56 = vcombine.high %v24523_v54, %v24523_v54  ;;  %v2723_v33 = vcombine.high %v24443_v55, %v24443_v55 }
 0x792   : > { %15994 = vmatprep.subr.bf16.mxu0 %v21467_v3  ;;  %v3115_v3 = vcombine.high %v24447_v45, %v24447_v45  ;;  %v21546_v45 = vld [vmem:[%s21987_s4 + $0x1e10] ss:$8 sps:$4 sm:$0xff]  }
 0x793   : > { %v24545_v55 = vrot.slane %v3086_v56, %v22061_v50  ;;  %v21629_v56 = vld [vmem:[%s21987_s4 + $0x3ee4] ss:$8 sps:$4 sm:$0xff]  }
 0x794   : > { %14683 = vmatpush1.bf16.msra.mxu1 %v21462_v58  ;;  %v21540_v58 = vld [vmem:[%s21987_s4 + $0x1e00] ss:$8 sps:$4 sm:$0xff]  }
 0x795   : > { %15995 = vmatpush1.bf16.msra.mxu0 %v21465_v4  ;;  %14684 = vmatprep.subr.bf16.mxu1 %v21470_v0  ;;  %v21543_v4 = vld [vmem:[%s21987_s4 + $0x3e00] ss:$8 sps:$4 sm:$0xff]   ;;  %v21548_v0 = vld [vmem:[%s21987_s4 + $0x1e14] ss:$8 sps:$4 sm:$0xff]  }
 0x796   : > { %15996 = vmatprep.subr.bf16.mxu0 %v21473_v6  ;;  %v21551_v6 = vld [vmem:[%s21987_s4 + $0x3e14] ss:$8 sps:$4 sm:$0xff]  }
 0x798   : > { %14685 = vmatpush1.bf16.msra.mxu1 %v21468_v19  ;;  %v24542_v19 = vrot.slane %v2694_v22, %v22061_v50  ;;  %v21626_v22 = vld [vmem:[%s21987_s4 + $0x1ee4] ss:$8 sps:$4 sm:$0xff]  }
 0x799   : > { %15997 = vmatpush1.bf16.msra.mxu0 %v21471_v20  ;;  %14686 = vmatprep.subr.bf16.mxu1 %v21476_v1  ;;  %v21549_v20 = vld [vmem:[%s21987_s4 + $0x3e10] ss:$8 sps:$4 sm:$0xff]   ;;  %v21554_v1 = vld [vmem:[%s21987_s4 + $0x1e24] ss:$8 sps:$4 sm:$0xff]  }
 0x79a   : > { %15998 = vmatprep.subr.bf16.mxu0 %v21479_v42  ;;  %v21557_v42 = vld [vmem:[%s21987_s4 + $0x3e24] ss:$8 sps:$4 sm:$0xff]  }
 0x79c   : > { %14687 = vmatpush1.bf16.msra.mxu1 %v21474_v40  ;;  %v21552_v40 = vld [vmem:[%s21987_s4 + $0x1e20] ss:$8 sps:$4 sm:$0xff]  }
 0x79d   : > { %15999 = vmatpush1.bf16.msra.mxu0 %v21477_v39  ;;  %14688 = vmatprep.subr.bf16.mxu1 %v21482_v7  ;;  %v21555_v39 = vld [vmem:[%s21987_s4 + $0x3e20] ss:$8 sps:$4 sm:$0xff]   ;;  %v21560_v7 = vld [vmem:[%s21987_s4 + $0x1e34] ss:$8 sps:$4 sm:$0xff]  }
 0x79e   : > { %16000 = vmatprep.subr.bf16.mxu0 %v21485_v61  ;;  %v21563_v61 = vld [vmem:[%s21987_s4 + $0x3e34] ss:$8 sps:$4 sm:$0xff]  }
 0x7a0   : > { %14689 = vmatpush1.bf16.msra.mxu1 %v21480_v38  ;;  %v21558_v38 = vld [vmem:[%s21987_s4 + $0x1e30] ss:$8 sps:$4 sm:$0xff]  }
 0x7a1   : > { %16001 = vmatpush1.bf16.msra.mxu0 %v21483_v52  ;;  %14690 = vmatprep.subr.bf16.mxu1 %v21488_v5  ;;  %v21561_v52 = vld [vmem:[%s21987_s4 + $0x3e30] ss:$8 sps:$4 sm:$0xff]   ;;  %v21566_v5 = vld [vmem:[%s21987_s4 + $0x1e44] ss:$8 sps:$4 sm:$0xff]  }
 0x7a2   : > { %16002 = vmatprep.subr.bf16.mxu0 %v21491_v2  ;;  %v21569_v2 = vld [vmem:[%s21987_s4 + $0x3e44] ss:$8 sps:$4 sm:$0xff]  }
 0x7a4   : > { %14691 = vmatpush1.bf16.msra.mxu1 %v21486_v63  ;;  %v21564_v63 = vld [vmem:[%s21987_s4 + $0x1e40] ss:$8 sps:$4 sm:$0xff]  }
 0x7a5   : > { %16003 = vmatpush1.bf16.msra.mxu0 %v21489_v24  ;;  %14692 = vmatprep.subr.bf16.mxu1 %v21494_v13  ;;  %v21567_v24 = vld [vmem:[%s21987_s4 + $0x3e40] ss:$8 sps:$4 sm:$0xff]   ;;  %v21572_v13 = vld [vmem:[%s21987_s4 + $0x1e54] ss:$8 sps:$4 sm:$0xff]  }
 0x7a6   : > { %16004 = vmatprep.subr.bf16.mxu0 %v21497_v53  ;;  %v21575_v53 = vld [vmem:[%s21987_s4 + $0x3e54] ss:$8 sps:$4 sm:$0xff]  }
 0x7a8   : > { %14693 = vmatpush1.bf16.msra.mxu1 %v21492_v59  ;;  %v21570_v59 = vld [vmem:[%s21987_s4 + $0x1e50] ss:$8 sps:$4 sm:$0xff]  }
 0x7a9   : > { %16005 = vmatpush1.bf16.msra.mxu0 %v21495_v57  ;;  %14694 = vmatprep.subr.bf16.mxu1 %v21500_v12  ;;  %v21573_v57 = vld [vmem:[%s21987_s4 + $0x3e50] ss:$8 sps:$4 sm:$0xff]   ;;  %v21578_v12 = vld [vmem:[%s21987_s4 + $0x1e64] ss:$8 sps:$4 sm:$0xff]  }
 0x7aa   : > { %16006 = vmatprep.subr.bf16.mxu0 %v21503_v28  ;;  %v21581_v28 = vld [vmem:[%s21987_s4 + $0x3e64] ss:$8 sps:$4 sm:$0xff]  }
 0x7ac   : > { %14695 = vmatpush1.bf16.msra.mxu1 %v21498_v29  ;;  %v21576_v29 = vld [vmem:[%s21987_s4 + $0x1e60] ss:$8 sps:$4 sm:$0xff]  }
 0x7ad   : > { %16007 = vmatpush1.bf16.msra.mxu0 %v21501_v31  ;;  %14696 = vmatprep.subr.bf16.mxu1 %v21506_v60  ;;  %v21579_v31 = vld [vmem:[%s21987_s4 + $0x3e60] ss:$8 sps:$4 sm:$0xff]   ;;  %v21584_v60 = vld [vmem:[%s21987_s4 + $0x1e74] ss:$8 sps:$4 sm:$0xff]  }
 0x7ae   : > { %16008 = vmatprep.subr.bf16.mxu0 %v21509_v9  ;;  %v21587_v9 = vld [vmem:[%s21987_s4 + $0x3e74] ss:$8 sps:$4 sm:$0xff]  }
 0x7b0   : > { %14697 = vmatpush1.bf16.msra.mxu1 %v21504_v23  ;;  %v21582_v23 = vld [vmem:[%s21987_s4 + $0x1e70] ss:$8 sps:$4 sm:$0xff]  }
 0x7b1   : > { %16009 = vmatpush1.bf16.msra.mxu0 %v21507_v8  ;;  %14698 = vmatprep.subr.bf16.mxu1 %v21512_v35  ;;  %v21585_v8 = vld [vmem:[%s21987_s4 + $0x3e70] ss:$8 sps:$4 sm:$0xff]   ;;  %v21590_v35 = vld [vmem:[%s21987_s4 + $0x1e84] ss:$8 sps:$4 sm:$0xff]  }
 0x7b2   : > { %16010 = vmatprep.subr.bf16.mxu0 %v21515_v27  ;;  %v21593_v27 = vld [vmem:[%s21987_s4 + $0x3e84] ss:$8 sps:$4 sm:$0xff]  }
 0x7b4   : > { %14699 = vmatpush1.bf16.msra.mxu1 %v21510_v34  ;;  %v21588_v34 = vld [vmem:[%s21987_s4 + $0x1e80] ss:$8 sps:$4 sm:$0xff]  }
 0x7b5   : > { %16011 = vmatpush1.bf16.msra.mxu0 %v21513_v15  ;;  %14700 = vmatprep.subr.bf16.mxu1 %v21518_v11  ;;  %v21591_v15 = vld [vmem:[%s21987_s4 + $0x3e80] ss:$8 sps:$4 sm:$0xff]   ;;  %v21596_v11 = vld [vmem:[%s21987_s4 + $0x1e94] ss:$8 sps:$4 sm:$0xff]  }
 0x7b6   : > { %16012 = vmatprep.subr.bf16.mxu0 %v21521_v46  ;;  %v21599_v46 = vld [vmem:[%s21987_s4 + $0x3e94] ss:$8 sps:$4 sm:$0xff]  }
 0x7b8   : > { %14701 = vmatpush1.bf16.msra.mxu1 %v21516_v26  ;;  %v21594_v26 = vld [vmem:[%s21987_s4 + $0x1e90] ss:$8 sps:$4 sm:$0xff]  }
 0x7b9   : > { %16013 = vmatpush1.bf16.msra.mxu0 %v21519_v47  ;;  %14702 = vmatprep.subr.bf16.mxu1 %v21524_v37  ;;  %v21597_v47 = vld [vmem:[%s21987_s4 + $0x3e90] ss:$8 sps:$4 sm:$0xff]   ;;  %v21602_v37 = vld [vmem:[%s21987_s4 + $0x1ea4] ss:$8 sps:$4 sm:$0xff]  }
 0x7ba   : > { %16014 = vmatprep.subr.bf16.mxu0 %v21527_v48  ;;  %v21605_v48 = vld [vmem:[%s21987_s4 + $0x3ea4] ss:$8 sps:$4 sm:$0xff]  }
 0x7bc   : > { %14703 = vmatpush1.bf16.msra.mxu1 %v21522_v43  ;;  %v21600_v43 = vld [vmem:[%s21987_s4 + $0x1ea0] ss:$8 sps:$4 sm:$0xff]  }
 0x7bd   : > { %16015 = vmatpush1.bf16.msra.mxu0 %v21525_v49  ;;  %14704 = vmatprep.subr.bf16.mxu1 %v21530_v14  ;;  %v21603_v49 = vld [vmem:[%s21987_s4 + $0x3ea0] ss:$8 sps:$4 sm:$0xff]   ;;  %v21608_v14 = vld [vmem:[%s21987_s4 + $0x1eb4] ss:$8 sps:$4 sm:$0xff]  }
 0x7be   : > { %16016 = vmatprep.subr.bf16.mxu0 %v21533_v41  ;;  %v21611_v41 = vld [vmem:[%s21987_s4 + $0x3eb4] ss:$8 sps:$4 sm:$0xff]  }
 0x7c0   : > { %14705 = vmatpush1.bf16.msra.mxu1 %v21528_v51  ;;  %v21614_v51 = vld [vmem:[%s21987_s4 + $0x1ec4] ss:$8 sps:$4 sm:$0xff]  }
 0x7c1   : > { %16017 = vmatpush1.bf16.msra.mxu0 %v21531_v17  ;;  %14706 = vmatprep.subr.bf16.mxu1 %v21536_v10  ;;  %v21617_v17 = vld [vmem:[%s21987_s4 + $0x3ec4] ss:$8 sps:$4 sm:$0xff]   ;;  %v21612_v10 = vld [vmem:[%s21987_s4 + $0x1ec0] ss:$8 sps:$4 sm:$0xff]  }
 0x7c2   : > { %16018 = vmatprep.subr.bf16.mxu0 %v21539_v18  ;;  %v21615_v18 = vld [vmem:[%s21987_s4 + $0x3ec0] ss:$8 sps:$4 sm:$0xff]  }
 0x7c4   : > { %14707 = vmatpush1.bf16.msra.mxu1 %v21534_v21  ;;  %v21620_v21 = vld [vmem:[%s21987_s4 + $0x1ed4] ss:$8 sps:$4 sm:$0xff]  }
 0x7c5   : > { %16019 = vmatpush1.bf16.msra.mxu0 %v21537_v36  ;;  %14717 = vmatprep.subr.bf16.mxu1 %v21542_v32  ;;  %v21623_v36 = vld [vmem:[%s21987_s4 + $0x3ed4] ss:$8 sps:$4 sm:$0xff]   ;;  %v21618_v32 = vld [vmem:[%s21987_s4 + $0x1ed0] ss:$8 sps:$4 sm:$0xff]  }
 0x7c6   : > { %16029 = vmatprep.subr.bf16.mxu0 %v21545_v16  ;;  %v21621_v16 = vld [vmem:[%s21987_s4 + $0x3ed0] ss:$8 sps:$4 sm:$0xff]  }
 0x7c7   : > { %14709 = vmatmul.mubr.bf16.vlgmr.msra.gmra.mrb[0].mxu1 %v2723_v33  ;;  %v21624_v33 = vld [vmem:[%s21987_s4 + $0x1ee0] ss:$8 sps:$4 sm:$0xff]  }
 0x7c8   : > { %16021 = vmatmul.mubr.bf16.vlgmr.msra.gmra.mrb[0].mxu0 %v3115_v3  ;;  %14718 = vmatpush1.bf16.msra.mxu1 %v21540_v58  ;;  %v21627_v3 = vld [vmem:[%s21987_s4 + $0x3ee0] ss:$8 sps:$4 sm:$0xff]   ;;  %v21632_v58 = vld [vmem:[%s21987_s4 + $0x1ef4] ss:$8 sps:$4 sm:$0xff]  }
 0x7c9   : > { %16030 = vmatpush1.bf16.msra.mxu0 %v21543_v4  ;;  %14719 = vmatprep.subr.bf16.mxu1 %v21548_v0  ;;  %v21635_v4 = vld [vmem:[%s21987_s4 + $0x3ef4] ss:$8 sps:$4 sm:$0xff]   ;;  %v21630_v0 = vld [vmem:[%s21987_s4 + $0x1ef0] ss:$8 sps:$4 sm:$0xff]  }
 0x7ca   : > { %16031 = vmatprep.subr.bf16.mxu0 %v21551_v6  ;;  %14749 = vmatprep.mubr.bf16.mxu1 %v24542_v19  ;;  %v21633_v6 = vld [vmem:[%s21987_s4 + $0x3ef0] ss:$8 sps:$4 sm:$0xff]  }
 0x7cb   : > { %16061 = vmatprep.mubr.bf16.mxu0 %v24545_v55 }
 0x7cc   : > { %14720 = vmatpush1.bf16.msra.mxu1 %v21546_v45  ;;  %v21639_v45 = vld [vmem:[%s21987_s4 + $0x1f04] ss:$8 sps:$4 sm:$0xff]  }
 0x7cd   : > { %16032 = vmatpush1.bf16.msra.mxu0 %v21549_v20  ;;  %14721 = vmatprep.subr.bf16.mxu1 %v21554_v1  ;;  %v21643_v20 = vld [vmem:[%s21987_s4 + $0x3f04] ss:$8 sps:$4 sm:$0xff]   ;;  %v24611_v1 = vrot.slane %v24520_v62, %v22061_v50  ;;  %v2726_v62 = vcombine.high %v24542_v19, %v24542_v19 }
 0x7ce   : > { %16033 = vmatprep.subr.bf16.mxu0 %v21557_v42  ;;  %v24615_v42 = vrot.slane %v24523_v54, %v22061_v50  ;;  %v21644_v50 = vld [vmem:[%s21987_s4 + $0x1f10] ss:$8 sps:$4 sm:$0xff]   ;;  %v21652_v19 = vld [vmem:[%s21987_s4 + $0x1f24] ss:$8 sps:$4 sm:$0xff]  }
 0x7cf   : > { %v21647_v54 = vld [vmem:[%s21987_s4 + $0x3f10] ss:$8 sps:$4 sm:$0xff]  }
 0x7d0   : > { %14722 = vmatpush1.bf16.msra.mxu1 %v21552_v40  ;;  %v21637_v40 = vld [vmem:[%s21987_s4 + $0x1f00] ss:$8 sps:$4 sm:$0xff]  }
 0x7d1   : > { %16034 = vmatpush1.bf16.msra.mxu0 %v21555_v39  ;;  %14723 = vmatprep.subr.bf16.mxu1 %v21560_v7  ;;  %v21641_v39 = vld [vmem:[%s21987_s4 + $0x3f00] ss:$8 sps:$4 sm:$0xff]   ;;  %v21646_v7 = vld [vmem:[%s21987_s4 + $0x1f14] ss:$8 sps:$4 sm:$0xff]  }
 0x7d2   : > { %16035 = vmatprep.subr.bf16.mxu0 %v21563_v61  ;;  %v21649_v61 = vld [vmem:[%s21987_s4 + $0x3f14] ss:$8 sps:$4 sm:$0xff]  }
 0x7d4   : > { %14724 = vmatpush1.bf16.msra.mxu1 %v21558_v38  ;;  %v3118_v38 = vcombine.high %v24545_v55, %v24545_v55  ;;  %v21650_v55 = vld [vmem:[%s21987_s4 + $0x1f20] ss:$8 sps:$4 sm:$0xff]  }
 0x7d5   : > { %16036 = vmatpush1.bf16.msra.mxu0 %v21561_v52  ;;  %14725 = vmatprep.subr.bf16.mxu1 %v21566_v5  ;;  %v21655_v52 = vld [vmem:[%s21987_s4 + $0x3f24] ss:$8 sps:$4 sm:$0xff]   ;;  %v21653_v5 = vld [vmem:[%s21987_s4 + $0x3f20] ss:$8 sps:$4 sm:$0xff]  }
 0x7d6   : > { %16037 = vmatprep.subr.bf16.mxu0 %v21569_v2  ;;  %v21658_v2 = vld [vmem:[%s21987_s4 + $0x1f34] ss:$8 sps:$4 sm:$0xff]  }
 0x7d8   : > { %14726 = vmatpush1.bf16.msra.mxu1 %v21564_v63  ;;  %v21661_v63 = vld [vmem:[%s21987_s4 + $0x3f34] ss:$8 sps:$4 sm:$0xff]  }
 0x7d9   : > { %16038 = vmatpush1.bf16.msra.mxu0 %v21567_v24  ;;  %14727 = vmatprep.subr.bf16.mxu1 %v21572_v13  ;;  %v21656_v24 = vld [vmem:[%s21987_s4 + $0x1f30] ss:$8 sps:$4 sm:$0xff]  }
 0x7da   : > { %16039 = vmatprep.subr.bf16.mxu0 %v21575_v53  ;;  %v21659_v13 = vld [vmem:[%s21987_s4 + $0x3f30] ss:$8 sps:$4 sm:$0xff]   ;;  %v21664_v53 = vld [vmem:[%s21987_s4 + $0x1f44] ss:$8 sps:$4 sm:$0xff]  }
 0x7dc   : > { %14728 = vmatpush1.bf16.msra.mxu1 %v21570_v59  ;;  %v21667_v59 = vld [vmem:[%s21987_s4 + $0x3f44] ss:$8 sps:$4 sm:$0xff]  }
 0x7dd   : > { %16040 = vmatpush1.bf16.msra.mxu0 %v21573_v57  ;;  %14729 = vmatprep.subr.bf16.mxu1 %v21578_v12  ;;  %v21662_v57 = vld [vmem:[%s21987_s4 + $0x1f40] ss:$8 sps:$4 sm:$0xff]  }
 0x7de   : > { %16041 = vmatprep.subr.bf16.mxu0 %v21581_v28  ;;  %v21665_v12 = vld [vmem:[%s21987_s4 + $0x3f40] ss:$8 sps:$4 sm:$0xff]   ;;  %v21670_v28 = vld [vmem:[%s21987_s4 + $0x1f54] ss:$8 sps:$4 sm:$0xff]  }
 0x7e0   : > { %14730 = vmatpush1.bf16.msra.mxu1 %v21576_v29  ;;  %v21673_v29 = vld [vmem:[%s21987_s4 + $0x3f54] ss:$8 sps:$4 sm:$0xff]  }
 0x7e1   : > { %16042 = vmatpush1.bf16.msra.mxu0 %v21579_v31  ;;  %14731 = vmatprep.subr.bf16.mxu1 %v21584_v60  ;;  %v21668_v31 = vld [vmem:[%s21987_s4 + $0x1f50] ss:$8 sps:$4 sm:$0xff]  }
 0x7e2   : > { %16043 = vmatprep.subr.bf16.mxu0 %v21587_v9  ;;  %v21671_v60 = vld [vmem:[%s21987_s4 + $0x3f50] ss:$8 sps:$4 sm:$0xff]   ;;  %v21676_v9 = vld [vmem:[%s21987_s4 + $0x1f64] ss:$8 sps:$4 sm:$0xff]  }
 0x7e4   : > { %14732 = vmatpush1.bf16.msra.mxu1 %v21582_v23  ;;  %v21679_v23 = vld [vmem:[%s21987_s4 + $0x3f64] ss:$8 sps:$4 sm:$0xff]  }
 0x7e5   : > { %16044 = vmatpush1.bf16.msra.mxu0 %v21585_v8  ;;  %14733 = vmatprep.subr.bf16.mxu1 %v21590_v35  ;;  %v21674_v8 = vld [vmem:[%s21987_s4 + $0x1f60] ss:$8 sps:$4 sm:$0xff]  }
 0x7e6   : > { %16045 = vmatprep.subr.bf16.mxu0 %v21593_v27  ;;  %v21677_v35 = vld [vmem:[%s21987_s4 + $0x3f60] ss:$8 sps:$4 sm:$0xff]   ;;  %v21682_v27 = vld [vmem:[%s21987_s4 + $0x1f74] ss:$8 sps:$4 sm:$0xff]  }
 0x7e8   : > { %14734 = vmatpush1.bf16.msra.mxu1 %v21588_v34  ;;  %v21685_v34 = vld [vmem:[%s21987_s4 + $0x3f74] ss:$8 sps:$4 sm:$0xff]  }
 0x7e9   : > { %16046 = vmatpush1.bf16.msra.mxu0 %v21591_v15  ;;  %14735 = vmatprep.subr.bf16.mxu1 %v21596_v11  ;;  %v21680_v15 = vld [vmem:[%s21987_s4 + $0x1f70] ss:$8 sps:$4 sm:$0xff]  }
 0x7ea   : > { %16047 = vmatprep.subr.bf16.mxu0 %v21599_v46  ;;  %v21683_v11 = vld [vmem:[%s21987_s4 + $0x3f70] ss:$8 sps:$4 sm:$0xff]   ;;  %v21688_v46 = vld [vmem:[%s21987_s4 + $0x1f84] ss:$8 sps:$4 sm:$0xff]  }
 0x7ec   : > { %14736 = vmatpush1.bf16.msra.mxu1 %v21594_v26  ;;  %v21691_v26 = vld [vmem:[%s21987_s4 + $0x3f84] ss:$8 sps:$4 sm:$0xff]  }
 0x7ed   : > { %16048 = vmatpush1.bf16.msra.mxu0 %v21597_v47  ;;  %14737 = vmatprep.subr.bf16.mxu1 %v21602_v37  ;;  %v21686_v47 = vld [vmem:[%s21987_s4 + $0x1f80] ss:$8 sps:$4 sm:$0xff]  }
 0x7ee   : > { %16049 = vmatprep.subr.bf16.mxu0 %v21605_v48  ;;  %v21689_v37 = vld [vmem:[%s21987_s4 + $0x3f80] ss:$8 sps:$4 sm:$0xff]   ;;  %v21694_v48 = vld [vmem:[%s21987_s4 + $0x1f94] ss:$8 sps:$4 sm:$0xff]  }
 0x7f0   : > { %14738 = vmatpush1.bf16.msra.mxu1 %v21600_v43  ;;  %v21697_v43 = vld [vmem:[%s21987_s4 + $0x3f94] ss:$8 sps:$4 sm:$0xff]  }
 0x7f1   : > { %16050 = vmatpush1.bf16.msra.mxu0 %v21603_v49  ;;  %14739 = vmatprep.subr.bf16.mxu1 %v21608_v14  ;;  %v21692_v49 = vld [vmem:[%s21987_s4 + $0x1f90] ss:$8 sps:$4 sm:$0xff]  }
 0x7f2   : > { %16051 = vmatprep.subr.bf16.mxu0 %v21611_v41  ;;  %v21695_v14 = vld [vmem:[%s21987_s4 + $0x3f90] ss:$8 sps:$4 sm:$0xff]   ;;  %v21700_v41 = vld [vmem:[%s21987_s4 + $0x1fa4] ss:$8 sps:$4 sm:$0xff]  }
 0x7f4   : > { %14740 = vmatpush1.bf16.msra.mxu1 %v21606_v25  ;;  %v21703_v25 = vld [vmem:[%s21987_s4 + $0x3fa4] ss:$8 sps:$4 sm:$0xff]  }
 0x7f5   : > { %16052 = vmatpush1.bf16.msra.mxu0 %v21609_v30  ;;  %14741 = vmatprep.subr.bf16.mxu1 %v21614_v51  ;;  %v21698_v30 = vld [vmem:[%s21987_s4 + $0x1fa0] ss:$8 sps:$4 sm:$0xff]  }
 0x7f6   : > { %16053 = vmatprep.subr.bf16.mxu0 %v21617_v17  ;;  %v21701_v51 = vld [vmem:[%s21987_s4 + $0x3fa0] ss:$8 sps:$4 sm:$0xff]   ;;  %v21706_v17 = vld [vmem:[%s21987_s4 + $0x1fb4] ss:$8 sps:$4 sm:$0xff]  }
 0x7f8   : > { %14742 = vmatpush1.bf16.msra.mxu1 %v21612_v10  ;;  %v21709_v10 = vld [vmem:[%s21987_s4 + $0x3fb4] ss:$8 sps:$4 sm:$0xff]  }
 0x7f9   : > { %16054 = vmatpush1.bf16.msra.mxu0 %v21615_v18  ;;  %14743 = vmatprep.subr.bf16.mxu1 %v21620_v21  ;;  %v21704_v18 = vld [vmem:[%s21987_s4 + $0x1fb0] ss:$8 sps:$4 sm:$0xff]  }
 0x7fa   : > { %16055 = vmatprep.subr.bf16.mxu0 %v21623_v36  ;;  %v21707_v21 = vld [vmem:[%s21987_s4 + $0x3fb0] ss:$8 sps:$4 sm:$0xff]   ;;  %v21712_v36 = vld [vmem:[%s21987_s4 + $0x1fc4] ss:$8 sps:$4 sm:$0xff]  }
 0x7fc   : > { %14744 = vmatpush1.bf16.msra.mxu1 %v21618_v32  ;;  %v21715_v32 = vld [vmem:[%s21987_s4 + $0x3fc4] ss:$8 sps:$4 sm:$0xff]  }
 0x7fd   : > { %16056 = vmatpush1.bf16.msra.mxu0 %v21621_v16  ;;  %14745 = vmatprep.subr.bf16.mxu1 %v21626_v22  ;;  %v21710_v16 = vld [vmem:[%s21987_s4 + $0x1fc0] ss:$8 sps:$4 sm:$0xff]  }
 0x7fe   : > { %16057 = vmatprep.subr.bf16.mxu0 %v21629_v56  ;;  %v21713_v22 = vld [vmem:[%s21987_s4 + $0x3fc0] ss:$8 sps:$4 sm:$0xff]   ;;  %v21718_v56 = vld [vmem:[%s21987_s4 + $0x1fd4] ss:$8 sps:$4 sm:$0xff]  }
 0x800   : > { %14746 = vmatpush1.bf16.msra.mxu1 %v21624_v33  ;;  %v21721_v33 = vld [vmem:[%s21987_s4 + $0x3fd4] ss:$8 sps:$4 sm:$0xff]  }
 0x801   : > { %16058 = vmatpush1.bf16.msra.mxu0 %v21627_v3  ;;  %14747 = vmatprep.subr.bf16.mxu1 %v21632_v58  ;;  %v21716_v3 = vld [vmem:[%s21987_s4 + $0x1fd0] ss:$8 sps:$4 sm:$0xff]  }
 0x802   : > { %16059 = vmatprep.subr.bf16.mxu0 %v21635_v4  ;;  %v21719_v58 = vld [vmem:[%s21987_s4 + $0x3fd0] ss:$8 sps:$4 sm:$0xff]   ;;  %v21724_v4 = vld [vmem:[%s21987_s4 + $0x1fe4] ss:$8 sps:$4 sm:$0xff]  }
 0x804   : > { %14748 = vmatpush1.bf16.msra.mxu1 %v21630_v0  ;;  %v21727_v0 = vld [vmem:[%s21987_s4 + $0x3fe4] ss:$8 sps:$4 sm:$0xff]  }
 0x805   : > { %16060 = vmatpush1.bf16.msra.mxu0 %v21633_v6  ;;  %14758 = vmatprep.subr.bf16.mxu1 %v21639_v45  ;;  %v21722_v6 = vld [vmem:[%s21987_s4 + $0x1fe0] ss:$8 sps:$4 sm:$0xff]  }
 0x806   : > { %16070 = vmatprep.subr.bf16.mxu0 %v21643_v20  ;;  %v21725_v45 = vld [vmem:[%s21987_s4 + $0x3fe0] ss:$8 sps:$4 sm:$0xff]   ;;  %v21730_v20 = vld [vmem:[%s21987_s4 + $0x1ff4] ss:$8 sps:$4 sm:$0xff]  }
 0x807   : > { %14750 = vmatmul.mubr.bf16.vlgmr.msra.gmra.mrb[0].mxu1 %v24611_v1 }
 0x808   : > { %16062 = vmatmul.mubr.bf16.vlgmr.msra.gmra.mrb[0].mxu0 %v24615_v42  ;;  %14759 = vmatpush1.bf16.msra.mxu1 %v21637_v40  ;;  %v21733_v40 = vld [vmem:[%s21987_s4 + $0x3ff4] ss:$8 sps:$4 sm:$0xff]  }
 0x809   : > { %16071 = vmatpush1.bf16.msra.mxu0 %v21641_v39  ;;  %14760 = vmatprep.subr.bf16.mxu1 %v21646_v7  ;;  %v21728_v39 = vld [vmem:[%s21987_s4 + $0x1ff0] ss:$8 sps:$4 sm:$0xff]  }
 0x80a   : > { %16072 = vmatprep.subr.bf16.mxu0 %v21649_v61  ;;  %14790 = vmatprep.mubr.bf16.mxu1 %v2726_v62  ;;  %v21731_v7 = vld [vmem:[%s21987_s4 + $0x3ff0] ss:$8 sps:$4 sm:$0xff]   ;;  %v2724_v61 = vcombine.high %v24611_v1, %v24611_v1  ;;  %v3116_v62 = vcombine.high %v24615_v42, %v24615_v42 }
 0x80b   : > { %16102 = vmatprep.mubr.bf16.mxu0 %v3118_v38  ;;  %v21850_v38 = vmov 1983009808  }
 0x80c   : > { %14761 = vmatpush1.bf16.msra.mxu1 %v21644_v50  ;;  %v16115_v50 = vunpack.c.l.s4 %v21850_v38 }
 0x80d   : > { %16073 = vmatpush1.bf16.msra.mxu0 %v21647_v54  ;;  %14762 = vmatprep.subr.bf16.mxu1 %v21652_v19 }
 0x80e   : > { %16074 = vmatprep.subr.bf16.mxu0 %v21655_v52  ;;  %v16116_v54 = vunpack.c.0.s8 %v16115_v50 }
 0x810   : > { %14763 = vmatpush1.bf16.msra.mxu1 %v21650_v55  ;;  %v16119_v1 = vsub.s32 %v16116_v54, %v22053_v44 }
 0x811   : > { %16075 = vmatpush1.bf16.msra.mxu0 %v21653_v5  ;;  %14764 = vmatprep.subr.bf16.mxu1 %v21658_v2 }
 0x812   : > { %16076 = vmatprep.subr.bf16.mxu0 %v21661_v63 }
 0x814   : > { %14765 = vmatpush1.bf16.msra.mxu1 %v21656_v24 }
 0x815   : > { %16077 = vmatpush1.bf16.msra.mxu0 %v21659_v13  ;;  %14766 = vmatprep.subr.bf16.mxu1 %v21664_v53 }
 0x816   : > { %16078 = vmatprep.subr.bf16.mxu0 %v21667_v59 }
 0x818   : > { %14767 = vmatpush1.bf16.msra.mxu1 %v21662_v57  ;;  %v254_v57 = vld [vmem:[%s22010_s16] sm:$0xf] }
 0x819   : > { %16079 = vmatpush1.bf16.msra.mxu0 %v21665_v12  ;;  %14768 = vmatprep.subr.bf16.mxu1 %v21670_v28 }
 0x81a   : > { %16080 = vmatprep.subr.bf16.mxu0 %v21673_v29  ;;  %v16129_v29 = vld [vmem:[%s241_s26] sm:$0x3] (!%p18315_p6) }
 0x81c   : > { %14769 = vmatpush1.bf16.msra.mxu1 %v21668_v31  ;;  %v16133_v31 = vsub.s32 (!%p18315_p6), 0, %v22053_v44 }
 0x81d   : > { %16081 = vmatpush1.bf16.msra.mxu0 %v21671_v60  ;;  %14770 = vmatprep.subr.bf16.mxu1 %v21676_v9  ;;  %v16137_v60 = vsub.s32 (!%p18315_p6), 1, %v22053_v44 }
 0x81e   : > { %16082 = vmatprep.subr.bf16.mxu0 %v21679_v23  ;;  %v16134_v9 = vrot.slane (!%p18315_p6), %v16129_v29, %v16133_v31 }
 0x81f   : > { %v16138_v23 = vrot.slane (!%p18315_p6), %v16129_v29, %v16137_v60 }
 0x820   : > { %14771 = vmatpush1.bf16.msra.mxu1 %v21674_v8 }
 0x821   : > { %16083 = vmatpush1.bf16.msra.mxu0 %v21677_v35  ;;  %14772 = vmatprep.subr.bf16.mxu1 %v21682_v27  ;;  %v16139_v8 = vcombine.low (!%p18315_p6), %v16134_v9, %v16138_v23 }
 0x822   : > { %16084 = vmatprep.subr.bf16.mxu0 %v21685_v34 }
 0x823   : > { %v16146_v27 = vrot.slane (!%p18315_p6), %v16139_v8, %v16119_v1 }
 0x824   : > { %14773 = vmatpush1.bf16.msra.mxu1 %v21680_v15 }
 0x825   : > { %16085 = vmatpush1.bf16.msra.mxu0 %v21683_v11  ;;  %14774 = vmatprep.subr.bf16.mxu1 %v21688_v46 }
 0x826   : > { %16086 = vmatprep.subr.bf16.mxu0 %v21691_v26 }
 0x828   : > { %14775 = vmatpush1.bf16.msra.mxu1 %v21686_v47 }
 0x829   : > { %16087 = vmatpush1.bf16.msra.mxu0 %v21689_v37  ;;  %14776 = vmatprep.subr.bf16.mxu1 %v21694_v48 }
 0x82a   : > { %16088 = vmatprep.subr.bf16.mxu0 %v21697_v43 }
 0x82c   : > { %14777 = vmatpush1.bf16.msra.mxu1 %v21692_v49 }
 0x82d   : > { %16089 = vmatpush1.bf16.msra.mxu0 %v21695_v14  ;;  %14778 = vmatprep.subr.bf16.mxu1 %v21700_v41 }
 0x82e   : > { %16090 = vmatprep.subr.bf16.mxu0 %v21703_v25 }
 0x830   : > { %14779 = vmatpush1.bf16.msra.mxu1 %v21698_v30 }
 0x831   : > { %16091 = vmatpush1.bf16.msra.mxu0 %v21701_v51  ;;  %14780 = vmatprep.subr.bf16.mxu1 %v21706_v17 }
 0x832   : > { %16092 = vmatprep.subr.bf16.mxu0 %v21709_v10 }
 0x834   : > { %14781 = vmatpush1.bf16.msra.mxu1 %v21704_v18 }
 0x835   : > { %16093 = vmatpush1.bf16.msra.mxu0 %v21707_v21  ;;  %14782 = vmatprep.subr.bf16.mxu1 %v21712_v36 }
 0x836   : > { %16094 = vmatprep.subr.bf16.mxu0 %v21715_v32 }
 0x838   : > { %14783 = vmatpush1.bf16.msra.mxu1 %v21710_v16 }
 0x839   : > { %16095 = vmatpush1.bf16.msra.mxu0 %v21713_v22  ;;  %14784 = vmatprep.subr.bf16.mxu1 %v21718_v56 }
 0x83a   : > { %16096 = vmatprep.subr.bf16.mxu0 %v21721_v33 }
 0x83c   : > { %14785 = vmatpush1.bf16.msra.mxu1 %v21716_v3 }
 0x83d   : > { %16097 = vmatpush1.bf16.msra.mxu0 %v21719_v58  ;;  %14786 = vmatprep.subr.bf16.mxu1 %v21724_v4 }
 0x83e   : > { %16098 = vmatprep.subr.bf16.mxu0 %v21727_v0 }
 0x840   : > { %14787 = vmatpush1.bf16.msra.mxu1 %v21722_v6 }
 0x841   : > { %16099 = vmatpush1.bf16.msra.mxu0 %v21725_v45  ;;  %14788 = vmatprep.subr.bf16.mxu1 %v21730_v20 }
 0x842   : > { %16100 = vmatprep.subr.bf16.mxu0 %v21733_v40 }
 0x844   : > { %14789 = vmatpush1.bf16.msra.mxu1 %v21728_v39 }
 0x845   : > { %16101 = vmatpush1.bf16.msra.mxu0 %v21731_v7 }
 0x847   : > { %14791 = vmatmul.mubr.bf16.vlgmr.msra.gmra.mrb[0].mxu1 %v2724_v61 }
 0x848   : > { %16103 = vmatmul.mubr.bf16.vlgmr.msra.gmra.mrb[0].mxu0 %v3116_v62 }
 0x91a   : > { %v14792_v19 = vpop.f32.mrb[0].mxu1 }
 0x91b   : > { %v16104_v52 = vpop.f32.mrb[0].mxu0  ;;  %v14794_v5 = vpop.f32.mrb[1].mxu1 }
 0x91c   : > { %v18319_v55 = vadd.f32 %v16104_v52, %v14792_v19  ;;  %v16106_v2 = vpop.f32.mrb[1].mxu0  ;;  %v14796_v24 = vpop.f32.mrb[2].mxu1 }
 0x91d   : > { %v18320_v63 = vadd.f32 %v16106_v2, %v14794_v5  ;;  %v16108_v13 = vpop.f32.mrb[2].mxu0  ;;  %v14797_v42 = vpop.f32.mrb[3].mxu1 }
 0x91e   : > { %v16109_v53 = vpop.f32.mrb[3].mxu0 }
 0x91f   : > { %v16113_v59 = vcombine.low %v18319_v55, %v18320_v63  ;;  %16127 = sbr.rel (%p18315_p6) target bundleno = 2354 (0x932), region = 44 }
 0x921   : > { %v16120_v12 = vrot.slane %v16113_v59, %v16119_v1 }
 0x923   : > { %v16122_v28 = vadd.f32 %v16120_v12, %v254_v57 }
 0x925   : > { %16123 = vst [vmem:[%s22010_s16] sm:$0xf] %v16122_v28 }
 0x92c   : > { %v16128_v35 = vld [vmem:[%s22010_s16] sm:$0xf] }
 0x92d   : > { %v16148_v34 = vadd.f32 %v16146_v27, %v16128_v35 }
 0x92f   : > { %v16149_v15 = vmax.f32 %v16148_v34, 0.0 }
 0x931   : > { %16150 = vst [vmem:[%s22010_s16] sm:$0xf] %v16149_v15 }
 0x932 PF: > { %s16_s19 = sadd.s32 1, %s21842_s19   ;;  %s24733_s12 = smov %s21818_s13 }
 0x933   : > { %p13_p8 = scmp.ge.s32.totalorder %s16_s19, 10   ;;  %s24734_s13 = smov %s21822_s14 }
 0x934   : > { %s24735_s14 = smov %s21938_s5  ;;  %s24736_s15 = smov %s21834_s17 }
 0x935   : > { %s24737_s16 = smov %s21838_s18  ;;  %s24738_s17 = smov %s24741_s21 }
 0x936   : > { %s24739_s18 = smov %s24745_s22  ;;  %15 = sbr.rel (!%p13_p8) target bundleno = 5 (0x5), region = 86 }
 0x93d   :  { %16173 = vsyncpa [#allocation3], 1 }
 0x93e   :  { %16175 = vsyncpa [#allocation3 + $0x1], 1 }

// kernel: net_forward.9
= control target key start
LH: loop header
LB: loop body
LE: loop exit
PB: predicated region body
PF: predicated region fallthrough
CT: control target
= control target key end

     0   :  { %v573_v47 = vmov 1983009808   ;;  %v99_v49 = vlaneseq  ;;  %vm575_vm0 = vmmov 0   ;;  %vm350_vm1 = vcmask 1024   ;;  %s859_s1 = inlined_call_operand.vmem [shape: f32[512,128], index: 1, kind: input, shape index: {}]   ;;  %s860_s0 = inlined_call_operand.vmem [shape: f32[2,512], index: 0, kind: input, shape index: {}]   ;;  %s861_s3 = inlined_call_operand.vmem [shape: f32[128,1], index: 3, kind: input, shape index: {}]   ;;  %s862_s4 = inlined_call_operand.<no memory space> [shape: f32[1,1], index: 4, kind: input, shape index: {}]   ;;  %s863_s2 = inlined_call_operand.vmem [shape: f32[1,128], index: 2, kind: input, shape index: {}]   ;;  %s864_s5 = inlined_call_operand.vmem [shape: f32[2,1], index: 5, kind: output, shape index: {}]  }
   0x1   :  { %v39_v0 = vld [vmem:[%s859_s1 + $0x80] sm:$0xff]  ;;  %v40_v1 = vld [vmem:[%s859_s1 + $0x88] sm:$0xff]  ;;  %v41_v11 = vld [vmem:[%s859_s1 + $0x90] sm:$0xff]  ;;  %v97_v48 = vunpack.c.l.s4 %v573_v47  ;;  %v574_v47 = vmov 0.0|0.0  }
   0x2   :  { %v23_v2 = vld [vmem:[%s859_s1] sm:$0xff]  ;;  %v480_v3 = vpack.c.bf16 %v40_v1, %v39_v0  ;;  %v24_v4 = vld [vmem:[%s859_s1 + $0x8] sm:$0xff]  ;;  %v42_v13 = vld [vmem:[%s859_s1 + $0x98] sm:$0xff]  ;;  %v100_v0 = vshrl.u32 %v99_v49, 7 }
   0x3   :  { %v71_v5 = vld [vmem:[%s859_s1 + $0x180] sm:$0xff]  ;;  %v72_v6 = vld [vmem:[%s859_s1 + $0x188] sm:$0xff]  ;;  %v482_v7 = vpack.c.bf16 %v24_v4, %v23_v2  ;;  %v25_v14 = vld [vmem:[%s859_s1 + $0x10] sm:$0xff]  ;;  %v484_v16 = vpack.c.bf16 %v42_v13, %v41_v11  ;;  %v98_v63 = vunpack.c.0.s8 %v97_v48 }
   0x4   :  { %v512_v8 = vpack.c.bf16 %v72_v6, %v71_v5  ;;  %v55_v9 = vld [vmem:[%s859_s1 + $0x100] sm:$0xff]  ;;  %v56_v10 = vld [vmem:[%s859_s1 + $0x108] sm:$0xff]  ;;  %481 = vmatprep.subr.bf16.mxu0 %v480_v3  ;;  %v26_v15 = vld [vmem:[%s859_s1 + $0x18] sm:$0xff] }
   0x5   :  { %v514_v12 = vpack.c.bf16 %v56_v10, %v55_v9  ;;  %483 = vmatpush3.bf16.msra.mxu0 %v482_v7  ;;  %v486_v17 = vpack.c.bf16 %v26_v15, %v25_v14  ;;  %v73_v18 = vld [vmem:[%s859_s1 + $0x190] sm:$0xff]  ;;  %v74_v19 = vld [vmem:[%s859_s1 + $0x198] sm:$0xff]  ;;  %v43_v23 = vld [vmem:[%s859_s1 + $0xa0] sm:$0xff]  ;;  %v101_v13 = vsub.s32 %v98_v63, %v100_v0 }
   0x6   :  { %513 = vmatprep.subr.bf16.mxu1 %v512_v8  ;;  %v57_v20 = vld [vmem:[%s859_s1 + $0x110] sm:$0xff]  ;;  %v516_v21 = vpack.c.bf16 %v74_v19, %v73_v18  ;;  %v58_v22 = vld [vmem:[%s859_s1 + $0x118] sm:$0xff]  ;;  %v44_v24 = vld [vmem:[%s859_s1 + $0xa8] sm:$0xff]  ;;  %485 = vmatprep.subr.bf16.mxu0 %v484_v16 }
   0x7   :  { %515 = vmatpush3.bf16.msra.mxu1 %v514_v12  ;;  %v518_v25 = vpack.c.bf16 %v58_v22, %v57_v20  ;;  %v488_v26 = vpack.c.bf16 %v44_v24, %v43_v23  ;;  %v27_v27 = vld [vmem:[%s859_s1 + $0x20] sm:$0xff]  ;;  %v28_v28 = vld [vmem:[%s859_s1 + $0x28] sm:$0xff]  ;;  %v45_v35 = vld [vmem:[%s859_s1 + $0xb0] sm:$0xff] }
   0x8   :  { %v75_v29 = vld [vmem:[%s859_s1 + $0x1a0] sm:$0xff]  ;;  %517 = vmatprep.subr.bf16.mxu1 %v516_v21  ;;  %v76_v30 = vld [vmem:[%s859_s1 + $0x1a8] sm:$0xff]  ;;  %v490_v33 = vpack.c.bf16 %v28_v28, %v27_v27  ;;  %v46_v36 = vld [vmem:[%s859_s1 + $0xb8] sm:$0xff] }
   0x9   :  { %v59_v31 = vld [vmem:[%s859_s1 + $0x120] sm:$0xff]  ;;  %v60_v32 = vld [vmem:[%s859_s1 + $0x128] sm:$0xff]  ;;  %487 = vmatpush3.bf16.msra.mxu0 %v486_v17  ;;  %v520_v34 = vpack.c.bf16 %v76_v30, %v75_v29  ;;  %v29_v37 = vld [vmem:[%s859_s1 + $0x30] sm:$0xff]  ;;  %v492_v39 = vpack.c.bf16 %v46_v36, %v45_v35 }
   0xa   :  { %489 = vmatprep.subr.bf16.mxu0 %v488_v26  ;;  %v522_v38 = vpack.c.bf16 %v60_v32, %v59_v31  ;;  %v30_v40 = vld [vmem:[%s859_s1 + $0x38] sm:$0xff]  ;;  %v77_v41 = vld [vmem:[%s859_s1 + $0x1b0] sm:$0xff]  ;;  %v47_v46 = vld [vmem:[%s859_s1 + $0xc0] sm:$0xff] }
   0xb   :  { %519 = vmatpush3.bf16.msra.mxu1 %v518_v25  ;;  %v78_v42 = vld [vmem:[%s859_s1 + $0x1b8] sm:$0xff]  ;;  %v61_v44 = vld [vmem:[%s859_s1 + $0x130] sm:$0xff]  ;;  %v48_v50 = vld [vmem:[%s859_s1 + $0xc8] sm:$0xff]  ;;  %v494_v51 = vpack.c.bf16 %v30_v40, %v29_v37 }
   0xc   :  { %521 = vmatprep.subr.bf16.mxu1 %v520_v34  ;;  %v524_v43 = vpack.c.bf16 %v78_v42, %v77_v41  ;;  %v62_v45 = vld [vmem:[%s859_s1 + $0x138] sm:$0xff]  ;;  %v79_v52 = vld [vmem:[%s859_s1 + $0x1c0] sm:$0xff]  ;;  %v80_v53 = vld [vmem:[%s859_s1 + $0x1c8] sm:$0xff]  ;;  %v496_v55 = vpack.c.bf16 %v48_v50, %v47_v46 }
   0xd   :  { %491 = vmatpush3.bf16.msra.mxu0 %v490_v33  ;;  %v526_v54 = vpack.c.bf16 %v62_v45, %v61_v44  ;;  %v31_v56 = vld [vmem:[%s859_s1 + $0x40] sm:$0xff]  ;;  %v32_v57 = vld [vmem:[%s859_s1 + $0x48] sm:$0xff]  ;;  %v528_v59 = vpack.c.bf16 %v80_v53, %v79_v52  ;;  %v49_v61 = vld [vmem:[%s859_s1 + $0xd0] sm:$0xff] }
   0xe   :  { %493 = vmatprep.subr.bf16.mxu0 %v492_v39  ;;  %v63_v58 = vld [vmem:[%s859_s1 + $0x140] sm:$0xff]  ;;  %v64_v60 = vld [vmem:[%s859_s1 + $0x148] sm:$0xff]  ;;  %v50_v62 = vld [vmem:[%s859_s1 + $0xd8] sm:$0xff]  ;;  %v498_v3 = vpack.c.bf16 %v32_v57, %v31_v56 }
   0xf   :  { %523 = vmatpush3.bf16.msra.mxu1 %v522_v38  ;;  %v81_v1 = vld [vmem:[%s859_s1 + $0x1d0] sm:$0xff]  ;;  %v82_v2 = vld [vmem:[%s859_s1 + $0x1d8] sm:$0xff]  ;;  %v530_v4 = vpack.c.bf16 %v64_v60, %v63_v58  ;;  %v500_v5 = vpack.c.bf16 %v50_v62, %v49_v61  ;;  %v51_v11 = vld [vmem:[%s859_s1 + $0xe0] sm:$0xff] }
  0x10   :  { %525 = vmatprep.subr.bf16.mxu1 %v524_v43  ;;  %v33_v6 = vld [vmem:[%s859_s1 + $0x50] sm:$0xff]  ;;  %v34_v7 = vld [vmem:[%s859_s1 + $0x58] sm:$0xff]  ;;  %v532_v9 = vpack.c.bf16 %v82_v2, %v81_v1  ;;  %v52_v12 = vld [vmem:[%s859_s1 + $0xe8] sm:$0xff] }
  0x11   :  { %495 = vmatpush3.bf16.msra.mxu0 %v494_v51  ;;  %v65_v8 = vld [vmem:[%s859_s1 + $0x150] sm:$0xff]  ;;  %v66_v10 = vld [vmem:[%s859_s1 + $0x158] sm:$0xff]  ;;  %v83_v14 = vld [vmem:[%s859_s1 + $0x1e0] sm:$0xff]  ;;  %v502_v16 = vpack.c.bf16 %v34_v7, %v33_v6  ;;  %v504_v19 = vpack.c.bf16 %v52_v12, %v51_v11  ;;  %v10_v6 = vstv %s862_s4 }
  0x12   :  { %497 = vmatprep.subr.bf16.mxu0 %v496_v55  ;;  %v84_v15 = vld [vmem:[%s859_s1 + $0x1e8] sm:$0xff]  ;;  %v35_v17 = vld [vmem:[%s859_s1 + $0x60] sm:$0xff]  ;;  %v534_v18 = vpack.c.bf16 %v66_v10, %v65_v8  ;;  %v53_v25 = vld [vmem:[%s859_s1 + $0xf0] sm:$0xff]  ;;  %11 = vst [vmem:[#allocation2] sm:$0x1] %v10_v6 }
  0x13   :  { %527 = vmatpush3.bf16.msra.mxu1 %v526_v54  ;;  %v36_v20 = vld [vmem:[%s859_s1 + $0x68] sm:$0xff]  ;;  %v67_v21 = vld [vmem:[%s859_s1 + $0x160] sm:$0xff]  ;;  %v536_v23 = vpack.c.bf16 %v84_v15, %v83_v14  ;;  %v54_v26 = vld [vmem:[%s859_s1 + $0xf8] sm:$0xff] }
  0x14   :  { %529 = vmatprep.subr.bf16.mxu1 %v528_v59  ;;  %v22_v22 = vld [vmem:[%s860_s0] sm:$0xff]  ;;  %v68_v24 = vld [vmem:[%s859_s1 + $0x168] sm:$0xff]  ;;  %v85_v29 = vld [vmem:[%s859_s1 + $0x1f0] sm:$0xff]  ;;  %v506_v31 = vpack.c.bf16 %v36_v20, %v35_v17  ;;  %v508_v35 = vpack.c.bf16 %v54_v26, %v53_v25 }
  0x15   :  { %499 = vmatpush3.bf16.msra.mxu0 %v498_v3  ;;  %v102_v27 = vrot.slane %v22_v22, %v101_v13  ;;  %v95_v28 = vcombine.high %v22_v22, %v22_v22  ;;  %v86_v30 = vld [vmem:[%s859_s1 + $0x1f8] sm:$0xff]  ;;  %v538_v34 = vpack.c.bf16 %v68_v24, %v67_v21  ;;  %v37_v36 = vld [vmem:[%s859_s1 + $0x70] sm:$0xff]  ;;  %v257_v44 = vld [vmem:[%s861_s3] sm:$0xff] }
  0x16   :  { %501 = vmatprep.subr.bf16.mxu0 %v500_v5  ;;  %v38_v37 = vld [vmem:[%s859_s1 + $0x78] sm:$0xff]  ;;  %v540_v38 = vpack.c.bf16 %v86_v30, %v85_v29  ;;  %v69_v39 = vld [vmem:[%s859_s1 + $0x170] sm:$0xff]  ;;  %v258_v45 = vld [vmem:[%s861_s3 + $0x8] sm:$0xff]  ;;  %v576_v5 = vmov 0.0  }
  0x17   :  { %531 = vmatpush3.bf16.msra.mxu1 %v530_v4  ;;  %v110_v32 = vcombine.high %v102_v27, %v102_v27  ;;  %v109_v33 = vrot.slane %v95_v28, %v101_v13  ;;  %v70_v40 = vld [vmem:[%s859_s1 + $0x178] sm:$0xff]  ;;  %v510_v42 = vpack.c.bf16 %v38_v37, %v37_v36  ;;  %v545_v46 = vpack.c.bf16 %v258_v45, %v257_v44  ;;  %v259_v48 = vld [vmem:[%s861_s3 + $0x10] sm:$0xff]  ;;  %v261_v51 = vld [vmem:[%s861_s3 + $0x20] sm:$0xff] }
  0x18   :  { %533 = vmatprep.subr.bf16.mxu1 %v532_v9  ;;  %v542_v43 = vpack.c.bf16 %v70_v40, %v69_v39  ;;  %v260_v49 = vld [vmem:[%s861_s3 + $0x18] sm:$0xff]  ;;  %v262_v52 = vld [vmem:[%s861_s3 + $0x28] sm:$0xff]  ;;  %v263_v54 = vld [vmem:[%s861_s3 + $0x30] sm:$0xff] }
  0x19   :  { %503 = vmatpush3.bf16.msra.mxu0 %v502_v16  ;;  %180 = vmatprep.mubr.f32.mxu0 %v110_v32  ;;  %v111_v41 = vcombine.high %v109_v33, %v109_v33  ;;  %v548_v50 = vpack.c.bf16 %v260_v49, %v259_v48  ;;  %v551_v53 = vpack.c.bf16 %v262_v52, %v261_v51  ;;  %v264_v55 = vld [vmem:[%s861_s3 + $0x38] sm:$0xff]  ;;  %v265_v57 = vld [vmem:[%s861_s3 + $0x40] sm:$0xff]  ;;  %v266_v58 = vld [vmem:[%s861_s3 + $0x48] sm:$0xff] }
  0x1a   :  { %505 = vmatprep.subr.bf16.mxu0 %v504_v19  ;;  %v554_v56 = vpack.c.bf16 %v264_v55, %v263_v54  ;;  %v557_v59 = vpack.c.bf16 %v266_v58, %v265_v57  ;;  %v267_v60 = vld [vmem:[%s861_s3 + $0x50] sm:$0xff]  ;;  %v268_v61 = vld [vmem:[%s861_s3 + $0x58] sm:$0xff]  ;;  %v269_v63 = vld [vmem:[%s861_s3 + $0x60] sm:$0xff] }
  0x1b   :  { %535 = vmatpush3.bf16.msra.mxu1 %v534_v18  ;;  %250 = vmatprep.mubr.f32.mxu1 %v111_v41  ;;  %v560_v62 = vpack.c.bf16 %v268_v61, %v267_v60  ;;  %v270_v0 = vld [vmem:[%s861_s3 + $0x68] sm:$0xff]  ;;  %v271_v2 = vld [vmem:[%s861_s3 + $0x70] sm:$0xff]  ;;  %v272_v3 = vld [vmem:[%s861_s3 + $0x78] sm:$0xff] }
  0x1c   :  { %537 = vmatprep.subr.bf16.mxu1 %v536_v23  ;;  %v563_v1 = vpack.c.bf16 %v270_v0, %v269_v63  ;;  %v566_v4 = vpack.c.bf16 %v272_v3, %v271_v2  ;;  %v356_v8 = vld [vmem:[%s863_s2] ss:$0 sm:$0xff] }
  0x1d   :  { %507 = vmatpush3.bf16.msra.mxu0 %v506_v31  ;;  %v357_v17 = vld [vmem:[#allocation2] ss:$0 sm:$0xff] }
  0x1e   :  { %509 = vmatprep.subr.bf16.mxu0 %v508_v35 }
  0x1f   :  { %539 = vmatpush3.bf16.msra.mxu1 %v538_v34 }
  0x20   :  { %541 = vmatprep.subr.bf16.mxu1 %v540_v38 }
  0x21   :  { %511 = vmatpush3.bf16.msra.mxu0 %v510_v42 }
  0x22   :  { %544 = vmatprep.subr.bf16.mxu0 %v574_v47 }
  0x23   :  { %543 = vmatpush3.bf16.msra.mxu1 %v542_v43 }
  0x24   :  { %181 = vmatmul.mubr.f32.vlgmr.msra.gmra.mrb[0].mxu0 %v102_v27 }
  0x25   :  { %546 = vmatpush3.bf16.msra.mxu0 %v545_v46  ;;  %477 = vmatprep.mubr.msk.f32.mxu0 %vm575_vm0, %v576_v5 }
  0x26   :  { %251 = vmatmul.mubr.f32.vlgmr.msra.gmra.mrb[0].mxu1 %v109_v33  ;;  %547 = vmatprep.subr.bf16.mxu0 %v574_v47 }
  0x29   :  { %549 = vmatpush3.bf16.msra.mxu0 %v548_v50 }
  0x2a   :  { %550 = vmatprep.subr.bf16.mxu0 %v574_v47 }
  0x2d   :  { %552 = vmatpush3.bf16.msra.mxu0 %v551_v53 }
  0x2e   :  { %553 = vmatprep.subr.bf16.mxu0 %v574_v47 }
  0x31   :  { %555 = vmatpush3.bf16.msra.mxu0 %v554_v56 }
  0x32   :  { %556 = vmatprep.subr.bf16.mxu0 %v574_v47 }
  0x35   :  { %558 = vmatpush3.bf16.msra.mxu0 %v557_v59 }
  0x36   :  { %559 = vmatprep.subr.bf16.mxu0 %v574_v47 }
  0x39   :  { %561 = vmatpush3.bf16.msra.mxu0 %v560_v62 }
  0x3a   :  { %562 = vmatprep.subr.bf16.mxu0 %v574_v47 }
  0x3d   :  { %564 = vmatpush3.bf16.msra.mxu0 %v563_v1 }
  0x3e   :  { %565 = vmatprep.subr.bf16.mxu0 %v574_v47 }
  0x41   :  { %567 = vmatpush3.bf16.msra.mxu0 %v566_v4 }
  0xf7   :  { %v390_v7 = vpop.f32.mrb[0].mxu0 }
  0xf8   :  { %v391_v9 = vpop.f32.mrb[1].mxu0 }
  0xf9   :  { %v425_v10 = vpop.f32.mrb[0].mxu1  ;;  %v392_v11 = vadd.f32 %v391_v9, %v390_v7 }
  0xfa   :  { %v426_v12 = vpop.f32.mrb[1].mxu1 }
  0xfb   :  { %v427_v13 = vadd.f32 %v426_v12, %v425_v10  ;;  %v183_v14 = vadd.f32 %v392_v11, %v356_v8 }
  0xfd   :  { %v253_v15 = vadd.f32 %v427_v13, %v183_v14 }
  0xff   :  { %v256_v16 = vmax.f32 %v253_v15, 0.0 }
 0x101   :  { %478 = vmatmul.mubr.f32.vlgmr.msra.gmra.mrb[2].mxu0 %v256_v16 }
 0x1d4   :  { %v346_v18 = vpop.f32.mrb[2].mxu0 }
 0x1d5   :  { %v347_v19 = vadd.f32 %v357_v17, %v346_v18  ;;  %v479_v20 = vpop.f32.mrb[3].mxu0 }
 0x1d7   :  { %351 = vst.msk [vmem:[%s864_s5] sm:$0x3] %vm350_vm1, %v347_v19 }

</bundles_post_ra>
